<compile_context>
chip_gen: v6e
topology: v6e:2x2x1
jax: 0.10.0
libtpu: 0.0.40
codegen_flags: <defaults>
</compile_context>

<pallas_src>
import functools

import jax
import jax.numpy as jnp
from jax.experimental import pallas as pl
from jax.experimental.pallas import tpu as pltpu

C_LANE = 128      # all trunk channels are zero-padded to the TPU lane width
TM_MAX = 512      # GEMM row tile (sized for v7x's smaller VMEM as well)
TK_MAX = 2048     # contraction tile; K <= TK_MAX keeps the whole K resident


def _round_up(x, m):
    return ((x + m - 1) // m) * m


# ----------------------------------------------------------------------------
# Pallas kernels
# ----------------------------------------------------------------------------

def _gemm_onepass_kernel(a_ref, w_ref, bias_ref, *rest, relu, has_residual):
    """Single-K-block GEMM: one MXU pass + fused bias (+residual) (+ReLU)."""
    if has_residual:
        res_ref, o_ref = rest
    else:
        res_ref = None
        (o_ref,) = rest
    y = jnp.dot(a_ref[...], w_ref[...], preferred_element_type=jnp.float32)
    y = y + bias_ref[...]
    if has_residual:
        y = y + res_ref[...].astype(jnp.float32)
    if relu:
        y = jnp.maximum(y, 0.0)
    o_ref[...] = y.astype(o_ref.dtype)


def _gemm_epilogue_kernel(a_ref, w_ref, bias_ref, *rest, relu, has_residual):
    """Tiled multi-K GEMM with f32 accumulator and fused epilogue."""
    if has_residual:
        res_ref, o_ref, acc_ref = rest
    else:
        res_ref = None
        o_ref, acc_ref = rest

    @pl.when(pl.program_id(2) == 0)
    def _():
        acc_ref[...] = jnp.zeros_like(acc_ref)

    acc_ref[...] += jnp.dot(a_ref[...], w_ref[...],
                            preferred_element_type=jnp.float32)

    @pl.when(pl.program_id(2) == pl.num_programs(2) - 1)
    def _():
        y = acc_ref[...] + bias_ref[...]
        if has_residual:
            y = y + res_ref[...].astype(jnp.float32)
        if relu:
            y = jnp.maximum(y, 0.0)
        o_ref[...] = y.astype(o_ref.dtype)


def _affine_relu_kernel(x_ref, scale_ref, shift_ref, o_ref):
    # Only used when 'conv1' (the pre-BN activation) must be extracted; the
    # normal path has BN folded into the conv weights.
    y = x_ref[...].astype(jnp.float32) * scale_ref[...] + shift_ref[...]
    o_ref[...] = jnp.maximum(y, 0.0).astype(o_ref.dtype)


def _max_reduce_kernel(p_ref, o_ref):
    # p: (9, TM, 128) -> max over the 3x3 window axis
    o_ref[...] = jnp.max(p_ref[...], axis=0)


def _mean_reduce_kernel(x_ref, o_ref):
    # x: (N, H*W, 128) -> global average pool (f32 output)
    o_ref[...] = jnp.mean(x_ref[...].astype(jnp.float32), axis=1)


# ----------------------------------------------------------------------------
# Pallas wrappers
# ----------------------------------------------------------------------------

def gemm_fused(a, w, bias, *, residual=None, relu=False,
               out_dtype=jnp.bfloat16):
    """(M, K) @ (K, N) + bias (+residual) (+ReLU); N must be a multiple of 128."""
    M, K = a.shape
    Kw, N = w.shape
    assert K == Kw and N % C_LANE == 0

    tm = min(TM_MAX, _round_up(M, 8))
    mp = _round_up(M, tm)
    # K padded to a lane multiple so A-loads are lane-dense / W sublane-aligned;
    # whole-K blocks when K fits in VMEM, otherwise tile over K.
    tk = min(TK_MAX, _round_up(K, C_LANE))
    kp = _round_up(K, tk)
    tn = C_LANE

    if mp != M:
        a = jnp.pad(a, ((0, mp - M), (0, 0)))
        if residual is not None:
            residual = jnp.pad(residual, ((0, mp - M), (0, 0)))
    if kp != K:
        a = jnp.pad(a, ((0, 0), (0, kp - K)))
        w = jnp.pad(w, ((0, kp - K), (0, 0)))

    bias2 = bias.astype(jnp.float32).reshape(1, N)
    has_residual = residual is not None
    single_k = (kp == tk)

    if single_k:
        in_arrays = [a, w, bias2]
        in_specs = [
            pl.BlockSpec((tm, tk), lambda i, j: (i, 0)),
            pl.BlockSpec((tk, tn), lambda i, j: (0, j)),
            pl.BlockSpec((1, tn), lambda i, j: (0, j)),
        ]
        if has_residual:
            in_arrays.append(residual)
            in_specs.append(pl.BlockSpec((tm, tn), lambda i, j: (i, j)))
        out = pl.pallas_call(
            functools.partial(_gemm_onepass_kernel, relu=relu,
                              has_residual=has_residual),
            out_shape=jax.ShapeDtypeStruct((mp, N), out_dtype),
            grid=(mp // tm, N // tn),
            in_specs=in_specs,
            out_specs=pl.BlockSpec((tm, tn), lambda i, j: (i, j)),
            compiler_params=pltpu.CompilerParams(
                dimension_semantics=("parallel", "parallel")),
        )(*in_arrays)
    else:
        in_arrays = [a, w, bias2]
        in_specs = [
            pl.BlockSpec((tm, tk), lambda i, j, k: (i, k)),
            pl.BlockSpec((tk, tn), lambda i, j, k: (k, j)),
            pl.BlockSpec((1, tn), lambda i, j, k: (0, j)),
        ]
        if has_residual:
            in_arrays.append(residual)
            in_specs.append(pl.BlockSpec((tm, tn), lambda i, j, k: (i, j)))
        out = pl.pallas_call(
            functools.partial(_gemm_epilogue_kernel, relu=relu,
                              has_residual=has_residual),
            out_shape=jax.ShapeDtypeStruct((mp, N), out_dtype),
            grid=(mp // tm, N // tn, kp // tk),
            in_specs=in_specs,
            out_specs=pl.BlockSpec((tm, tn), lambda i, j, k: (i, j)),
            scratch_shapes=[pltpu.VMEM((tm, tn), jnp.float32)],
            compiler_params=pltpu.CompilerParams(
                dimension_semantics=("parallel", "parallel", "arbitrary")),
        )(*in_arrays)
    return out[:M] if mp != M else out


def _extract_patches(x_nhwc, kh, kw, stride, pad, pad_value=0.0):
    """im2col glue (plain JAX): -> (N*Ho*Wo, kh*kw*C), feature order (kh, kw, C)."""
    N, H, W, C = x_nhwc.shape
    xp = jnp.pad(x_nhwc, ((0, 0), (pad, pad), (pad, pad), (0, 0)),
                 constant_values=pad_value)
    Ho = (H + 2 * pad - kh) // stride + 1
    Wo = (W + 2 * pad - kw) // stride + 1
    cols = []
    for i in range(kh):
        for j in range(kw):
            cols.append(xp[:, i:i + stride * Ho:stride, j:j + stride * Wo:stride, :])
    patches = jnp.stack(cols, axis=3)                       # (N, Ho, Wo, kh*kw, C)
    return patches.reshape(N * Ho * Wo, kh * kw * C), (N, Ho, Wo)


def conv_gemm(x_nhwc, wmat, bias, *, k, stride, pad, relu, residual=None):
    """Conv (BN already folded into wmat/bias) as im2col + fused Pallas GEMM."""
    patches, (N, Ho, Wo) = _extract_patches(x_nhwc, k, k, stride, pad)
    res2 = None
    if residual is not None:
        res2 = residual.reshape(N * Ho * Wo, residual.shape[-1])
    out = gemm_fused(patches, wmat, bias, residual=res2, relu=relu)
    return out.reshape(N, Ho, Wo, C_LANE)


def affine_relu(x_nhwc, scale, shift):
    """Lane-dense BN(scale, shift) + ReLU, tiled over rows (fallback path only)."""
    N, H, W, C = x_nhwc.shape
    M = N * H * W
    tm = min(TM_MAX, _round_up(M, 8))
    mp = _round_up(M, tm)
    x2 = x_nhwc.reshape(M, C)
    if mp != M:
        x2 = jnp.pad(x2, ((0, mp - M), (0, 0)))
    out = pl.pallas_call(
        _affine_relu_kernel,
        out_shape=jax.ShapeDtypeStruct((mp, C), x_nhwc.dtype),
        grid=(mp // tm,),
        in_specs=[pl.BlockSpec((tm, C), lambda i: (i, 0)),
                  pl.BlockSpec((1, C), lambda i: (0, 0)),
                  pl.BlockSpec((1, C), lambda i: (0, 0))],
        out_specs=pl.BlockSpec((tm, C), lambda i: (i, 0)),
        compiler_params=pltpu.CompilerParams(
            dimension_semantics=("parallel",)),
    )(x2, scale.astype(jnp.float32).reshape(1, C),
      shift.astype(jnp.float32).reshape(1, C))
    out = out[:M] if mp != M else out
    return out.reshape(N, H, W, C)


def maxpool_3x3_s2_p1(x_nhwc):
    N, H, W, C = x_nhwc.shape
    k, s, pad = 3, 2, 1
    Ho = (H + 2 * pad - k) // s + 1
    Wo = (W + 2 * pad - k) // s + 1
    xp = jnp.pad(x_nhwc, ((0, 0), (pad, pad), (pad, pad), (0, 0)),
                 constant_values=-jnp.inf)
    cols = [xp[:, i:i + s * Ho:s, j:j + s * Wo:s, :]
            for i in range(k) for j in range(k)]
    patches = jnp.stack(cols, axis=0).reshape(k * k, N * Ho * Wo, C)

    M = N * Ho * Wo
    tm = min(TM_MAX, _round_up(M, 8))
    mp = _round_up(M, tm)
    if mp != M:
        patches = jnp.pad(patches, ((0, 0), (0, mp - M), (0, 0)))
    out = pl.pallas_call(
        _max_reduce_kernel,
        out_shape=jax.ShapeDtypeStruct((mp, C), x_nhwc.dtype),
        grid=(mp // tm,),
        in_specs=[pl.BlockSpec((k * k, tm, C), lambda i: (0, i, 0))],
        out_specs=pl.BlockSpec((tm, C), lambda i: (i, 0)),
        compiler_params=pltpu.CompilerParams(
            dimension_semantics=("parallel",)),
    )(patches)
    out = out[:M] if mp != M else out
    return out.reshape(N, Ho, Wo, C)


def global_avgpool(x_nhwc):
    # AdaptiveAvgPool2d((1,1)) followed by .view(N, -1); lane-dense (C=128).
    N, H, W, C = x_nhwc.shape
    x3 = x_nhwc.reshape(N, H * W, C)
    return pl.pallas_call(
        _mean_reduce_kernel,
        out_shape=jax.ShapeDtypeStruct((N, C), jnp.float32),
        grid=(1,),
        in_specs=[pl.BlockSpec((N, H * W, C), lambda i: (0, 0, 0))],
        out_specs=pl.BlockSpec((N, C), lambda i: (0, 0)),
    )(x3)


# ----------------------------------------------------------------------------
# Raw (PyTorch-style) parameters and one-time inference prep (BN folding,
# GEMM-layout packing, channel padding, bf16 cast)
# ----------------------------------------------------------------------------

def _bn_init(key, c):
    k1, k2, k3 = jax.random.split(key, 3)
    gamma = 1.0 + 0.05 * jax.random.normal(k1, (c,), jnp.float32)
    beta = 0.05 * jax.random.normal(k2, (c,), jnp.float32)
    mean = 0.05 * jax.random.normal(k3, (c,), jnp.float32)
    var = jnp.ones((c,), jnp.float32)
    return (gamma, beta, mean, var)


def _conv_init(key, cout, cin, k):
    fan_in = cin * k * k
    return jax.random.normal(key, (cout, cin, k, k), jnp.float32) / jnp.sqrt(fan_in)


def make_params(key, widths=(8, 8, 16, 32, 64), num_classes=10, in_ch=3):
    keys = iter(jax.random.split(key, 128))
    p = {}
    p["conv1_w"] = _conv_init(next(keys), widths[0], in_ch, 7)
    p["bn1"] = _bn_init(next(keys), widths[0])
    cin = widths[0]
    for li, cout in enumerate(widths[1:], start=1):
        blocks = []
        for bi in range(2):
            stride = 2 if (li > 1 and bi == 0) else 1
            blk = {
                "conv1_w": _conv_init(next(keys), cout, cin if bi == 0 else cout, 3),
                "bn1": _bn_init(next(keys), cout),
                "conv2_w": _conv_init(next(keys), cout, cout, 3),
                "bn2": _bn_init(next(keys), cout),
            }
            if bi == 0 and (stride != 1 or cin != cout):
                blk["down_w"] = _conv_init(next(keys), cout, cin, 1)
                blk["down_bn"] = _bn_init(next(keys), cout)
            blocks.append(blk)
        p[f"layer{li}"] = blocks
        cin = cout
    p["fc_w"] = jax.random.normal(next(keys), (num_classes, widths[-1]),
                                  jnp.float32) / jnp.sqrt(widths[-1])
    p["fc_b"] = 0.05 * jax.random.normal(next(keys), (num_classes,), jnp.float32)
    return p


def _pad_vec(v):
    return jnp.pad(v.astype(jnp.float32), (0, C_LANE - v.shape[0]))


def _pack_conv(w_oihw, cin_pad):
    """OIHW -> (kh*kw*cin_pad, 128) bf16, zero-padded on both channel axes."""
    cout, cin, kh, kw = w_oihw.shape
    w = jnp.pad(w_oihw, ((0, C_LANE - cout), (0, cin_pad - cin), (0, 0), (0, 0)))
    wmat = jnp.transpose(w, (2, 3, 1, 0)).reshape(kh * kw * cin_pad, C_LANE)
    return wmat.astype(jnp.bfloat16)


def _fold_conv_bn(w_oihw, bn, cin_pad, eps=1e-5):
    gamma, beta, mean, var = bn
    scale = gamma / jnp.sqrt(var + eps)          # per-output-channel
    shift = beta - mean * scale
    return _pack_conv(w_oihw * scale[:, None, None, None], cin_pad), _pad_vec(shift)


def prepare_params(raw, eps=1e-5):
    """One-time inference prep: fold BN, pack/pad weights, cast to bf16."""
    p = {}
    gamma, beta, mean, var = raw["bn1"]
    scale = gamma / jnp.sqrt(var + eps)
    shift = beta - mean * scale
    w1 = raw["conv1_w"]
    in_ch = w1.shape[1]
    p["stem"] = {
        "w": _pack_conv(w1 * scale[:, None, None, None], in_ch),  # BN folded
        "b": _pad_vec(shift),
        "w_raw": _pack_conv(w1, in_ch),                           # for 'conv1' extract
        "bn_scale": _pad_vec(scale),
        "bn_shift": _pad_vec(shift),
    }
    for li in range(1, 5):
        blocks = []
        for blk in raw[f"layer{li}"]:
            nb = {}
            nb["w1"], nb["b1"] = _fold_conv_bn(blk["conv1_w"], blk["bn1"], C_LANE, eps)
            nb["w2"], nb["b2"] = _fold_conv_bn(blk["conv2_w"], blk["bn2"], C_LANE, eps)
            if "down_w" in blk:
                nb["wd"], nb["bd"] = _fold_conv_bn(blk["down_w"], blk["down_bn"],
                                                   C_LANE, eps)
            blocks.append(nb)
        p[f"layer{li}"] = blocks
    wfc = jnp.transpose(raw["fc_w"])              # (in, out), pre-transposed once
    wfc = jnp.pad(wfc, ((0, C_LANE - wfc.shape[0]), (0, C_LANE - wfc.shape[1])))
    p["fc_w"] = wfc.astype(jnp.bfloat16)
    p["fc_b"] = _pad_vec(raw["fc_b"])
    return p


# ----------------------------------------------------------------------------
# Forward pass (mirrors ResNetFeatureExtractor.forward)
# ----------------------------------------------------------------------------

def basic_block(x, blk, stride):
    # relu(bn2(conv2(relu(bn1(conv1(x))))) + identity); BN folded, residual
    # add + final ReLU fused into the second conv's GEMM epilogue.
    out = conv_gemm(x, blk["w1"], blk["b1"], k=3, stride=stride, pad=1, relu=True)
    if "wd" in blk:
        identity = conv_gemm(x, blk["wd"], blk["bd"], k=1, stride=stride, pad=0,
                             relu=False)
    else:
        identity = x
    return conv_gemm(out, blk["w2"], blk["b2"], k=3, stride=1, pad=1, relu=True,
                     residual=identity)


def run_layer(x, blocks, first_stride):
    for bi, blk in enumerate(blocks):
        x = basic_block(x, blk, first_stride if bi == 0 else 1)
    return x


def resnet_feature_extractor_forward(x_nchw, params, *, extracted_layers,
                                     widths=(8, 8, 16, 32, 64), num_classes=10):
    """Returns the list of extracted tensors in PyTorch NCHW / (N, F) layout."""
    outputs = []

    def emit_map(t, c):
        outputs.append(jnp.transpose(t[..., :c].astype(jnp.float32), (0, 3, 1, 2)))
        return len(outputs) == len(extracted_layers)

    x = jnp.transpose(x_nchw, (0, 2, 3, 1)).astype(jnp.bfloat16)   # -> NHWC bf16

    stem = params["stem"]
    if "conv1" in extracted_layers:
        # Need the exact pre-BN conv1 activation: run the unfolded conv, then
        # apply BN+ReLU as a lane-dense elementwise kernel.
        raw = conv_gemm(x, stem["w_raw"], jnp.zeros((C_LANE,), jnp.float32),
                        k=7, stride=2, pad=3, relu=False)
        if emit_map(raw, widths[0]):
            return outputs
        x = affine_relu(raw, stem["bn_scale"], stem["bn_shift"])
    else:
        x = conv_gemm(x, stem["w"], stem["b"], k=7, stride=2, pad=3, relu=True)

    x = maxpool_3x3_s2_p1(x)
    if "maxpool" in extracted_layers:
        if emit_map(x, widths[0]):
            return outputs

    x = run_layer(x, params["layer1"], 1)
    x = run_layer(x, params["layer2"], 2)
    x = run_layer(x, params["layer3"], 2)
    if "layer3" in extracted_layers:
        if emit_map(x, widths[3]):
            return outputs
    x = run_layer(x, params["layer4"], 2)
    if "layer4" in extracted_layers:
        if emit_map(x, widths[4]):
            return outputs

    pooled = global_avgpool(x)                        # (N, 128) f32, padded ch = 0
    if "avgpool" in extracted_layers:
        outputs.append(pooled[:, :widths[4]])
    if "fc" in extracted_layers:
        y = gemm_fused(pooled.astype(jnp.bfloat16), params["fc_w"], params["fc_b"],
                       relu=False, out_dtype=jnp.float32)
        outputs.append(y[:, :num_classes])
    return outputs


# ----------------------------------------------------------------------------
if __name__ == "__main__":
    key = jax.random.PRNGKey(0)
    k_in, k_par = jax.random.split(key)

    # Small ResNet-consistent input: NCHW, 3 channels, 32x32 spatial.
    x = jax.random.normal(k_in, (2, 3, 32, 32), jnp.float32)

    widths = (8, 8, 16, 32, 64)
    num_classes = 10
    raw_params = make_params(k_par, widths=widths, num_classes=num_classes)
    params = prepare_params(raw_params)               # one-time BN fold / packing

    extracted_layers = ["maxpool", "layer4", "avgpool", "fc"]
    fwd = jax.jit(functools.partial(resnet_feature_extractor_forward,
                                    extracted_layers=extracted_layers,
                                    widths=widths, num_classes=num_classes))
    outs = fwd(x, params)
    for o in outs:
        jax.block_until_ready(o)

    print("KERNEL_OK")
</pallas_src>

<mosaic_0001>
module attributes {stable_mosaic.version = 11 : i64} {
  func.func @_gemm_onepass_kernel(%arg0: i32, %arg1: i32, %arg2: memref<512x256xbf16, #tpu.memory_space<vmem>>, %arg3: memref<256x128xbf16, #tpu.memory_space<vmem>>, %arg4: memref<1x128xf32, #tpu.memory_space<vmem>>, %arg5: memref<512x128xbf16, #tpu.memory_space<vmem>>) attributes {dimension_semantics = [#tpu.dimension_semantics<parallel>, #tpu.dimension_semantics<parallel>], iteration_bounds = array<i64: 1, 1>, scalar_prefetch = 0 : i64, scratch_operands = 0 : i64, tpu.core_type = #tpu.core_type<tc>, window_params = [{transform_indices = @transform_0, window_bounds = array<i64: 512, 256>}, {transform_indices = @transform_1, window_bounds = array<i64: 256, 128>}, {transform_indices = @transform_2, window_bounds = array<i64: 1, 128>}, {transform_indices = @transform_3, window_bounds = array<i64: 512, 128>}]} {
    %c0 = arith.constant 0 : index
    %c0_0 = arith.constant 0 : index
    %0 = vector.load %arg2[%c0, %c0_0] : memref<512x256xbf16, #tpu.memory_space<vmem>>, vector<512x256xbf16>
    %c0_1 = arith.constant 0 : index
    %c0_2 = arith.constant 0 : index
    %1 = vector.load %arg3[%c0_1, %c0_2] : memref<256x128xbf16, #tpu.memory_space<vmem>>, vector<256x128xbf16>
    %cst = arith.constant dense<0.000000e+00> : vector<512x128xf32>
    %2 = tpu.matmul %0, %1, %cst {dimension_numbers = #tpu.dot_dimension_numbers<[1], [0], [0], [1], [0, 0, 1, 1], [], []>} : vector<512x256xbf16>, vector<256x128xbf16>, vector<512x128xf32> -> vector<512x128xf32>
    %c0_3 = arith.constant 0 : index
    %c0_4 = arith.constant 0 : index
    %3 = vector.load %arg4[%c0_3, %c0_4] : memref<1x128xf32, #tpu.memory_space<vmem>>, vector<1x128xf32>
    %4 = vector.broadcast %3 : vector<1x128xf32> to vector<512x128xf32>
    %5 = arith.addf %2, %4 : vector<512x128xf32>
    %cst_5 = arith.constant 0.000000e+00 : f32
    %6 = vector.broadcast %cst_5 : f32 to vector<512x128xf32>
    %7 = arith.maximumf %5, %6 : vector<512x128xf32>
    %8 = arith.truncf %7 : vector<512x128xf32> to vector<512x128xbf16>
    %c0_6 = arith.constant 0 : index
    %c0_7 = arith.constant 0 : index
    %9 = vector.load %arg5[%c0_6, %c0_7] : memref<512x128xbf16, #tpu.memory_space<vmem>>, vector<512x128xbf16>
    tpu.vector_store %arg5[%c0_6, %c0_7], %8 {strides = array<i32>} : memref<512x128xbf16, #tpu.memory_space<vmem>>, vector<512x128xbf16>,
    return
  }
  func.func @transform_0(%arg0: i32, %arg1: i32) -> (i32, i32) {
    %c0_i32 = arith.constant 0 : i32
    %c0_i32_0 = arith.constant 0 : i32
    return %arg0, %c0_i32 : i32, i32
  }
  func.func @transform_1(%arg0: i32, %arg1: i32) -> (i32, i32) {
    %c0_i32 = arith.constant 0 : i32
    %c0_i32_0 = arith.constant 0 : i32
    return %c0_i32, %arg1 : i32, i32
  }
  func.func @transform_2(%arg0: i32, %arg1: i32) -> (i32, i32) {
    %c0_i32 = arith.constant 0 : i32
    %c0_i32_0 = arith.constant 0 : i32
    return %c0_i32, %arg1 : i32, i32
  }
  func.func @transform_3(%arg0: i32, %arg1: i32) -> (i32, i32) {
    %c0_i32 = arith.constant 0 : i32
    return %arg0, %arg1 : i32, i32
  }
}

module attributes {stable_mosaic.version = 11 : i64} {
  func.func @_max_reduce_kernel(%arg0: i32, %arg1: memref<9x128x128xbf16, #tpu.memory_space<vmem>>, %arg2: memref<128x128xbf16, #tpu.memory_space<vmem>>) attributes {dimension_semantics = [#tpu.dimension_semantics<parallel>], iteration_bounds = array<i64: 1>, scalar_prefetch = 0 : i64, scratch_operands = 0 : i64, tpu.core_type = #tpu.core_type<tc>, window_params = [{transform_indices = @transform_0, window_bounds = array<i64: 9, 128, 128>}, {transform_indices = @transform_1, window_bounds = array<i64: 128, 128>}]} {
    %c0 = arith.constant 0 : index
    %c0_0 = arith.constant 0 : index
    %c0_1 = arith.constant 0 : index
    %0 = vector.load %arg1[%c0, %c0_0, %c0_1] : memref<9x128x128xbf16, #tpu.memory_space<vmem>>, vector<9x128x128xbf16>
    %cst = arith.constant dense<0xFF80> : vector<128x128xbf16>
    %1 = vector.multi_reduction <maximumf>, %0, %cst [0] : vector<9x128x128xbf16> to vector<128x128xbf16>
    %c0_2 = arith.constant 0 : index
    %c0_3 = arith.constant 0 : index
    %2 = vector.load %arg2[%c0_2, %c0_3] : memref<128x128xbf16, #tpu.memory_space<vmem>>, vector<128x128xbf16>
    tpu.vector_store %arg2[%c0_2, %c0_3], %1 {strides = array<i32>} : memref<128x128xbf16, #tpu.memory_space<vmem>>, vector<128x128xbf16>,
    return
  }
  func.func @transform_0(%arg0: i32) -> (i32, i32, i32) {
    %c0_i32 = arith.constant 0 : i32
    %c0_i32_0 = arith.constant 0 : i32
    %c0_i32_1 = arith.constant 0 : i32
    return %c0_i32, %arg0, %c0_i32_0 : i32, i32, i32
  }
  func.func @transform_1(%arg0: i32) -> (i32, i32) {
    %c0_i32 = arith.constant 0 : i32
    %c0_i32_0 = arith.constant 0 : i32
    return %arg0, %c0_i32 : i32, i32
  }
}

module attributes {stable_mosaic.version = 11 : i64} {
  func.func @_gemm_onepass_kernel(%arg0: i32, %arg1: i32, %arg2: memref<128x1152xbf16, #tpu.memory_space<vmem>>, %arg3: memref<1152x128xbf16, #tpu.memory_space<vmem>>, %arg4: memref<1x128xf32, #tpu.memory_space<vmem>>, %arg5: memref<128x128xbf16, #tpu.memory_space<vmem>>) attributes {dimension_semantics = [#tpu.dimension_semantics<parallel>, #tpu.dimension_semantics<parallel>], iteration_bounds = array<i64: 1, 1>, scalar_prefetch = 0 : i64, scratch_operands = 0 : i64, tpu.core_type = #tpu.core_type<tc>, window_params = [{transform_indices = @transform_0, window_bounds = array<i64: 128, 1152>}, {transform_indices = @transform_1, window_bounds = array<i64: 1152, 128>}, {transform_indices = @transform_2, window_bounds = array<i64: 1, 128>}, {transform_indices = @transform_3, window_bounds = array<i64: 128, 128>}]} {
    %c0 = arith.constant 0 : index
    %c0_0 = arith.constant 0 : index
    %0 = vector.load %arg2[%c0, %c0_0] : memref<128x1152xbf16, #tpu.memory_space<vmem>>, vector<128x1152xbf16>
    %c0_1 = arith.constant 0 : index
    %c0_2 = arith.constant 0 : index
    %1 = vector.load %arg3[%c0_1, %c0_2] : memref<1152x128xbf16, #tpu.memory_space<vmem>>, vector<1152x128xbf16>
    %cst = arith.constant dense<0.000000e+00> : vector<128x128xf32>
    %2 = tpu.matmul %0, %1, %cst {dimension_numbers = #tpu.dot_dimension_numbers<[1], [0], [0], [1], [0, 0, 1, 1], [], []>} : vector<128x1152xbf16>, vector<1152x128xbf16>, vector<128x128xf32> -> vector<128x128xf32>
    %c0_3 = arith.constant 0 : index
    %c0_4 = arith.constant 0 : index
    %3 = vector.load %arg4[%c0_3, %c0_4] : memref<1x128xf32, #tpu.memory_space<vmem>>, vector<1x128xf32>
    %4 = vector.broadcast %3 : vector<1x128xf32> to vector<128x128xf32>
    %5 = arith.addf %2, %4 : vector<128x128xf32>
    %cst_5 = arith.constant 0.000000e+00 : f32
    %6 = vector.broadcast %cst_5 : f32 to vector<128x128xf32>
    %7 = arith.maximumf %5, %6 : vector<128x128xf32>
    %8 = arith.truncf %7 : vector<128x128xf32> to vector<128x128xbf16>
    %c0_6 = arith.constant 0 : index
    %c0_7 = arith.constant 0 : index
    %9 = vector.load %arg5[%c0_6, %c0_7] : memref<128x128xbf16, #tpu.memory_space<vmem>>, vector<128x128xbf16>
    tpu.vector_store %arg5[%c0_6, %c0_7], %8 {strides = array<i32>} : memref<128x128xbf16, #tpu.memory_space<vmem>>, vector<128x128xbf16>,
    return
  }
  func.func @transform_0(%arg0: i32, %arg1: i32) -> (i32, i32) {
    %c0_i32 = arith.constant 0 : i32
    %c0_i32_0 = arith.constant 0 : i32
    return %arg0, %c0_i32 : i32, i32
  }
  func.func @transform_1(%arg0: i32, %arg1: i32) -> (i32, i32) {
    %c0_i32 = arith.constant 0 : i32
    %c0_i32_0 = arith.constant 0 : i32
    return %c0_i32, %arg1 : i32, i32
  }
  func.func @transform_2(%arg0: i32, %arg1: i32) -> (i32, i32) {
    %c0_i32 = arith.constant 0 : i32
    %c0_i32_0 = arith.constant 0 : i32
    return %c0_i32, %arg1 : i32, i32
  }
  func.func @transform_3(%arg0: i32, %arg1: i32) -> (i32, i32) {
    %c0_i32 = arith.constant 0 : i32
    return %arg0, %arg1 : i32, i32
  }
}

module attributes {stable_mosaic.version = 11 : i64} {
  func.func @_gemm_onepass_kernel(%arg0: i32, %arg1: i32, %arg2: memref<128x1152xbf16, #tpu.memory_space<vmem>>, %arg3: memref<1152x128xbf16, #tpu.memory_space<vmem>>, %arg4: memref<1x128xf32, #tpu.memory_space<vmem>>, %arg5: memref<128x128xbf16, #tpu.memory_space<vmem>>, %arg6: memref<128x128xbf16, #tpu.memory_space<vmem>>) attributes {dimension_semantics = [#tpu.dimension_semantics<parallel>, #tpu.dimension_semantics<parallel>], iteration_bounds = array<i64: 1, 1>, scalar_prefetch = 0 : i64, scratch_operands = 0 : i64, tpu.core_type = #tpu.core_type<tc>, window_params = [{transform_indices = @transform_0, window_bounds = array<i64: 128, 1152>}, {transform_indices = @transform_1, window_bounds = array<i64: 1152, 128>}, {transform_indices = @transform_2, window_bounds = array<i64: 1, 128>}, {transform_indices = @transform_3, window_bounds = array<i64: 128, 128>}, {transform_indices = @transform_4, window_bounds = array<i64: 128, 128>}]} {
    %c0 = arith.constant 0 : index
    %c0_0 = arith.constant 0 : index
    %0 = vector.load %arg2[%c0, %c0_0] : memref<128x1152xbf16, #tpu.memory_space<vmem>>, vector<128x1152xbf16>
    %c0_1 = arith.constant 0 : index
    %c0_2 = arith.constant 0 : index
    %1 = vector.load %arg3[%c0_1, %c0_2] : memref<1152x128xbf16, #tpu.memory_space<vmem>>, vector<1152x128xbf16>
    %cst = arith.constant dense<0.000000e+00> : vector<128x128xf32>
    %2 = tpu.matmul %0, %1, %cst {dimension_numbers = #tpu.dot_dimension_numbers<[1], [0], [0], [1], [0, 0, 1, 1], [], []>} : vector<128x1152xbf16>, vector<1152x128xbf16>, vector<128x128xf32> -> vector<128x128xf32>
    %c0_3 = arith.constant 0 : index
    %c0_4 = arith.constant 0 : index
    %3 = vector.load %arg4[%c0_3, %c0_4] : memref<1x128xf32, #tpu.memory_space<vmem>>, vector<1x128xf32>
    %4 = vector.broadcast %3 : vector<1x128xf32> to vector<128x128xf32>
    %5 = arith.addf %2, %4 : vector<128x128xf32>
    %c0_5 = arith.constant 0 : index
    %c0_6 = arith.constant 0 : index
    %6 = vector.load %arg5[%c0_5, %c0_6] : memref<128x128xbf16, #tpu.memory_space<vmem>>, vector<128x128xbf16>
    %7 = arith.extf %6 : vector<128x128xbf16> to vector<128x128xf32>
    %8 = arith.addf %5, %7 : vector<128x128xf32>
    %cst_7 = arith.constant 0.000000e+00 : f32
    %9 = vector.broadcast %cst_7 : f32 to vector<128x128xf32>
    %10 = arith.maximumf %8, %9 : vector<128x128xf32>
    %11 = arith.truncf %10 : vector<128x128xf32> to vector<128x128xbf16>
    %c0_8 = arith.constant 0 : index
    %c0_9 = arith.constant 0 : index
    %12 = vector.load %arg6[%c0_8, %c0_9] : memref<128x128xbf16, #tpu.memory_space<vmem>>, vector<128x128xbf16>
    tpu.vector_store %arg6[%c0_8, %c0_9], %11 {strides = array<i32>} : memref<128x128xbf16, #tpu.memory_space<vmem>>, vector<128x128xbf16>,
    return
  }
  func.func @transform_0(%arg0: i32, %arg1: i32) -> (i32, i32) {
    %c0_i32 = arith.constant 0 : i32
    %c0_i32_0 = arith.constant 0 : i32
    return %arg0, %c0_i32 : i32, i32
  }
  func.func @transform_1(%arg0: i32, %arg1: i32) -> (i32, i32) {
    %c0_i32 = arith.constant 0 : i32
    %c0_i32_0 = arith.constant 0 : i32
    return %c0_i32, %arg1 : i32, i32
  }
  func.func @transform_2(%arg0: i32, %arg1: i32) -> (i32, i32) {
    %c0_i32 = arith.constant 0 : i32
    %c0_i32_0 = arith.constant 0 : i32
    return %c0_i32, %arg1 : i32, i32
  }
  func.func @transform_3(%arg0: i32, %arg1: i32) -> (i32, i32) {
    %c0_i32 = arith.constant 0 : i32
    return %arg0, %arg1 : i32, i32
  }
  func.func @transform_4(%arg0: i32, %arg1: i32) -> (i32, i32) {
    %c0_i32 = arith.constant 0 : i32
    return %arg0, %arg1 : i32, i32
  }
}

module attributes {stable_mosaic.version = 11 : i64} {
  func.func @_gemm_onepass_kernel(%arg0: i32, %arg1: i32, %arg2: memref<32x1152xbf16, #tpu.memory_space<vmem>>, %arg3: memref<1152x128xbf16, #tpu.memory_space<vmem>>, %arg4: memref<1x128xf32, #tpu.memory_space<vmem>>, %arg5: memref<32x128xbf16, #tpu.memory_space<vmem>>) attributes {dimension_semantics = [#tpu.dimension_semantics<parallel>, #tpu.dimension_semantics<parallel>], iteration_bounds = array<i64: 1, 1>, scalar_prefetch = 0 : i64, scratch_operands = 0 : i64, tpu.core_type = #tpu.core_type<tc>, window_params = [{transform_indices = @transform_0, window_bounds = array<i64: 32, 1152>}, {transform_indices = @transform_1, window_bounds = array<i64: 1152, 128>}, {transform_indices = @transform_2, window_bounds = array<i64: 1, 128>}, {transform_indices = @transform_3, window_bounds = array<i64: 32, 128>}]} {
    %c0 = arith.constant 0 : index
    %c0_0 = arith.constant 0 : index
    %0 = vector.load %arg2[%c0, %c0_0] : memref<32x1152xbf16, #tpu.memory_space<vmem>>, vector<32x1152xbf16>
    %c0_1 = arith.constant 0 : index
    %c0_2 = arith.constant 0 : index
    %1 = vector.load %arg3[%c0_1, %c0_2] : memref<1152x128xbf16, #tpu.memory_space<vmem>>, vector<1152x128xbf16>
    %cst = arith.constant dense<0.000000e+00> : vector<32x128xf32>
    %2 = tpu.matmul %0, %1, %cst {dimension_numbers = #tpu.dot_dimension_numbers<[1], [0], [0], [1], [0, 0, 1, 1], [], []>} : vector<32x1152xbf16>, vector<1152x128xbf16>, vector<32x128xf32> -> vector<32x128xf32>
    %c0_3 = arith.constant 0 : index
    %c0_4 = arith.constant 0 : index
    %3 = vector.load %arg4[%c0_3, %c0_4] : memref<1x128xf32, #tpu.memory_space<vmem>>, vector<1x128xf32>
    %4 = vector.broadcast %3 : vector<1x128xf32> to vector<32x128xf32>
    %5 = arith.addf %2, %4 : vector<32x128xf32>
    %cst_5 = arith.constant 0.000000e+00 : f32
    %6 = vector.broadcast %cst_5 : f32 to vector<32x128xf32>
    %7 = arith.maximumf %5, %6 : vector<32x128xf32>
    %8 = arith.truncf %7 : vector<32x128xf32> to vector<32x128xbf16>
    %c0_6 = arith.constant 0 : index
    %c0_7 = arith.constant 0 : index
    %9 = vector.load %arg5[%c0_6, %c0_7] : memref<32x128xbf16, #tpu.memory_space<vmem>>, vector<32x128xbf16>
    tpu.vector_store %arg5[%c0_6, %c0_7], %8 {strides = array<i32>} : memref<32x128xbf16, #tpu.memory_space<vmem>>, vector<32x128xbf16>,
    return
  }
  func.func @transform_0(%arg0: i32, %arg1: i32) -> (i32, i32) {
    %c0_i32 = arith.constant 0 : i32
    %c0_i32_0 = arith.constant 0 : i32
    return %arg0, %c0_i32 : i32, i32
  }
  func.func @transform_1(%arg0: i32, %arg1: i32) -> (i32, i32) {
    %c0_i32 = arith.constant 0 : i32
    %c0_i32_0 = arith.constant 0 : i32
    return %c0_i32, %arg1 : i32, i32
  }
  func.func @transform_2(%arg0: i32, %arg1: i32) -> (i32, i32) {
    %c0_i32 = arith.constant 0 : i32
    %c0_i32_0 = arith.constant 0 : i32
    return %c0_i32, %arg1 : i32, i32
  }
  func.func @transform_3(%arg0: i32, %arg1: i32) -> (i32, i32) {
    %c0_i32 = arith.constant 0 : i32
    return %arg0, %arg1 : i32, i32
  }
}

module attributes {stable_mosaic.version = 11 : i64} {
  func.func @_gemm_onepass_kernel(%arg0: i32, %arg1: i32, %arg2: memref<32x128xbf16, #tpu.memory_space<vmem>>, %arg3: memref<128x128xbf16, #tpu.memory_space<vmem>>, %arg4: memref<1x128xf32, #tpu.memory_space<vmem>>, %arg5: memref<32x128xbf16, #tpu.memory_space<vmem>>) attributes {dimension_semantics = [#tpu.dimension_semantics<parallel>, #tpu.dimension_semantics<parallel>], iteration_bounds = array<i64: 1, 1>, scalar_prefetch = 0 : i64, scratch_operands = 0 : i64, tpu.core_type = #tpu.core_type<tc>, window_params = [{transform_indices = @transform_0, window_bounds = array<i64: 32, 128>}, {transform_indices = @transform_1, window_bounds = array<i64: 128, 128>}, {transform_indices = @transform_2, window_bounds = array<i64: 1, 128>}, {transform_indices = @transform_3, window_bounds = array<i64: 32, 128>}]} {
    %c0 = arith.constant 0 : index
    %c0_0 = arith.constant 0 : index
    %0 = vector.load %arg2[%c0, %c0_0] : memref<32x128xbf16, #tpu.memory_space<vmem>>, vector<32x128xbf16>
    %c0_1 = arith.constant 0 : index
    %c0_2 = arith.constant 0 : index
    %1 = vector.load %arg3[%c0_1, %c0_2] : memref<128x128xbf16, #tpu.memory_space<vmem>>, vector<128x128xbf16>
    %cst = arith.constant dense<0.000000e+00> : vector<32x128xf32>
    %2 = tpu.matmul %0, %1, %cst {dimension_numbers = #tpu.dot_dimension_numbers<[1], [0], [0], [1], [0, 0, 1, 1], [], []>} : vector<32x128xbf16>, vector<128x128xbf16>, vector<32x128xf32> -> vector<32x128xf32>
    %c0_3 = arith.constant 0 : index
    %c0_4 = arith.constant 0 : index
    %3 = vector.load %arg4[%c0_3, %c0_4] : memref<1x128xf32, #tpu.memory_space<vmem>>, vector<1x128xf32>
    %4 = vector.broadcast %3 : vector<1x128xf32> to vector<32x128xf32>
    %5 = arith.addf %2, %4 : vector<32x128xf32>
    %6 = arith.truncf %5 : vector<32x128xf32> to vector<32x128xbf16>
    %c0_5 = arith.constant 0 : index
    %c0_6 = arith.constant 0 : index
    %7 = vector.load %arg5[%c0_5, %c0_6] : memref<32x128xbf16, #tpu.memory_space<vmem>>, vector<32x128xbf16>
    tpu.vector_store %arg5[%c0_5, %c0_6], %6 {strides = array<i32>} : memref<32x128xbf16, #tpu.memory_space<vmem>>, vector<32x128xbf16>,
    return
  }
  func.func @transform_0(%arg0: i32, %arg1: i32) -> (i32, i32) {
    %c0_i32 = arith.constant 0 : i32
    %c0_i32_0 = arith.constant 0 : i32
    return %arg0, %c0_i32 : i32, i32
  }
  func.func @transform_1(%arg0: i32, %arg1: i32) -> (i32, i32) {
    %c0_i32 = arith.constant 0 : i32
    %c0_i32_0 = arith.constant 0 : i32
    return %c0_i32, %arg1 : i32, i32
  }
  func.func @transform_2(%arg0: i32, %arg1: i32) -> (i32, i32) {
    %c0_i32 = arith.constant 0 : i32
    %c0_i32_0 = arith.constant 0 : i32
    return %c0_i32, %arg1 : i32, i32
  }
  func.func @transform_3(%arg0: i32, %arg1: i32) -> (i32, i32) {
    %c0_i32 = arith.constant 0 : i32
    return %arg0, %arg1 : i32, i32
  }
}

module attributes {stable_mosaic.version = 11 : i64} {
  func.func @_gemm_onepass_kernel(%arg0: i32, %arg1: i32, %arg2: memref<32x1152xbf16, #tpu.memory_space<vmem>>, %arg3: memref<1152x128xbf16, #tpu.memory_space<vmem>>, %arg4: memref<1x128xf32, #tpu.memory_space<vmem>>, %arg5: memref<32x128xbf16, #tpu.memory_space<vmem>>, %arg6: memref<32x128xbf16, #tpu.memory_space<vmem>>) attributes {dimension_semantics = [#tpu.dimension_semantics<parallel>, #tpu.dimension_semantics<parallel>], iteration_bounds = array<i64: 1, 1>, scalar_prefetch = 0 : i64, scratch_operands = 0 : i64, tpu.core_type = #tpu.core_type<tc>, window_params = [{transform_indices = @transform_0, window_bounds = array<i64: 32, 1152>}, {transform_indices = @transform_1, window_bounds = array<i64: 1152, 128>}, {transform_indices = @transform_2, window_bounds = array<i64: 1, 128>}, {transform_indices = @transform_3, window_bounds = array<i64: 32, 128>}, {transform_indices = @transform_4, window_bounds = array<i64: 32, 128>}]} {
    %c0 = arith.constant 0 : index
    %c0_0 = arith.constant 0 : index
    %0 = vector.load %arg2[%c0, %c0_0] : memref<32x1152xbf16, #tpu.memory_space<vmem>>, vector<32x1152xbf16>
    %c0_1 = arith.constant 0 : index
    %c0_2 = arith.constant 0 : index
    %1 = vector.load %arg3[%c0_1, %c0_2] : memref<1152x128xbf16, #tpu.memory_space<vmem>>, vector<1152x128xbf16>
    %cst = arith.constant dense<0.000000e+00> : vector<32x128xf32>
    %2 = tpu.matmul %0, %1, %cst {dimension_numbers = #tpu.dot_dimension_numbers<[1], [0], [0], [1], [0, 0, 1, 1], [], []>} : vector<32x1152xbf16>, vector<1152x128xbf16>, vector<32x128xf32> -> vector<32x128xf32>
    %c0_3 = arith.constant 0 : index
    %c0_4 = arith.constant 0 : index
    %3 = vector.load %arg4[%c0_3, %c0_4] : memref<1x128xf32, #tpu.memory_space<vmem>>, vector<1x128xf32>
    %4 = vector.broadcast %3 : vector<1x128xf32> to vector<32x128xf32>
    %5 = arith.addf %2, %4 : vector<32x128xf32>
    %c0_5 = arith.constant 0 : index
    %c0_6 = arith.constant 0 : index
    %6 = vector.load %arg5[%c0_5, %c0_6] : memref<32x128xbf16, #tpu.memory_space<vmem>>, vector<32x128xbf16>
    %7 = arith.extf %6 : vector<32x128xbf16> to vector<32x128xf32>
    %8 = arith.addf %5, %7 : vector<32x128xf32>
    %cst_7 = arith.constant 0.000000e+00 : f32
    %9 = vector.broadcast %cst_7 : f32 to vector<32x128xf32>
    %10 = arith.maximumf %8, %9 : vector<32x128xf32>
    %11 = arith.truncf %10 : vector<32x128xf32> to vector<32x128xbf16>
    %c0_8 = arith.constant 0 : index
    %c0_9 = arith.constant 0 : index
    %12 = vector.load %arg6[%c0_8, %c0_9] : memref<32x128xbf16, #tpu.memory_space<vmem>>, vector<32x128xbf16>
    tpu.vector_store %arg6[%c0_8, %c0_9], %11 {strides = array<i32>} : memref<32x128xbf16, #tpu.memory_space<vmem>>, vector<32x128xbf16>,
    return
  }
  func.func @transform_0(%arg0: i32, %arg1: i32) -> (i32, i32) {
    %c0_i32 = arith.constant 0 : i32
    %c0_i32_0 = arith.constant 0 : i32
    return %arg0, %c0_i32 : i32, i32
  }
  func.func @transform_1(%arg0: i32, %arg1: i32) -> (i32, i32) {
    %c0_i32 = arith.constant 0 : i32
    %c0_i32_0 = arith.constant 0 : i32
    return %c0_i32, %arg1 : i32, i32
  }
  func.func @transform_2(%arg0: i32, %arg1: i32) -> (i32, i32) {
    %c0_i32 = arith.constant 0 : i32
    %c0_i32_0 = arith.constant 0 : i32
    return %c0_i32, %arg1 : i32, i32
  }
  func.func @transform_3(%arg0: i32, %arg1: i32) -> (i32, i32) {
    %c0_i32 = arith.constant 0 : i32
    return %arg0, %arg1 : i32, i32
  }
  func.func @transform_4(%arg0: i32, %arg1: i32) -> (i32, i32) {
    %c0_i32 = arith.constant 0 : i32
    return %arg0, %arg1 : i32, i32
  }
}

module attributes {stable_mosaic.version = 11 : i64} {
  func.func @_gemm_onepass_kernel(%arg0: i32, %arg1: i32, %arg2: memref<8x1152xbf16, #tpu.memory_space<vmem>>, %arg3: memref<1152x128xbf16, #tpu.memory_space<vmem>>, %arg4: memref<1x128xf32, #tpu.memory_space<vmem>>, %arg5: memref<8x128xbf16, #tpu.memory_space<vmem>>) attributes {dimension_semantics = [#tpu.dimension_semantics<parallel>, #tpu.dimension_semantics<parallel>], iteration_bounds = array<i64: 1, 1>, scalar_prefetch = 0 : i64, scratch_operands = 0 : i64, tpu.core_type = #tpu.core_type<tc>, window_params = [{transform_indices = @transform_0, window_bounds = array<i64: 8, 1152>}, {transform_indices = @transform_1, window_bounds = array<i64: 1152, 128>}, {transform_indices = @transform_2, window_bounds = array<i64: 1, 128>}, {transform_indices = @transform_3, window_bounds = array<i64: 8, 128>}]} {
    %c0 = arith.constant 0 : index
    %c0_0 = arith.constant 0 : index
    %0 = vector.load %arg2[%c0, %c0_0] : memref<8x1152xbf16, #tpu.memory_space<vmem>>, vector<8x1152xbf16>
    %c0_1 = arith.constant 0 : index
    %c0_2 = arith.constant 0 : index
    %1 = vector.load %arg3[%c0_1, %c0_2] : memref<1152x128xbf16, #tpu.memory_space<vmem>>, vector<1152x128xbf16>
    %cst = arith.constant dense<0.000000e+00> : vector<8x128xf32>
    %2 = tpu.matmul %0, %1, %cst {dimension_numbers = #tpu.dot_dimension_numbers<[1], [0], [0], [1], [0, 0, 1, 1], [], []>} : vector<8x1152xbf16>, vector<1152x128xbf16>, vector<8x128xf32> -> vector<8x128xf32>
    %c0_3 = arith.constant 0 : index
    %c0_4 = arith.constant 0 : index
    %3 = vector.load %arg4[%c0_3, %c0_4] : memref<1x128xf32, #tpu.memory_space<vmem>>, vector<1x128xf32>
    %4 = vector.broadcast %3 : vector<1x128xf32> to vector<8x128xf32>
    %5 = arith.addf %2, %4 : vector<8x128xf32>
    %cst_5 = arith.constant 0.000000e+00 : f32
    %6 = vector.broadcast %cst_5 : f32 to vector<8x128xf32>
    %7 = arith.maximumf %5, %6 : vector<8x128xf32>
    %8 = arith.truncf %7 : vector<8x128xf32> to vector<8x128xbf16>
    %c0_6 = arith.constant 0 : index
    %c0_7 = arith.constant 0 : index
    %9 = vector.load %arg5[%c0_6, %c0_7] : memref<8x128xbf16, #tpu.memory_space<vmem>>, vector<8x128xbf16>
    tpu.vector_store %arg5[%c0_6, %c0_7], %8 {strides = array<i32>} : memref<8x128xbf16, #tpu.memory_space<vmem>>, vector<8x128xbf16>,
    return
  }
  func.func @transform_0(%arg0: i32, %arg1: i32) -> (i32, i32) {
    %c0_i32 = arith.constant 0 : i32
    %c0_i32_0 = arith.constant 0 : i32
    return %arg0, %c0_i32 : i32, i32
  }
  func.func @transform_1(%arg0: i32, %arg1: i32) -> (i32, i32) {
    %c0_i32 = arith.constant 0 : i32
    %c0_i32_0 = arith.constant 0 : i32
    return %c0_i32, %arg1 : i32, i32
  }
  func.func @transform_2(%arg0: i32, %arg1: i32) -> (i32, i32) {
    %c0_i32 = arith.constant 0 : i32
    %c0_i32_0 = arith.constant 0 : i32
    return %c0_i32, %arg1 : i32, i32
  }
  func.func @transform_3(%arg0: i32, %arg1: i32) -> (i32, i32) {
    %c0_i32 = arith.constant 0 : i32
    return %arg0, %arg1 : i32, i32
  }
}

module attributes {stable_mosaic.version = 11 : i64} {
  func.func @_gemm_onepass_kernel(%arg0: i32, %arg1: i32, %arg2: memref<8x1152xbf16, #tpu.memory_space<vmem>>, %arg3: memref<1152x128xbf16, #tpu.memory_space<vmem>>, %arg4: memref<1x128xf32, #tpu.memory_space<vmem>>, %arg5: memref<8x128xbf16, #tpu.memory_space<vmem>>, %arg6: memref<8x128xbf16, #tpu.memory_space<vmem>>) attributes {dimension_semantics = [#tpu.dimension_semantics<parallel>, #tpu.dimension_semantics<parallel>], iteration_bounds = array<i64: 1, 1>, scalar_prefetch = 0 : i64, scratch_operands = 0 : i64, tpu.core_type = #tpu.core_type<tc>, window_params = [{transform_indices = @transform_0, window_bounds = array<i64: 8, 1152>}, {transform_indices = @transform_1, window_bounds = array<i64: 1152, 128>}, {transform_indices = @transform_2, window_bounds = array<i64: 1, 128>}, {transform_indices = @transform_3, window_bounds = array<i64: 8, 128>}, {transform_indices = @transform_4, window_bounds = array<i64: 8, 128>}]} {
    %c0 = arith.constant 0 : index
    %c0_0 = arith.constant 0 : index
    %0 = vector.load %arg2[%c0, %c0_0] : memref<8x1152xbf16, #tpu.memory_space<vmem>>, vector<8x1152xbf16>
    %c0_1 = arith.constant 0 : index
    %c0_2 = arith.constant 0 : index
    %1 = vector.load %arg3[%c0_1, %c0_2] : memref<1152x128xbf16, #tpu.memory_space<vmem>>, vector<1152x128xbf16>
    %cst = arith.constant dense<0.000000e+00> : vector<8x128xf32>
    %2 = tpu.matmul %0, %1, %cst {dimension_numbers = #tpu.dot_dimension_numbers<[1], [0], [0], [1], [0, 0, 1, 1], [], []>} : vector<8x1152xbf16>, vector<1152x128xbf16>, vector<8x128xf32> -> vector<8x128xf32>
    %c0_3 = arith.constant 0 : index
    %c0_4 = arith.constant 0 : index
    %3 = vector.load %arg4[%c0_3, %c0_4] : memref<1x128xf32, #tpu.memory_space<vmem>>, vector<1x128xf32>
    %4 = vector.broadcast %3 : vector<1x128xf32> to vector<8x128xf32>
    %5 = arith.addf %2, %4 : vector<8x128xf32>
    %c0_5 = arith.constant 0 : index
    %c0_6 = arith.constant 0 : index
    %6 = vector.load %arg5[%c0_5, %c0_6] : memref<8x128xbf16, #tpu.memory_space<vmem>>, vector<8x128xbf16>
    %7 = arith.extf %6 : vector<8x128xbf16> to vector<8x128xf32>
    %8 = arith.addf %5, %7 : vector<8x128xf32>
    %cst_7 = arith.constant 0.000000e+00 : f32
    %9 = vector.broadcast %cst_7 : f32 to vector<8x128xf32>
    %10 = arith.maximumf %8, %9 : vector<8x128xf32>
    %11 = arith.truncf %10 : vector<8x128xf32> to vector<8x128xbf16>
    %c0_8 = arith.constant 0 : index
    %c0_9 = arith.constant 0 : index
    %12 = vector.load %arg6[%c0_8, %c0_9] : memref<8x128xbf16, #tpu.memory_space<vmem>>, vector<8x128xbf16>
    tpu.vector_store %arg6[%c0_8, %c0_9], %11 {strides = array<i32>} : memref<8x128xbf16, #tpu.memory_space<vmem>>, vector<8x128xbf16>,
    return
  }
  func.func @transform_0(%arg0: i32, %arg1: i32) -> (i32, i32) {
    %c0_i32 = arith.constant 0 : i32
    %c0_i32_0 = arith.constant 0 : i32
    return %arg0, %c0_i32 : i32, i32
  }
  func.func @transform_1(%arg0: i32, %arg1: i32) -> (i32, i32) {
    %c0_i32 = arith.constant 0 : i32
    %c0_i32_0 = arith.constant 0 : i32
    return %c0_i32, %arg1 : i32, i32
  }
  func.func @transform_2(%arg0: i32, %arg1: i32) -> (i32, i32) {
    %c0_i32 = arith.constant 0 : i32
    %c0_i32_0 = arith.constant 0 : i32
    return %c0_i32, %arg1 : i32, i32
  }
  func.func @transform_3(%arg0: i32, %arg1: i32) -> (i32, i32) {
    %c0_i32 = arith.constant 0 : i32
    return %arg0, %arg1 : i32, i32
  }
  func.func @transform_4(%arg0: i32, %arg1: i32) -> (i32, i32) {
    %c0_i32 = arith.constant 0 : i32
    return %arg0, %arg1 : i32, i32
  }
}

module attributes {stable_mosaic.version = 11 : i64} {
  func.func @_gemm_onepass_kernel(%arg0: i32, %arg1: i32, %arg2: memref<8x128xbf16, #tpu.memory_space<vmem>>, %arg3: memref<128x128xbf16, #tpu.memory_space<vmem>>, %arg4: memref<1x128xf32, #tpu.memory_space<vmem>>, %arg5: memref<8x128xbf16, #tpu.memory_space<vmem>>) attributes {dimension_semantics = [#tpu.dimension_semantics<parallel>, #tpu.dimension_semantics<parallel>], iteration_bounds = array<i64: 1, 1>, scalar_prefetch = 0 : i64, scratch_operands = 0 : i64, tpu.core_type = #tpu.core_type<tc>, window_params = [{transform_indices = @transform_0, window_bounds = array<i64: 8, 128>}, {transform_indices = @transform_1, window_bounds = array<i64: 128, 128>}, {transform_indices = @transform_2, window_bounds = array<i64: 1, 128>}, {transform_indices = @transform_3, window_bounds = array<i64: 8, 128>}]} {
    %c0 = arith.constant 0 : index
    %c0_0 = arith.constant 0 : index
    %0 = vector.load %arg2[%c0, %c0_0] : memref<8x128xbf16, #tpu.memory_space<vmem>>, vector<8x128xbf16>
    %c0_1 = arith.constant 0 : index
    %c0_2 = arith.constant 0 : index
    %1 = vector.load %arg3[%c0_1, %c0_2] : memref<128x128xbf16, #tpu.memory_space<vmem>>, vector<128x128xbf16>
    %cst = arith.constant dense<0.000000e+00> : vector<8x128xf32>
    %2 = tpu.matmul %0, %1, %cst {dimension_numbers = #tpu.dot_dimension_numbers<[1], [0], [0], [1], [0, 0, 1, 1], [], []>} : vector<8x128xbf16>, vector<128x128xbf16>, vector<8x128xf32> -> vector<8x128xf32>
    %c0_3 = arith.constant 0 : index
    %c0_4 = arith.constant 0 : index
    %3 = vector.load %arg4[%c0_3, %c0_4] : memref<1x128xf32, #tpu.memory_space<vmem>>, vector<1x128xf32>
    %4 = vector.broadcast %3 : vector<1x128xf32> to vector<8x128xf32>
    %5 = arith.addf %2, %4 : vector<8x128xf32>
    %6 = arith.truncf %5 : vector<8x128xf32> to vector<8x128xbf16>
    %c0_5 = arith.constant 0 : index
    %c0_6 = arith.constant 0 : index
    %7 = vector.load %arg5[%c0_5, %c0_6] : memref<8x128xbf16, #tpu.memory_space<vmem>>, vector<8x128xbf16>
    tpu.vector_store %arg5[%c0_5, %c0_6], %6 {strides = array<i32>} : memref<8x128xbf16, #tpu.memory_space<vmem>>, vector<8x128xbf16>,
    return
  }
  func.func @transform_0(%arg0: i32, %arg1: i32) -> (i32, i32) {
    %c0_i32 = arith.constant 0 : i32
    %c0_i32_0 = arith.constant 0 : i32
    return %arg0, %c0_i32 : i32, i32
  }
  func.func @transform_1(%arg0: i32, %arg1: i32) -> (i32, i32) {
    %c0_i32 = arith.constant 0 : i32
    %c0_i32_0 = arith.constant 0 : i32
    return %c0_i32, %arg1 : i32, i32
  }
  func.func @transform_2(%arg0: i32, %arg1: i32) -> (i32, i32) {
    %c0_i32 = arith.constant 0 : i32
    %c0_i32_0 = arith.constant 0 : i32
    return %c0_i32, %arg1 : i32, i32
  }
  func.func @transform_3(%arg0: i32, %arg1: i32) -> (i32, i32) {
    %c0_i32 = arith.constant 0 : i32
    return %arg0, %arg1 : i32, i32
  }
}

module attributes {stable_mosaic.version = 11 : i64} {
  func.func @_mean_reduce_kernel(%arg0: i32, %arg1: memref<2x1x128xbf16, #tpu.memory_space<vmem>>, %arg2: memref<2x128xf32, #tpu.memory_space<vmem>>) attributes {dimension_semantics = [#tpu.dimension_semantics<arbitrary>], iteration_bounds = array<i64: 1>, scalar_prefetch = 0 : i64, scratch_operands = 0 : i64, tpu.core_type = #tpu.core_type<tc>, window_params = [{pipeline_mode = #tpu.pipeline_mode<synchronous>, transform_indices = @transform_0, window_bounds = array<i64: 2, 1, 128>}, {pipeline_mode = #tpu.pipeline_mode<synchronous>, transform_indices = @transform_1, window_bounds = array<i64: 2, 128>}]} {
    %c0 = arith.constant 0 : index
    %c0_0 = arith.constant 0 : index
    %c0_1 = arith.constant 0 : index
    %0 = vector.load %arg1[%c0, %c0_0, %c0_1] : memref<2x1x128xbf16, #tpu.memory_space<vmem>>, vector<2x1x128xbf16>
    %1 = arith.extf %0 : vector<2x1x128xbf16> to vector<2x1x128xf32>
    %cst = arith.constant dense<0.000000e+00> : vector<2x128xf32>
    %2 = vector.multi_reduction <add>, %1, %cst [1] : vector<2x1x128xf32> to vector<2x128xf32>
    %cst_2 = arith.constant 1.000000e+00 : f32
    %3 = vector.broadcast %cst_2 : f32 to vector<2x128xf32>
    %4 = arith.divf %2, %3 : vector<2x128xf32>
    %c0_3 = arith.constant 0 : index
    %c0_4 = arith.constant 0 : index
    %5 = vector.load %arg2[%c0_3, %c0_4] : memref<2x128xf32, #tpu.memory_space<vmem>>, vector<2x128xf32>
    tpu.vector_store %arg2[%c0_3, %c0_4], %4 {strides = array<i32>} : memref<2x128xf32, #tpu.memory_space<vmem>>, vector<2x128xf32>,
    return
  }
  func.func @transform_0(%arg0: i32) -> (i32, i32, i32) {
    %c0_i32 = arith.constant 0 : i32
    %c0_i32_0 = arith.constant 0 : i32
    %c0_i32_1 = arith.constant 0 : i32
    %c0_i32_2 = arith.constant 0 : i32
    return %c0_i32, %c0_i32_0, %c0_i32_1 : i32, i32, i32
  }
  func.func @transform_1(%arg0: i32) -> (i32, i32) {
    %c0_i32 = arith.constant 0 : i32
    %c0_i32_0 = arith.constant 0 : i32
    %c0_i32_1 = arith.constant 0 : i32
    return %c0_i32, %c0_i32_0 : i32, i32
  }
}

module attributes {stable_mosaic.version = 11 : i64} {
  func.func @_gemm_onepass_kernel(%arg0: i32, %arg1: i32, %arg2: memref<8x128xbf16, #tpu.memory_space<vmem>>, %arg3: memref<128x128xbf16, #tpu.memory_space<vmem>>, %arg4: memref<1x128xf32, #tpu.memory_space<vmem>>, %arg5: memref<8x128xf32, #tpu.memory_space<vmem>>) attributes {dimension_semantics = [#tpu.dimension_semantics<parallel>, #tpu.dimension_semantics<parallel>], iteration_bounds = array<i64: 1, 1>, scalar_prefetch = 0 : i64, scratch_operands = 0 : i64, tpu.core_type = #tpu.core_type<tc>, window_params = [{transform_indices = @transform_0, window_bounds = array<i64: 8, 128>}, {transform_indices = @transform_1, window_bounds = array<i64: 128, 128>}, {transform_indices = @transform_2, window_bounds = array<i64: 1, 128>}, {transform_indices = @transform_3, window_bounds = array<i64: 8, 128>}]} {
    %c0 = arith.constant 0 : index
    %c0_0 = arith.constant 0 : index
    %0 = vector.load %arg2[%c0, %c0_0] : memref<8x128xbf16, #tpu.memory_space<vmem>>, vector<8x128xbf16>
    %c0_1 = arith.constant 0 : index
    %c0_2 = arith.constant 0 : index
    %1 = vector.load %arg3[%c0_1, %c0_2] : memref<128x128xbf16, #tpu.memory_space<vmem>>, vector<128x128xbf16>
    %cst = arith.constant dense<0.000000e+00> : vector<8x128xf32>
    %2 = tpu.matmul %0, %1, %cst {dimension_numbers = #tpu.dot_dimension_numbers<[1], [0], [0], [1], [0, 0, 1, 1], [], []>} : vector<8x128xbf16>, vector<128x128xbf16>, vector<8x128xf32> -> vector<8x128xf32>
    %c0_3 = arith.constant 0 : index
    %c0_4 = arith.constant 0 : index
    %3 = vector.load %arg4[%c0_3, %c0_4] : memref<1x128xf32, #tpu.memory_space<vmem>>, vector<1x128xf32>
    %4 = vector.broadcast %3 : vector<1x128xf32> to vector<8x128xf32>
    %5 = arith.addf %2, %4 : vector<8x128xf32>
    %c0_5 = arith.constant 0 : index
    %c0_6 = arith.constant 0 : index
    %6 = vector.load %arg5[%c0_5, %c0_6] : memref<8x128xf32, #tpu.memory_space<vmem>>, vector<8x128xf32>
    tpu.vector_store %arg5[%c0_5, %c0_6], %5 {strides = array<i32>} : memref<8x128xf32, #tpu.memory_space<vmem>>, vector<8x128xf32>,
    return
  }
  func.func @transform_0(%arg0: i32, %arg1: i32) -> (i32, i32) {
    %c0_i32 = arith.constant 0 : i32
    %c0_i32_0 = arith.constant 0 : i32
    return %arg0, %c0_i32 : i32, i32
  }
  func.func @transform_1(%arg0: i32, %arg1: i32) -> (i32, i32) {
    %c0_i32 = arith.constant 0 : i32
    %c0_i32_0 = arith.constant 0 : i32
    return %c0_i32, %arg1 : i32, i32
  }
  func.func @transform_2(%arg0: i32, %arg1: i32) -> (i32, i32) {
    %c0_i32 = arith.constant 0 : i32
    %c0_i32_0 = arith.constant 0 : i32
    return %c0_i32, %arg1 : i32, i32
  }
  func.func @transform_3(%arg0: i32, %arg1: i32) -> (i32, i32) {
    %c0_i32 = arith.constant 0 : i32
    return %arg0, %arg1 : i32, i32
  }
}

</mosaic_0001>

<bundles_post_ra>
// kernel: resnet_feature_extractor_forward.23
= control target key start
LH: loop header
LB: loop body
LE: loop exit
PB: predicated region body
PF: predicated region fallthrough
CT: control target
= control target key end

     0   :  { %v1756_v0 = vmov 0   ;;  %s2214_s1 = inlined_call_operand.vmem [shape: bf16[256,128], index: 1, kind: input, shape index: {}]   ;;  %s2215_s0 = inlined_call_operand.vmem [shape: bf16[512,256], index: 0, kind: input, shape index: {}]   ;;  %s2216_s2 = inlined_call_operand.vmem [shape: f32[1,128], index: 2, kind: input, shape index: {}]   ;;  %s2217_s3 = inlined_call_operand.vmem [shape: bf16[512,128], index: 3, kind: output, shape index: {}]  }
   0x1   :  { %534 = vmatprep.subr.bf16.mxu0 %v1756_v0  ;;  %1611 = vmatprep.subr.bf16.mxu1 %v1756_v0  ;;  %v1644_v1 = vld [vmem:[%s2214_s1 + $0x38] sm:$0xff]   ;;  %v1645_v2 = vld [vmem:[%s2214_s1 + $0x30] sm:$0xff]   ;;  %v1646_v3 = vld [vmem:[%s2214_s1 + $0x28] sm:$0xff]  }
   0x2   :  { %535 = vmatpush1.bf16.msra.mxu0 %v1644_v1  ;;  %1627 = vmatpush1.bf16.msra.mxu1 %v1644_v1  ;;  %v1647_v4 = vld [vmem:[%s2214_s1 + $0x20] sm:$0xff]   ;;  %v1648_v5 = vld [vmem:[%s2214_s1 + $0x18] sm:$0xff]   ;;  %v1649_v7 = vld [vmem:[%s2214_s1 + $0x10] sm:$0xff]  }
   0x3   :  { %536 = vmatprep.subr.bf16.mxu0 %v1756_v0  ;;  %1612 = vmatprep.subr.bf16.mxu1 %v1756_v0  ;;  %v1662_v6 = vld [vmem:[%s2215_s0 + $0x4] ss:$8 sps:$4 sm:$0xff]   ;;  %v1652_v11 = vld [vmem:[%s2214_s1 + $0x78] sm:$0xff]   ;;  %v1653_v12 = vld [vmem:[%s2214_s1 + $0x70] sm:$0xff]  }
   0x4   :  { %v1665_v8 = vld [vmem:[%s2215_s0 + $0x104] ss:$8 sps:$4 sm:$0xff]   ;;  %566 = vmatprep.mubr.bf16.mxu0 %v1662_v6  ;;  %v1656_v15 = vld [vmem:[%s2214_s1 + $0x58] sm:$0xff]   ;;  %v1657_v16 = vld [vmem:[%s2214_s1 + $0x50] sm:$0xff]  }
   0x5   :  { %694 = vmatprep.mubr.bf16.mxu1 %v1665_v8  ;;  %v1650_v9 = vld [vmem:[%s2214_s1 + $0x8] sm:$0xff]   ;;  %v1651_v10 = vld [vmem:[%s2214_s1] sm:$0xff]   ;;  %v1666_v21 = vld [vmem:[%s2215_s0 + $0x14] ss:$8 sps:$4 sm:$0xff]  }
   0x6   :  { %537 = vmatpush1.bf16.msra.mxu0 %v1645_v2  ;;  %1628 = vmatpush1.bf16.msra.mxu1 %v1645_v2  ;;  %v1654_v13 = vld [vmem:[%s2214_s1 + $0x68] sm:$0xff]   ;;  %v1655_v14 = vld [vmem:[%s2214_s1 + $0x60] sm:$0xff]   ;;  %v1668_v22 = vld [vmem:[%s2215_s0 + $0x114] ss:$8 sps:$4 sm:$0xff]  }
   0x7   :  { %538 = vmatprep.subr.bf16.mxu0 %v1756_v0  ;;  %1613 = vmatprep.subr.bf16.mxu1 %v1756_v0  ;;  %v1658_v17 = vld [vmem:[%s2214_s1 + $0x48] sm:$0xff]   ;;  %v1659_v18 = vld [vmem:[%s2214_s1 + $0x40] sm:$0xff]   ;;  %v1670_v23 = vld [vmem:[%s2215_s0 + $0x10] ss:$8 sps:$4 sm:$0xff]  }
   0x8   :  { %v1660_v19 = vld [vmem:[%s2215_s0] ss:$8 sps:$4 sm:$0xff]   ;;  %v1671_v24 = vld [vmem:[%s2215_s0 + $0x110] ss:$8 sps:$4 sm:$0xff]   ;;  %v1672_v25 = vld [vmem:[%s2215_s0 + $0x24] ss:$8 sps:$4 sm:$0xff]  }
   0x9   :  { %v1663_v20 = vld [vmem:[%s2215_s0 + $0x100] ss:$8 sps:$4 sm:$0xff]   ;;  %v1674_v26 = vld [vmem:[%s2215_s0 + $0x124] ss:$8 sps:$4 sm:$0xff]   ;;  %v1678_v29 = vld [vmem:[%s2215_s0 + $0x34] ss:$8 sps:$4 sm:$0xff]  }
   0xa   :  { %539 = vmatpush1.bf16.msra.mxu0 %v1646_v3  ;;  %1629 = vmatpush1.bf16.msra.mxu1 %v1646_v3  ;;  %v1676_v27 = vld [vmem:[%s2215_s0 + $0x20] ss:$8 sps:$4 sm:$0xff]   ;;  %v1680_v30 = vld [vmem:[%s2215_s0 + $0x134] ss:$8 sps:$4 sm:$0xff]   ;;  %v1682_v31 = vld [vmem:[%s2215_s0 + $0x30] ss:$8 sps:$4 sm:$0xff]  }
   0xb   :  { %540 = vmatprep.subr.bf16.mxu0 %v1756_v0  ;;  %1614 = vmatprep.subr.bf16.mxu1 %v1756_v0  ;;  %v1677_v28 = vld [vmem:[%s2215_s0 + $0x120] ss:$8 sps:$4 sm:$0xff]   ;;  %v1683_v32 = vld [vmem:[%s2215_s0 + $0x130] ss:$8 sps:$4 sm:$0xff]   ;;  %v1684_v33 = vld [vmem:[%s2215_s0 + $0x44] ss:$8 sps:$4 sm:$0xff]  }
   0xc   :  { %v1686_v34 = vld [vmem:[%s2215_s0 + $0x144] ss:$8 sps:$4 sm:$0xff]   ;;  %v1688_v35 = vld [vmem:[%s2215_s0 + $0x40] ss:$8 sps:$4 sm:$0xff]   ;;  %v1690_v37 = vld [vmem:[%s2215_s0 + $0x54] ss:$8 sps:$4 sm:$0xff]  }
   0xd   :  { %v1689_v36 = vld [vmem:[%s2215_s0 + $0x140] ss:$8 sps:$4 sm:$0xff]   ;;  %v1692_v38 = vld [vmem:[%s2215_s0 + $0x154] ss:$8 sps:$4 sm:$0xff]   ;;  %v1694_v39 = vld [vmem:[%s2215_s0 + $0x50] ss:$8 sps:$4 sm:$0xff]  }
   0xe   :  { %541 = vmatpush1.bf16.msra.mxu0 %v1647_v4  ;;  %1630 = vmatpush1.bf16.msra.mxu1 %v1647_v4  ;;  %v1695_v40 = vld [vmem:[%s2215_s0 + $0x150] ss:$8 sps:$4 sm:$0xff]   ;;  %v1696_v41 = vld [vmem:[%s2215_s0 + $0x64] ss:$8 sps:$4 sm:$0xff]   ;;  %v1700_v43 = vld [vmem:[%s2215_s0 + $0x60] ss:$8 sps:$4 sm:$0xff]  }
   0xf   :  { %542 = vmatprep.subr.bf16.mxu0 %v1756_v0  ;;  %1615 = vmatprep.subr.bf16.mxu1 %v1756_v0  ;;  %v1698_v42 = vld [vmem:[%s2215_s0 + $0x164] ss:$8 sps:$4 sm:$0xff]   ;;  %v1701_v44 = vld [vmem:[%s2215_s0 + $0x160] ss:$8 sps:$4 sm:$0xff]   ;;  %v1702_v45 = vld [vmem:[%s2215_s0 + $0x74] ss:$8 sps:$4 sm:$0xff]  }
  0x10   :  { %v1704_v46 = vld [vmem:[%s2215_s0 + $0x174] ss:$8 sps:$4 sm:$0xff]   ;;  %v1706_v47 = vld [vmem:[%s2215_s0 + $0x70] ss:$8 sps:$4 sm:$0xff]   ;;  %v1708_v49 = vld [vmem:[%s2215_s0 + $0x84] ss:$8 sps:$4 sm:$0xff]  }
  0x11   :  { %v1707_v48 = vld [vmem:[%s2215_s0 + $0x170] ss:$8 sps:$4 sm:$0xff]   ;;  %v1710_v50 = vld [vmem:[%s2215_s0 + $0x184] ss:$8 sps:$4 sm:$0xff]   ;;  %v1712_v51 = vld [vmem:[%s2215_s0 + $0x80] ss:$8 sps:$4 sm:$0xff]  }
  0x12   :  { %543 = vmatpush1.bf16.msra.mxu0 %v1648_v5  ;;  %1631 = vmatpush1.bf16.msra.mxu1 %v1648_v5  ;;  %v1713_v52 = vld [vmem:[%s2215_s0 + $0x180] ss:$8 sps:$4 sm:$0xff]   ;;  %v1714_v53 = vld [vmem:[%s2215_s0 + $0x94] ss:$8 sps:$4 sm:$0xff]   ;;  %v1718_v55 = vld [vmem:[%s2215_s0 + $0x90] ss:$8 sps:$4 sm:$0xff]  }
  0x13   :  { %544 = vmatprep.subr.bf16.mxu0 %v1756_v0  ;;  %1616 = vmatprep.subr.bf16.mxu1 %v1756_v0  ;;  %v1716_v54 = vld [vmem:[%s2215_s0 + $0x194] ss:$8 sps:$4 sm:$0xff]   ;;  %v1719_v56 = vld [vmem:[%s2215_s0 + $0x190] ss:$8 sps:$4 sm:$0xff]   ;;  %v1720_v57 = vld [vmem:[%s2215_s0 + $0xa4] ss:$8 sps:$4 sm:$0xff]  }
  0x14   :  { %v1722_v58 = vld [vmem:[%s2215_s0 + $0x1a4] ss:$8 sps:$4 sm:$0xff]   ;;  %v1724_v59 = vld [vmem:[%s2215_s0 + $0xa0] ss:$8 sps:$4 sm:$0xff]   ;;  %v1726_v61 = vld [vmem:[%s2215_s0 + $0xb4] ss:$8 sps:$4 sm:$0xff]  }
  0x15   :  { %v1725_v60 = vld [vmem:[%s2215_s0 + $0x1a0] ss:$8 sps:$4 sm:$0xff]   ;;  %v1728_v62 = vld [vmem:[%s2215_s0 + $0x1b4] ss:$8 sps:$4 sm:$0xff]   ;;  %v1730_v63 = vld [vmem:[%s2215_s0 + $0xb0] ss:$8 sps:$4 sm:$0xff]  }
  0x16   :  { %545 = vmatpush1.bf16.msra.mxu0 %v1649_v7  ;;  %1632 = vmatpush1.bf16.msra.mxu1 %v1649_v7  ;;  %v1732_v1 = vld [vmem:[%s2215_s0 + $0xc4] ss:$8 sps:$4 sm:$0xff]   ;;  %v1736_v3 = vld [vmem:[%s2215_s0 + $0xc0] ss:$8 sps:$4 sm:$0xff]   ;;  %v1738_v5 = vld [vmem:[%s2215_s0 + $0xd4] ss:$8 sps:$4 sm:$0xff]  }
  0x17   :  { %546 = vmatprep.subr.bf16.mxu0 %v1756_v0  ;;  %1617 = vmatprep.subr.bf16.mxu1 %v1756_v0  ;;  %v1734_v2 = vld [vmem:[%s2215_s0 + $0x1c4] ss:$8 sps:$4 sm:$0xff]   ;;  %v1737_v4 = vld [vmem:[%s2215_s0 + $0x1c0] ss:$8 sps:$4 sm:$0xff]   ;;  %v1740_v6 = vld [vmem:[%s2215_s0 + $0x1d4] ss:$8 sps:$4 sm:$0xff]  }
  0x18   :  { %v1742_v7 = vld [vmem:[%s2215_s0 + $0xd0] ss:$8 sps:$4 sm:$0xff]  }
  0x19   :  { %v1743_v8 = vld [vmem:[%s2215_s0 + $0x1d0] ss:$8 sps:$4 sm:$0xff]  }
  0x1a   :  { %547 = vmatpush1.bf16.msra.mxu0 %v1650_v9  ;;  %1633 = vmatpush1.bf16.msra.mxu1 %v1650_v9  ;;  %v1744_v9 = vld [vmem:[%s2215_s0 + $0xe4] ss:$8 sps:$4 sm:$0xff]  }
  0x1b   :  { %548 = vmatprep.subr.bf16.mxu0 %v1756_v0  ;;  %1618 = vmatprep.subr.bf16.mxu1 %v1756_v0 }
  0x1e   :  { %549 = vmatpush1.bf16.msra.mxu0 %v1651_v10  ;;  %1634 = vmatpush1.bf16.msra.mxu1 %v1651_v10  ;;  %v1746_v10 = vld [vmem:[%s2215_s0 + $0x1e4] ss:$8 sps:$4 sm:$0xff]  }
  0x1f   :  { %550 = vmatprep.subr.bf16.mxu0 %v1756_v0  ;;  %1619 = vmatprep.subr.bf16.mxu1 %v1756_v0 }
  0x22   :  { %551 = vmatpush2.bf16.msra.mxu0 %v1652_v11  ;;  %1635 = vmatpush2.bf16.msra.mxu1 %v1652_v11  ;;  %v1748_v11 = vld [vmem:[%s2215_s0 + $0xe0] ss:$8 sps:$4 sm:$0xff]  }
  0x23   :  { %552 = vmatprep.subr.bf16.mxu0 %v1756_v0  ;;  %1620 = vmatprep.subr.bf16.mxu1 %v1756_v0 }
  0x26   :  { %553 = vmatpush2.bf16.msra.mxu0 %v1653_v12  ;;  %1636 = vmatpush2.bf16.msra.mxu1 %v1653_v12  ;;  %v1749_v12 = vld [vmem:[%s2215_s0 + $0x1e0] ss:$8 sps:$4 sm:$0xff]  }
  0x27   :  { %554 = vmatprep.subr.bf16.mxu0 %v1756_v0  ;;  %1621 = vmatprep.subr.bf16.mxu1 %v1756_v0 }
  0x2a   :  { %555 = vmatpush2.bf16.msra.mxu0 %v1654_v13  ;;  %1637 = vmatpush2.bf16.msra.mxu1 %v1654_v13  ;;  %v1750_v13 = vld [vmem:[%s2215_s0 + $0xf4] ss:$8 sps:$4 sm:$0xff]  }
  0x2b   :  { %556 = vmatprep.subr.bf16.mxu0 %v1756_v0  ;;  %1622 = vmatprep.subr.bf16.mxu1 %v1756_v0 }
  0x2e   :  { %557 = vmatpush2.bf16.msra.mxu0 %v1655_v14  ;;  %1638 = vmatpush2.bf16.msra.mxu1 %v1655_v14  ;;  %v1752_v14 = vld [vmem:[%s2215_s0 + $0x1f4] ss:$8 sps:$4 sm:$0xff]  }
  0x2f   :  { %558 = vmatprep.subr.bf16.mxu0 %v1756_v0  ;;  %1623 = vmatprep.subr.bf16.mxu1 %v1756_v0 }
  0x32   :  { %559 = vmatpush2.bf16.msra.mxu0 %v1656_v15  ;;  %1639 = vmatpush2.bf16.msra.mxu1 %v1656_v15  ;;  %v1754_v15 = vld [vmem:[%s2215_s0 + $0xf0] ss:$8 sps:$4 sm:$0xff]  }
  0x33   :  { %560 = vmatprep.subr.bf16.mxu0 %v1756_v0  ;;  %1624 = vmatprep.subr.bf16.mxu1 %v1756_v0 }
  0x36   :  { %561 = vmatpush2.bf16.msra.mxu0 %v1657_v16  ;;  %1640 = vmatpush2.bf16.msra.mxu1 %v1657_v16  ;;  %v1755_v16 = vld [vmem:[%s2215_s0 + $0x1f0] ss:$8 sps:$4 sm:$0xff]  }
  0x37   :  { %562 = vmatprep.subr.bf16.mxu0 %v1756_v0  ;;  %1625 = vmatprep.subr.bf16.mxu1 %v1756_v0 }
  0x3a   :  { %563 = vmatpush2.bf16.msra.mxu0 %v1658_v17  ;;  %1641 = vmatpush2.bf16.msra.mxu1 %v1658_v17  ;;  %v2052_v17 = vld [vmem:[%s2216_s2] ss:$0 sm:$0xff] }
  0x3b   :  { %564 = vmatprep.subr.bf16.mxu0 %v1756_v0  ;;  %1626 = vmatprep.subr.bf16.mxu1 %v1756_v0  ;;  %v1731_v0 = vld [vmem:[%s2215_s0 + $0x1b0] ss:$8 sps:$4 sm:$0xff]  }
  0x3e   :  { %565 = vmatpush2.bf16.msra.mxu0 %v1659_v18  ;;  %1642 = vmatpush2.bf16.msra.mxu1 %v1659_v18 }
  0x41   :  { %567 = vmatmul.mubr.bf16.vlgmr.msra.gmra.mxu0 %v1660_v19  ;;  %695 = vmatmul.mubr.bf16.vlgmr.msra.gmra.mxu1 %v1663_v20 }
  0x42   :  { %574 = vmatprep.mubr.bf16.mxu0 %v1666_v21  ;;  %702 = vmatprep.mubr.bf16.mxu1 %v1668_v22 }
  0x49   :  { %575 = vmatmul.mubr.bf16.gmra.mxu0 %v1670_v23  ;;  %703 = vmatmul.mubr.bf16.gmra.mxu1 %v1671_v24 }
  0x4a   :  { %582 = vmatprep.mubr.bf16.mxu0 %v1672_v25  ;;  %710 = vmatprep.mubr.bf16.mxu1 %v1674_v26 }
  0x51   :  { %583 = vmatmul.mubr.bf16.gmra.mxu0 %v1676_v27  ;;  %711 = vmatmul.mubr.bf16.gmra.mxu1 %v1677_v28 }
  0x52   :  { %590 = vmatprep.mubr.bf16.mxu0 %v1678_v29  ;;  %718 = vmatprep.mubr.bf16.mxu1 %v1680_v30 }
  0x59   :  { %591 = vmatmul.mubr.bf16.gmra.mxu0 %v1682_v31  ;;  %719 = vmatmul.mubr.bf16.gmra.mxu1 %v1683_v32 }
  0x5a   :  { %598 = vmatprep.mubr.bf16.mxu0 %v1684_v33  ;;  %726 = vmatprep.mubr.bf16.mxu1 %v1686_v34 }
  0x61   :  { %599 = vmatmul.mubr.bf16.gmra.mxu0 %v1688_v35  ;;  %727 = vmatmul.mubr.bf16.gmra.mxu1 %v1689_v36 }
  0x62   :  { %606 = vmatprep.mubr.bf16.mxu0 %v1690_v37  ;;  %734 = vmatprep.mubr.bf16.mxu1 %v1692_v38 }
  0x69   :  { %607 = vmatmul.mubr.bf16.gmra.mxu0 %v1694_v39  ;;  %735 = vmatmul.mubr.bf16.gmra.mxu1 %v1695_v40 }
  0x6a   :  { %614 = vmatprep.mubr.bf16.mxu0 %v1696_v41  ;;  %742 = vmatprep.mubr.bf16.mxu1 %v1698_v42 }
  0x71   :  { %615 = vmatmul.mubr.bf16.gmra.mxu0 %v1700_v43  ;;  %743 = vmatmul.mubr.bf16.gmra.mxu1 %v1701_v44 }
  0x72   :  { %622 = vmatprep.mubr.bf16.mxu0 %v1702_v45  ;;  %750 = vmatprep.mubr.bf16.mxu1 %v1704_v46 }
  0x79   :  { %623 = vmatmul.mubr.bf16.gmra.mxu0 %v1706_v47  ;;  %751 = vmatmul.mubr.bf16.gmra.mxu1 %v1707_v48 }
  0x7a   :  { %630 = vmatprep.mubr.bf16.mxu0 %v1708_v49  ;;  %758 = vmatprep.mubr.bf16.mxu1 %v1710_v50 }
  0x81   :  { %631 = vmatmul.mubr.bf16.gmra.mxu0 %v1712_v51  ;;  %759 = vmatmul.mubr.bf16.gmra.mxu1 %v1713_v52 }
  0x82   :  { %638 = vmatprep.mubr.bf16.mxu0 %v1714_v53  ;;  %766 = vmatprep.mubr.bf16.mxu1 %v1716_v54 }
  0x89   :  { %639 = vmatmul.mubr.bf16.gmra.mxu0 %v1718_v55  ;;  %767 = vmatmul.mubr.bf16.gmra.mxu1 %v1719_v56 }
  0x8a   :  { %646 = vmatprep.mubr.bf16.mxu0 %v1720_v57  ;;  %774 = vmatprep.mubr.bf16.mxu1 %v1722_v58 }
  0x91   :  { %647 = vmatmul.mubr.bf16.gmra.mxu0 %v1724_v59  ;;  %775 = vmatmul.mubr.bf16.gmra.mxu1 %v1725_v60 }
  0x92   :  { %654 = vmatprep.mubr.bf16.mxu0 %v1726_v61  ;;  %782 = vmatprep.mubr.bf16.mxu1 %v1728_v62 }
  0x99   :  { %655 = vmatmul.mubr.bf16.gmra.mxu0 %v1730_v63  ;;  %783 = vmatmul.mubr.bf16.gmra.mxu1 %v1731_v0 }
  0x9a   :  { %662 = vmatprep.mubr.bf16.mxu0 %v1732_v1  ;;  %790 = vmatprep.mubr.bf16.mxu1 %v1734_v2 }
  0xa1   :  { %663 = vmatmul.mubr.bf16.gmra.mxu0 %v1736_v3  ;;  %791 = vmatmul.mubr.bf16.gmra.mxu1 %v1737_v4 }
  0xa2   :  { %670 = vmatprep.mubr.bf16.mxu0 %v1738_v5  ;;  %798 = vmatprep.mubr.bf16.mxu1 %v1740_v6 }
  0xa9   :  { %671 = vmatmul.mubr.bf16.gmra.mxu0 %v1742_v7  ;;  %799 = vmatmul.mubr.bf16.gmra.mxu1 %v1743_v8 }
  0xaa   :  { %678 = vmatprep.mubr.bf16.mxu0 %v1744_v9  ;;  %806 = vmatprep.mubr.bf16.mxu1 %v1746_v10 }
  0xb1   :  { %679 = vmatmul.mubr.bf16.gmra.mxu0 %v1748_v11  ;;  %807 = vmatmul.mubr.bf16.gmra.mxu1 %v1749_v12 }
  0xb2   :  { %686 = vmatprep.mubr.bf16.mxu0 %v1750_v13  ;;  %814 = vmatprep.mubr.bf16.mxu1 %v1752_v14 }
  0xb9   :  { %687 = vmatmul.mubr.bf16.gmra.mxu0 %v1754_v15  ;;  %815 = vmatmul.mubr.bf16.gmra.mxu1 %v1755_v16 }
 0x101   :  { %v568_v18 = vpop.f32.mrf.mxu0  ;;  %v696_v19 = vpop.f32.mrf.mxu1 }
 0x102   :  { %v569_v22 = vadd.f32 %v2052_v17, %v568_v18  ;;  %v697_v23 = vadd.f32 %v2052_v17, %v696_v19 }
 0x103   :  { %v570_v20 = vpop.f32.mrf.mxu0  ;;  %v698_v21 = vpop.f32.mrf.mxu1 }
 0x104   :  { %v823_v30 = vmax.f32 %v569_v22, 0.0  ;;  %v855_v31 = vmax.f32 %v697_v23, 0.0 }
 0x105   :  { %v571_v24 = vpop.f32.mrf.mxu0  ;;  %v699_v25 = vpop.f32.mrf.mxu1 }
 0x106   :  { %v572_v26 = vadd.f32 %v2052_v17, %v571_v24  ;;  %v700_v27 = vadd.f32 %v2052_v17, %v699_v25 }
 0x107   :  { %v573_v28 = vpop.f32.mrf.mxu0  ;;  %v701_v29 = vpop.f32.mrf.mxu1 }
 0x108   :  { %v824_v32 = vmax.f32 %v572_v26, 0.0  ;;  %v856_v33 = vmax.f32 %v700_v27, 0.0 }
 0x109   :  { %v576_v34 = vpop.f32.mrf.mxu0  ;;  %v704_v35 = vpop.f32.mrf.mxu1 }
 0x10a   :  { %v1423_v36 = vpack.c.bf16 %v824_v32, %v823_v30  ;;  %v1503_v37 = vpack.c.bf16 %v856_v33, %v855_v31  ;;  %v577_v40 = vadd.f32 %v2052_v17, %v576_v34  ;;  %v705_v41 = vadd.f32 %v2052_v17, %v704_v35 }
 0x10b   :  { %v578_v38 = vpop.f32.mrf.mxu0  ;;  %v706_v39 = vpop.f32.mrf.mxu1 }
 0x10c   :  { %1424 = vst [vmem:[%s2217_s3] sm:$0xff] %v1423_v36   ;;  %1595 = vst [vmem:[%s2217_s3 + $0x80] sm:$0xff] %v1503_v37   ;;  %v825_v48 = vmax.f32 %v577_v40, 0.0  ;;  %v857_v49 = vmax.f32 %v705_v41, 0.0 }
 0x10d   :  { %v579_v42 = vpop.f32.mrf.mxu0  ;;  %v707_v43 = vpop.f32.mrf.mxu1 }
 0x10e   :  { %v580_v44 = vadd.f32 %v2052_v17, %v579_v42  ;;  %v708_v45 = vadd.f32 %v2052_v17, %v707_v43 }
 0x10f   :  { %v581_v46 = vpop.f32.mrf.mxu0  ;;  %v709_v47 = vpop.f32.mrf.mxu1 }
 0x110   :  { %v826_v50 = vmax.f32 %v580_v44, 0.0  ;;  %v858_v51 = vmax.f32 %v708_v45, 0.0 }
 0x111   :  { %v584_v52 = vpop.f32.mrf.mxu0  ;;  %v712_v53 = vpop.f32.mrf.mxu1 }
 0x112   :  { %v1428_v54 = vpack.c.bf16 %v826_v50, %v825_v48  ;;  %v1508_v55 = vpack.c.bf16 %v858_v51, %v857_v49  ;;  %v585_v58 = vadd.f32 %v2052_v17, %v584_v52  ;;  %v713_v59 = vadd.f32 %v2052_v17, %v712_v53 }
 0x113   :  { %v586_v56 = vpop.f32.mrf.mxu0  ;;  %v714_v57 = vpop.f32.mrf.mxu1 }
 0x114   :  { %1580 = vst [vmem:[%s2217_s3 + $0x8] sm:$0xff] %v1428_v54   ;;  %1596 = vst [vmem:[%s2217_s3 + $0x88] sm:$0xff] %v1508_v55   ;;  %v827_v2 = vmax.f32 %v585_v58, 0.0  ;;  %v859_v3 = vmax.f32 %v713_v59, 0.0 }
 0x115   :  { %v587_v60 = vpop.f32.mrf.mxu0  ;;  %v715_v61 = vpop.f32.mrf.mxu1 }
 0x116   :  { %v588_v62 = vadd.f32 %v2052_v17, %v587_v60  ;;  %v716_v63 = vadd.f32 %v2052_v17, %v715_v61 }
 0x117   :  { %v589_v0 = vpop.f32.mrf.mxu0  ;;  %v717_v1 = vpop.f32.mrf.mxu1 }
 0x118   :  { %v828_v4 = vmax.f32 %v588_v62, 0.0  ;;  %v860_v5 = vmax.f32 %v716_v63, 0.0 }
 0x119   :  { %v592_v6 = vpop.f32.mrf.mxu0  ;;  %v720_v7 = vpop.f32.mrf.mxu1 }
 0x11a   :  { %v1433_v8 = vpack.c.bf16 %v828_v4, %v827_v2  ;;  %v1513_v9 = vpack.c.bf16 %v860_v5, %v859_v3  ;;  %v593_v12 = vadd.f32 %v2052_v17, %v592_v6  ;;  %v721_v13 = vadd.f32 %v2052_v17, %v720_v7 }
 0x11b   :  { %v594_v10 = vpop.f32.mrf.mxu0  ;;  %v722_v11 = vpop.f32.mrf.mxu1 }
 0x11c   :  { %1581 = vst [vmem:[%s2217_s3 + $0x10] sm:$0xff] %v1433_v8   ;;  %1597 = vst [vmem:[%s2217_s3 + $0x90] sm:$0xff] %v1513_v9   ;;  %v829_v21 = vmax.f32 %v593_v12, 0.0  ;;  %v861_v22 = vmax.f32 %v721_v13, 0.0 }
 0x11d   :  { %v595_v14 = vpop.f32.mrf.mxu0  ;;  %v723_v15 = vpop.f32.mrf.mxu1 }
 0x11e   :  { %v596_v16 = vadd.f32 %v2052_v17, %v595_v14  ;;  %v724_v18 = vadd.f32 %v2052_v17, %v723_v15 }
 0x11f   :  { %v597_v19 = vpop.f32.mrf.mxu0  ;;  %v725_v20 = vpop.f32.mrf.mxu1 }
 0x120   :  { %v830_v23 = vmax.f32 %v596_v16, 0.0  ;;  %v862_v24 = vmax.f32 %v724_v18, 0.0 }
 0x121   :  { %v600_v25 = vpop.f32.mrf.mxu0  ;;  %v728_v26 = vpop.f32.mrf.mxu1 }
 0x122   :  { %v1438_v27 = vpack.c.bf16 %v830_v23, %v829_v21  ;;  %v1518_v28 = vpack.c.bf16 %v862_v24, %v861_v22  ;;  %v601_v31 = vadd.f32 %v2052_v17, %v600_v25  ;;  %v729_v32 = vadd.f32 %v2052_v17, %v728_v26 }
 0x123   :  { %v602_v29 = vpop.f32.mrf.mxu0  ;;  %v730_v30 = vpop.f32.mrf.mxu1 }
 0x124   :  { %1582 = vst [vmem:[%s2217_s3 + $0x18] sm:$0xff] %v1438_v27   ;;  %1598 = vst [vmem:[%s2217_s3 + $0x98] sm:$0xff] %v1518_v28   ;;  %v831_v39 = vmax.f32 %v601_v31, 0.0  ;;  %v863_v40 = vmax.f32 %v729_v32, 0.0 }
 0x125   :  { %v603_v33 = vpop.f32.mrf.mxu0  ;;  %v731_v34 = vpop.f32.mrf.mxu1 }
 0x126   :  { %v604_v35 = vadd.f32 %v2052_v17, %v603_v33  ;;  %v732_v36 = vadd.f32 %v2052_v17, %v731_v34 }
 0x127   :  { %v605_v37 = vpop.f32.mrf.mxu0  ;;  %v733_v38 = vpop.f32.mrf.mxu1 }
 0x128   :  { %v832_v41 = vmax.f32 %v604_v35, 0.0  ;;  %v864_v42 = vmax.f32 %v732_v36, 0.0 }
 0x129   :  { %v608_v43 = vpop.f32.mrf.mxu0  ;;  %v736_v44 = vpop.f32.mrf.mxu1 }
 0x12a   :  { %v1443_v45 = vpack.c.bf16 %v832_v41, %v831_v39  ;;  %v1523_v46 = vpack.c.bf16 %v864_v42, %v863_v40  ;;  %v609_v49 = vadd.f32 %v2052_v17, %v608_v43  ;;  %v737_v50 = vadd.f32 %v2052_v17, %v736_v44 }
 0x12b   :  { %v610_v47 = vpop.f32.mrf.mxu0  ;;  %v738_v48 = vpop.f32.mrf.mxu1 }
 0x12c   :  { %1583 = vst [vmem:[%s2217_s3 + $0x20] sm:$0xff] %v1443_v45   ;;  %1599 = vst [vmem:[%s2217_s3 + $0xa0] sm:$0xff] %v1523_v46   ;;  %v833_v57 = vmax.f32 %v609_v49, 0.0  ;;  %v865_v58 = vmax.f32 %v737_v50, 0.0 }
 0x12d   :  { %v611_v51 = vpop.f32.mrf.mxu0  ;;  %v739_v52 = vpop.f32.mrf.mxu1 }
 0x12e   :  { %v612_v53 = vadd.f32 %v2052_v17, %v611_v51  ;;  %v740_v54 = vadd.f32 %v2052_v17, %v739_v52 }
 0x12f   :  { %v613_v55 = vpop.f32.mrf.mxu0  ;;  %v741_v56 = vpop.f32.mrf.mxu1 }
 0x130   :  { %v834_v59 = vmax.f32 %v612_v53, 0.0  ;;  %v866_v60 = vmax.f32 %v740_v54, 0.0 }
 0x131   :  { %v616_v61 = vpop.f32.mrf.mxu0  ;;  %v744_v62 = vpop.f32.mrf.mxu1 }
 0x132   :  { %v1448_v63 = vpack.c.bf16 %v834_v59, %v833_v57  ;;  %v1528_v0 = vpack.c.bf16 %v866_v60, %v865_v58  ;;  %v617_v3 = vadd.f32 %v2052_v17, %v616_v61  ;;  %v745_v4 = vadd.f32 %v2052_v17, %v744_v62 }
 0x133   :  { %v618_v1 = vpop.f32.mrf.mxu0  ;;  %v746_v2 = vpop.f32.mrf.mxu1 }
 0x134   :  { %1584 = vst [vmem:[%s2217_s3 + $0x28] sm:$0xff] %v1448_v63   ;;  %1600 = vst [vmem:[%s2217_s3 + $0xa8] sm:$0xff] %v1528_v0   ;;  %v835_v11 = vmax.f32 %v617_v3, 0.0  ;;  %v867_v12 = vmax.f32 %v745_v4, 0.0 }
 0x135   :  { %v619_v5 = vpop.f32.mrf.mxu0  ;;  %v747_v6 = vpop.f32.mrf.mxu1 }
 0x136   :  { %v620_v7 = vadd.f32 %v2052_v17, %v619_v5  ;;  %v748_v8 = vadd.f32 %v2052_v17, %v747_v6 }
 0x137   :  { %v621_v9 = vpop.f32.mrf.mxu0  ;;  %v749_v10 = vpop.f32.mrf.mxu1 }
 0x138   :  { %v836_v13 = vmax.f32 %v620_v7, 0.0  ;;  %v868_v14 = vmax.f32 %v748_v8, 0.0 }
 0x139   :  { %v624_v15 = vpop.f32.mrf.mxu0  ;;  %v752_v16 = vpop.f32.mrf.mxu1 }
 0x13a   :  { %v1453_v18 = vpack.c.bf16 %v836_v13, %v835_v11  ;;  %v1533_v19 = vpack.c.bf16 %v868_v14, %v867_v12  ;;  %v625_v22 = vadd.f32 %v2052_v17, %v624_v15  ;;  %v753_v23 = vadd.f32 %v2052_v17, %v752_v16 }
 0x13b   :  { %v626_v20 = vpop.f32.mrf.mxu0  ;;  %v754_v21 = vpop.f32.mrf.mxu1 }
 0x13c   :  { %1585 = vst [vmem:[%s2217_s3 + $0x30] sm:$0xff] %v1453_v18   ;;  %1601 = vst [vmem:[%s2217_s3 + $0xb0] sm:$0xff] %v1533_v19   ;;  %v837_v30 = vmax.f32 %v625_v22, 0.0  ;;  %v869_v31 = vmax.f32 %v753_v23, 0.0 }
 0x13d   :  { %v627_v24 = vpop.f32.mrf.mxu0  ;;  %v755_v25 = vpop.f32.mrf.mxu1 }
 0x13e   :  { %v628_v26 = vadd.f32 %v2052_v17, %v627_v24  ;;  %v756_v27 = vadd.f32 %v2052_v17, %v755_v25 }
 0x13f   :  { %v629_v28 = vpop.f32.mrf.mxu0  ;;  %v757_v29 = vpop.f32.mrf.mxu1 }
 0x140   :  { %v838_v32 = vmax.f32 %v628_v26, 0.0  ;;  %v870_v33 = vmax.f32 %v756_v27, 0.0 }
 0x141   :  { %v632_v34 = vpop.f32.mrf.mxu0  ;;  %v760_v35 = vpop.f32.mrf.mxu1 }
 0x142   :  { %v1458_v36 = vpack.c.bf16 %v838_v32, %v837_v30  ;;  %v1538_v37 = vpack.c.bf16 %v870_v33, %v869_v31  ;;  %v633_v40 = vadd.f32 %v2052_v17, %v632_v34  ;;  %v761_v41 = vadd.f32 %v2052_v17, %v760_v35 }
 0x143   :  { %v634_v38 = vpop.f32.mrf.mxu0  ;;  %v762_v39 = vpop.f32.mrf.mxu1 }
 0x144   :  { %1586 = vst [vmem:[%s2217_s3 + $0x38] sm:$0xff] %v1458_v36   ;;  %1602 = vst [vmem:[%s2217_s3 + $0xb8] sm:$0xff] %v1538_v37   ;;  %v839_v48 = vmax.f32 %v633_v40, 0.0  ;;  %v871_v49 = vmax.f32 %v761_v41, 0.0 }
 0x145   :  { %v635_v42 = vpop.f32.mrf.mxu0  ;;  %v763_v43 = vpop.f32.mrf.mxu1 }
 0x146   :  { %v636_v44 = vadd.f32 %v2052_v17, %v635_v42  ;;  %v764_v45 = vadd.f32 %v2052_v17, %v763_v43 }
 0x147   :  { %v637_v46 = vpop.f32.mrf.mxu0  ;;  %v765_v47 = vpop.f32.mrf.mxu1 }
 0x148   :  { %v840_v50 = vmax.f32 %v636_v44, 0.0  ;;  %v872_v51 = vmax.f32 %v764_v45, 0.0 }
 0x149   :  { %v640_v52 = vpop.f32.mrf.mxu0  ;;  %v768_v53 = vpop.f32.mrf.mxu1 }
 0x14a   :  { %v1463_v54 = vpack.c.bf16 %v840_v50, %v839_v48  ;;  %v1543_v55 = vpack.c.bf16 %v872_v51, %v871_v49  ;;  %v641_v58 = vadd.f32 %v2052_v17, %v640_v52  ;;  %v769_v59 = vadd.f32 %v2052_v17, %v768_v53 }
 0x14b   :  { %v642_v56 = vpop.f32.mrf.mxu0  ;;  %v770_v57 = vpop.f32.mrf.mxu1 }
 0x14c   :  { %1587 = vst [vmem:[%s2217_s3 + $0x40] sm:$0xff] %v1463_v54   ;;  %1603 = vst [vmem:[%s2217_s3 + $0xc0] sm:$0xff] %v1543_v55   ;;  %v841_v2 = vmax.f32 %v641_v58, 0.0  ;;  %v873_v3 = vmax.f32 %v769_v59, 0.0 }
 0x14d   :  { %v643_v60 = vpop.f32.mrf.mxu0  ;;  %v771_v61 = vpop.f32.mrf.mxu1 }
 0x14e   :  { %v644_v62 = vadd.f32 %v2052_v17, %v643_v60  ;;  %v772_v63 = vadd.f32 %v2052_v17, %v771_v61 }
 0x14f   :  { %v645_v0 = vpop.f32.mrf.mxu0  ;;  %v773_v1 = vpop.f32.mrf.mxu1 }
 0x150   :  { %v842_v4 = vmax.f32 %v644_v62, 0.0  ;;  %v874_v5 = vmax.f32 %v772_v63, 0.0 }
 0x151   :  { %v648_v6 = vpop.f32.mrf.mxu0  ;;  %v776_v7 = vpop.f32.mrf.mxu1 }
 0x152   :  { %v1468_v8 = vpack.c.bf16 %v842_v4, %v841_v2  ;;  %v1548_v9 = vpack.c.bf16 %v874_v5, %v873_v3  ;;  %v649_v12 = vadd.f32 %v2052_v17, %v648_v6  ;;  %v777_v13 = vadd.f32 %v2052_v17, %v776_v7 }
 0x153   :  { %v650_v10 = vpop.f32.mrf.mxu0  ;;  %v778_v11 = vpop.f32.mrf.mxu1 }
 0x154   :  { %1588 = vst [vmem:[%s2217_s3 + $0x48] sm:$0xff] %v1468_v8   ;;  %1604 = vst [vmem:[%s2217_s3 + $0xc8] sm:$0xff] %v1548_v9   ;;  %v843_v21 = vmax.f32 %v649_v12, 0.0  ;;  %v875_v22 = vmax.f32 %v777_v13, 0.0 }
 0x155   :  { %v651_v14 = vpop.f32.mrf.mxu0  ;;  %v779_v15 = vpop.f32.mrf.mxu1 }
 0x156   :  { %v652_v16 = vadd.f32 %v2052_v17, %v651_v14  ;;  %v780_v18 = vadd.f32 %v2052_v17, %v779_v15 }
 0x157   :  { %v653_v19 = vpop.f32.mrf.mxu0  ;;  %v781_v20 = vpop.f32.mrf.mxu1 }
 0x158   :  { %v844_v23 = vmax.f32 %v652_v16, 0.0  ;;  %v876_v24 = vmax.f32 %v780_v18, 0.0 }
 0x159   :  { %v656_v25 = vpop.f32.mrf.mxu0  ;;  %v784_v26 = vpop.f32.mrf.mxu1 }
 0x15a   :  { %v1473_v27 = vpack.c.bf16 %v844_v23, %v843_v21  ;;  %v1553_v28 = vpack.c.bf16 %v876_v24, %v875_v22  ;;  %v657_v31 = vadd.f32 %v2052_v17, %v656_v25  ;;  %v785_v32 = vadd.f32 %v2052_v17, %v784_v26 }
 0x15b   :  { %v658_v29 = vpop.f32.mrf.mxu0  ;;  %v786_v30 = vpop.f32.mrf.mxu1 }
 0x15c   :  { %1589 = vst [vmem:[%s2217_s3 + $0x50] sm:$0xff] %v1473_v27   ;;  %1605 = vst [vmem:[%s2217_s3 + $0xd0] sm:$0xff] %v1553_v28   ;;  %v845_v39 = vmax.f32 %v657_v31, 0.0  ;;  %v877_v40 = vmax.f32 %v785_v32, 0.0 }
 0x15d   :  { %v659_v33 = vpop.f32.mrf.mxu0  ;;  %v787_v34 = vpop.f32.mrf.mxu1 }
 0x15e   :  { %v660_v35 = vadd.f32 %v2052_v17, %v659_v33  ;;  %v788_v36 = vadd.f32 %v2052_v17, %v787_v34 }
 0x15f   :  { %v661_v37 = vpop.f32.mrf.mxu0  ;;  %v789_v38 = vpop.f32.mrf.mxu1 }
 0x160   :  { %v846_v41 = vmax.f32 %v660_v35, 0.0  ;;  %v878_v42 = vmax.f32 %v788_v36, 0.0 }
 0x161   :  { %v664_v43 = vpop.f32.mrf.mxu0  ;;  %v792_v44 = vpop.f32.mrf.mxu1 }
 0x162   :  { %v1478_v45 = vpack.c.bf16 %v846_v41, %v845_v39  ;;  %v1558_v46 = vpack.c.bf16 %v878_v42, %v877_v40  ;;  %v665_v49 = vadd.f32 %v2052_v17, %v664_v43  ;;  %v793_v50 = vadd.f32 %v2052_v17, %v792_v44 }
 0x163   :  { %v666_v47 = vpop.f32.mrf.mxu0  ;;  %v794_v48 = vpop.f32.mrf.mxu1 }
 0x164   :  { %1590 = vst [vmem:[%s2217_s3 + $0x58] sm:$0xff] %v1478_v45   ;;  %1606 = vst [vmem:[%s2217_s3 + $0xd8] sm:$0xff] %v1558_v46   ;;  %v847_v57 = vmax.f32 %v665_v49, 0.0  ;;  %v879_v58 = vmax.f32 %v793_v50, 0.0 }
 0x165   :  { %v667_v51 = vpop.f32.mrf.mxu0  ;;  %v795_v52 = vpop.f32.mrf.mxu1 }
 0x166   :  { %v668_v53 = vadd.f32 %v2052_v17, %v667_v51  ;;  %v796_v54 = vadd.f32 %v2052_v17, %v795_v52 }
 0x167   :  { %v669_v55 = vpop.f32.mrf.mxu0  ;;  %v797_v56 = vpop.f32.mrf.mxu1 }
 0x168   :  { %v848_v59 = vmax.f32 %v668_v53, 0.0  ;;  %v880_v60 = vmax.f32 %v796_v54, 0.0 }
 0x169   :  { %v672_v61 = vpop.f32.mrf.mxu0  ;;  %v800_v62 = vpop.f32.mrf.mxu1 }
 0x16a   :  { %v1483_v63 = vpack.c.bf16 %v848_v59, %v847_v57  ;;  %v1563_v0 = vpack.c.bf16 %v880_v60, %v879_v58  ;;  %v673_v3 = vadd.f32 %v2052_v17, %v672_v61  ;;  %v801_v4 = vadd.f32 %v2052_v17, %v800_v62 }
 0x16b   :  { %v674_v1 = vpop.f32.mrf.mxu0  ;;  %v802_v2 = vpop.f32.mrf.mxu1 }
 0x16c   :  { %1591 = vst [vmem:[%s2217_s3 + $0x60] sm:$0xff] %v1483_v63   ;;  %1607 = vst [vmem:[%s2217_s3 + $0xe0] sm:$0xff] %v1563_v0   ;;  %v849_v11 = vmax.f32 %v673_v3, 0.0  ;;  %v881_v12 = vmax.f32 %v801_v4, 0.0 }
 0x16d   :  { %v675_v5 = vpop.f32.mrf.mxu0  ;;  %v803_v6 = vpop.f32.mrf.mxu1 }
 0x16e   :  { %v676_v7 = vadd.f32 %v2052_v17, %v675_v5  ;;  %v804_v8 = vadd.f32 %v2052_v17, %v803_v6 }
 0x16f   :  { %v677_v9 = vpop.f32.mrf.mxu0  ;;  %v805_v10 = vpop.f32.mrf.mxu1 }
 0x170   :  { %v850_v13 = vmax.f32 %v676_v7, 0.0  ;;  %v882_v14 = vmax.f32 %v804_v8, 0.0 }
 0x171   :  { %v680_v15 = vpop.f32.mrf.mxu0  ;;  %v808_v16 = vpop.f32.mrf.mxu1 }
 0x172   :  { %v1488_v18 = vpack.c.bf16 %v850_v13, %v849_v11  ;;  %v1568_v19 = vpack.c.bf16 %v882_v14, %v881_v12  ;;  %v681_v22 = vadd.f32 %v2052_v17, %v680_v15  ;;  %v809_v23 = vadd.f32 %v2052_v17, %v808_v16 }
 0x173   :  { %v682_v20 = vpop.f32.mrf.mxu0  ;;  %v810_v21 = vpop.f32.mrf.mxu1 }
 0x174   :  { %1592 = vst [vmem:[%s2217_s3 + $0x68] sm:$0xff] %v1488_v18   ;;  %1608 = vst [vmem:[%s2217_s3 + $0xe8] sm:$0xff] %v1568_v19   ;;  %v851_v30 = vmax.f32 %v681_v22, 0.0  ;;  %v883_v31 = vmax.f32 %v809_v23, 0.0 }
 0x175   :  { %v683_v24 = vpop.f32.mrf.mxu0  ;;  %v811_v25 = vpop.f32.mrf.mxu1 }
 0x176   :  { %v684_v26 = vadd.f32 %v2052_v17, %v683_v24  ;;  %v812_v27 = vadd.f32 %v2052_v17, %v811_v25 }
 0x177   :  { %v685_v28 = vpop.f32.mrf.mxu0  ;;  %v813_v29 = vpop.f32.mrf.mxu1 }
 0x178   :  { %v852_v32 = vmax.f32 %v684_v26, 0.0  ;;  %v884_v33 = vmax.f32 %v812_v27, 0.0 }
 0x179   :  { %v688_v34 = vpop.f32.mrf.mxu0  ;;  %v816_v35 = vpop.f32.mrf.mxu1 }
 0x17a   :  { %v1493_v36 = vpack.c.bf16 %v852_v32, %v851_v30  ;;  %v1573_v37 = vpack.c.bf16 %v884_v33, %v883_v31  ;;  %v689_v40 = vadd.f32 %v2052_v17, %v688_v34  ;;  %v817_v41 = vadd.f32 %v2052_v17, %v816_v35 }
 0x17b   :  { %v690_v38 = vpop.f32.mrf.mxu0  ;;  %v818_v39 = vpop.f32.mrf.mxu1 }
 0x17c   :  { %1593 = vst [vmem:[%s2217_s3 + $0x70] sm:$0xff] %v1493_v36   ;;  %1609 = vst [vmem:[%s2217_s3 + $0xf0] sm:$0xff] %v1573_v37   ;;  %v853_v48 = vmax.f32 %v689_v40, 0.0  ;;  %v885_v49 = vmax.f32 %v817_v41, 0.0 }
 0x17d   :  { %v691_v42 = vpop.f32.mrf.mxu0  ;;  %v819_v43 = vpop.f32.mrf.mxu1 }
 0x17e   :  { %v692_v44 = vadd.f32 %v2052_v17, %v691_v42  ;;  %v820_v45 = vadd.f32 %v2052_v17, %v819_v43 }
 0x17f   :  { %v693_v46 = vpop.f32.mrf.mxu0  ;;  %v821_v47 = vpop.f32.mrf.mxu1 }
 0x180   :  { %v854_v50 = vmax.f32 %v692_v44, 0.0  ;;  %v886_v51 = vmax.f32 %v820_v45, 0.0 }
 0x182   :  { %v1498_v52 = vpack.c.bf16 %v854_v50, %v853_v48  ;;  %v1578_v53 = vpack.c.bf16 %v886_v51, %v885_v49 }
 0x184   :  { %1594 = vst [vmem:[%s2217_s3 + $0x78] sm:$0xff] %v1498_v52   ;;  %1610 = vst [vmem:[%s2217_s3 + $0xf8] sm:$0xff] %v1578_v53  }

// kernel: resnet_feature_extractor_forward.24
= control target key start
LH: loop header
LB: loop body
LE: loop exit
PB: predicated region body
PF: predicated region fallthrough
CT: control target
= control target key end

     0   :  { %vm153_vm0 = vcmask 1043456   ;;  %s1400_s0 = inlined_call_operand.vmem [shape: bf16[9,128,128], index: 0, kind: input, shape index: {}]   ;;  %s1401_s1 = inlined_call_operand.vmem [shape: bf16[128,128], index: 1, kind: output, shape index: {}]  }
   0x1   :  { %v9_v0 = vld [vmem:[%s1400_s0] sm:$0xf]  ;;  %v10_v3 = vld [vmem:[%s1400_s0 + $0x4] sm:$0xf]  ;;  %v11_v39 = vld [vmem:[%s1400_s0 + $0x8] sm:$0xf] }
   0x2   :  { %v25_v1 = vld [vmem:[%s1400_s0 + $0x40] sm:$0xf]  ;;  %v26_v4 = vld [vmem:[%s1400_s0 + $0x44] sm:$0xf]  ;;  %v156_v7 = vsel %vm153_vm0, %v9_v0, 4286644096 }
   0x3   :  { %v41_v2 = vld [vmem:[%s1400_s0 + $0x80] sm:$0xf]  ;;  %v42_v5 = vld [vmem:[%s1400_s0 + $0x84] sm:$0xf]  ;;  %v159_v8 = vsel %vm153_vm0, %v25_v1, 4286644096 }
   0x4   :  { %v57_v6 = vld [vmem:[%s1400_s0 + $0xc0] sm:$0xf]  ;;  %v163_v9 = vsel %vm153_vm0, %v41_v2, 4286644096  ;;  %v161_v11 = vmax.bf16 %v159_v8, %v156_v7  ;;  %v58_v12 = vld [vmem:[%s1400_s0 + $0xc4] sm:$0xf] }
   0x5   :  { %v73_v10 = vld [vmem:[%s1400_s0 + $0x100] sm:$0xf]  ;;  %v167_v14 = vsel %vm153_vm0, %v57_v6, 4286644096  ;;  %v191_v16 = vsel %vm153_vm0, %v10_v3, 4286644096 }
   0x6   :  { %v89_v13 = vld [vmem:[%s1400_s0 + $0x140] sm:$0xf]  ;;  %v165_v15 = vmax.bf16 %v163_v9, %v161_v11  ;;  %v194_v17 = vsel %vm153_vm0, %v26_v4, 4286644096  ;;  %v198_v18 = vsel %vm153_vm0, %v42_v5, 4286644096 }
   0x7   :  { %v74_v19 = vld [vmem:[%s1400_s0 + $0x104] sm:$0xf]  ;;  %v171_v20 = vsel %vm153_vm0, %v73_v10, 4286644096  ;;  %v196_v21 = vmax.bf16 %v194_v17, %v191_v16  ;;  %v105_v23 = vld [vmem:[%s1400_s0 + $0x180] sm:$0xf] }
   0x8   :  { %v90_v22 = vld [vmem:[%s1400_s0 + $0x144] sm:$0xf]  ;;  %v169_v24 = vmax.bf16 %v167_v14, %v165_v15  ;;  %v202_v25 = vsel %vm153_vm0, %v58_v12, 4286644096  ;;  %v175_v27 = vsel %vm153_vm0, %v89_v13, 4286644096 }
   0x9   :  { %v106_v26 = vld [vmem:[%s1400_s0 + $0x184] sm:$0xf]  ;;  %v200_v28 = vmax.bf16 %v198_v18, %v196_v21  ;;  %v121_v29 = vld [vmem:[%s1400_s0 + $0x1c0] sm:$0xf]  ;;  %v206_v32 = vsel %vm153_vm0, %v74_v19, 4286644096 }
   0xa   :  { %v137_v30 = vld [vmem:[%s1400_s0 + $0x200] sm:$0xf]  ;;  %v173_v31 = vmax.bf16 %v171_v20, %v169_v24  ;;  %v122_v33 = vld [vmem:[%s1400_s0 + $0x1c4] sm:$0xf]  ;;  %v179_v34 = vsel %vm153_vm0, %v105_v23, 4286644096 }
   0xb   :  { %v204_v35 = vmax.bf16 %v202_v25, %v200_v28  ;;  %v210_v36 = vsel %vm153_vm0, %v90_v22, 4286644096  ;;  %v138_v37 = vld [vmem:[%s1400_s0 + $0x204] sm:$0xf]  ;;  %v27_v40 = vld [vmem:[%s1400_s0 + $0x48] sm:$0xf] }
   0xc   :  { %v177_v38 = vmax.bf16 %v175_v27, %v173_v31  ;;  %v43_v41 = vld [vmem:[%s1400_s0 + $0x88] sm:$0xf]  ;;  %v183_v42 = vsel %vm153_vm0, %v121_v29, 4286644096  ;;  %v187_v43 = vsel %vm153_vm0, %v137_v30, 4286644096 }
   0xd   :  { %v208_v44 = vmax.bf16 %v206_v32, %v204_v35  ;;  %v214_v45 = vsel %vm153_vm0, %v106_v26, 4286644096  ;;  %v12_v47 = vld [vmem:[%s1400_s0 + $0xc] sm:$0xf]  ;;  %v59_v48 = vld [vmem:[%s1400_s0 + $0xc8] sm:$0xf] }
   0xe   :  { %v181_v46 = vmax.bf16 %v179_v34, %v177_v38  ;;  %v75_v49 = vld [vmem:[%s1400_s0 + $0x108] sm:$0xf]  ;;  %v226_v51 = vsel %vm153_vm0, %v11_v39, 4286644096  ;;  %v229_v52 = vsel %vm153_vm0, %v27_v40, 4286644096 }
   0xf   :  { %v212_v50 = vmax.bf16 %v210_v36, %v208_v44  ;;  %v233_v53 = vsel %vm153_vm0, %v43_v41, 4286644096  ;;  %v218_v55 = vsel %vm153_vm0, %v122_v33, 4286644096  ;;  %v28_v56 = vld [vmem:[%s1400_s0 + $0x4c] sm:$0xf]  ;;  %v231_v58 = vmax.bf16 %v229_v52, %v226_v51 }
  0x10   :  { %v185_v54 = vmax.bf16 %v183_v42, %v181_v46  ;;  %v44_v57 = vld [vmem:[%s1400_s0 + $0x8c] sm:$0xf]  ;;  %v222_v60 = vsel %vm153_vm0, %v138_v37, 4286644096  ;;  %v237_v62 = vsel %vm153_vm0, %v59_v48, 4286644096 }
  0x11   :  { %v216_v59 = vmax.bf16 %v214_v45, %v212_v50  ;;  %v60_v61 = vld [vmem:[%s1400_s0 + $0xcc] sm:$0xf]  ;;  %v91_v63 = vld [vmem:[%s1400_s0 + $0x148] sm:$0xf]  ;;  %v235_v0 = vmax.bf16 %v233_v53, %v231_v58  ;;  %v241_v1 = vsel %vm153_vm0, %v75_v49, 4286644096 }
  0x12   :  { %v261_v2 = vsel %vm153_vm0, %v12_v47, 4286644096  ;;  %v189_v3 = vmax.bf16 %v187_v43, %v185_v54  ;;  %v264_v5 = vsel %vm153_vm0, %v28_v56, 4286644096  ;;  %v268_v6 = vsel %vm153_vm0, %v44_v57, 4286644096 }
  0x13   :  { %v220_v4 = vmax.bf16 %v218_v55, %v216_v59  ;;  %v76_v7 = vld [vmem:[%s1400_s0 + $0x10c] sm:$0xf]  ;;  %v107_v8 = vld [vmem:[%s1400_s0 + $0x188] sm:$0xf]  ;;  %v239_v9 = vmax.bf16 %v237_v62, %v235_v0  ;;  %v266_v10 = vmax.bf16 %v264_v5, %v261_v2  ;;  %v245_v12 = vsel %vm153_vm0, %v91_v63, 4286644096 }
  0x14   :  { %v272_v13 = vsel %vm153_vm0, %v60_v61, 4286644096  ;;  %v92_v14 = vld [vmem:[%s1400_s0 + $0x14c] sm:$0xf]  ;;  %v123_v16 = vld [vmem:[%s1400_s0 + $0x1c8] sm:$0xf] }
  0x15   :  { %v224_v11 = vmax.bf16 %v222_v60, %v220_v4  ;;  %v108_v15 = vld [vmem:[%s1400_s0 + $0x18c] sm:$0xf]  ;;  %v243_v17 = vmax.bf16 %v241_v1, %v239_v9  ;;  %v270_v18 = vmax.bf16 %v268_v6, %v266_v10  ;;  %v139_v20 = vld [vmem:[%s1400_s0 + $0x208] sm:$0xf]  ;;  %v249_v21 = vsel %vm153_vm0, %v107_v8, 4286644096 }
  0x16   :  { %v276_v22 = vsel %vm153_vm0, %v76_v7, 4286644096  ;;  %v124_v23 = vld [vmem:[%s1400_s0 + $0x1cc] sm:$0xf]  ;;  %v13_v26 = vld [vmem:[%s1400_s0 + $0x10] sm:$0xf] }
  0x17   :  { %v775_v19 = vcombine.low %v189_v3, %v224_v11  ;;  %v247_v24 = vmax.bf16 %v245_v12, %v243_v17  ;;  %v274_v25 = vmax.bf16 %v272_v13, %v270_v18  ;;  %v29_v27 = vld [vmem:[%s1400_s0 + $0x50] sm:$0xf]  ;;  %v140_v29 = vld [vmem:[%s1400_s0 + $0x20c] sm:$0xf]  ;;  %v253_v30 = vsel %vm153_vm0, %v123_v16, 4286644096 }
  0x18   :  { %v45_v28 = vld [vmem:[%s1400_s0 + $0x90] sm:$0xf]  ;;  %v280_v31 = vsel %vm153_vm0, %v92_v14, 4286644096  ;;  %v257_v33 = vsel %vm153_vm0, %v139_v20, 4286644096 }
  0x19   :  { %739 = vst [vmem:[%s1401_s1] sm:$0xff] %v775_v19   ;;  %v251_v32 = vmax.bf16 %v249_v21, %v247_v24  ;;  %v278_v34 = vmax.bf16 %v276_v22, %v274_v25  ;;  %v284_v35 = vsel %vm153_vm0, %v108_v15, 4286644096  ;;  %v61_v36 = vld [vmem:[%s1400_s0 + $0xd0] sm:$0xf]  ;;  %v296_v37 = vsel %vm153_vm0, %v13_v26, 4286644096 }
  0x1a   :  { %v299_v38 = vsel %vm153_vm0, %v29_v27, 4286644096  ;;  %v303_v39 = vsel %vm153_vm0, %v45_v28, 4286644096  ;;  %v14_v42 = vld [vmem:[%s1400_s0 + $0x14] sm:$0xf] }
  0x1b   :  { %v255_v40 = vmax.bf16 %v253_v30, %v251_v32  ;;  %v282_v41 = vmax.bf16 %v280_v31, %v278_v34  ;;  %v30_v43 = vld [vmem:[%s1400_s0 + $0x54] sm:$0xf]  ;;  %v77_v44 = vld [vmem:[%s1400_s0 + $0x110] sm:$0xf]  ;;  %v301_v45 = vmax.bf16 %v299_v38, %v296_v37  ;;  %v288_v46 = vsel %vm153_vm0, %v124_v23, 4286644096 }
  0x1c   :  { %v46_v47 = vld [vmem:[%s1400_s0 + $0x94] sm:$0xf]  ;;  %v307_v48 = vsel %vm153_vm0, %v61_v36, 4286644096  ;;  %v292_v50 = vsel %vm153_vm0, %v140_v29, 4286644096 }
  0x1d   :  { %v286_v49 = vmax.bf16 %v284_v35, %v282_v41  ;;  %v62_v51 = vld [vmem:[%s1400_s0 + $0xd4] sm:$0xf]  ;;  %v93_v52 = vld [vmem:[%s1400_s0 + $0x150] sm:$0xf]  ;;  %v305_v53 = vmax.bf16 %v303_v39, %v301_v45  ;;  %v259_v54 = vmax.bf16 %v257_v33, %v255_v40  ;;  %v311_v55 = vsel %vm153_vm0, %v77_v44, 4286644096 }
  0x1e   :  { %v331_v56 = vsel %vm153_vm0, %v14_v42, 4286644096  ;;  %v334_v57 = vsel %vm153_vm0, %v30_v43, 4286644096  ;;  %v78_v59 = vld [vmem:[%s1400_s0 + $0x114] sm:$0xf] }
  0x1f   :  { %v290_v58 = vmax.bf16 %v288_v46, %v286_v49  ;;  %v109_v60 = vld [vmem:[%s1400_s0 + $0x190] sm:$0xf]  ;;  %v309_v61 = vmax.bf16 %v307_v48, %v305_v53  ;;  %v336_v62 = vmax.bf16 %v334_v57, %v331_v56  ;;  %v338_v63 = vsel %vm153_vm0, %v46_v47, 4286644096  ;;  %v94_v3 = vld [vmem:[%s1400_s0 + $0x154] sm:$0xf] }
  0x20   :  { %v315_v0 = vsel %vm153_vm0, %v93_v52, 4286644096  ;;  %v342_v1 = vsel %vm153_vm0, %v62_v51, 4286644096  ;;  %v110_v4 = vld [vmem:[%s1400_s0 + $0x194] sm:$0xf] }
  0x21   :  { %v294_v2 = vmax.bf16 %v292_v50, %v290_v58  ;;  %v125_v5 = vld [vmem:[%s1400_s0 + $0x1d0] sm:$0xf]  ;;  %v313_v6 = vmax.bf16 %v311_v55, %v309_v61  ;;  %v340_v7 = vmax.bf16 %v338_v63, %v336_v62  ;;  %v319_v9 = vsel %vm153_vm0, %v109_v60, 4286644096  ;;  %v126_v12 = vld [vmem:[%s1400_s0 + $0x1d4] sm:$0xf] }
  0x22   :  { %v141_v8 = vld [vmem:[%s1400_s0 + $0x210] sm:$0xf]  ;;  %v346_v10 = vsel %vm153_vm0, %v78_v59, 4286644096  ;;  %v15_v15 = vld [vmem:[%s1400_s0 + $0x18] sm:$0xf] }
  0x23   :  { %v776_v11 = vcombine.low %v259_v54, %v294_v2  ;;  %v317_v13 = vmax.bf16 %v315_v0, %v313_v6  ;;  %v344_v14 = vmax.bf16 %v342_v1, %v340_v7  ;;  %v31_v16 = vld [vmem:[%s1400_s0 + $0x58] sm:$0xf]  ;;  %v142_v18 = vld [vmem:[%s1400_s0 + $0x214] sm:$0xf]  ;;  %v323_v19 = vsel %vm153_vm0, %v125_v5, 4286644096 }
  0x24   :  { %v47_v17 = vld [vmem:[%s1400_s0 + $0x98] sm:$0xf]  ;;  %v350_v20 = vsel %vm153_vm0, %v94_v3, 4286644096  ;;  %v354_v23 = vsel %vm153_vm0, %v110_v4, 4286644096 }
  0x25   :  { %777 = vst [vmem:[%s1401_s1 + $0x8] sm:$0xff] %v776_v11   ;;  %v321_v21 = vmax.bf16 %v319_v9, %v317_v13  ;;  %v348_v22 = vmax.bf16 %v346_v10, %v344_v14  ;;  %v16_v24 = vld [vmem:[%s1400_s0 + $0x1c] sm:$0xf]  ;;  %v63_v25 = vld [vmem:[%s1400_s0 + $0xd8] sm:$0xf] }
  0x26   :  { %v366_v26 = vsel %vm153_vm0, %v15_v15, 4286644096  ;;  %v369_v27 = vsel %vm153_vm0, %v31_v16, 4286644096  ;;  %v373_v28 = vsel %vm153_vm0, %v47_v17, 4286644096 }
  0x27   :  { %v325_v29 = vmax.bf16 %v323_v19, %v321_v21  ;;  %v327_v30 = vsel %vm153_vm0, %v141_v8, 4286644096  ;;  %v352_v31 = vmax.bf16 %v350_v20, %v348_v22  ;;  %v32_v32 = vld [vmem:[%s1400_s0 + $0x5c] sm:$0xf]  ;;  %v79_v33 = vld [vmem:[%s1400_s0 + $0x118] sm:$0xf]  ;;  %v371_v34 = vmax.bf16 %v369_v27, %v366_v26 }
  0x28   :  { %v358_v35 = vsel %vm153_vm0, %v126_v12, 4286644096  ;;  %v48_v36 = vld [vmem:[%s1400_s0 + $0x9c] sm:$0xf]  ;;  %v377_v37 = vsel %vm153_vm0, %v63_v25, 4286644096 }
  0x29   :  { %v356_v38 = vmax.bf16 %v354_v23, %v352_v31  ;;  %v362_v39 = vsel %vm153_vm0, %v142_v18, 4286644096  ;;  %v64_v40 = vld [vmem:[%s1400_s0 + $0xdc] sm:$0xf]  ;;  %v95_v41 = vld [vmem:[%s1400_s0 + $0x158] sm:$0xf]  ;;  %v375_v42 = vmax.bf16 %v373_v28, %v371_v34  ;;  %v329_v43 = vmax.bf16 %v327_v30, %v325_v29 }
  0x2a   :  { %v381_v44 = vsel %vm153_vm0, %v79_v33, 4286644096  ;;  %v401_v45 = vsel %vm153_vm0, %v16_v24, 4286644096  ;;  %v404_v46 = vsel %vm153_vm0, %v32_v32, 4286644096 }
  0x2b   :  { %v360_v47 = vmax.bf16 %v358_v35, %v356_v38  ;;  %v80_v48 = vld [vmem:[%s1400_s0 + $0x11c] sm:$0xf]  ;;  %v111_v49 = vld [vmem:[%s1400_s0 + $0x198] sm:$0xf]  ;;  %v379_v50 = vmax.bf16 %v377_v37, %v375_v42  ;;  %v406_v51 = vmax.bf16 %v404_v46, %v401_v45  ;;  %v408_v52 = vsel %vm153_vm0, %v48_v36, 4286644096 }
  0x2c   :  { %v385_v53 = vsel %vm153_vm0, %v95_v41, 4286644096  ;;  %v412_v54 = vsel %vm153_vm0, %v64_v40, 4286644096  ;;  %v96_v56 = vld [vmem:[%s1400_s0 + $0x15c] sm:$0xf] }
  0x2d   :  { %v364_v55 = vmax.bf16 %v362_v39, %v360_v47  ;;  %v112_v57 = vld [vmem:[%s1400_s0 + $0x19c] sm:$0xf]  ;;  %v127_v58 = vld [vmem:[%s1400_s0 + $0x1d8] sm:$0xf]  ;;  %v383_v59 = vmax.bf16 %v381_v44, %v379_v50  ;;  %v410_v60 = vmax.bf16 %v408_v52, %v406_v51  ;;  %v389_v62 = vsel %vm153_vm0, %v111_v49, 4286644096 }
  0x2e   :  { %v143_v61 = vld [vmem:[%s1400_s0 + $0x218] sm:$0xf]  ;;  %v416_v63 = vsel %vm153_vm0, %v80_v48, 4286644096  ;;  %v128_v1 = vld [vmem:[%s1400_s0 + $0x1dc] sm:$0xf] }
  0x2f   :  { %v778_v0 = vcombine.low %v329_v43, %v364_v55  ;;  %v387_v2 = vmax.bf16 %v385_v53, %v383_v59  ;;  %v414_v3 = vmax.bf16 %v412_v54, %v410_v60  ;;  %v17_v4 = vld [vmem:[%s1400_s0 + $0x20] sm:$0xf]  ;;  %v144_v7 = vld [vmem:[%s1400_s0 + $0x21c] sm:$0xf]  ;;  %v393_v8 = vsel %vm153_vm0, %v127_v58, 4286644096 }
  0x30   :  { %v33_v5 = vld [vmem:[%s1400_s0 + $0x60] sm:$0xf]  ;;  %v420_v9 = vsel %vm153_vm0, %v96_v56, 4286644096  ;;  %v424_v12 = vsel %vm153_vm0, %v112_v57, 4286644096 }
  0x31   :  { %v49_v6 = vld [vmem:[%s1400_s0 + $0xa0] sm:$0xf]  ;;  %779 = vst [vmem:[%s1401_s1 + $0x10] sm:$0xff] %v778_v0   ;;  %v391_v10 = vmax.bf16 %v389_v62, %v387_v2  ;;  %v418_v11 = vmax.bf16 %v416_v63, %v414_v3  ;;  %v18_v13 = vld [vmem:[%s1400_s0 + $0x24] sm:$0xf] }
  0x32   :  { %v65_v14 = vld [vmem:[%s1400_s0 + $0xe0] sm:$0xf]  ;;  %v436_v15 = vsel %vm153_vm0, %v17_v4, 4286644096  ;;  %v439_v16 = vsel %vm153_vm0, %v33_v5, 4286644096 }
  0x33   :  { %v443_v17 = vsel %vm153_vm0, %v49_v6, 4286644096  ;;  %v395_v18 = vmax.bf16 %v393_v8, %v391_v10  ;;  %v397_v19 = vsel %vm153_vm0, %v143_v61, 4286644096  ;;  %v422_v20 = vmax.bf16 %v420_v9, %v418_v11  ;;  %v34_v21 = vld [vmem:[%s1400_s0 + $0x64] sm:$0xf] }
  0x34   :  { %v81_v22 = vld [vmem:[%s1400_s0 + $0x120] sm:$0xf]  ;;  %v441_v23 = vmax.bf16 %v439_v16, %v436_v15  ;;  %v428_v24 = vsel %vm153_vm0, %v128_v1, 4286644096  ;;  %v50_v25 = vld [vmem:[%s1400_s0 + $0xa4] sm:$0xf] }
  0x35   :  { %v447_v26 = vsel %vm153_vm0, %v65_v14, 4286644096  ;;  %v426_v27 = vmax.bf16 %v424_v12, %v422_v20  ;;  %v432_v28 = vsel %vm153_vm0, %v144_v7, 4286644096  ;;  %v66_v29 = vld [vmem:[%s1400_s0 + $0xe4] sm:$0xf]  ;;  %v399_v32 = vmax.bf16 %v397_v19, %v395_v18 }
  0x36   :  { %v97_v30 = vld [vmem:[%s1400_s0 + $0x160] sm:$0xf]  ;;  %v445_v31 = vmax.bf16 %v443_v17, %v441_v23  ;;  %v451_v33 = vsel %vm153_vm0, %v81_v22, 4286644096  ;;  %v471_v34 = vsel %vm153_vm0, %v18_v13, 4286644096 }
  0x37   :  { %v474_v35 = vsel %vm153_vm0, %v34_v21, 4286644096  ;;  %v430_v36 = vmax.bf16 %v428_v24, %v426_v27  ;;  %v82_v37 = vld [vmem:[%s1400_s0 + $0x124] sm:$0xf]  ;;  %v113_v38 = vld [vmem:[%s1400_s0 + $0x1a0] sm:$0xf] }
  0x38   :  { %v449_v39 = vmax.bf16 %v447_v26, %v445_v31  ;;  %v476_v40 = vmax.bf16 %v474_v35, %v471_v34  ;;  %v478_v41 = vsel %vm153_vm0, %v50_v25, 4286644096  ;;  %v455_v42 = vsel %vm153_vm0, %v97_v30, 4286644096  ;;  %v98_v45 = vld [vmem:[%s1400_s0 + $0x164] sm:$0xf] }
  0x39   :  { %v482_v43 = vsel %vm153_vm0, %v66_v29, 4286644096  ;;  %v434_v44 = vmax.bf16 %v432_v28, %v430_v36  ;;  %v114_v46 = vld [vmem:[%s1400_s0 + $0x1a4] sm:$0xf]  ;;  %v129_v47 = vld [vmem:[%s1400_s0 + $0x1e0] sm:$0xf] }
  0x3a   :  { %v453_v48 = vmax.bf16 %v451_v33, %v449_v39  ;;  %v480_v49 = vmax.bf16 %v478_v41, %v476_v40  ;;  %v145_v50 = vld [vmem:[%s1400_s0 + $0x220] sm:$0xf]  ;;  %v459_v51 = vsel %vm153_vm0, %v113_v38, 4286644096  ;;  %v486_v52 = vsel %vm153_vm0, %v82_v37, 4286644096 }
  0x3b   :  { %v780_v53 = vcombine.low %v399_v32, %v434_v44  ;;  %v130_v54 = vld [vmem:[%s1400_s0 + $0x1e4] sm:$0xf]  ;;  %v19_v57 = vld [vmem:[%s1400_s0 + $0x28] sm:$0xf]  ;;  %v463_v61 = vsel %vm153_vm0, %v129_v47, 4286644096 }
  0x3c   :  { %v457_v55 = vmax.bf16 %v455_v42, %v453_v48  ;;  %v484_v56 = vmax.bf16 %v482_v43, %v480_v49  ;;  %v35_v58 = vld [vmem:[%s1400_s0 + $0x68] sm:$0xf]  ;;  %v146_v60 = vld [vmem:[%s1400_s0 + $0x224] sm:$0xf]  ;;  %v490_v62 = vsel %vm153_vm0, %v98_v45, 4286644096 }
  0x3d   :  { %v51_v59 = vld [vmem:[%s1400_s0 + $0xa8] sm:$0xf]  ;;  %781 = vst [vmem:[%s1401_s1 + $0x18] sm:$0xff] %v780_v53   ;;  %v494_v1 = vsel %vm153_vm0, %v114_v46, 4286644096 }
  0x3e   :  { %v461_v63 = vmax.bf16 %v459_v51, %v457_v55  ;;  %v488_v0 = vmax.bf16 %v486_v52, %v484_v56  ;;  %v20_v2 = vld [vmem:[%s1400_s0 + $0x2c] sm:$0xf]  ;;  %v67_v3 = vld [vmem:[%s1400_s0 + $0xe8] sm:$0xf]  ;;  %v506_v4 = vsel %vm153_vm0, %v19_v57, 4286644096 }
  0x3f   :  { %v509_v5 = vsel %vm153_vm0, %v35_v58, 4286644096  ;;  %v513_v6 = vsel %vm153_vm0, %v51_v59, 4286644096  ;;  %v467_v8 = vsel %vm153_vm0, %v145_v50, 4286644096 }
  0x40   :  { %v465_v7 = vmax.bf16 %v463_v61, %v461_v63  ;;  %v492_v9 = vmax.bf16 %v490_v62, %v488_v0  ;;  %v36_v10 = vld [vmem:[%s1400_s0 + $0x6c] sm:$0xf]  ;;  %v83_v11 = vld [vmem:[%s1400_s0 + $0x128] sm:$0xf]  ;;  %v511_v12 = vmax.bf16 %v509_v5, %v506_v4  ;;  %v498_v13 = vsel %vm153_vm0, %v130_v54, 4286644096 }
  0x41   :  { %v52_v14 = vld [vmem:[%s1400_s0 + $0xac] sm:$0xf]  ;;  %v517_v15 = vsel %vm153_vm0, %v67_v3, 4286644096  ;;  %v502_v17 = vsel %vm153_vm0, %v146_v60, 4286644096 }
  0x42   :  { %v496_v16 = vmax.bf16 %v494_v1, %v492_v9  ;;  %v68_v18 = vld [vmem:[%s1400_s0 + $0xec] sm:$0xf]  ;;  %v99_v19 = vld [vmem:[%s1400_s0 + $0x168] sm:$0xf]  ;;  %v515_v20 = vmax.bf16 %v513_v6, %v511_v12  ;;  %v469_v21 = vmax.bf16 %v467_v8, %v465_v7  ;;  %v521_v22 = vsel %vm153_vm0, %v83_v11, 4286644096 }
  0x43   :  { %v541_v23 = vsel %vm153_vm0, %v20_v2, 4286644096  ;;  %v544_v24 = vsel %vm153_vm0, %v36_v10, 4286644096  ;;  %v84_v26 = vld [vmem:[%s1400_s0 + $0x12c] sm:$0xf] }
  0x44   :  { %v500_v25 = vmax.bf16 %v498_v13, %v496_v16  ;;  %v115_v27 = vld [vmem:[%s1400_s0 + $0x1a8] sm:$0xf]  ;;  %v519_v28 = vmax.bf16 %v517_v15, %v515_v20  ;;  %v546_v29 = vmax.bf16 %v544_v24, %v541_v23  ;;  %v548_v30 = vsel %vm153_vm0, %v52_v14, 4286644096  ;;  %v100_v34 = vld [vmem:[%s1400_s0 + $0x16c] sm:$0xf] }
  0x45   :  { %v525_v31 = vsel %vm153_vm0, %v99_v19, 4286644096  ;;  %v552_v32 = vsel %vm153_vm0, %v68_v18, 4286644096  ;;  %v116_v35 = vld [vmem:[%s1400_s0 + $0x1ac] sm:$0xf] }
  0x46   :  { %v504_v33 = vmax.bf16 %v502_v17, %v500_v25  ;;  %v131_v36 = vld [vmem:[%s1400_s0 + $0x1e8] sm:$0xf]  ;;  %v523_v37 = vmax.bf16 %v521_v22, %v519_v28  ;;  %v550_v38 = vmax.bf16 %v548_v30, %v546_v29  ;;  %v529_v40 = vsel %vm153_vm0, %v115_v27, 4286644096  ;;  %v132_v43 = vld [vmem:[%s1400_s0 + $0x1ec] sm:$0xf] }
  0x47   :  { %v147_v39 = vld [vmem:[%s1400_s0 + $0x228] sm:$0xf]  ;;  %v556_v41 = vsel %vm153_vm0, %v84_v26, 4286644096  ;;  %v21_v46 = vld [vmem:[%s1400_s0 + $0x30] sm:$0xf] }
  0x48   :  { %v782_v42 = vcombine.low %v469_v21, %v504_v33  ;;  %v527_v44 = vmax.bf16 %v525_v31, %v523_v37  ;;  %v554_v45 = vmax.bf16 %v552_v32, %v550_v38  ;;  %v37_v47 = vld [vmem:[%s1400_s0 + $0x70] sm:$0xf]  ;;  %v148_v49 = vld [vmem:[%s1400_s0 + $0x22c] sm:$0xf]  ;;  %v533_v50 = vsel %vm153_vm0, %v131_v36, 4286644096 }
  0x49   :  { %v53_v48 = vld [vmem:[%s1400_s0 + $0xb0] sm:$0xf]  ;;  %v560_v51 = vsel %vm153_vm0, %v100_v34, 4286644096  ;;  %v564_v54 = vsel %vm153_vm0, %v116_v35, 4286644096 }
  0x4a   :  { %783 = vst [vmem:[%s1401_s1 + $0x20] sm:$0xff] %v782_v42   ;;  %v531_v52 = vmax.bf16 %v529_v40, %v527_v44  ;;  %v558_v53 = vmax.bf16 %v556_v41, %v554_v45  ;;  %v22_v55 = vld [vmem:[%s1400_s0 + $0x34] sm:$0xf]  ;;  %v69_v56 = vld [vmem:[%s1400_s0 + $0xf0] sm:$0xf] }
  0x4b   :  { %v576_v57 = vsel %vm153_vm0, %v21_v46, 4286644096  ;;  %v579_v58 = vsel %vm153_vm0, %v37_v47, 4286644096  ;;  %v583_v59 = vsel %vm153_vm0, %v53_v48, 4286644096 }
  0x4c   :  { %v535_v60 = vmax.bf16 %v533_v50, %v531_v52  ;;  %v537_v61 = vsel %vm153_vm0, %v147_v39, 4286644096  ;;  %v562_v62 = vmax.bf16 %v560_v51, %v558_v53  ;;  %v38_v63 = vld [vmem:[%s1400_s0 + $0x74] sm:$0xf]  ;;  %v85_v0 = vld [vmem:[%s1400_s0 + $0x130] sm:$0xf]  ;;  %v581_v1 = vmax.bf16 %v579_v58, %v576_v57 }
  0x4d   :  { %v568_v2 = vsel %vm153_vm0, %v132_v43, 4286644096  ;;  %v54_v3 = vld [vmem:[%s1400_s0 + $0xb4] sm:$0xf]  ;;  %v587_v4 = vsel %vm153_vm0, %v69_v56, 4286644096 }
  0x4e   :  { %v566_v5 = vmax.bf16 %v564_v54, %v562_v62  ;;  %v572_v6 = vsel %vm153_vm0, %v148_v49, 4286644096  ;;  %v70_v7 = vld [vmem:[%s1400_s0 + $0xf4] sm:$0xf]  ;;  %v101_v8 = vld [vmem:[%s1400_s0 + $0x170] sm:$0xf]  ;;  %v585_v9 = vmax.bf16 %v583_v59, %v581_v1  ;;  %v539_v10 = vmax.bf16 %v537_v61, %v535_v60 }
  0x4f   :  { %v591_v11 = vsel %vm153_vm0, %v85_v0, 4286644096  ;;  %v611_v12 = vsel %vm153_vm0, %v22_v55, 4286644096  ;;  %v614_v13 = vsel %vm153_vm0, %v38_v63, 4286644096 }
  0x50   :  { %v570_v14 = vmax.bf16 %v568_v2, %v566_v5  ;;  %v86_v15 = vld [vmem:[%s1400_s0 + $0x134] sm:$0xf]  ;;  %v117_v16 = vld [vmem:[%s1400_s0 + $0x1b0] sm:$0xf]  ;;  %v589_v17 = vmax.bf16 %v587_v4, %v585_v9  ;;  %v616_v18 = vmax.bf16 %v614_v13, %v611_v12  ;;  %v618_v19 = vsel %vm153_vm0, %v54_v3, 4286644096 }
  0x51   :  { %v595_v20 = vsel %vm153_vm0, %v101_v8, 4286644096  ;;  %v622_v21 = vsel %vm153_vm0, %v70_v7, 4286644096  ;;  %v102_v23 = vld [vmem:[%s1400_s0 + $0x174] sm:$0xf] }
  0x52   :  { %v574_v22 = vmax.bf16 %v572_v6, %v570_v14  ;;  %v118_v24 = vld [vmem:[%s1400_s0 + $0x1b4] sm:$0xf]  ;;  %v133_v25 = vld [vmem:[%s1400_s0 + $0x1f0] sm:$0xf]  ;;  %v593_v26 = vmax.bf16 %v591_v11, %v589_v17  ;;  %v620_v27 = vmax.bf16 %v618_v19, %v616_v18  ;;  %v599_v29 = vsel %vm153_vm0, %v117_v16, 4286644096 }
  0x53   :  { %v149_v28 = vld [vmem:[%s1400_s0 + $0x230] sm:$0xf]  ;;  %v626_v30 = vsel %vm153_vm0, %v86_v15, 4286644096  ;;  %v134_v32 = vld [vmem:[%s1400_s0 + $0x1f4] sm:$0xf] }
  0x54   :  { %v784_v31 = vcombine.low %v539_v10, %v574_v22  ;;  %v597_v33 = vmax.bf16 %v595_v20, %v593_v26  ;;  %v624_v34 = vmax.bf16 %v622_v21, %v620_v27  ;;  %v23_v35 = vld [vmem:[%s1400_s0 + $0x38] sm:$0xf]  ;;  %v150_v38 = vld [vmem:[%s1400_s0 + $0x234] sm:$0xf]  ;;  %v603_v39 = vsel %vm153_vm0, %v133_v25, 4286644096 }
  0x55   :  { %v39_v36 = vld [vmem:[%s1400_s0 + $0x78] sm:$0xf]  ;;  %v630_v40 = vsel %vm153_vm0, %v102_v23, 4286644096  ;;  %v634_v43 = vsel %vm153_vm0, %v118_v24, 4286644096 }
  0x56   :  { %v55_v37 = vld [vmem:[%s1400_s0 + $0xb8] sm:$0xf]  ;;  %785 = vst [vmem:[%s1401_s1 + $0x28] sm:$0xff] %v784_v31   ;;  %v601_v41 = vmax.bf16 %v599_v29, %v597_v33  ;;  %v628_v42 = vmax.bf16 %v626_v30, %v624_v34  ;;  %v24_v44 = vld [vmem:[%s1400_s0 + $0x3c] sm:$0xf] }
  0x57   :  { %v71_v45 = vld [vmem:[%s1400_s0 + $0xf8] sm:$0xf]  ;;  %v646_v46 = vsel %vm153_vm0, %v23_v35, 4286644096  ;;  %v649_v47 = vsel %vm153_vm0, %v39_v36, 4286644096 }
  0x58   :  { %v653_v48 = vsel %vm153_vm0, %v55_v37, 4286644096  ;;  %v605_v49 = vmax.bf16 %v603_v39, %v601_v41  ;;  %v607_v50 = vsel %vm153_vm0, %v149_v28, 4286644096  ;;  %v632_v51 = vmax.bf16 %v630_v40, %v628_v42  ;;  %v40_v52 = vld [vmem:[%s1400_s0 + $0x7c] sm:$0xf] }
  0x59   :  { %v87_v53 = vld [vmem:[%s1400_s0 + $0x138] sm:$0xf]  ;;  %v651_v54 = vmax.bf16 %v649_v47, %v646_v46  ;;  %v638_v55 = vsel %vm153_vm0, %v134_v32, 4286644096  ;;  %v56_v56 = vld [vmem:[%s1400_s0 + $0xbc] sm:$0xf] }
  0x5a   :  { %v657_v57 = vsel %vm153_vm0, %v71_v45, 4286644096  ;;  %v636_v58 = vmax.bf16 %v634_v43, %v632_v51  ;;  %v642_v59 = vsel %vm153_vm0, %v150_v38, 4286644096  ;;  %v72_v60 = vld [vmem:[%s1400_s0 + $0xfc] sm:$0xf]  ;;  %v609_v63 = vmax.bf16 %v607_v50, %v605_v49 }
  0x5b   :  { %v103_v61 = vld [vmem:[%s1400_s0 + $0x178] sm:$0xf]  ;;  %v655_v62 = vmax.bf16 %v653_v48, %v651_v54  ;;  %v661_v0 = vsel %vm153_vm0, %v87_v53, 4286644096  ;;  %v681_v1 = vsel %vm153_vm0, %v24_v44, 4286644096 }
  0x5c   :  { %v684_v2 = vsel %vm153_vm0, %v40_v52, 4286644096  ;;  %v640_v3 = vmax.bf16 %v638_v55, %v636_v58  ;;  %v88_v4 = vld [vmem:[%s1400_s0 + $0x13c] sm:$0xf]  ;;  %v119_v5 = vld [vmem:[%s1400_s0 + $0x1b8] sm:$0xf] }
  0x5d   :  { %v659_v6 = vmax.bf16 %v657_v57, %v655_v62  ;;  %v686_v7 = vmax.bf16 %v684_v2, %v681_v1  ;;  %v688_v8 = vsel %vm153_vm0, %v56_v56, 4286644096  ;;  %v665_v9 = vsel %vm153_vm0, %v103_v61, 4286644096  ;;  %v104_v12 = vld [vmem:[%s1400_s0 + $0x17c] sm:$0xf] }
  0x5e   :  { %v692_v10 = vsel %vm153_vm0, %v72_v60, 4286644096  ;;  %v644_v11 = vmax.bf16 %v642_v59, %v640_v3  ;;  %v135_v13 = vld [vmem:[%s1400_s0 + $0x1f8] sm:$0xf]  ;;  %v669_v16 = vsel %vm153_vm0, %v119_v5, 4286644096 }
  0x5f   :  { %v663_v14 = vmax.bf16 %v661_v0, %v659_v6  ;;  %v690_v15 = vmax.bf16 %v688_v8, %v686_v7  ;;  %v696_v17 = vsel %vm153_vm0, %v88_v4, 4286644096  ;;  %v120_v19 = vld [vmem:[%s1400_s0 + $0x1bc] sm:$0xf]  ;;  %v673_v22 = vsel %vm153_vm0, %v135_v13, 4286644096 }
  0x60   :  { %v786_v18 = vcombine.low %v609_v63, %v644_v11  ;;  %v700_v23 = vsel %vm153_vm0, %v104_v12, 4286644096  ;;  %v136_v24 = vld [vmem:[%s1400_s0 + $0x1fc] sm:$0xf]  ;;  %v151_v25 = vld [vmem:[%s1400_s0 + $0x238] sm:$0xf] }
  0x61   :  { %v667_v20 = vmax.bf16 %v665_v9, %v663_v14  ;;  %v694_v21 = vmax.bf16 %v692_v10, %v690_v15  ;;  %v704_v28 = vsel %vm153_vm0, %v120_v19, 4286644096  ;;  %v152_v29 = vld [vmem:[%s1400_s0 + $0x23c] sm:$0xf]  ;;  %v677_v32 = vsel %vm153_vm0, %v151_v25, 4286644096 }
  0x62   :  { %787 = vst [vmem:[%s1401_s1 + $0x30] sm:$0xff] %v786_v18   ;;  %v708_v33 = vsel %vm153_vm0, %v136_v24, 4286644096  ;;  %v712_v35 = vsel %vm153_vm0, %v152_v29, 4286644096 }
  0x63   :  { %v671_v26 = vmax.bf16 %v669_v16, %v667_v20  ;;  %v698_v27 = vmax.bf16 %v696_v17, %v694_v21 }
  0x65   :  { %v675_v30 = vmax.bf16 %v673_v22, %v671_v26  ;;  %v702_v31 = vmax.bf16 %v700_v23, %v698_v27 }
  0x67   :  { %v706_v34 = vmax.bf16 %v704_v28, %v702_v31  ;;  %v679_v36 = vmax.bf16 %v677_v32, %v675_v30 }
  0x69   :  { %v710_v37 = vmax.bf16 %v708_v33, %v706_v34 }
  0x6b   :  { %v714_v38 = vmax.bf16 %v712_v35, %v710_v37 }
  0x6d   :  { %v788_v39 = vcombine.low %v679_v36, %v714_v38 }
  0x6f   :  { %789 = vst [vmem:[%s1401_s1 + $0x38] sm:$0xff] %v788_v39  }

// kernel: resnet_feature_extractor_forward.25
= control target key start
LH: loop header
LB: loop body
LE: loop exit
PB: predicated region body
PF: predicated region fallthrough
CT: control target
= control target key end

     0   :  { %s2950_s1 = inlined_call_operand.vmem [shape: bf16[1152,128], index: 1, kind: input, shape index: {}]   ;;  %s2951_s0 = inlined_call_operand.vmem [shape: bf16[128,1152], index: 0, kind: input, shape index: {}]   ;;  %s2952_s2 = inlined_call_operand.vmem [shape: f32[1,128], index: 2, kind: input, shape index: {}]   ;;  %s2953_s3 = inlined_call_operand.vmem [shape: bf16[128,128], index: 3, kind: output, shape index: {}]  }
   0x1   :  { %v2175_v0 = vld [vmem:[%s2950_s1 + $0x78] sm:$0xff]   ;;  %v2179_v4 = vld [vmem:[%s2950_s1 + $0x70] sm:$0xff]   ;;  %v2183_v8 = vld [vmem:[%s2950_s1 + $0x68] sm:$0xff]  }
   0x2   :  { %v2176_v1 = vld [vmem:[%s2950_s1 + $0xf8] sm:$0xff]   ;;  %1855 = vmatprep.subr.bf16.mxu0 %v2175_v0  ;;  %v2180_v5 = vld [vmem:[%s2950_s1 + $0xf0] sm:$0xff]   ;;  %v2184_v9 = vld [vmem:[%s2950_s1 + $0xe8] sm:$0xff]  }
   0x3   :  { %v2177_v2 = vld [vmem:[%s2950_s1 + $0x38] sm:$0xff]   ;;  %1919 = vmatprep.subr.bf16.mxu1 %v2176_v1  ;;  %v2181_v6 = vld [vmem:[%s2950_s1 + $0x30] sm:$0xff]   ;;  %v2185_v10 = vld [vmem:[%s2950_s1 + $0x28] sm:$0xff]  }
   0x4   :  { %v2178_v3 = vld [vmem:[%s2950_s1 + $0xb8] sm:$0xff]   ;;  %1856 = vmatpush3.bf16.msra.mxu0 %v2177_v2  ;;  %v2182_v7 = vld [vmem:[%s2950_s1 + $0xb0] sm:$0xff]   ;;  %v2186_v11 = vld [vmem:[%s2950_s1 + $0xa8] sm:$0xff]  }
   0x5   :  { %1920 = vmatpush3.bf16.msra.mxu1 %v2178_v3  ;;  %1857 = vmatprep.subr.bf16.mxu0 %v2179_v4  ;;  %v2187_v12 = vld [vmem:[%s2950_s1 + $0x60] sm:$0xff]   ;;  %v2191_v16 = vld [vmem:[%s2950_s1 + $0x58] sm:$0xff]   ;;  %v2195_v20 = vld [vmem:[%s2950_s1 + $0x50] sm:$0xff]  }
   0x6   :  { %1921 = vmatprep.subr.bf16.mxu1 %v2180_v5  ;;  %v2188_v13 = vld [vmem:[%s2950_s1 + $0xe0] sm:$0xff]   ;;  %v2192_v17 = vld [vmem:[%s2950_s1 + $0xd8] sm:$0xff]   ;;  %v2196_v21 = vld [vmem:[%s2950_s1 + $0xd0] sm:$0xff]  }
   0x7   :  { %v2189_v14 = vld [vmem:[%s2950_s1 + $0x20] sm:$0xff]   ;;  %v2193_v18 = vld [vmem:[%s2950_s1 + $0x18] sm:$0xff]   ;;  %v2197_v22 = vld [vmem:[%s2950_s1 + $0x10] sm:$0xff]  }
   0x8   :  { %1858 = vmatpush3.bf16.msra.mxu0 %v2181_v6  ;;  %v2190_v15 = vld [vmem:[%s2950_s1 + $0xa0] sm:$0xff]   ;;  %v2194_v19 = vld [vmem:[%s2950_s1 + $0x98] sm:$0xff]   ;;  %v2198_v23 = vld [vmem:[%s2950_s1 + $0x90] sm:$0xff]  }
   0x9   :  { %1922 = vmatpush3.bf16.msra.mxu1 %v2182_v7  ;;  %1859 = vmatprep.subr.bf16.mxu0 %v2183_v8  ;;  %v2199_v24 = vld [vmem:[%s2950_s1 + $0x48] sm:$0xff]   ;;  %v2203_v28 = vld [vmem:[%s2950_s1 + $0x40] sm:$0xff]   ;;  %v2213_v36 = vld [vmem:[%s2950_s1 + $0x178] sm:$0xff]  }
   0xa   :  { %1923 = vmatprep.subr.bf16.mxu1 %v2184_v9  ;;  %v2200_v25 = vld [vmem:[%s2950_s1 + $0xc8] sm:$0xff]   ;;  %v2204_v29 = vld [vmem:[%s2950_s1 + $0xc0] sm:$0xff]   ;;  %v2214_v37 = vld [vmem:[%s2950_s1 + $0x1f8] sm:$0xff]  }
   0xb   :  { %v2201_v26 = vld [vmem:[%s2950_s1 + $0x8] sm:$0xff]   ;;  %v2205_v30 = vld [vmem:[%s2950_s1] sm:$0xff]   ;;  %v2215_v38 = vld [vmem:[%s2950_s1 + $0x138] sm:$0xff]  }
   0xc   :  { %1860 = vmatpush3.bf16.msra.mxu0 %v2185_v10  ;;  %v2202_v27 = vld [vmem:[%s2950_s1 + $0x88] sm:$0xff]   ;;  %v2206_v31 = vld [vmem:[%s2950_s1 + $0x80] sm:$0xff]   ;;  %v2216_v39 = vld [vmem:[%s2950_s1 + $0x1b8] sm:$0xff]  }
   0xd   :  { %1924 = vmatpush3.bf16.msra.mxu1 %v2186_v11  ;;  %1861 = vmatprep.subr.bf16.mxu0 %v2187_v12  ;;  %v2207_v32 = vld [vmem:[%s2951_s0] ss:$36 sps:$4 sm:$0xff]   ;;  %v2210_v34 = vld [vmem:[%s2951_s0 + $0x8] ss:$36 sps:$4 sm:$0xff]   ;;  %v2219_v41 = vld [vmem:[%s2951_s0 + $0x54] ss:$36 sps:$4 sm:$0xff]  }
   0xe   :  { %1925 = vmatprep.subr.bf16.mxu1 %v2188_v13  ;;  %v2209_v33 = vld [vmem:[%s2951_s0 + $0x4] ss:$36 sps:$4 sm:$0xff]   ;;  %v2212_v35 = vld [vmem:[%s2951_s0 + $0xc] ss:$36 sps:$4 sm:$0xff]   ;;  %v2227_v48 = vld [vmem:[%s2951_s0 + $0x94] ss:$36 sps:$4 sm:$0xff]  }
   0xf   :  { %1078 = vmatprep.mubr.bf16.mxu0 %v2209_v33  ;;  %1175 = vmatprep.mubr.bf16.mxu1 %v2212_v35  ;;  %v2217_v40 = vld [vmem:[%s2951_s0 + $0x4c] ss:$36 sps:$4 sm:$0xff]   ;;  %v2229_v49 = vld [vmem:[%s2951_s0 + $0x9c] ss:$36 sps:$4 sm:$0xff]   ;;  %v2239_v57 = vld [vmem:[%s2951_s0 + $0xe4] ss:$36 sps:$4 sm:$0xff]  }
  0x10   :  { %1862 = vmatpush3.bf16.msra.mxu0 %v2189_v14  ;;  %v2221_v42 = vld [vmem:[%s2951_s0 + $0x48] ss:$36 sps:$4 sm:$0xff]   ;;  %v2222_v43 = vld [vmem:[%s2951_s0 + $0x50] ss:$36 sps:$4 sm:$0xff]   ;;  %v2232_v51 = vld [vmem:[%s2951_s0 + $0x98] ss:$36 sps:$4 sm:$0xff]  }
  0x11   :  { %1926 = vmatpush3.bf16.msra.mxu1 %v2190_v15  ;;  %1863 = vmatprep.subr.bf16.mxu0 %v2191_v16  ;;  %v2223_v44 = vld [vmem:[%s2950_s1 + $0x170] sm:$0xff]   ;;  %v2233_v52 = vld [vmem:[%s2950_s1 + $0x168] sm:$0xff]   ;;  %v2237_v56 = vld [vmem:[%s2951_s0 + $0xdc] ss:$36 sps:$4 sm:$0xff]  }
  0x12   :  { %1927 = vmatprep.subr.bf16.mxu1 %v2192_v17  ;;  %v2224_v45 = vld [vmem:[%s2950_s1 + $0x1f0] sm:$0xff]   ;;  %v2234_v53 = vld [vmem:[%s2950_s1 + $0x1e8] sm:$0xff]   ;;  %v2241_v58 = vld [vmem:[%s2951_s0 + $0xd8] ss:$36 sps:$4 sm:$0xff]  }
  0x13   :  { %v2225_v46 = vld [vmem:[%s2950_s1 + $0x130] sm:$0xff]   ;;  %v2235_v54 = vld [vmem:[%s2950_s1 + $0x128] sm:$0xff]   ;;  %v2242_v59 = vld [vmem:[%s2951_s0 + $0xe0] ss:$36 sps:$4 sm:$0xff]  }
  0x14   :  { %1864 = vmatpush3.bf16.msra.mxu0 %v2193_v18  ;;  %v2226_v47 = vld [vmem:[%s2950_s1 + $0x1b0] sm:$0xff]   ;;  %v2236_v55 = vld [vmem:[%s2950_s1 + $0x1a8] sm:$0xff]   ;;  %v2243_v60 = vld [vmem:[%s2950_s1 + $0x160] sm:$0xff]  }
  0x15   :  { %1928 = vmatpush3.bf16.msra.mxu1 %v2194_v19  ;;  %1865 = vmatprep.subr.bf16.mxu0 %v2195_v20  ;;  %v2231_v50 = vld [vmem:[%s2951_s0 + $0x90] ss:$36 sps:$4 sm:$0xff]   ;;  %v2244_v61 = vld [vmem:[%s2950_s1 + $0x1e0] sm:$0xff]   ;;  %v2253_v3 = vld [vmem:[%s2950_s1 + $0x158] sm:$0xff]  }
  0x16   :  { %1929 = vmatprep.subr.bf16.mxu1 %v2196_v21  ;;  %v2245_v62 = vld [vmem:[%s2950_s1 + $0x120] sm:$0xff]   ;;  %v2249_v1 = vld [vmem:[%s2951_s0 + $0x12c] ss:$36 sps:$4 sm:$0xff]   ;;  %v2254_v5 = vld [vmem:[%s2950_s1 + $0x1d8] sm:$0xff]  }
  0x17   :  { %v2246_v63 = vld [vmem:[%s2950_s1 + $0x1a0] sm:$0xff]   ;;  %v2252_v4 = vld [vmem:[%s2951_s0 + $0x128] ss:$36 sps:$4 sm:$0xff]   ;;  %v2255_v6 = vld [vmem:[%s2950_s1 + $0x118] sm:$0xff]  }
  0x18   :  { %1866 = vmatpush3.bf16.msra.mxu0 %v2197_v22  ;;  %v2247_v0 = vld [vmem:[%s2951_s0 + $0x124] ss:$36 sps:$4 sm:$0xff]   ;;  %v2256_v7 = vld [vmem:[%s2950_s1 + $0x198] sm:$0xff]   ;;  %v2257_v8 = vld [vmem:[%s2951_s0 + $0x16c] ss:$36 sps:$4 sm:$0xff]  }
  0x19   :  { %1930 = vmatpush3.bf16.msra.mxu1 %v2198_v23  ;;  %1867 = vmatprep.subr.bf16.mxu0 %v2199_v24  ;;  %v2251_v2 = vld [vmem:[%s2951_s0 + $0x120] ss:$36 sps:$4 sm:$0xff]   ;;  %v2259_v9 = vld [vmem:[%s2951_s0 + $0x174] ss:$36 sps:$4 sm:$0xff]   ;;  %v2261_v12 = vld [vmem:[%s2951_s0 + $0x168] ss:$36 sps:$4 sm:$0xff]  }
  0x1a   :  { %1931 = vmatprep.subr.bf16.mxu1 %v2200_v25  ;;  %v2263_v10 = vld [vmem:[%s2950_s1 + $0x150] sm:$0xff]   ;;  %v2269_v17 = vld [vmem:[%s2951_s0 + $0x1bc] ss:$36 sps:$4 sm:$0xff]   ;;  %v2273_v18 = vld [vmem:[%s2950_s1 + $0x148] sm:$0xff]  }
  0x1b   :  { %v2264_v11 = vld [vmem:[%s2950_s1 + $0x1d0] sm:$0xff]   ;;  %v2274_v19 = vld [vmem:[%s2950_s1 + $0x1c8] sm:$0xff]   ;;  %v2272_v23 = vld [vmem:[%s2951_s0 + $0x1b8] ss:$36 sps:$4 sm:$0xff]  }
  0x1c   :  { %1868 = vmatpush3.bf16.msra.mxu0 %v2201_v26  ;;  %v2265_v13 = vld [vmem:[%s2950_s1 + $0x110] sm:$0xff]   ;;  %v2275_v20 = vld [vmem:[%s2950_s1 + $0x108] sm:$0xff]   ;;  %v2277_v24 = vld [vmem:[%s2951_s0 + $0x1fc] ss:$36 sps:$4 sm:$0xff]  }
  0x1d   :  { %1932 = vmatpush3.bf16.msra.mxu1 %v2202_v27  ;;  %1869 = vmatprep.subr.bf16.mxu0 %v2203_v28  ;;  %v2266_v14 = vld [vmem:[%s2950_s1 + $0x190] sm:$0xff]   ;;  %v2276_v21 = vld [vmem:[%s2950_s1 + $0x188] sm:$0xff]   ;;  %v2283_v26 = vld [vmem:[%s2950_s1 + $0x140] sm:$0xff]  }
  0x1e   :  { %1933 = vmatprep.subr.bf16.mxu1 %v2204_v29  ;;  %v2262_v15 = vld [vmem:[%s2951_s0 + $0x170] ss:$36 sps:$4 sm:$0xff]   ;;  %v2279_v25 = vld [vmem:[%s2951_s0 + $0x204] ss:$36 sps:$4 sm:$0xff]  }
  0x1f   :  { %v2267_v16 = vld [vmem:[%s2951_s0 + $0x1b4] ss:$36 sps:$4 sm:$0xff]   ;;  %v2284_v27 = vld [vmem:[%s2950_s1 + $0x1c0] sm:$0xff]  }
  0x20   :  { %1870 = vmatpush3.bf16.msra.mxu0 %v2205_v30  ;;  %v2271_v22 = vld [vmem:[%s2951_s0 + $0x1b0] ss:$36 sps:$4 sm:$0xff]   ;;  %v2285_v28 = vld [vmem:[%s2950_s1 + $0x100] sm:$0xff]   ;;  %v2281_v30 = vld [vmem:[%s2951_s0 + $0x1f8] ss:$36 sps:$4 sm:$0xff]  }
  0x21   :  { %1934 = vmatpush3.bf16.msra.mxu1 %v2206_v31  ;;  %1983 = vmatprep.subr.bf16.mxu0 %v2213_v36  ;;  %v2286_v29 = vld [vmem:[%s2950_s1 + $0x180] sm:$0xff]   ;;  %v2289_v33 = vld [vmem:[%s2951_s0 + $0x14] ss:$36 sps:$4 sm:$0xff]  }
  0x22   :  { %2047 = vmatprep.subr.bf16.mxu1 %v2214_v37  ;;  %v2282_v31 = vld [vmem:[%s2951_s0 + $0x200] ss:$36 sps:$4 sm:$0xff]   ;;  %v2287_v35 = vld [vmem:[%s2951_s0 + $0x10] ss:$36 sps:$4 sm:$0xff]   ;;  %v2290_v36 = vld [vmem:[%s2951_s0 + $0x18] ss:$36 sps:$4 sm:$0xff]  }
  0x23   :  { %1079 = vmatmul.mubr.bf16.vlgmr.msra.gmra.mxu0 %v2207_v32  ;;  %v2293_v32 = vld [vmem:[%s2950_s1 + $0x238] sm:$0xff]  }
  0x24   :  { %1176 = vmatmul.mubr.bf16.vlgmr.msra.gmra.mxu1 %v2210_v34  ;;  %1984 = vmatpush3.bf16.msra.mxu0 %v2215_v38  ;;  %v2292_v34 = vld [vmem:[%s2951_s0 + $0x1c] ss:$36 sps:$4 sm:$0xff]   ;;  %v2296_v38 = vld [vmem:[%s2951_s0 + $0x64] ss:$36 sps:$4 sm:$0xff]  }
  0x25   :  { %2048 = vmatpush3.bf16.msra.mxu1 %v2216_v39  ;;  %1086 = vmatprep.mubr.bf16.mxu0 %v2217_v40  ;;  %v2294_v37 = vld [vmem:[%s2951_s0 + $0x5c] ss:$36 sps:$4 sm:$0xff]   ;;  %v2300_v39 = vld [vmem:[%s2950_s1 + $0x230] sm:$0xff]   ;;  %v2307_v40 = vld [vmem:[%s2950_s1 + $0x228] sm:$0xff]  }
  0x26   :  { %1183 = vmatprep.mubr.bf16.mxu1 %v2219_v41  ;;  %1985 = vmatprep.subr.bf16.mxu0 %v2223_v44  ;;  %v2298_v41 = vld [vmem:[%s2951_s0 + $0x58] ss:$36 sps:$4 sm:$0xff]   ;;  %v2303_v44 = vld [vmem:[%s2951_s0 + $0xac] ss:$36 sps:$4 sm:$0xff]  }
  0x27   :  { %2049 = vmatprep.subr.bf16.mxu1 %v2224_v45  ;;  %v2314_v45 = vld [vmem:[%s2950_s1 + $0x220] sm:$0xff]  }
  0x28   :  { %1986 = vmatpush3.bf16.msra.mxu0 %v2225_v46  ;;  %v2321_v46 = vld [vmem:[%s2950_s1 + $0x218] sm:$0xff]  }
  0x29   :  { %2050 = vmatpush3.bf16.msra.mxu1 %v2226_v47  ;;  %1987 = vmatprep.subr.bf16.mxu0 %v2233_v52  ;;  %v2305_v47 = vld [vmem:[%s2951_s0 + $0xa0] ss:$36 sps:$4 sm:$0xff]   ;;  %v2312_v52 = vld [vmem:[%s2951_s0 + $0xe8] ss:$36 sps:$4 sm:$0xff]  }
  0x2a   :  { %2051 = vmatprep.subr.bf16.mxu1 %v2234_v53  ;;  %v2335_v53 = vld [vmem:[%s2950_s1 + $0x208] sm:$0xff]  }
  0x2b   :  { %1087 = vmatmul.mubr.bf16.gmra.mxu0 %v2221_v42  ;;  %v2299_v42 = vld [vmem:[%s2951_s0 + $0x60] ss:$36 sps:$4 sm:$0xff]  }
  0x2c   :  { %1184 = vmatmul.mubr.bf16.gmra.mxu1 %v2222_v43  ;;  %1094 = vmatprep.mubr.bf16.mxu0 %v2227_v48  ;;  %v2301_v43 = vld [vmem:[%s2951_s0 + $0xa4] ss:$36 sps:$4 sm:$0xff]  }
  0x2d   :  { %1191 = vmatprep.mubr.bf16.mxu1 %v2229_v49  ;;  %1988 = vmatpush3.bf16.msra.mxu0 %v2235_v54  ;;  %v2306_v48 = vld [vmem:[%s2951_s0 + $0xa8] ss:$36 sps:$4 sm:$0xff]   ;;  %v2313_v54 = vld [vmem:[%s2951_s0 + $0xf0] ss:$36 sps:$4 sm:$0xff]  }
  0x2e   :  { %2052 = vmatpush3.bf16.msra.mxu1 %v2236_v55  ;;  %1989 = vmatprep.subr.bf16.mxu0 %v2243_v60  ;;  %v2308_v49 = vld [vmem:[%s2951_s0 + $0xec] ss:$36 sps:$4 sm:$0xff]   ;;  %v2315_v55 = vld [vmem:[%s2951_s0 + $0x134] ss:$36 sps:$4 sm:$0xff]   ;;  %v2322_v60 = vld [vmem:[%s2951_s0 + $0x17c] ss:$36 sps:$4 sm:$0xff]  }
  0x2f   :  { %2053 = vmatprep.subr.bf16.mxu1 %v2244_v61  ;;  %v2324_v61 = vld [vmem:[%s2951_s0 + $0x184] ss:$36 sps:$4 sm:$0xff]  }
  0x31   :  { %1990 = vmatpush3.bf16.msra.mxu0 %v2245_v62  ;;  %v2326_v62 = vld [vmem:[%s2951_s0 + $0x178] ss:$36 sps:$4 sm:$0xff]  }
  0x32   :  { %2054 = vmatpush3.bf16.msra.mxu1 %v2246_v63  ;;  %1991 = vmatprep.subr.bf16.mxu0 %v2253_v3  ;;  %v2327_v63 = vld [vmem:[%s2951_s0 + $0x180] ss:$36 sps:$4 sm:$0xff]   ;;  %v2334_v3 = vld [vmem:[%s2951_s0 + $0x1c8] ss:$36 sps:$4 sm:$0xff]  }
  0x33   :  { %1095 = vmatmul.mubr.bf16.gmra.mxu0 %v2231_v50  ;;  %2055 = vmatprep.subr.bf16.mxu1 %v2254_v5  ;;  %v2310_v50 = vld [vmem:[%s2951_s0 + $0xf4] ss:$36 sps:$4 sm:$0xff]  }
  0x34   :  { %1192 = vmatmul.mubr.bf16.gmra.mxu1 %v2232_v51  ;;  %1102 = vmatprep.mubr.bf16.mxu0 %v2237_v56  ;;  %v2328_v51 = vld [vmem:[%s2950_s1 + $0x210] sm:$0xff]   ;;  %v2317_v56 = vld [vmem:[%s2951_s0 + $0x13c] ss:$36 sps:$4 sm:$0xff]  }
  0x35   :  { %1199 = vmatprep.mubr.bf16.mxu1 %v2239_v57  ;;  %1992 = vmatpush3.bf16.msra.mxu0 %v2255_v6  ;;  %v2342_v57 = vld [vmem:[%s2950_s1 + $0x200] sm:$0xff]   ;;  %v2338_v5 = vld [vmem:[%s2951_s0 + $0x214] ss:$36 sps:$4 sm:$0xff]   ;;  %v2340_v6 = vld [vmem:[%s2951_s0 + $0x208] ss:$36 sps:$4 sm:$0xff]  }
  0x36   :  { %2056 = vmatpush3.bf16.msra.mxu1 %v2256_v7  ;;  %1993 = vmatprep.subr.bf16.mxu0 %v2263_v10  ;;  %v2341_v7 = vld [vmem:[%s2951_s0 + $0x210] ss:$36 sps:$4 sm:$0xff]   ;;  %v2345_v10 = vld [vmem:[%s2951_s0 + $0x68] ss:$36 sps:$4 sm:$0xff]  }
  0x37   :  { %2057 = vmatprep.subr.bf16.mxu1 %v2264_v11  ;;  %v2346_v11 = vld [vmem:[%s2951_s0 + $0x188] ss:$36 sps:$4 sm:$0xff]  }
  0x39   :  { %1994 = vmatpush3.bf16.msra.mxu0 %v2265_v13  ;;  %v2348_v13 = vld [vmem:[%s2951_s0 + $0x1d0] ss:$36 sps:$4 sm:$0xff]  }
  0x3a   :  { %2058 = vmatpush3.bf16.msra.mxu1 %v2266_v14  ;;  %1995 = vmatprep.subr.bf16.mxu0 %v2273_v18  ;;  %v2349_v14 = vld [vmem:[%s2951_s0 + $0xf8] ss:$36 sps:$4 sm:$0xff]   ;;  %v2806_v18 = vld [vmem:[%s2952_s2] ss:$0 sm:$0xff] }
  0x3b   :  { %1103 = vmatmul.mubr.bf16.gmra.mxu0 %v2241_v58  ;;  %2059 = vmatprep.subr.bf16.mxu1 %v2274_v19  ;;  %v2319_v58 = vld [vmem:[%s2951_s0 + $0x130] ss:$36 sps:$4 sm:$0xff]  }
  0x3c   :  { %1200 = vmatmul.mubr.bf16.gmra.mxu1 %v2242_v59  ;;  %1110 = vmatprep.mubr.bf16.mxu0 %v2247_v0  ;;  %v2320_v59 = vld [vmem:[%s2951_s0 + $0x138] ss:$36 sps:$4 sm:$0xff]   ;;  %v2329_v0 = vld [vmem:[%s2951_s0 + $0x1c4] ss:$36 sps:$4 sm:$0xff]  }
  0x3d   :  { %1207 = vmatprep.mubr.bf16.mxu1 %v2249_v1  ;;  %1996 = vmatpush3.bf16.msra.mxu0 %v2275_v20  ;;  %v2331_v1 = vld [vmem:[%s2951_s0 + $0x1cc] ss:$36 sps:$4 sm:$0xff]  }
  0x3e   :  { %2060 = vmatpush3.bf16.msra.mxu1 %v2276_v21  ;;  %1997 = vmatprep.subr.bf16.mxu0 %v2283_v26 }
  0x3f   :  { %2061 = vmatprep.subr.bf16.mxu1 %v2284_v27 }
  0x41   :  { %1998 = vmatpush3.bf16.msra.mxu0 %v2285_v28 }
  0x42   :  { %2062 = vmatpush3.bf16.msra.mxu1 %v2286_v29  ;;  %2127 = vmatprep.subr.bf16.mxu0 %v2293_v32 }
  0x43   :  { %1111 = vmatmul.mubr.bf16.gmra.mxu0 %v2251_v2  ;;  %2159 = vmatprep.subr.bf16.mxu1 %v2293_v32  ;;  %v2333_v2 = vld [vmem:[%s2951_s0 + $0x1c0] ss:$36 sps:$4 sm:$0xff]  }
  0x44   :  { %1208 = vmatmul.mubr.bf16.gmra.mxu1 %v2252_v4  ;;  %1118 = vmatprep.mubr.bf16.mxu0 %v2257_v8  ;;  %v2336_v4 = vld [vmem:[%s2951_s0 + $0x20c] ss:$36 sps:$4 sm:$0xff]   ;;  %v2343_v8 = vld [vmem:[%s2951_s0 + $0x20] ss:$36 sps:$4 sm:$0xff]  }
  0x45   :  { %1215 = vmatprep.mubr.bf16.mxu1 %v2259_v9  ;;  %v2344_v9 = vld [vmem:[%s2951_s0 + $0x140] ss:$36 sps:$4 sm:$0xff]  }
  0x4b   :  { %1119 = vmatmul.mubr.bf16.gmra.mxu0 %v2261_v12  ;;  %v2347_v12 = vld [vmem:[%s2951_s0 + $0xb0] ss:$36 sps:$4 sm:$0xff]  }
  0x4c   :  { %1216 = vmatmul.mubr.bf16.gmra.mxu1 %v2262_v15  ;;  %1126 = vmatprep.mubr.bf16.mxu0 %v2267_v16  ;;  %v2350_v15 = vld [vmem:[%s2951_s0 + $0x218] ss:$36 sps:$4 sm:$0xff]  }
  0x4d   :  { %1223 = vmatprep.mubr.bf16.mxu1 %v2269_v17 }
  0x53   :  { %1127 = vmatmul.mubr.bf16.gmra.mxu0 %v2271_v22 }
  0x54   :  { %1224 = vmatmul.mubr.bf16.gmra.mxu1 %v2272_v23  ;;  %1134 = vmatprep.mubr.bf16.mxu0 %v2277_v24 }
  0x55   :  { %1231 = vmatprep.mubr.bf16.mxu1 %v2279_v25 }
  0x5b   :  { %1135 = vmatmul.mubr.bf16.gmra.mxu0 %v2281_v30 }
  0x5c   :  { %1232 = vmatmul.mubr.bf16.gmra.mxu1 %v2282_v31  ;;  %1272 = vmatprep.mubr.bf16.mxu0 %v2289_v33 }
  0x5d   :  { %1369 = vmatprep.mubr.bf16.mxu1 %v2292_v34 }
  0x63   :  { %1273 = vmatmul.mubr.bf16.vlgmr.msra.gmra.mxu0 %v2287_v35 }
  0x64   :  { %1370 = vmatmul.mubr.bf16.vlgmr.msra.gmra.mxu1 %v2290_v36  ;;  %2128 = vmatpush3.bf16.msra.mxu0 %v2293_v32 }
  0x65   :  { %2167 = vmatpush3.bf16.msra.mxu1 %v2293_v32  ;;  %1280 = vmatprep.mubr.bf16.mxu0 %v2294_v37 }
  0x66   :  { %1377 = vmatprep.mubr.bf16.mxu1 %v2296_v38  ;;  %2129 = vmatprep.subr.bf16.mxu0 %v2300_v39 }
  0x67   :  { %2160 = vmatprep.subr.bf16.mxu1 %v2300_v39 }
  0x68   :  { %2130 = vmatpush3.bf16.msra.mxu0 %v2300_v39 }
  0x69   :  { %2168 = vmatpush3.bf16.msra.mxu1 %v2300_v39  ;;  %2131 = vmatprep.subr.bf16.mxu0 %v2307_v40 }
  0x6a   :  { %2161 = vmatprep.subr.bf16.mxu1 %v2307_v40 }
  0x6b   :  { %1281 = vmatmul.mubr.bf16.gmra.mxu0 %v2298_v41 }
  0x6c   :  { %1378 = vmatmul.mubr.bf16.gmra.mxu1 %v2299_v42  ;;  %1288 = vmatprep.mubr.bf16.mxu0 %v2301_v43 }
  0x6d   :  { %1385 = vmatprep.mubr.bf16.mxu1 %v2303_v44  ;;  %2132 = vmatpush3.bf16.msra.mxu0 %v2307_v40 }
  0x6e   :  { %2169 = vmatpush3.bf16.msra.mxu1 %v2307_v40  ;;  %2133 = vmatprep.subr.bf16.mxu0 %v2314_v45 }
  0x6f   :  { %2162 = vmatprep.subr.bf16.mxu1 %v2314_v45 }
  0x71   :  { %2134 = vmatpush3.bf16.msra.mxu0 %v2314_v45 }
  0x72   :  { %2170 = vmatpush3.bf16.msra.mxu1 %v2314_v45  ;;  %2135 = vmatprep.subr.bf16.mxu0 %v2321_v46 }
  0x73   :  { %1289 = vmatmul.mubr.bf16.gmra.mxu0 %v2305_v47  ;;  %2163 = vmatprep.subr.bf16.mxu1 %v2321_v46 }
  0x74   :  { %1386 = vmatmul.mubr.bf16.gmra.mxu1 %v2306_v48  ;;  %1296 = vmatprep.mubr.bf16.mxu0 %v2308_v49 }
  0x75   :  { %1393 = vmatprep.mubr.bf16.mxu1 %v2310_v50  ;;  %2136 = vmatpush3.bf16.msra.mxu0 %v2321_v46 }
  0x76   :  { %2171 = vmatpush3.bf16.msra.mxu1 %v2321_v46  ;;  %2137 = vmatprep.subr.bf16.mxu0 %v2328_v51 }
  0x77   :  { %2164 = vmatprep.subr.bf16.mxu1 %v2328_v51 }
  0x79   :  { %2138 = vmatpush3.bf16.msra.mxu0 %v2328_v51 }
  0x7a   :  { %2172 = vmatpush3.bf16.msra.mxu1 %v2328_v51  ;;  %2139 = vmatprep.subr.bf16.mxu0 %v2335_v53 }
  0x7b   :  { %1297 = vmatmul.mubr.bf16.gmra.mxu0 %v2312_v52  ;;  %2165 = vmatprep.subr.bf16.mxu1 %v2335_v53 }
  0x7c   :  { %1394 = vmatmul.mubr.bf16.gmra.mxu1 %v2313_v54  ;;  %1304 = vmatprep.mubr.bf16.mxu0 %v2315_v55 }
  0x7d   :  { %1401 = vmatprep.mubr.bf16.mxu1 %v2317_v56  ;;  %2140 = vmatpush3.bf16.msra.mxu0 %v2335_v53 }
  0x7e   :  { %2173 = vmatpush3.bf16.msra.mxu1 %v2335_v53  ;;  %2141 = vmatprep.subr.bf16.mxu0 %v2342_v57 }
  0x7f   :  { %2166 = vmatprep.subr.bf16.mxu1 %v2342_v57 }
  0x81   :  { %2142 = vmatpush3.bf16.msra.mxu0 %v2342_v57 }
  0x82   :  { %2174 = vmatpush3.bf16.msra.mxu1 %v2342_v57 }
  0x83   :  { %1305 = vmatmul.mubr.bf16.gmra.mxu0 %v2319_v58 }
  0x84   :  { %1402 = vmatmul.mubr.bf16.gmra.mxu1 %v2320_v59  ;;  %1312 = vmatprep.mubr.bf16.mxu0 %v2322_v60 }
  0x85   :  { %1409 = vmatprep.mubr.bf16.mxu1 %v2324_v61 }
  0x8b   :  { %1313 = vmatmul.mubr.bf16.gmra.mxu0 %v2326_v62 }
  0x8c   :  { %1410 = vmatmul.mubr.bf16.gmra.mxu1 %v2327_v63  ;;  %1320 = vmatprep.mubr.bf16.mxu0 %v2329_v0 }
  0x8d   :  { %1417 = vmatprep.mubr.bf16.mxu1 %v2331_v1 }
  0x93   :  { %1321 = vmatmul.mubr.bf16.gmra.mxu0 %v2333_v2 }
  0x94   :  { %1418 = vmatmul.mubr.bf16.gmra.mxu1 %v2334_v3  ;;  %1328 = vmatprep.mubr.bf16.mxu0 %v2336_v4 }
  0x95   :  { %1425 = vmatprep.mubr.bf16.mxu1 %v2338_v5 }
  0x9b   :  { %1329 = vmatmul.mubr.bf16.gmra.mxu0 %v2340_v6 }
  0x9c   :  { %1426 = vmatmul.mubr.bf16.gmra.mxu1 %v2341_v7  ;;  %2143 = vmatprep.mubr.bf16.mxu0 %v2343_v8 }
  0x9d   :  { %2151 = vmatprep.mubr.bf16.mxu1 %v2344_v9 }
  0xa3   :  { %2144 = vmatmul.mubr.bf16.vlgmr.msra.gmra.mxu0 %v2345_v10 }
  0xa4   :  { %2152 = vmatmul.mubr.bf16.vlgmr.msra.gmra.mxu1 %v2346_v11  ;;  %2147 = vmatprep.mubr.bf16.mxu0 %v2347_v12 }
  0xa5   :  { %2155 = vmatprep.mubr.bf16.mxu1 %v2348_v13 }
  0xab   :  { %2148 = vmatmul.mubr.bf16.gmra.mxu0 %v2349_v14 }
  0xac   :  { %2156 = vmatmul.mubr.bf16.gmra.mxu1 %v2350_v15 }
  0xe3   :  { %v1871_v16 = vpop.f32.mrf.mxu0 }
  0xe4   :  { %v1935_v17 = vpop.f32.mrf.mxu1 }
  0xe5   :  { %v1872_v19 = vpop.f32.mrf.mxu0 }
  0xe6   :  { %v1873_v20 = vadd.f32 %v1872_v19, %v1871_v16  ;;  %v1936_v21 = vpop.f32.mrf.mxu1 }
  0xe7   :  { %v1937_v22 = vadd.f32 %v1936_v21, %v1935_v17  ;;  %v1874_v23 = vpop.f32.mrf.mxu0 }
  0xe8   :  { %v1081_v24 = vadd.f32 %v1873_v20, %v2806_v18  ;;  %v1938_v25 = vpop.f32.mrf.mxu1 }
  0xe9   :  { %v1875_v26 = vpop.f32.mrf.mxu0 }
  0xea   :  { %v2809_v27 = vadd.f32 %v1937_v22, %v1081_v24  ;;  %v1876_v28 = vadd.f32 %v1875_v26, %v1874_v23  ;;  %v1939_v29 = vpop.f32.mrf.mxu1 }
  0xeb   :  { %v1940_v30 = vadd.f32 %v1939_v29, %v1938_v25  ;;  %v1877_v31 = vpop.f32.mrf.mxu0 }
  0xec   :  { %v1084_v32 = vadd.f32 %v1876_v28, %v2806_v18  ;;  %v1941_v33 = vpop.f32.mrf.mxu1 }
  0xed   :  { %v1878_v34 = vpop.f32.mrf.mxu0 }
  0xee   :  { %v2812_v35 = vadd.f32 %v1940_v30, %v1084_v32  ;;  %v1879_v36 = vadd.f32 %v1878_v34, %v1877_v31  ;;  %v1942_v37 = vpop.f32.mrf.mxu1 }
  0xef   :  { %v1943_v38 = vadd.f32 %v1942_v37, %v1941_v33  ;;  %v1880_v39 = vpop.f32.mrf.mxu0 }
  0xf0   :  { %v1089_v40 = vadd.f32 %v1879_v36, %v2806_v18  ;;  %v1944_v41 = vpop.f32.mrf.mxu1 }
  0xf1   :  { %v1881_v42 = vpop.f32.mrf.mxu0 }
  0xf2   :  { %v2815_v43 = vadd.f32 %v1943_v38, %v1089_v40  ;;  %v1882_v44 = vadd.f32 %v1881_v42, %v1880_v39  ;;  %v1945_v45 = vpop.f32.mrf.mxu1 }
  0xf3   :  { %v1946_v46 = vadd.f32 %v1945_v45, %v1944_v41  ;;  %v1883_v47 = vpop.f32.mrf.mxu0 }
  0xf4   :  { %v1092_v48 = vadd.f32 %v1882_v44, %v2806_v18  ;;  %v1947_v49 = vpop.f32.mrf.mxu1 }
  0xf5   :  { %v1884_v50 = vpop.f32.mrf.mxu0 }
  0xf6   :  { %v2818_v51 = vadd.f32 %v1946_v46, %v1092_v48  ;;  %v1885_v52 = vadd.f32 %v1884_v50, %v1883_v47  ;;  %v1948_v53 = vpop.f32.mrf.mxu1 }
  0xf7   :  { %v1949_v54 = vadd.f32 %v1948_v53, %v1947_v49  ;;  %v1886_v55 = vpop.f32.mrf.mxu0 }
  0xf8   :  { %v1097_v56 = vadd.f32 %v1885_v52, %v2806_v18  ;;  %v1950_v57 = vpop.f32.mrf.mxu1 }
  0xf9   :  { %v1887_v58 = vpop.f32.mrf.mxu0 }
  0xfa   :  { %v2821_v59 = vadd.f32 %v1949_v54, %v1097_v56  ;;  %v1888_v60 = vadd.f32 %v1887_v58, %v1886_v55  ;;  %v1951_v61 = vpop.f32.mrf.mxu1 }
  0xfb   :  { %v1952_v62 = vadd.f32 %v1951_v61, %v1950_v57  ;;  %v1889_v63 = vpop.f32.mrf.mxu0 }
  0xfc   :  { %v1100_v0 = vadd.f32 %v1888_v60, %v2806_v18  ;;  %v1953_v1 = vpop.f32.mrf.mxu1 }
  0xfd   :  { %v1890_v2 = vpop.f32.mrf.mxu0 }
  0xfe   :  { %v2824_v3 = vadd.f32 %v1952_v62, %v1100_v0  ;;  %v1891_v4 = vadd.f32 %v1890_v2, %v1889_v63  ;;  %v1954_v5 = vpop.f32.mrf.mxu1 }
  0xff   :  { %v1955_v6 = vadd.f32 %v1954_v5, %v1953_v1  ;;  %v1892_v7 = vpop.f32.mrf.mxu0 }
 0x100   :  { %2954 = vst [vmem:[#allocation2_spill] sm:$0xff] %v2824_v3  ;;  %v1105_v8 = vadd.f32 %v1891_v4, %v2806_v18  ;;  %v1956_v9 = vpop.f32.mrf.mxu1 }
 0x101   :  { %v1893_v10 = vpop.f32.mrf.mxu0 }
 0x102   :  { %v2827_v11 = vadd.f32 %v1955_v6, %v1105_v8  ;;  %v1894_v12 = vadd.f32 %v1893_v10, %v1892_v7  ;;  %v1957_v13 = vpop.f32.mrf.mxu1 }
 0x103   :  { %v1958_v14 = vadd.f32 %v1957_v13, %v1956_v9  ;;  %v1895_v15 = vpop.f32.mrf.mxu0 }
 0x104   :  { %v1108_v16 = vadd.f32 %v1894_v12, %v2806_v18  ;;  %v1959_v17 = vpop.f32.mrf.mxu1 }
 0x105   :  { %v1896_v19 = vpop.f32.mrf.mxu0 }
 0x106   :  { %v2830_v20 = vadd.f32 %v1958_v14, %v1108_v16  ;;  %v1897_v21 = vadd.f32 %v1896_v19, %v1895_v15  ;;  %v1960_v22 = vpop.f32.mrf.mxu1 }
 0x107   :  { %v1961_v23 = vadd.f32 %v1960_v22, %v1959_v17  ;;  %v1898_v24 = vpop.f32.mrf.mxu0 }
 0x108   :  { %2955 = vst [vmem:[#allocation3_spill] sm:$0xff] %v2830_v20  ;;  %v1113_v25 = vadd.f32 %v1897_v21, %v2806_v18  ;;  %v1962_v26 = vpop.f32.mrf.mxu1 }
 0x109   :  { %v1899_v28 = vpop.f32.mrf.mxu0 }
 0x10a   :  { %v2833_v29 = vadd.f32 %v1961_v23, %v1113_v25  ;;  %v1900_v30 = vadd.f32 %v1899_v28, %v1898_v24  ;;  %v1963_v31 = vpop.f32.mrf.mxu1 }
 0x10b   :  { %v1964_v32 = vadd.f32 %v1963_v31, %v1962_v26  ;;  %v1901_v33 = vpop.f32.mrf.mxu0 }
 0x10c   :  { %v1116_v34 = vadd.f32 %v1900_v30, %v2806_v18  ;;  %v1965_v36 = vpop.f32.mrf.mxu1 }
 0x10d   :  { %v1902_v37 = vpop.f32.mrf.mxu0 }
 0x10e   :  { %v2836_v38 = vadd.f32 %v1964_v32, %v1116_v34  ;;  %v1903_v39 = vadd.f32 %v1902_v37, %v1901_v33  ;;  %v1966_v40 = vpop.f32.mrf.mxu1 }
 0x10f   :  { %v1967_v41 = vadd.f32 %v1966_v40, %v1965_v36  ;;  %v1904_v42 = vpop.f32.mrf.mxu0 }
 0x110   :  { %2956 = vst [vmem:[#allocation4_spill] sm:$0xff] %v2836_v38  ;;  %v1121_v44 = vadd.f32 %v1903_v39, %v2806_v18  ;;  %v1968_v45 = vpop.f32.mrf.mxu1 }
 0x111   :  { %v1905_v46 = vpop.f32.mrf.mxu0 }
 0x112   :  { %v2839_v47 = vadd.f32 %v1967_v41, %v1121_v44  ;;  %v1906_v48 = vadd.f32 %v1905_v46, %v1904_v42  ;;  %v1969_v49 = vpop.f32.mrf.mxu1 }
 0x113   :  { %v1970_v50 = vadd.f32 %v1969_v49, %v1968_v45  ;;  %v1907_v52 = vpop.f32.mrf.mxu0 }
 0x114   :  { %v1124_v53 = vadd.f32 %v1906_v48, %v2806_v18  ;;  %v1971_v54 = vpop.f32.mrf.mxu1 }
 0x115   :  { %v1908_v55 = vpop.f32.mrf.mxu0 }
 0x116   :  { %v2842_v56 = vadd.f32 %v1970_v50, %v1124_v53  ;;  %v1909_v57 = vadd.f32 %v1908_v55, %v1907_v52  ;;  %v1972_v58 = vpop.f32.mrf.mxu1 }
 0x117   :  { %v1973_v60 = vadd.f32 %v1972_v58, %v1971_v54  ;;  %v1910_v61 = vpop.f32.mrf.mxu0 }
 0x118   :  { %2957 = vst [vmem:[#allocation5_spill] sm:$0xff] %v2842_v56  ;;  %v1129_v62 = vadd.f32 %v1909_v57, %v2806_v18  ;;  %v1974_v63 = vpop.f32.mrf.mxu1 }
 0x119   :  { %v1911_v0 = vpop.f32.mrf.mxu0 }
 0x11a   :  { %v2845_v1 = vadd.f32 %v1973_v60, %v1129_v62  ;;  %v1912_v2 = vadd.f32 %v1911_v0, %v1910_v61  ;;  %v1975_v4 = vpop.f32.mrf.mxu1 }
 0x11b   :  { %v1976_v5 = vadd.f32 %v1975_v4, %v1974_v63  ;;  %v1913_v6 = vpop.f32.mrf.mxu0 }
 0x11c   :  { %2958 = vst [vmem:[#allocation6_spill] sm:$0xff] %v2845_v1  ;;  %v1132_v7 = vadd.f32 %v1912_v2, %v2806_v18  ;;  %v1977_v8 = vpop.f32.mrf.mxu1 }
 0x11d   :  { %v1914_v9 = vpop.f32.mrf.mxu0 }
 0x11e   :  { %v2848_v10 = vadd.f32 %v1976_v5, %v1132_v7  ;;  %v1915_v12 = vadd.f32 %v1914_v9, %v1913_v6  ;;  %v1978_v13 = vpop.f32.mrf.mxu1 }
 0x11f   :  { %v1979_v14 = vadd.f32 %v1978_v13, %v1977_v8  ;;  %v1916_v15 = vpop.f32.mrf.mxu0 }
 0x120   :  { %2959 = vst [vmem:[#allocation7_spill] sm:$0xff] %v2848_v10  ;;  %v1137_v16 = vadd.f32 %v1915_v12, %v2806_v18  ;;  %v1980_v17 = vpop.f32.mrf.mxu1 }
 0x121   :  { %v1917_v19 = vpop.f32.mrf.mxu0 }
 0x122   :  { %v2851_v21 = vadd.f32 %v1979_v14, %v1137_v16  ;;  %v1918_v22 = vadd.f32 %v1917_v19, %v1916_v15  ;;  %v1981_v23 = vpop.f32.mrf.mxu1 }
 0x123   :  { %v1982_v24 = vadd.f32 %v1981_v23, %v1980_v17  ;;  %v1999_v25 = vpop.f32.mrf.mxu0 }
 0x124   :  { %2960 = vst [vmem:[#allocation8_spill] sm:$0xff] %v2851_v21  ;;  %v1140_v26 = vadd.f32 %v1918_v22, %v2806_v18  ;;  %v2063_v28 = vpop.f32.mrf.mxu1 }
 0x125   :  { %v2000_v30 = vpop.f32.mrf.mxu0 }
 0x126   :  { %v2854_v31 = vadd.f32 %v1982_v24, %v1140_v26  ;;  %v2001_v32 = vadd.f32 %v2000_v30, %v1999_v25  ;;  %v2064_v33 = vpop.f32.mrf.mxu1 }
 0x127   :  { %v2002_v34 = vpop.f32.mrf.mxu0  ;;  %v2065_v37 = vadd.f32 %v2064_v33, %v2063_v28 }
 0x128   :  { %2961 = vst [vmem:[#allocation9_spill] sm:$0xff] %v2854_v31  ;;  %v1275_v36 = vadd.f32 %v2001_v32, %v2809_v27  ;;  %v2857_v39 = vpop.f32.mrf.mxu1 }
 0x129   :  { %v2003_v40 = vpop.f32.mrf.mxu0 }
 0x12a   :  { %v2859_v41 = vpop.f32.mrf.mxu1  ;;  %v2861_v42 = vadd.f32 %v2065_v37, %v1275_v36  ;;  %v2004_v10 = vadd.f32 %v2003_v40, %v2002_v34 }
 0x12b   :  { %v2005_v44 = vpop.f32.mrf.mxu0 }
 0x12c   :  { %2962 = vst [vmem:[#allocation10_spill] sm:$0xff] %v2861_v42  ;;  %v2069_v45 = vpop.f32.mrf.mxu1  ;;  %v1278_v56 = vadd.f32 %v2004_v10, %v2812_v35 }
 0x12d   :  { %v2006_v18 = vpop.f32.mrf.mxu0 }
 0x12e   :  { %v2070_v46 = vpop.f32.mrf.mxu1  ;;  %v2007_v42 = vadd.f32 %v2006_v18, %v2005_v44  ;;  %v2068_v44 = vadd.f32 %v2859_v41, %v2857_v39 }
 0x12f   :  { %v2008_v48 = vpop.f32.mrf.mxu0  ;;  %v2071_v18 = vadd.f32 %v2070_v46, %v2069_v45 }
 0x130   :  { %v2072_v49 = vpop.f32.mrf.mxu1 }
 0x131   :  { %v2009_v50 = vpop.f32.mrf.mxu0 }
 0x132   :  { %v2073_v52 = vpop.f32.mrf.mxu1  ;;  %v2010_v21 = vadd.f32 %v2009_v50, %v2008_v48 }
 0x133   :  { %v2011_v53 = vpop.f32.mrf.mxu0  ;;  %v2074_v48 = vadd.f32 %v2073_v52, %v2072_v49 }
 0x134   :  { %v2075_v54 = vpop.f32.mrf.mxu1 }
 0x135   :  { %v2012_v55 = vpop.f32.mrf.mxu0 }
 0x136   :  { %v2076_v27 = vpop.f32.mrf.mxu1 }
 0x137   :  { %v2014_v57 = vpop.f32.mrf.mxu0 }
 0x138   :  { %v2863_v58 = vpop.f32.mrf.mxu1 }
 0x139   :  { %v2015_v60 = vpop.f32.mrf.mxu0 }
 0x13a   :  { %v2865_v61 = vpop.f32.mrf.mxu1  ;;  %v2016_v35 = vadd.f32 %v2015_v60, %v2014_v57 }
 0x13b   :  { %v2017_v62 = vpop.f32.mrf.mxu0  ;;  %v2899_v41 = vadd.f32 %v2865_v61, %v2863_v58 }
 0x13c   :  { %v2867_v63 = vpop.f32.mrf.mxu1 }
 0x13d   :  { %v2018_v0 = vpop.f32.mrf.mxu0 }
 0x13e   :  { %v2082_v2 = vpop.f32.mrf.mxu1  ;;  %v2019_v38 = vadd.f32 %v2018_v0, %v2017_v62 }
 0x13f   :  { %v2020_v4 = vpop.f32.mrf.mxu0  ;;  %v2083_v45 = vadd.f32 %v2082_v2, %v2867_v63 }
 0x140   :  { %v2869_v5 = vpop.f32.mrf.mxu1 }
 0x141   :  { %2963 = vst [vmem:[#allocation11_spill] sm:$0xff] %v2869_v5  ;;  %v2021_v6 = vpop.f32.mrf.mxu0 }
 0x142   :  { %v2871_v7 = vpop.f32.mrf.mxu1  ;;  %v2022_v46 = vadd.f32 %v2021_v6, %v2020_v4 }
 0x143   :  { %2964 = vst [vmem:[#allocation12_spill] sm:$0xff] %v2871_v7  ;;  %v2023_v8 = vpop.f32.mrf.mxu0  ;;  %v2013_v7 = vadd.f32 %v2012_v55, %v2011_v53  ;;  %v2077_v55 = vadd.f32 %v2076_v27, %v2075_v54  ;;  %v2971_v27 = vld [vmem:[#allocation5_spill] sm:$0xff] }
 0x144   :  { %v2873_v9 = vpop.f32.mrf.mxu1 }
 0x145   :  { %2965 = vst [vmem:[#allocation13_spill] sm:$0xff] %v2873_v9  ;;  %v2024_v12 = vpop.f32.mrf.mxu0  ;;  %v1291_v34 = vadd.f32 %v2013_v7, %v2821_v59 }
 0x146   :  { %v2088_v13 = vpop.f32.mrf.mxu1  ;;  %v2025_v50 = vadd.f32 %v2024_v12, %v2023_v8 }
 0x147   :  { %v2026_v14 = vpop.f32.mrf.mxu0  ;;  %v2895_v39 = vadd.f32 %v2077_v55, %v1291_v34  ;;  %v2981_v55 = vld [vmem:[#allocation7_spill] sm:$0xff] }
 0x148   :  { %v2090_v15 = vpop.f32.mrf.mxu1  ;;  %v1307_v49 = vadd.f32 %v2025_v50, %v2833_v29 }
 0x149   :  { %v2027_v16 = vpop.f32.mrf.mxu0 }
 0x14a   :  { %v2091_v17 = vpop.f32.mrf.mxu1  ;;  %v2028_v10 = vadd.f32 %v2027_v16, %v2026_v14 }
 0x14b   :  { %v2029_v19 = vpop.f32.mrf.mxu0  ;;  %v2092_v14 = vadd.f32 %v2091_v17, %v2090_v15 }
 0x14c   :  { %v2093_v22 = vpop.f32.mrf.mxu1  ;;  %v2972_v8 = vld [vmem:[#allocation13_spill] sm:$0xff] }
 0x14d   :  { %v2030_v23 = vpop.f32.mrf.mxu0  ;;  %v2089_v12 = vadd.f32 %v2088_v13, %v2972_v8 }
 0x14e   :  { %v2094_v24 = vpop.f32.mrf.mxu1  ;;  %v2031_v40 = vadd.f32 %v2030_v23, %v2029_v19  ;;  %v2973_v23 = vld [vmem:[#allocation3_spill] sm:$0xff] }
 0x14f   :  { %v2032_v25 = vpop.f32.mrf.mxu0  ;;  %v2095_v54 = vadd.f32 %v2094_v24, %v2093_v22  ;;  %v1404_v24 = vadd.f32 %v2089_v12, %v1307_v49 }
 0x150   :  { %v2096_v26 = vpop.f32.mrf.mxu1  ;;  %v1315_v59 = vadd.f32 %v2031_v40, %v2839_v47 }
 0x151   :  { %v2033_v28 = vpop.f32.mrf.mxu0 }
 0x152   :  { %v2097_v30 = vpop.f32.mrf.mxu1  ;;  %v2034_v62 = vadd.f32 %v2033_v28, %v2032_v25  ;;  %v1412_v29 = vadd.f32 %v2095_v54, %v1315_v59  ;;  %v1302_v25 = vadd.f32 %v2022_v46, %v2973_v23  ;;  %v2974_v28 = vld [vmem:[#allocation11_spill] sm:$0xff]  ;;  %v2982_v46 = vld [vmem:[#allocation9_spill] sm:$0xff] }
 0x153   :  { %v2035_v32 = vpop.f32.mrf.mxu0  ;;  %v2098_v63 = vadd.f32 %v2097_v30, %v2096_v26  ;;  %v2978_v30 = vld [vmem:[#allocation8_spill] sm:$0xff] }
 0x154   :  { %v2875_v33 = vpop.f32.mrf.mxu1  ;;  %v1318_v57 = vadd.f32 %v2034_v62, %v2971_v27 }
 0x155   :  { %2966 = vst [vmem:[#allocation14_spill] sm:$0xff] %v2875_v33  ;;  %v2036_v36 = vpop.f32.mrf.mxu0  ;;  %v1283_v33 = vadd.f32 %v2007_v42, %v2815_v43  ;;  %v1299_v43 = vadd.f32 %v2019_v38, %v2827_v11  ;;  %v2969_v38 = vld [vmem:[#allocation2_spill] sm:$0xff] }
 0x156   :  { %v2877_v37 = vpop.f32.mrf.mxu1  ;;  %v2904_v52 = vadd.f32 %v2016_v35, %v2969_v38  ;;  %v2037_v2 = vadd.f32 %v2036_v36, %v2035_v32  ;;  %v1415_v15 = vadd.f32 %v2098_v63, %v1318_v57 }
 0x157   :  { %2967 = vst [vmem:[#allocation15_spill] sm:$0xff] %v2877_v37  ;;  %v2038_v31 = vpop.f32.mrf.mxu0  ;;  %v1286_v37 = vadd.f32 %v2010_v21, %v2818_v51  ;;  %v1375_v51 = vadd.f32 %v2068_v44, %v1278_v56  ;;  %v1380_v7 = vadd.f32 %v2071_v18, %v1283_v33  ;;  %v2970_v56 = vld [vmem:[#allocation4_spill] sm:$0xff]  ;;  %v1396_v16 = vadd.f32 %v2083_v45, %v1299_v43 }
 0x158   :  { %v2879_v1 = vpop.f32.mrf.mxu1  ;;  %v1310_v47 = vadd.f32 %v2028_v10, %v2970_v56  ;;  %v2975_v33 = vld [vmem:[#allocation12_spill] sm:$0xff] }
 0x159   :  { %2968 = vst [vmem:[#allocation16_spill] sm:$0xff] %v2879_v1  ;;  %v2039_v5 = vpop.f32.mrf.mxu0  ;;  %v1383_v19 = vadd.f32 %v2074_v48, %v1286_v37  ;;  %v2086_v37 = vadd.f32 %v2975_v33, %v2974_v28  ;;  %v2980_v48 = vld [vmem:[#allocation6_spill] sm:$0xff] }
 0x15a   :  { %v2881_v20 = vpop.f32.mrf.mxu1  ;;  %v2040_v4 = vadd.f32 %v2039_v5, %v2038_v31  ;;  %v2979_v5 = vld [vmem:[#allocation10_spill] sm:$0xff]  ;;  %v1323_v50 = vadd.f32 %v2037_v2, %v2980_v48 }
 0x15b   :  { %v2041_v9 = vpop.f32.mrf.mxu0 }
 0x15c   :  { %v2884_v3 = vpop.f32.mrf.mxu1  ;;  %v1326_v35 = vadd.f32 %v2040_v4, %v2981_v55  ;;  %v1399_v4 = vadd.f32 %v2086_v37, %v1302_v25  ;;  %v1391_v25 = vadd.f32 %v2899_v41, %v2904_v52 }
 0x15d   :  { %v2042_v1 = vpop.f32.mrf.mxu0 }
 0x15e   :  { %v2106_v53 = vpop.f32.mrf.mxu1  ;;  %v2043_v58 = vadd.f32 %v2042_v1, %v2041_v9  ;;  %v1407_v1 = vadd.f32 %v2092_v14, %v1310_v47  ;;  %v2976_v9 = vld [vmem:[#allocation14_spill] sm:$0xff]  ;;  %v2977_v17 = vld [vmem:[#allocation15_spill] sm:$0xff] }
 0x15f   :  { %v2044_v0 = vpop.f32.mrf.mxu0  ;;  %v2101_v26 = vadd.f32 %v2977_v17, %v2976_v9  ;;  %v2107_v43 = vadd.f32 %v2106_v53, %v2884_v3 }
 0x160   :  { %v2892_v42 = vpop.f32.mrf.mxu1  ;;  %v1331_v31 = vadd.f32 %v2043_v58, %v2978_v30 }
 0x161   :  { %v2045_v21 = vpop.f32.mrf.mxu0  ;;  %v1420_v63 = vadd.f32 %v2101_v26, %v1323_v50 }
 0x162   :  { %v2109_v11 = vpop.f32.mrf.mxu1  ;;  %v2046_v40 = vadd.f32 %v2045_v21, %v2044_v0 }
 0x163   :  { %v2145_v60 = vpop.f32.mrf.mxu0  ;;  %v2110_v12 = vadd.f32 %v2109_v11, %v2892_v42 }
 0x164   :  { %v2153_v61 = vpop.f32.mrf.mxu1  ;;  %v1477_v22 = vadd.f32 %v2145_v60, %v1380_v7  ;;  %v1334_v49 = vadd.f32 %v2046_v40, %v2982_v46  ;;  %v1428_v60 = vadd.f32 %v2107_v43, %v1331_v31 }
 0x165   :  { %v1468_v6 = vpop.f32.mrf.mxu0  ;;  %v1509_v44 = vadd.f32 %v2153_v61, %v1412_v29  ;;  %v2983_v29 = vld [vmem:[#allocation16_spill] sm:$0xff] }
 0x166   :  { %v1500_v34 = vpop.f32.mrf.mxu1  ;;  %v1469_v32 = vadd.f32 %v1468_v6, %v2979_v5  ;;  %v1533_v59 = vmax.f32 %v1477_v22, 0.0  ;;  %v2104_v6 = vadd.f32 %v2881_v20, %v2983_v29  ;;  %v1431_v28 = vadd.f32 %v2110_v12, %v1334_v49 }
 0x167   :  { %v2146_v13 = vpop.f32.mrf.mxu0  ;;  %v1501_v10 = vadd.f32 %v1500_v34, %v1404_v24  ;;  %v1541_v38 = vmax.f32 %v1509_v44, 0.0 }
 0x168   :  { %v1480_v36 = vadd.f32 %v2146_v13, %v1383_v19  ;;  %v2154_v18 = vpop.f32.mrf.mxu1  ;;  %v1531_v54 = vmax.f32 %v1469_v32, 0.0  ;;  %v1423_v34 = vadd.f32 %v2104_v6, %v1326_v35 }
 0x169   :  { %v1512_v62 = vadd.f32 %v2154_v18, %v1415_v15  ;;  %v1471_v0 = vpop.f32.mrf.mxu0  ;;  %v1539_v14 = vmax.f32 %v1501_v10, 0.0 }
 0x16a   :  { %v1534_v21 = vmax.f32 %v1480_v36, 0.0  ;;  %v1472_v7 = vadd.f32 %v1471_v0, %v1375_v51  ;;  %v1503_v45 = vpop.f32.mrf.mxu1 }
 0x16b   :  { %v1542_v56 = vmax.f32 %v1512_v62, 0.0  ;;  %v1504_v47 = vadd.f32 %v1503_v45, %v1407_v1  ;;  %v2149_v19 = vpop.f32.mrf.mxu0 }
 0x16c   :  { %v1816_v27 = vpack.c.bf16 %v1534_v21, %v1533_v59  ;;  %v1532_v57 = vmax.f32 %v1472_v7, 0.0  ;;  %v2157_v8 = vpop.f32.mrf.mxu1  ;;  %v1493_v61 = vadd.f32 %v2149_v19, %v1396_v16 }
 0x16d   :  { %v1836_v58 = vpack.c.bf16 %v1542_v56, %v1541_v38  ;;  %v1540_v3 = vmax.f32 %v1504_v47, 0.0  ;;  %v1484_v53 = vpop.f32.mrf.mxu0  ;;  %v1525_v11 = vadd.f32 %v2157_v8, %v1428_v60 }
 0x16e   :  { %1848 = vst [vmem:[%s2953_s3 + $0x8] sm:$0xff] %v1816_v27   ;;  %v1811_v51 = vpack.c.bf16 %v1532_v57, %v1531_v54  ;;  %v1516_v2 = vpop.f32.mrf.mxu1  ;;  %v1485_v16 = vadd.f32 %v1484_v53, %v2895_v39  ;;  %v1537_v40 = vmax.f32 %v1493_v61, 0.0 }
 0x16f   :  { %1852 = vst [vmem:[%s2953_s3 + $0x28] sm:$0xff] %v1836_v58   ;;  %v1831_v42 = vpack.c.bf16 %v1540_v3, %v1539_v14  ;;  %v2150_v23 = vpop.f32.mrf.mxu0  ;;  %v1517_v20 = vadd.f32 %v1516_v2, %v1420_v63  ;;  %v1545_v1 = vmax.f32 %v1525_v11, 0.0 }
 0x170   :  { %1812 = vst [vmem:[%s2953_s3] sm:$0xff] %v1811_v51   ;;  %v1496_v33 = vadd.f32 %v2150_v23, %v1399_v4  ;;  %v2158_v22 = vpop.f32.mrf.mxu1  ;;  %v1535_v17 = vmax.f32 %v1485_v16, 0.0 }
 0x171   :  { %1851 = vst [vmem:[%s2953_s3 + $0x20] sm:$0xff] %v1831_v42   ;;  %v1528_v37 = vadd.f32 %v2158_v22, %v1431_v28  ;;  %v1487_v24 = vpop.f32.mrf.mxu0  ;;  %v1543_v31 = vmax.f32 %v1517_v20, 0.0 }
 0x172   :  { %v1538_v44 = vmax.f32 %v1496_v33, 0.0  ;;  %v1488_v13 = vadd.f32 %v1487_v24, %v1391_v25  ;;  %v1519_v15 = vpop.f32.mrf.mxu1 }
 0x173   :  { %v1546_v9 = vmax.f32 %v1528_v37, 0.0  ;;  %v1520_v39 = vadd.f32 %v1519_v15, %v1423_v34 }
 0x174   :  { %v1826_v26 = vpack.c.bf16 %v1538_v44, %v1537_v40  ;;  %v1536_v30 = vmax.f32 %v1488_v13, 0.0 }
 0x175   :  { %v1846_v41 = vpack.c.bf16 %v1546_v9, %v1545_v1  ;;  %v1544_v52 = vmax.f32 %v1520_v39, 0.0 }
 0x176   :  { %1850 = vst [vmem:[%s2953_s3 + $0x18] sm:$0xff] %v1826_v26   ;;  %v1821_v5 = vpack.c.bf16 %v1536_v30, %v1535_v17 }
 0x177   :  { %1854 = vst [vmem:[%s2953_s3 + $0x38] sm:$0xff] %v1846_v41   ;;  %v1841_v32 = vpack.c.bf16 %v1544_v52, %v1543_v31 }
 0x178   :  { %1849 = vst [vmem:[%s2953_s3 + $0x10] sm:$0xff] %v1821_v5  }
 0x179   :  { %1853 = vst [vmem:[%s2953_s3 + $0x30] sm:$0xff] %v1841_v32  }

// kernel: resnet_feature_extractor_forward.26
= control target key start
LH: loop header
LB: loop body
LE: loop exit
PB: predicated region body
PF: predicated region fallthrough
CT: control target
= control target key end

     0   :  { %s3196_s1 = inlined_call_operand.vmem [shape: bf16[1152,128], index: 1, kind: input, shape index: {}]   ;;  %s3197_s0 = inlined_call_operand.vmem [shape: bf16[128,1152], index: 0, kind: input, shape index: {}]   ;;  %s3198_s2 = inlined_call_operand.vmem [shape: f32[1,128], index: 2, kind: input, shape index: {}]   ;;  %s3199_s3 = inlined_call_operand.vmem [shape: bf16[128,128], index: 3, kind: input, shape index: {}]   ;;  %s3200_s4 = inlined_call_operand.vmem [shape: bf16[128,128], index: 4, kind: output, shape index: {}]  }
   0x1   :  { %v2265_v0 = vld [vmem:[%s3196_s1 + $0x78] sm:$0xff]   ;;  %v2269_v4 = vld [vmem:[%s3196_s1 + $0x70] sm:$0xff]   ;;  %v2273_v8 = vld [vmem:[%s3196_s1 + $0x68] sm:$0xff]  }
   0x2   :  { %v2266_v1 = vld [vmem:[%s3196_s1 + $0xf8] sm:$0xff]   ;;  %1945 = vmatprep.subr.bf16.mxu0 %v2265_v0  ;;  %v2270_v5 = vld [vmem:[%s3196_s1 + $0xf0] sm:$0xff]   ;;  %v2274_v9 = vld [vmem:[%s3196_s1 + $0xe8] sm:$0xff]  }
   0x3   :  { %v2267_v2 = vld [vmem:[%s3196_s1 + $0x38] sm:$0xff]   ;;  %2009 = vmatprep.subr.bf16.mxu1 %v2266_v1  ;;  %v2271_v6 = vld [vmem:[%s3196_s1 + $0x30] sm:$0xff]   ;;  %v2275_v10 = vld [vmem:[%s3196_s1 + $0x28] sm:$0xff]  }
   0x4   :  { %v2268_v3 = vld [vmem:[%s3196_s1 + $0xb8] sm:$0xff]   ;;  %1946 = vmatpush3.bf16.msra.mxu0 %v2267_v2  ;;  %v2272_v7 = vld [vmem:[%s3196_s1 + $0xb0] sm:$0xff]   ;;  %v2276_v11 = vld [vmem:[%s3196_s1 + $0xa8] sm:$0xff]  }
   0x5   :  { %2010 = vmatpush3.bf16.msra.mxu1 %v2268_v3  ;;  %1947 = vmatprep.subr.bf16.mxu0 %v2269_v4  ;;  %v2277_v12 = vld [vmem:[%s3196_s1 + $0x60] sm:$0xff]   ;;  %v2281_v16 = vld [vmem:[%s3196_s1 + $0x58] sm:$0xff]   ;;  %v2285_v20 = vld [vmem:[%s3196_s1 + $0x50] sm:$0xff]  }
   0x6   :  { %2011 = vmatprep.subr.bf16.mxu1 %v2270_v5  ;;  %v2278_v13 = vld [vmem:[%s3196_s1 + $0xe0] sm:$0xff]   ;;  %v2282_v17 = vld [vmem:[%s3196_s1 + $0xd8] sm:$0xff]   ;;  %v2286_v21 = vld [vmem:[%s3196_s1 + $0xd0] sm:$0xff]  }
   0x7   :  { %v2279_v14 = vld [vmem:[%s3196_s1 + $0x20] sm:$0xff]   ;;  %v2283_v18 = vld [vmem:[%s3196_s1 + $0x18] sm:$0xff]   ;;  %v2287_v22 = vld [vmem:[%s3196_s1 + $0x10] sm:$0xff]  }
   0x8   :  { %1948 = vmatpush3.bf16.msra.mxu0 %v2271_v6  ;;  %v2280_v15 = vld [vmem:[%s3196_s1 + $0xa0] sm:$0xff]   ;;  %v2284_v19 = vld [vmem:[%s3196_s1 + $0x98] sm:$0xff]   ;;  %v2288_v23 = vld [vmem:[%s3196_s1 + $0x90] sm:$0xff]  }
   0x9   :  { %2012 = vmatpush3.bf16.msra.mxu1 %v2272_v7  ;;  %1949 = vmatprep.subr.bf16.mxu0 %v2273_v8  ;;  %v2289_v24 = vld [vmem:[%s3196_s1 + $0x48] sm:$0xff]   ;;  %v2293_v28 = vld [vmem:[%s3196_s1 + $0x40] sm:$0xff]   ;;  %v2303_v36 = vld [vmem:[%s3196_s1 + $0x178] sm:$0xff]  }
   0xa   :  { %2013 = vmatprep.subr.bf16.mxu1 %v2274_v9  ;;  %v2290_v25 = vld [vmem:[%s3196_s1 + $0xc8] sm:$0xff]   ;;  %v2294_v29 = vld [vmem:[%s3196_s1 + $0xc0] sm:$0xff]   ;;  %v2304_v37 = vld [vmem:[%s3196_s1 + $0x1f8] sm:$0xff]  }
   0xb   :  { %v2291_v26 = vld [vmem:[%s3196_s1 + $0x8] sm:$0xff]   ;;  %v2295_v30 = vld [vmem:[%s3196_s1] sm:$0xff]   ;;  %v2305_v38 = vld [vmem:[%s3196_s1 + $0x138] sm:$0xff]  }
   0xc   :  { %1950 = vmatpush3.bf16.msra.mxu0 %v2275_v10  ;;  %v2292_v27 = vld [vmem:[%s3196_s1 + $0x88] sm:$0xff]   ;;  %v2296_v31 = vld [vmem:[%s3196_s1 + $0x80] sm:$0xff]   ;;  %v2306_v39 = vld [vmem:[%s3196_s1 + $0x1b8] sm:$0xff]  }
   0xd   :  { %2014 = vmatpush3.bf16.msra.mxu1 %v2276_v11  ;;  %1951 = vmatprep.subr.bf16.mxu0 %v2277_v12  ;;  %v2297_v32 = vld [vmem:[%s3197_s0] ss:$36 sps:$4 sm:$0xff]   ;;  %v2300_v34 = vld [vmem:[%s3197_s0 + $0x8] ss:$36 sps:$4 sm:$0xff]   ;;  %v2309_v41 = vld [vmem:[%s3197_s0 + $0x54] ss:$36 sps:$4 sm:$0xff]  }
   0xe   :  { %2015 = vmatprep.subr.bf16.mxu1 %v2278_v13  ;;  %v2299_v33 = vld [vmem:[%s3197_s0 + $0x4] ss:$36 sps:$4 sm:$0xff]   ;;  %v2302_v35 = vld [vmem:[%s3197_s0 + $0xc] ss:$36 sps:$4 sm:$0xff]   ;;  %v2317_v48 = vld [vmem:[%s3197_s0 + $0x94] ss:$36 sps:$4 sm:$0xff]  }
   0xf   :  { %1081 = vmatprep.mubr.bf16.mxu0 %v2299_v33  ;;  %1178 = vmatprep.mubr.bf16.mxu1 %v2302_v35  ;;  %v2307_v40 = vld [vmem:[%s3197_s0 + $0x4c] ss:$36 sps:$4 sm:$0xff]   ;;  %v2319_v49 = vld [vmem:[%s3197_s0 + $0x9c] ss:$36 sps:$4 sm:$0xff]   ;;  %v2329_v57 = vld [vmem:[%s3197_s0 + $0xe4] ss:$36 sps:$4 sm:$0xff]  }
  0x10   :  { %1952 = vmatpush3.bf16.msra.mxu0 %v2279_v14  ;;  %v2311_v42 = vld [vmem:[%s3197_s0 + $0x48] ss:$36 sps:$4 sm:$0xff]   ;;  %v2312_v43 = vld [vmem:[%s3197_s0 + $0x50] ss:$36 sps:$4 sm:$0xff]   ;;  %v2322_v51 = vld [vmem:[%s3197_s0 + $0x98] ss:$36 sps:$4 sm:$0xff]  }
  0x11   :  { %2016 = vmatpush3.bf16.msra.mxu1 %v2280_v15  ;;  %1953 = vmatprep.subr.bf16.mxu0 %v2281_v16  ;;  %v2313_v44 = vld [vmem:[%s3196_s1 + $0x170] sm:$0xff]   ;;  %v2323_v52 = vld [vmem:[%s3196_s1 + $0x168] sm:$0xff]   ;;  %v2327_v56 = vld [vmem:[%s3197_s0 + $0xdc] ss:$36 sps:$4 sm:$0xff]  }
  0x12   :  { %2017 = vmatprep.subr.bf16.mxu1 %v2282_v17  ;;  %v2314_v45 = vld [vmem:[%s3196_s1 + $0x1f0] sm:$0xff]   ;;  %v2324_v53 = vld [vmem:[%s3196_s1 + $0x1e8] sm:$0xff]   ;;  %v2331_v58 = vld [vmem:[%s3197_s0 + $0xd8] ss:$36 sps:$4 sm:$0xff]  }
  0x13   :  { %v2315_v46 = vld [vmem:[%s3196_s1 + $0x130] sm:$0xff]   ;;  %v2325_v54 = vld [vmem:[%s3196_s1 + $0x128] sm:$0xff]   ;;  %v2332_v59 = vld [vmem:[%s3197_s0 + $0xe0] ss:$36 sps:$4 sm:$0xff]  }
  0x14   :  { %1954 = vmatpush3.bf16.msra.mxu0 %v2283_v18  ;;  %v2316_v47 = vld [vmem:[%s3196_s1 + $0x1b0] sm:$0xff]   ;;  %v2326_v55 = vld [vmem:[%s3196_s1 + $0x1a8] sm:$0xff]   ;;  %v2333_v60 = vld [vmem:[%s3196_s1 + $0x160] sm:$0xff]  }
  0x15   :  { %2018 = vmatpush3.bf16.msra.mxu1 %v2284_v19  ;;  %1955 = vmatprep.subr.bf16.mxu0 %v2285_v20  ;;  %v2321_v50 = vld [vmem:[%s3197_s0 + $0x90] ss:$36 sps:$4 sm:$0xff]   ;;  %v2334_v61 = vld [vmem:[%s3196_s1 + $0x1e0] sm:$0xff]   ;;  %v2343_v3 = vld [vmem:[%s3196_s1 + $0x158] sm:$0xff]  }
  0x16   :  { %2019 = vmatprep.subr.bf16.mxu1 %v2286_v21  ;;  %v2335_v62 = vld [vmem:[%s3196_s1 + $0x120] sm:$0xff]   ;;  %v2339_v1 = vld [vmem:[%s3197_s0 + $0x12c] ss:$36 sps:$4 sm:$0xff]   ;;  %v2344_v5 = vld [vmem:[%s3196_s1 + $0x1d8] sm:$0xff]  }
  0x17   :  { %v2336_v63 = vld [vmem:[%s3196_s1 + $0x1a0] sm:$0xff]   ;;  %v2342_v4 = vld [vmem:[%s3197_s0 + $0x128] ss:$36 sps:$4 sm:$0xff]   ;;  %v2345_v6 = vld [vmem:[%s3196_s1 + $0x118] sm:$0xff]  }
  0x18   :  { %1956 = vmatpush3.bf16.msra.mxu0 %v2287_v22  ;;  %v2337_v0 = vld [vmem:[%s3197_s0 + $0x124] ss:$36 sps:$4 sm:$0xff]   ;;  %v2346_v7 = vld [vmem:[%s3196_s1 + $0x198] sm:$0xff]   ;;  %v2347_v8 = vld [vmem:[%s3197_s0 + $0x16c] ss:$36 sps:$4 sm:$0xff]  }
  0x19   :  { %2020 = vmatpush3.bf16.msra.mxu1 %v2288_v23  ;;  %1957 = vmatprep.subr.bf16.mxu0 %v2289_v24  ;;  %v2341_v2 = vld [vmem:[%s3197_s0 + $0x120] ss:$36 sps:$4 sm:$0xff]   ;;  %v2349_v9 = vld [vmem:[%s3197_s0 + $0x174] ss:$36 sps:$4 sm:$0xff]   ;;  %v2351_v12 = vld [vmem:[%s3197_s0 + $0x168] ss:$36 sps:$4 sm:$0xff]  }
  0x1a   :  { %2021 = vmatprep.subr.bf16.mxu1 %v2290_v25  ;;  %v2353_v10 = vld [vmem:[%s3196_s1 + $0x150] sm:$0xff]   ;;  %v2359_v17 = vld [vmem:[%s3197_s0 + $0x1bc] ss:$36 sps:$4 sm:$0xff]   ;;  %v2363_v18 = vld [vmem:[%s3196_s1 + $0x148] sm:$0xff]  }
  0x1b   :  { %v2354_v11 = vld [vmem:[%s3196_s1 + $0x1d0] sm:$0xff]   ;;  %v2364_v19 = vld [vmem:[%s3196_s1 + $0x1c8] sm:$0xff]   ;;  %v2362_v23 = vld [vmem:[%s3197_s0 + $0x1b8] ss:$36 sps:$4 sm:$0xff]  }
  0x1c   :  { %1958 = vmatpush3.bf16.msra.mxu0 %v2291_v26  ;;  %v2355_v13 = vld [vmem:[%s3196_s1 + $0x110] sm:$0xff]   ;;  %v2365_v20 = vld [vmem:[%s3196_s1 + $0x108] sm:$0xff]   ;;  %v2367_v24 = vld [vmem:[%s3197_s0 + $0x1fc] ss:$36 sps:$4 sm:$0xff]  }
  0x1d   :  { %2022 = vmatpush3.bf16.msra.mxu1 %v2292_v27  ;;  %1959 = vmatprep.subr.bf16.mxu0 %v2293_v28  ;;  %v2356_v14 = vld [vmem:[%s3196_s1 + $0x190] sm:$0xff]   ;;  %v2366_v21 = vld [vmem:[%s3196_s1 + $0x188] sm:$0xff]   ;;  %v2373_v26 = vld [vmem:[%s3196_s1 + $0x140] sm:$0xff]  }
  0x1e   :  { %2023 = vmatprep.subr.bf16.mxu1 %v2294_v29  ;;  %v2352_v15 = vld [vmem:[%s3197_s0 + $0x170] ss:$36 sps:$4 sm:$0xff]   ;;  %v2369_v25 = vld [vmem:[%s3197_s0 + $0x204] ss:$36 sps:$4 sm:$0xff]  }
  0x1f   :  { %v2357_v16 = vld [vmem:[%s3197_s0 + $0x1b4] ss:$36 sps:$4 sm:$0xff]   ;;  %v2374_v27 = vld [vmem:[%s3196_s1 + $0x1c0] sm:$0xff]  }
  0x20   :  { %1960 = vmatpush3.bf16.msra.mxu0 %v2295_v30  ;;  %v2361_v22 = vld [vmem:[%s3197_s0 + $0x1b0] ss:$36 sps:$4 sm:$0xff]   ;;  %v2375_v28 = vld [vmem:[%s3196_s1 + $0x100] sm:$0xff]   ;;  %v2371_v30 = vld [vmem:[%s3197_s0 + $0x1f8] ss:$36 sps:$4 sm:$0xff]  }
  0x21   :  { %2024 = vmatpush3.bf16.msra.mxu1 %v2296_v31  ;;  %2073 = vmatprep.subr.bf16.mxu0 %v2303_v36  ;;  %v2376_v29 = vld [vmem:[%s3196_s1 + $0x180] sm:$0xff]   ;;  %v2379_v33 = vld [vmem:[%s3197_s0 + $0x14] ss:$36 sps:$4 sm:$0xff]  }
  0x22   :  { %2137 = vmatprep.subr.bf16.mxu1 %v2304_v37  ;;  %v2372_v31 = vld [vmem:[%s3197_s0 + $0x200] ss:$36 sps:$4 sm:$0xff]   ;;  %v2377_v35 = vld [vmem:[%s3197_s0 + $0x10] ss:$36 sps:$4 sm:$0xff]   ;;  %v2380_v36 = vld [vmem:[%s3197_s0 + $0x18] ss:$36 sps:$4 sm:$0xff]  }
  0x23   :  { %1082 = vmatmul.mubr.bf16.vlgmr.msra.gmra.mxu0 %v2297_v32  ;;  %v2383_v32 = vld [vmem:[%s3196_s1 + $0x238] sm:$0xff]  }
  0x24   :  { %1179 = vmatmul.mubr.bf16.vlgmr.msra.gmra.mxu1 %v2300_v34  ;;  %2074 = vmatpush3.bf16.msra.mxu0 %v2305_v38  ;;  %v2382_v34 = vld [vmem:[%s3197_s0 + $0x1c] ss:$36 sps:$4 sm:$0xff]   ;;  %v2386_v38 = vld [vmem:[%s3197_s0 + $0x64] ss:$36 sps:$4 sm:$0xff]  }
  0x25   :  { %2138 = vmatpush3.bf16.msra.mxu1 %v2306_v39  ;;  %1089 = vmatprep.mubr.bf16.mxu0 %v2307_v40  ;;  %v2384_v37 = vld [vmem:[%s3197_s0 + $0x5c] ss:$36 sps:$4 sm:$0xff]   ;;  %v2390_v39 = vld [vmem:[%s3196_s1 + $0x230] sm:$0xff]   ;;  %v2397_v40 = vld [vmem:[%s3196_s1 + $0x228] sm:$0xff]  }
  0x26   :  { %1186 = vmatprep.mubr.bf16.mxu1 %v2309_v41  ;;  %2075 = vmatprep.subr.bf16.mxu0 %v2313_v44  ;;  %v2388_v41 = vld [vmem:[%s3197_s0 + $0x58] ss:$36 sps:$4 sm:$0xff]   ;;  %v2393_v44 = vld [vmem:[%s3197_s0 + $0xac] ss:$36 sps:$4 sm:$0xff]  }
  0x27   :  { %2139 = vmatprep.subr.bf16.mxu1 %v2314_v45  ;;  %v2404_v45 = vld [vmem:[%s3196_s1 + $0x220] sm:$0xff]  }
  0x28   :  { %2076 = vmatpush3.bf16.msra.mxu0 %v2315_v46  ;;  %v2411_v46 = vld [vmem:[%s3196_s1 + $0x218] sm:$0xff]  }
  0x29   :  { %2140 = vmatpush3.bf16.msra.mxu1 %v2316_v47  ;;  %2077 = vmatprep.subr.bf16.mxu0 %v2323_v52  ;;  %v2395_v47 = vld [vmem:[%s3197_s0 + $0xa0] ss:$36 sps:$4 sm:$0xff]   ;;  %v2402_v52 = vld [vmem:[%s3197_s0 + $0xe8] ss:$36 sps:$4 sm:$0xff]  }
  0x2a   :  { %2141 = vmatprep.subr.bf16.mxu1 %v2324_v53  ;;  %v2425_v53 = vld [vmem:[%s3196_s1 + $0x208] sm:$0xff]  }
  0x2b   :  { %1090 = vmatmul.mubr.bf16.gmra.mxu0 %v2311_v42  ;;  %v2389_v42 = vld [vmem:[%s3197_s0 + $0x60] ss:$36 sps:$4 sm:$0xff]  }
  0x2c   :  { %1187 = vmatmul.mubr.bf16.gmra.mxu1 %v2312_v43  ;;  %1097 = vmatprep.mubr.bf16.mxu0 %v2317_v48  ;;  %v2391_v43 = vld [vmem:[%s3197_s0 + $0xa4] ss:$36 sps:$4 sm:$0xff]  }
  0x2d   :  { %1194 = vmatprep.mubr.bf16.mxu1 %v2319_v49  ;;  %2078 = vmatpush3.bf16.msra.mxu0 %v2325_v54  ;;  %v2396_v48 = vld [vmem:[%s3197_s0 + $0xa8] ss:$36 sps:$4 sm:$0xff]   ;;  %v2403_v54 = vld [vmem:[%s3197_s0 + $0xf0] ss:$36 sps:$4 sm:$0xff]  }
  0x2e   :  { %2142 = vmatpush3.bf16.msra.mxu1 %v2326_v55  ;;  %2079 = vmatprep.subr.bf16.mxu0 %v2333_v60  ;;  %v2398_v49 = vld [vmem:[%s3197_s0 + $0xec] ss:$36 sps:$4 sm:$0xff]   ;;  %v2405_v55 = vld [vmem:[%s3197_s0 + $0x134] ss:$36 sps:$4 sm:$0xff]   ;;  %v2412_v60 = vld [vmem:[%s3197_s0 + $0x17c] ss:$36 sps:$4 sm:$0xff]  }
  0x2f   :  { %2143 = vmatprep.subr.bf16.mxu1 %v2334_v61  ;;  %v2414_v61 = vld [vmem:[%s3197_s0 + $0x184] ss:$36 sps:$4 sm:$0xff]  }
  0x31   :  { %2080 = vmatpush3.bf16.msra.mxu0 %v2335_v62  ;;  %v2416_v62 = vld [vmem:[%s3197_s0 + $0x178] ss:$36 sps:$4 sm:$0xff]  }
  0x32   :  { %2144 = vmatpush3.bf16.msra.mxu1 %v2336_v63  ;;  %2081 = vmatprep.subr.bf16.mxu0 %v2343_v3  ;;  %v2417_v63 = vld [vmem:[%s3197_s0 + $0x180] ss:$36 sps:$4 sm:$0xff]   ;;  %v2424_v3 = vld [vmem:[%s3197_s0 + $0x1c8] ss:$36 sps:$4 sm:$0xff]  }
  0x33   :  { %1098 = vmatmul.mubr.bf16.gmra.mxu0 %v2321_v50  ;;  %2145 = vmatprep.subr.bf16.mxu1 %v2344_v5  ;;  %v2400_v50 = vld [vmem:[%s3197_s0 + $0xf4] ss:$36 sps:$4 sm:$0xff]  }
  0x34   :  { %1195 = vmatmul.mubr.bf16.gmra.mxu1 %v2322_v51  ;;  %1105 = vmatprep.mubr.bf16.mxu0 %v2327_v56  ;;  %v2418_v51 = vld [vmem:[%s3196_s1 + $0x210] sm:$0xff]   ;;  %v2407_v56 = vld [vmem:[%s3197_s0 + $0x13c] ss:$36 sps:$4 sm:$0xff]  }
  0x35   :  { %1202 = vmatprep.mubr.bf16.mxu1 %v2329_v57  ;;  %2082 = vmatpush3.bf16.msra.mxu0 %v2345_v6  ;;  %v2432_v57 = vld [vmem:[%s3196_s1 + $0x200] sm:$0xff]   ;;  %v2428_v5 = vld [vmem:[%s3197_s0 + $0x214] ss:$36 sps:$4 sm:$0xff]   ;;  %v2430_v6 = vld [vmem:[%s3197_s0 + $0x208] ss:$36 sps:$4 sm:$0xff]  }
  0x36   :  { %2146 = vmatpush3.bf16.msra.mxu1 %v2346_v7  ;;  %2083 = vmatprep.subr.bf16.mxu0 %v2353_v10  ;;  %v2431_v7 = vld [vmem:[%s3197_s0 + $0x210] ss:$36 sps:$4 sm:$0xff]   ;;  %v2435_v10 = vld [vmem:[%s3197_s0 + $0x68] ss:$36 sps:$4 sm:$0xff]  }
  0x37   :  { %2147 = vmatprep.subr.bf16.mxu1 %v2354_v11  ;;  %v2436_v11 = vld [vmem:[%s3197_s0 + $0x188] ss:$36 sps:$4 sm:$0xff]  }
  0x39   :  { %2084 = vmatpush3.bf16.msra.mxu0 %v2355_v13  ;;  %v2438_v13 = vld [vmem:[%s3197_s0 + $0x1d0] ss:$36 sps:$4 sm:$0xff]  }
  0x3a   :  { %2148 = vmatpush3.bf16.msra.mxu1 %v2356_v14  ;;  %2085 = vmatprep.subr.bf16.mxu0 %v2363_v18  ;;  %v2439_v14 = vld [vmem:[%s3197_s0 + $0xf8] ss:$36 sps:$4 sm:$0xff]   ;;  %v2901_v18 = vld [vmem:[%s3198_s2] ss:$0 sm:$0xff] }
  0x3b   :  { %1106 = vmatmul.mubr.bf16.gmra.mxu0 %v2331_v58  ;;  %2149 = vmatprep.subr.bf16.mxu1 %v2364_v19  ;;  %v2409_v58 = vld [vmem:[%s3197_s0 + $0x130] ss:$36 sps:$4 sm:$0xff]  }
  0x3c   :  { %1203 = vmatmul.mubr.bf16.gmra.mxu1 %v2332_v59  ;;  %1113 = vmatprep.mubr.bf16.mxu0 %v2337_v0  ;;  %v2410_v59 = vld [vmem:[%s3197_s0 + $0x138] ss:$36 sps:$4 sm:$0xff]   ;;  %v2419_v0 = vld [vmem:[%s3197_s0 + $0x1c4] ss:$36 sps:$4 sm:$0xff]  }
  0x3d   :  { %1210 = vmatprep.mubr.bf16.mxu1 %v2339_v1  ;;  %2086 = vmatpush3.bf16.msra.mxu0 %v2365_v20  ;;  %v2421_v1 = vld [vmem:[%s3197_s0 + $0x1cc] ss:$36 sps:$4 sm:$0xff]  }
  0x3e   :  { %2150 = vmatpush3.bf16.msra.mxu1 %v2366_v21  ;;  %2087 = vmatprep.subr.bf16.mxu0 %v2373_v26 }
  0x3f   :  { %2151 = vmatprep.subr.bf16.mxu1 %v2374_v27 }
  0x41   :  { %2088 = vmatpush3.bf16.msra.mxu0 %v2375_v28 }
  0x42   :  { %2152 = vmatpush3.bf16.msra.mxu1 %v2376_v29  ;;  %2217 = vmatprep.subr.bf16.mxu0 %v2383_v32 }
  0x43   :  { %1114 = vmatmul.mubr.bf16.gmra.mxu0 %v2341_v2  ;;  %2249 = vmatprep.subr.bf16.mxu1 %v2383_v32  ;;  %v2423_v2 = vld [vmem:[%s3197_s0 + $0x1c0] ss:$36 sps:$4 sm:$0xff]  }
  0x44   :  { %1211 = vmatmul.mubr.bf16.gmra.mxu1 %v2342_v4  ;;  %1121 = vmatprep.mubr.bf16.mxu0 %v2347_v8  ;;  %v2426_v4 = vld [vmem:[%s3197_s0 + $0x20c] ss:$36 sps:$4 sm:$0xff]   ;;  %v2433_v8 = vld [vmem:[%s3197_s0 + $0x20] ss:$36 sps:$4 sm:$0xff]  }
  0x45   :  { %1218 = vmatprep.mubr.bf16.mxu1 %v2349_v9  ;;  %v2434_v9 = vld [vmem:[%s3197_s0 + $0x140] ss:$36 sps:$4 sm:$0xff]  }
  0x4b   :  { %1122 = vmatmul.mubr.bf16.gmra.mxu0 %v2351_v12  ;;  %v2437_v12 = vld [vmem:[%s3197_s0 + $0xb0] ss:$36 sps:$4 sm:$0xff]  }
  0x4c   :  { %1219 = vmatmul.mubr.bf16.gmra.mxu1 %v2352_v15  ;;  %1129 = vmatprep.mubr.bf16.mxu0 %v2357_v16  ;;  %v2440_v15 = vld [vmem:[%s3197_s0 + $0x218] ss:$36 sps:$4 sm:$0xff]  }
  0x4d   :  { %1226 = vmatprep.mubr.bf16.mxu1 %v2359_v17 }
  0x53   :  { %1130 = vmatmul.mubr.bf16.gmra.mxu0 %v2361_v22 }
  0x54   :  { %1227 = vmatmul.mubr.bf16.gmra.mxu1 %v2362_v23  ;;  %1137 = vmatprep.mubr.bf16.mxu0 %v2367_v24 }
  0x55   :  { %1234 = vmatprep.mubr.bf16.mxu1 %v2369_v25 }
  0x5b   :  { %1138 = vmatmul.mubr.bf16.gmra.mxu0 %v2371_v30 }
  0x5c   :  { %1235 = vmatmul.mubr.bf16.gmra.mxu1 %v2372_v31  ;;  %1275 = vmatprep.mubr.bf16.mxu0 %v2379_v33 }
  0x5d   :  { %1372 = vmatprep.mubr.bf16.mxu1 %v2382_v34 }
  0x63   :  { %1276 = vmatmul.mubr.bf16.vlgmr.msra.gmra.mxu0 %v2377_v35 }
  0x64   :  { %1373 = vmatmul.mubr.bf16.vlgmr.msra.gmra.mxu1 %v2380_v36  ;;  %2218 = vmatpush3.bf16.msra.mxu0 %v2383_v32 }
  0x65   :  { %2257 = vmatpush3.bf16.msra.mxu1 %v2383_v32  ;;  %1283 = vmatprep.mubr.bf16.mxu0 %v2384_v37 }
  0x66   :  { %1380 = vmatprep.mubr.bf16.mxu1 %v2386_v38  ;;  %2219 = vmatprep.subr.bf16.mxu0 %v2390_v39 }
  0x67   :  { %2250 = vmatprep.subr.bf16.mxu1 %v2390_v39 }
  0x68   :  { %2220 = vmatpush3.bf16.msra.mxu0 %v2390_v39 }
  0x69   :  { %2258 = vmatpush3.bf16.msra.mxu1 %v2390_v39  ;;  %2221 = vmatprep.subr.bf16.mxu0 %v2397_v40 }
  0x6a   :  { %2251 = vmatprep.subr.bf16.mxu1 %v2397_v40 }
  0x6b   :  { %1284 = vmatmul.mubr.bf16.gmra.mxu0 %v2388_v41 }
  0x6c   :  { %1381 = vmatmul.mubr.bf16.gmra.mxu1 %v2389_v42  ;;  %1291 = vmatprep.mubr.bf16.mxu0 %v2391_v43 }
  0x6d   :  { %1388 = vmatprep.mubr.bf16.mxu1 %v2393_v44  ;;  %2222 = vmatpush3.bf16.msra.mxu0 %v2397_v40 }
  0x6e   :  { %2259 = vmatpush3.bf16.msra.mxu1 %v2397_v40  ;;  %2223 = vmatprep.subr.bf16.mxu0 %v2404_v45 }
  0x6f   :  { %2252 = vmatprep.subr.bf16.mxu1 %v2404_v45 }
  0x71   :  { %2224 = vmatpush3.bf16.msra.mxu0 %v2404_v45 }
  0x72   :  { %2260 = vmatpush3.bf16.msra.mxu1 %v2404_v45  ;;  %2225 = vmatprep.subr.bf16.mxu0 %v2411_v46 }
  0x73   :  { %1292 = vmatmul.mubr.bf16.gmra.mxu0 %v2395_v47  ;;  %2253 = vmatprep.subr.bf16.mxu1 %v2411_v46 }
  0x74   :  { %1389 = vmatmul.mubr.bf16.gmra.mxu1 %v2396_v48  ;;  %1299 = vmatprep.mubr.bf16.mxu0 %v2398_v49 }
  0x75   :  { %1396 = vmatprep.mubr.bf16.mxu1 %v2400_v50  ;;  %2226 = vmatpush3.bf16.msra.mxu0 %v2411_v46 }
  0x76   :  { %2261 = vmatpush3.bf16.msra.mxu1 %v2411_v46  ;;  %2227 = vmatprep.subr.bf16.mxu0 %v2418_v51 }
  0x77   :  { %2254 = vmatprep.subr.bf16.mxu1 %v2418_v51 }
  0x79   :  { %2228 = vmatpush3.bf16.msra.mxu0 %v2418_v51 }
  0x7a   :  { %2262 = vmatpush3.bf16.msra.mxu1 %v2418_v51  ;;  %2229 = vmatprep.subr.bf16.mxu0 %v2425_v53 }
  0x7b   :  { %1300 = vmatmul.mubr.bf16.gmra.mxu0 %v2402_v52  ;;  %2255 = vmatprep.subr.bf16.mxu1 %v2425_v53 }
  0x7c   :  { %1397 = vmatmul.mubr.bf16.gmra.mxu1 %v2403_v54  ;;  %1307 = vmatprep.mubr.bf16.mxu0 %v2405_v55 }
  0x7d   :  { %1404 = vmatprep.mubr.bf16.mxu1 %v2407_v56  ;;  %2230 = vmatpush3.bf16.msra.mxu0 %v2425_v53 }
  0x7e   :  { %2263 = vmatpush3.bf16.msra.mxu1 %v2425_v53  ;;  %2231 = vmatprep.subr.bf16.mxu0 %v2432_v57 }
  0x7f   :  { %2256 = vmatprep.subr.bf16.mxu1 %v2432_v57 }
  0x81   :  { %2232 = vmatpush3.bf16.msra.mxu0 %v2432_v57 }
  0x82   :  { %2264 = vmatpush3.bf16.msra.mxu1 %v2432_v57 }
  0x83   :  { %1308 = vmatmul.mubr.bf16.gmra.mxu0 %v2409_v58 }
  0x84   :  { %1405 = vmatmul.mubr.bf16.gmra.mxu1 %v2410_v59  ;;  %1315 = vmatprep.mubr.bf16.mxu0 %v2412_v60 }
  0x85   :  { %1412 = vmatprep.mubr.bf16.mxu1 %v2414_v61 }
  0x8b   :  { %1316 = vmatmul.mubr.bf16.gmra.mxu0 %v2416_v62 }
  0x8c   :  { %1413 = vmatmul.mubr.bf16.gmra.mxu1 %v2417_v63  ;;  %1323 = vmatprep.mubr.bf16.mxu0 %v2419_v0 }
  0x8d   :  { %1420 = vmatprep.mubr.bf16.mxu1 %v2421_v1 }
  0x93   :  { %1324 = vmatmul.mubr.bf16.gmra.mxu0 %v2423_v2 }
  0x94   :  { %1421 = vmatmul.mubr.bf16.gmra.mxu1 %v2424_v3  ;;  %1331 = vmatprep.mubr.bf16.mxu0 %v2426_v4 }
  0x95   :  { %1428 = vmatprep.mubr.bf16.mxu1 %v2428_v5 }
  0x9b   :  { %1332 = vmatmul.mubr.bf16.gmra.mxu0 %v2430_v6 }
  0x9c   :  { %1429 = vmatmul.mubr.bf16.gmra.mxu1 %v2431_v7  ;;  %2233 = vmatprep.mubr.bf16.mxu0 %v2433_v8 }
  0x9d   :  { %2241 = vmatprep.mubr.bf16.mxu1 %v2434_v9 }
  0xa3   :  { %2234 = vmatmul.mubr.bf16.vlgmr.msra.gmra.mxu0 %v2435_v10 }
  0xa4   :  { %2242 = vmatmul.mubr.bf16.vlgmr.msra.gmra.mxu1 %v2436_v11  ;;  %2237 = vmatprep.mubr.bf16.mxu0 %v2437_v12 }
  0xa5   :  { %2245 = vmatprep.mubr.bf16.mxu1 %v2438_v13 }
  0xab   :  { %2238 = vmatmul.mubr.bf16.gmra.mxu0 %v2439_v14 }
  0xac   :  { %2246 = vmatmul.mubr.bf16.gmra.mxu1 %v2440_v15 }
  0xe3   :  { %v1961_v16 = vpop.f32.mrf.mxu0 }
  0xe4   :  { %v2025_v17 = vpop.f32.mrf.mxu1 }
  0xe5   :  { %v1962_v19 = vpop.f32.mrf.mxu0 }
  0xe6   :  { %v1963_v20 = vadd.f32 %v1962_v19, %v1961_v16  ;;  %v2026_v21 = vpop.f32.mrf.mxu1 }
  0xe7   :  { %v2027_v22 = vadd.f32 %v2026_v21, %v2025_v17  ;;  %v1964_v23 = vpop.f32.mrf.mxu0 }
  0xe8   :  { %v1084_v24 = vadd.f32 %v1963_v20, %v2901_v18  ;;  %v2028_v25 = vpop.f32.mrf.mxu1 }
  0xe9   :  { %v1965_v26 = vpop.f32.mrf.mxu0 }
  0xea   :  { %v2904_v27 = vadd.f32 %v2027_v22, %v1084_v24  ;;  %v1966_v28 = vadd.f32 %v1965_v26, %v1964_v23  ;;  %v2029_v29 = vpop.f32.mrf.mxu1 }
  0xeb   :  { %v2030_v30 = vadd.f32 %v2029_v29, %v2028_v25  ;;  %v1967_v31 = vpop.f32.mrf.mxu0 }
  0xec   :  { %v1087_v32 = vadd.f32 %v1966_v28, %v2901_v18  ;;  %v2031_v33 = vpop.f32.mrf.mxu1 }
  0xed   :  { %v1968_v34 = vpop.f32.mrf.mxu0 }
  0xee   :  { %v2907_v35 = vadd.f32 %v2030_v30, %v1087_v32  ;;  %v1969_v36 = vadd.f32 %v1968_v34, %v1967_v31  ;;  %v2032_v37 = vpop.f32.mrf.mxu1 }
  0xef   :  { %v2033_v38 = vadd.f32 %v2032_v37, %v2031_v33  ;;  %v1970_v39 = vpop.f32.mrf.mxu0 }
  0xf0   :  { %v1092_v40 = vadd.f32 %v1969_v36, %v2901_v18  ;;  %v2034_v41 = vpop.f32.mrf.mxu1 }
  0xf1   :  { %v1971_v42 = vpop.f32.mrf.mxu0 }
  0xf2   :  { %v2910_v43 = vadd.f32 %v2033_v38, %v1092_v40  ;;  %v1972_v44 = vadd.f32 %v1971_v42, %v1970_v39  ;;  %v2035_v45 = vpop.f32.mrf.mxu1 }
  0xf3   :  { %v2036_v46 = vadd.f32 %v2035_v45, %v2034_v41  ;;  %v1973_v47 = vpop.f32.mrf.mxu0 }
  0xf4   :  { %v1095_v48 = vadd.f32 %v1972_v44, %v2901_v18  ;;  %v2037_v49 = vpop.f32.mrf.mxu1 }
  0xf5   :  { %v1974_v50 = vpop.f32.mrf.mxu0 }
  0xf6   :  { %v2913_v51 = vadd.f32 %v2036_v46, %v1095_v48  ;;  %v1975_v52 = vadd.f32 %v1974_v50, %v1973_v47  ;;  %v2038_v53 = vpop.f32.mrf.mxu1 }
  0xf7   :  { %v2039_v54 = vadd.f32 %v2038_v53, %v2037_v49  ;;  %v1976_v55 = vpop.f32.mrf.mxu0 }
  0xf8   :  { %v1100_v56 = vadd.f32 %v1975_v52, %v2901_v18  ;;  %v2040_v57 = vpop.f32.mrf.mxu1 }
  0xf9   :  { %v1977_v58 = vpop.f32.mrf.mxu0 }
  0xfa   :  { %v2916_v59 = vadd.f32 %v2039_v54, %v1100_v56  ;;  %v1978_v60 = vadd.f32 %v1977_v58, %v1976_v55  ;;  %v2041_v61 = vpop.f32.mrf.mxu1 }
  0xfb   :  { %v2042_v62 = vadd.f32 %v2041_v61, %v2040_v57  ;;  %v1979_v63 = vpop.f32.mrf.mxu0 }
  0xfc   :  { %v1103_v0 = vadd.f32 %v1978_v60, %v2901_v18  ;;  %v2043_v1 = vpop.f32.mrf.mxu1 }
  0xfd   :  { %v1980_v2 = vpop.f32.mrf.mxu0 }
  0xfe   :  { %v2919_v3 = vadd.f32 %v2042_v62, %v1103_v0  ;;  %v1981_v4 = vadd.f32 %v1980_v2, %v1979_v63  ;;  %v2044_v5 = vpop.f32.mrf.mxu1 }
  0xff   :  { %v2045_v6 = vadd.f32 %v2044_v5, %v2043_v1  ;;  %v1982_v7 = vpop.f32.mrf.mxu0 }
 0x100   :  { %v1108_v8 = vadd.f32 %v1981_v4, %v2901_v18  ;;  %v2046_v9 = vpop.f32.mrf.mxu1 }
 0x101   :  { %v1983_v10 = vpop.f32.mrf.mxu0 }
 0x102   :  { %v2922_v11 = vadd.f32 %v2045_v6, %v1108_v8  ;;  %v1984_v12 = vadd.f32 %v1983_v10, %v1982_v7  ;;  %v2047_v13 = vpop.f32.mrf.mxu1 }
 0x103   :  { %v2048_v14 = vadd.f32 %v2047_v13, %v2046_v9  ;;  %v1985_v15 = vpop.f32.mrf.mxu0 }
 0x104   :  { %v1111_v16 = vadd.f32 %v1984_v12, %v2901_v18  ;;  %v2049_v17 = vpop.f32.mrf.mxu1 }
 0x105   :  { %v1986_v19 = vpop.f32.mrf.mxu0 }
 0x106   :  { %v2925_v20 = vadd.f32 %v2048_v14, %v1111_v16  ;;  %v1987_v21 = vadd.f32 %v1986_v19, %v1985_v15  ;;  %v2050_v22 = vpop.f32.mrf.mxu1 }
 0x107   :  { %v2051_v23 = vadd.f32 %v2050_v22, %v2049_v17  ;;  %v1988_v24 = vpop.f32.mrf.mxu0 }
 0x108   :  { %v1116_v25 = vadd.f32 %v1987_v21, %v2901_v18  ;;  %v2052_v26 = vpop.f32.mrf.mxu1 }
 0x109   :  { %v1989_v28 = vpop.f32.mrf.mxu0 }
 0x10a   :  { %v2928_v29 = vadd.f32 %v2051_v23, %v1116_v25  ;;  %v1990_v30 = vadd.f32 %v1989_v28, %v1988_v24  ;;  %v2053_v31 = vpop.f32.mrf.mxu1 }
 0x10b   :  { %v2054_v32 = vadd.f32 %v2053_v31, %v2052_v26  ;;  %v1991_v33 = vpop.f32.mrf.mxu0 }
 0x10c   :  { %v1119_v34 = vadd.f32 %v1990_v30, %v2901_v18  ;;  %v2055_v36 = vpop.f32.mrf.mxu1 }
 0x10d   :  { %v1992_v37 = vpop.f32.mrf.mxu0 }
 0x10e   :  { %v2931_v38 = vadd.f32 %v2054_v32, %v1119_v34  ;;  %v1993_v39 = vadd.f32 %v1992_v37, %v1991_v33  ;;  %v2056_v40 = vpop.f32.mrf.mxu1 }
 0x10f   :  { %v2057_v41 = vadd.f32 %v2056_v40, %v2055_v36  ;;  %v1994_v42 = vpop.f32.mrf.mxu0 }
 0x110   :  { %3207 = vst [vmem:[#allocation2_spill] sm:$0xff] %v2931_v38  ;;  %v1124_v44 = vadd.f32 %v1993_v39, %v2901_v18  ;;  %v2058_v45 = vpop.f32.mrf.mxu1 }
 0x111   :  { %v1995_v46 = vpop.f32.mrf.mxu0 }
 0x112   :  { %v2934_v47 = vadd.f32 %v2057_v41, %v1124_v44  ;;  %v1996_v48 = vadd.f32 %v1995_v46, %v1994_v42  ;;  %v2059_v49 = vpop.f32.mrf.mxu1 }
 0x113   :  { %v2060_v50 = vadd.f32 %v2059_v49, %v2058_v45  ;;  %v1997_v52 = vpop.f32.mrf.mxu0 }
 0x114   :  { %v1127_v53 = vadd.f32 %v1996_v48, %v2901_v18  ;;  %v2061_v54 = vpop.f32.mrf.mxu1 }
 0x115   :  { %v1998_v55 = vpop.f32.mrf.mxu0 }
 0x116   :  { %v2937_v56 = vadd.f32 %v2060_v50, %v1127_v53  ;;  %v1999_v57 = vadd.f32 %v1998_v55, %v1997_v52  ;;  %v2062_v58 = vpop.f32.mrf.mxu1 }
 0x117   :  { %v2063_v60 = vadd.f32 %v2062_v58, %v2061_v54  ;;  %v2000_v61 = vpop.f32.mrf.mxu0 }
 0x118   :  { %3208 = vst [vmem:[#allocation3_spill] sm:$0xff] %v2937_v56  ;;  %v1132_v62 = vadd.f32 %v1999_v57, %v2901_v18  ;;  %v2064_v63 = vpop.f32.mrf.mxu1 }
 0x119   :  { %v2001_v0 = vpop.f32.mrf.mxu0 }
 0x11a   :  { %v2940_v1 = vadd.f32 %v2063_v60, %v1132_v62  ;;  %v2002_v2 = vadd.f32 %v2001_v0, %v2000_v61  ;;  %v2065_v4 = vpop.f32.mrf.mxu1 }
 0x11b   :  { %v2066_v5 = vadd.f32 %v2065_v4, %v2064_v63  ;;  %v2003_v6 = vpop.f32.mrf.mxu0 }
 0x11c   :  { %3209 = vst [vmem:[#allocation4_spill] sm:$0xff] %v2940_v1  ;;  %v1135_v7 = vadd.f32 %v2002_v2, %v2901_v18  ;;  %v2067_v8 = vpop.f32.mrf.mxu1 }
 0x11d   :  { %v2004_v9 = vpop.f32.mrf.mxu0 }
 0x11e   :  { %v2943_v10 = vadd.f32 %v2066_v5, %v1135_v7  ;;  %v2005_v12 = vadd.f32 %v2004_v9, %v2003_v6  ;;  %v2068_v13 = vpop.f32.mrf.mxu1 }
 0x11f   :  { %v2069_v14 = vadd.f32 %v2068_v13, %v2067_v8  ;;  %v2006_v15 = vpop.f32.mrf.mxu0 }
 0x120   :  { %3210 = vst [vmem:[#allocation5_spill] sm:$0xff] %v2943_v10  ;;  %v1140_v16 = vadd.f32 %v2005_v12, %v2901_v18  ;;  %v2070_v17 = vpop.f32.mrf.mxu1 }
 0x121   :  { %v2007_v19 = vpop.f32.mrf.mxu0 }
 0x122   :  { %v2946_v21 = vadd.f32 %v2069_v14, %v1140_v16  ;;  %v2008_v22 = vadd.f32 %v2007_v19, %v2006_v15  ;;  %v2071_v23 = vpop.f32.mrf.mxu1 }
 0x123   :  { %v2072_v24 = vadd.f32 %v2071_v23, %v2070_v17  ;;  %v2089_v25 = vpop.f32.mrf.mxu0 }
 0x124   :  { %3211 = vst [vmem:[#allocation6_spill] sm:$0xff] %v2946_v21  ;;  %v1143_v26 = vadd.f32 %v2008_v22, %v2901_v18  ;;  %v2153_v28 = vpop.f32.mrf.mxu1 }
 0x125   :  { %v2090_v30 = vpop.f32.mrf.mxu0 }
 0x126   :  { %v2949_v31 = vadd.f32 %v2072_v24, %v1143_v26  ;;  %v2091_v32 = vadd.f32 %v2090_v30, %v2089_v25  ;;  %v2154_v33 = vpop.f32.mrf.mxu1 }
 0x127   :  { %v2092_v34 = vpop.f32.mrf.mxu0  ;;  %v2155_v37 = vadd.f32 %v2154_v33, %v2153_v28  ;;  %v3015_v33 = vld [vmem:[%s3199_s3 + $0x8] sm:$0xff]  }
 0x128   :  { %3212 = vst [vmem:[#allocation7_spill] sm:$0xff] %v2949_v31  ;;  %v1278_v36 = vadd.f32 %v2091_v32, %v2904_v27  ;;  %v2952_v39 = vpop.f32.mrf.mxu1  ;;  %3221 = vst [vmem:[#allocation16_spill] sm:$0xff] %v3015_v33  ;;  %v3032_v31 = vld [vmem:[%s3199_s3 + $0x20] sm:$0xff]  }
 0x129   :  { %v2093_v40 = vpop.f32.mrf.mxu0 }
 0x12a   :  { %v2954_v41 = vpop.f32.mrf.mxu1  ;;  %v2956_v42 = vadd.f32 %v2155_v37, %v1278_v36  ;;  %v3020_v36 = vld [vmem:[%s3199_s3 + $0x28] sm:$0xff]   ;;  %v3025_v37 = vld [vmem:[%s3199_s3] sm:$0xff]  }
 0x12b   :  { %v2095_v44 = vpop.f32.mrf.mxu0  ;;  %3222 = vst [vmem:[#allocation17_spill] sm:$0xff] %v3020_v36  ;;  %3223 = vst [vmem:[#allocation18_spill] sm:$0xff] %v3025_v37 }
 0x12c   :  { %3213 = vst [vmem:[#allocation8_spill] sm:$0xff] %v2956_v42  ;;  %v2958_v45 = vpop.f32.mrf.mxu1  ;;  %v2094_v42 = vadd.f32 %v2093_v40, %v2092_v34 }
 0x12d   :  { %v2096_v18 = vpop.f32.mrf.mxu0 }
 0x12e   :  { %v2960_v46 = vpop.f32.mrf.mxu1  ;;  %v2097_v1 = vadd.f32 %v2096_v18, %v2095_v44 }
 0x12f   :  { %v2098_v48 = vpop.f32.mrf.mxu0 }
 0x130   :  { %v2962_v49 = vpop.f32.mrf.mxu1 }
 0x131   :  { %v2099_v50 = vpop.f32.mrf.mxu0 }
 0x132   :  { %v2964_v52 = vpop.f32.mrf.mxu1 }
 0x133   :  { %v2101_v27 = vpop.f32.mrf.mxu0 }
 0x134   :  { %v2966_v53 = vpop.f32.mrf.mxu1 }
 0x135   :  { %v2102_v54 = vpop.f32.mrf.mxu0 }
 0x136   :  { %v2968_v55 = vpop.f32.mrf.mxu1  ;;  %v2103_v56 = vadd.f32 %v2102_v54, %v2101_v27 }
 0x137   :  { %v2970_v57 = vpop.f32.mrf.mxu0 }
 0x138   :  { %v2972_v58 = vpop.f32.mrf.mxu1 }
 0x139   :  { %v2974_v60 = vpop.f32.mrf.mxu0 }
 0x13a   :  { %v2976_v61 = vpop.f32.mrf.mxu1 }
 0x13b   :  { %v2107_v62 = vpop.f32.mrf.mxu0 }
 0x13c   :  { %v2978_v63 = vpop.f32.mrf.mxu1 }
 0x13d   :  { %v2108_v0 = vpop.f32.mrf.mxu0 }
 0x13e   :  { %v2980_v2 = vpop.f32.mrf.mxu1 }
 0x13f   :  { %v2982_v4 = vpop.f32.mrf.mxu0 }
 0x140   :  { %v2984_v5 = vpop.f32.mrf.mxu1 }
 0x141   :  { %3214 = vst [vmem:[#allocation9_spill] sm:$0xff] %v2984_v5  ;;  %v2986_v6 = vpop.f32.mrf.mxu0  ;;  %v3063_v5 = vld [vmem:[%s3199_s3 + $0x30] sm:$0xff]  }
 0x142   :  { %v2988_v7 = vpop.f32.mrf.mxu1  ;;  %v1886_v54 = vunpack.c.h.bf16 %v3063_v5 }
 0x143   :  { %3215 = vst [vmem:[#allocation10_spill] sm:$0xff] %v2988_v7  ;;  %v2113_v8 = vpop.f32.mrf.mxu0  ;;  %v3042_v7 = vld [vmem:[%s3199_s3 + $0x18] sm:$0xff]  }
 0x144   :  { %v2990_v9 = vpop.f32.mrf.mxu1  ;;  %v1873_v36 = vunpack.c.l.bf16 %v3042_v7  ;;  %v1874_v18 = vunpack.c.h.bf16 %v3042_v7 }
 0x145   :  { %v2114_v12 = vpop.f32.mrf.mxu0 }
 0x146   :  { %v2992_v13 = vpop.f32.mrf.mxu1  ;;  %v2115_v44 = vadd.f32 %v2114_v12, %v2113_v8 }
 0x147   :  { %3216 = vst [vmem:[#allocation11_spill] sm:$0xff] %v2992_v13  ;;  %v2994_v14 = vpop.f32.mrf.mxu0  ;;  %v1294_v13 = vadd.f32 %v2103_v56, %v2916_v59  ;;  %v2112_v59 = vadd.f32 %v2986_v6, %v2982_v4  ;;  %v3111_v6 = vadd.f32 %v2976_v61, %v2972_v58 }
 0x148   :  { %v2996_v15 = vpop.f32.mrf.mxu1 }
 0x149   :  { %3217 = vst [vmem:[#allocation12_spill] sm:$0xff] %v2996_v15  ;;  %v2998_v16 = vpop.f32.mrf.mxu0  ;;  %v2109_v15 = vadd.f32 %v2108_v0, %v2107_v62  ;;  %v1286_v62 = vadd.f32 %v2097_v1, %v2910_v43  ;;  %v2164_v43 = vadd.f32 %v2964_v52, %v2962_v49  ;;  %v1310_v49 = vadd.f32 %v2115_v44, %v2928_v29 }
 0x14a   :  { %v3000_v17 = vpop.f32.mrf.mxu1  ;;  %v2118_v56 = vadd.f32 %v2998_v16, %v2994_v14  ;;  %v3228_v14 = vld [vmem:[#allocation2_spill] sm:$0xff] }
 0x14b   :  { %3218 = vst [vmem:[#allocation13_spill] sm:$0xff] %v3000_v17  ;;  %v2119_v19 = vpop.f32.mrf.mxu0  ;;  %v1281_v17 = vadd.f32 %v2094_v42, %v2907_v35 }
 0x14c   :  { %v3002_v22 = vpop.f32.mrf.mxu1 }
 0x14d   :  { %v2120_v23 = vpop.f32.mrf.mxu0 }
 0x14e   :  { %v3004_v24 = vpop.f32.mrf.mxu1  ;;  %v2121_v35 = vadd.f32 %v2120_v23, %v2119_v19  ;;  %v3227_v29 = vld [vmem:[#allocation11_spill] sm:$0xff] }
 0x14f   :  { %v3006_v25 = vpop.f32.mrf.mxu0  ;;  %v2179_v12 = vadd.f32 %v3227_v29, %v2990_v9 }
 0x150   :  { %v3008_v26 = vpop.f32.mrf.mxu1  ;;  %v3233_v44 = vld [vmem:[#allocation12_spill] sm:$0xff] }
 0x151   :  { %3219 = vst [vmem:[#allocation14_spill] sm:$0xff] %v3008_v26  ;;  %v2123_v28 = vpop.f32.mrf.mxu0  ;;  %v1878_v26 = vunpack.c.h.bf16 %v3032_v31  ;;  %v1407_v9 = vadd.f32 %v2179_v12, %v1310_v49 }
 0x152   :  { %v3010_v30 = vpop.f32.mrf.mxu1 }
 0x153   :  { %3220 = vst [vmem:[#allocation15_spill] sm:$0xff] %v3010_v30  ;;  %v2125_v32 = vpop.f32.mrf.mxu0 }
 0x154   :  { %v3027_v10 = vpop.f32.mrf.mxu1 }
 0x155   :  { %3224 = vst [vmem:[#allocation19_spill] sm:$0xff] %v3027_v10  ;;  %v2126_v21 = vpop.f32.mrf.mxu0  ;;  %v3047_v10 = vld [vmem:[%s3199_s3 + $0x38] sm:$0xff]  }
 0x156   :  { %v3034_v30 = vpop.f32.mrf.mxu1 }
 0x157   :  { %3225 = vst [vmem:[#allocation20_spill] sm:$0xff] %v3034_v30  ;;  %v3049_v34 = vpop.f32.mrf.mxu0  ;;  %v3058_v30 = vld [vmem:[%s3199_s3 + $0x10] sm:$0xff]  }
 0x158   :  { %3226 = vst [vmem:[#allocation21_spill] sm:$0xff] %v3049_v34  ;;  %v2100_v34 = vadd.f32 %v2099_v50, %v2098_v48  ;;  %v3065_v40 = vpop.f32.mrf.mxu1  ;;  %v2158_v50 = vadd.f32 %v2954_v41, %v2952_v39  ;;  %v1870_v27 = vunpack.c.h.bf16 %v3058_v30  ;;  %v2161_v48 = vadd.f32 %v2960_v46, %v2958_v45 }
 0x159   :  { %v2129_v37 = vpop.f32.mrf.mxu0  ;;  %v2106_v39 = vadd.f32 %v2974_v60, %v2970_v57  ;;  %v1302_v41 = vadd.f32 %v2109_v15, %v2922_v11  ;;  %v2173_v45 = vadd.f32 %v2980_v2, %v2978_v63  ;;  %v1318_v11 = vadd.f32 %v2121_v35, %v2934_v47 }
 0x15a   :  { %v3071_v38 = vpop.f32.mrf.mxu1  ;;  %v1289_v0 = vadd.f32 %v2100_v34, %v2913_v51  ;;  %v3089_v23 = vadd.f32 %v2158_v50, %v1281_v17  ;;  %v2167_v51 = vadd.f32 %v2968_v55, %v2966_v53  ;;  %v2124_v46 = vadd.f32 %v2123_v28, %v3006_v25  ;;  %v3230_v25 = vld [vmem:[#allocation4_spill] sm:$0xff]  ;;  %v3231_v34 = vld [vmem:[#allocation9_spill] sm:$0xff] }
 0x15b   :  { %v2131_v42 = vpop.f32.mrf.mxu0  ;;  %v2127_v57 = vadd.f32 %v2126_v21, %v2125_v32  ;;  %v1383_v53 = vadd.f32 %v2161_v48, %v1286_v62  ;;  %v3107_v4 = vadd.f32 %v2106_v39, %v2919_v3  ;;  %v2185_v47 = vadd.f32 %v3004_v24, %v3002_v22  ;;  %v3229_v3 = vld [vmem:[#allocation3_spill] sm:$0xff]  ;;  %v3232_v22 = vld [vmem:[#allocation10_spill] sm:$0xff]  ;;  %v3234_v48 = vld [vmem:[#allocation13_spill] sm:$0xff] }
 0x15c   :  { %v2195_v33 = vpop.f32.mrf.mxu1  ;;  %v1386_v55 = vadd.f32 %v2164_v43, %v1289_v0  ;;  %v3104_v8 = vadd.f32 %v2167_v51, %v1294_v13  ;;  %v1399_v21 = vadd.f32 %v2173_v45, %v1302_v41  ;;  %v1305_v2 = vadd.f32 %v2112_v59, %v2925_v20  ;;  %v3235_v62 = vld [vmem:[#allocation14_spill] sm:$0xff]  ;;  %v3236_v0 = vld [vmem:[#allocation15_spill] sm:$0xff] }
 0x15d   :  { %v2132_v19 = vpop.f32.mrf.mxu0  ;;  %v1313_v13 = vadd.f32 %v2118_v56, %v3228_v14  ;;  %v1321_v17 = vadd.f32 %v2124_v46, %v3229_v3  ;;  %v1326_v28 = vadd.f32 %v2127_v57, %v3230_v25  ;;  %v1415_v32 = vadd.f32 %v2185_v47, %v1318_v11  ;;  %v3237_v39 = vld [vmem:[#allocation19_spill] sm:$0xff]  ;;  %v3240_v45 = vld [vmem:[#allocation6_spill] sm:$0xff]  ;;  %v3241_v46 = vld [vmem:[#allocation8_spill] sm:$0xff] }
 0x15e   :  { %v2196_v1 = vpop.f32.mrf.mxu1  ;;  %v2133_v15 = vadd.f32 %v2132_v19, %v2131_v42  ;;  %v2176_v24 = vadd.f32 %v3232_v22, %v3231_v34  ;;  %v2182_v20 = vadd.f32 %v3234_v48, %v3233_v44  ;;  %v2188_v42 = vadd.f32 %v3236_v0, %v3235_v62  ;;  %v3238_v41 = vld [vmem:[#allocation20_spill] sm:$0xff]  ;;  %v3245_v44 = vld [vmem:[#allocation5_spill] sm:$0xff] }
 0x15f   :  { %v2134_v60 = vpop.f32.mrf.mxu0  ;;  %v2191_v19 = vadd.f32 %v3238_v41, %v3237_v39  ;;  %v3239_v43 = vld [vmem:[#allocation21_spill] sm:$0xff]  ;;  %v2194_v25 = vadd.f32 %v3071_v38, %v3065_v40 }
 0x160   :  { %v2198_v52 = vpop.f32.mrf.mxu1  ;;  %v2130_v51 = vadd.f32 %v2129_v37, %v3239_v43  ;;  %v1334_v11 = vadd.f32 %v2133_v15, %v3240_v45  ;;  %v1410_v47 = vadd.f32 %v2182_v20, %v1313_v13  ;;  %v1418_v14 = vadd.f32 %v2188_v42, %v1321_v17  ;;  %v3243_v37 = vld [vmem:[#allocation16_spill] sm:$0xff]  ;;  %v3246_v13 = vld [vmem:[#allocation17_spill] sm:$0xff] }
 0x161   :  { %v2135_v63 = vpop.f32.mrf.mxu0  ;;  %v1423_v3 = vadd.f32 %v2191_v19, %v1326_v28  ;;  %v3250_v62 = vunpack.c.h.bf16 %v3243_v37 }
 0x162   :  { %v2199_v16 = vpop.f32.mrf.mxu1  ;;  %v2136_v58 = vadd.f32 %v2135_v63, %v2134_v60  ;;  %v1402_v63 = vadd.f32 %v2176_v24, %v1305_v2  ;;  %v1329_v48 = vadd.f32 %v2130_v51, %v3245_v44  ;;  %v3247_v2 = vunpack.c.l.bf16 %v3246_v13 }
 0x163   :  { %v2235_v61 = vpop.f32.mrf.mxu0 }
 0x164   :  { %v1480_v50 = vadd.f32 %v2235_v61, %v1383_v53  ;;  %v2243_v35 = vpop.f32.mrf.mxu1  ;;  %v3242_v53 = vld [vmem:[#allocation7_spill] sm:$0xff]  ;;  %v2197_v61 = vadd.f32 %v2196_v1, %v2195_v33 }
 0x165   :  { %v1512_v59 = vadd.f32 %v2243_v35, %v1415_v32  ;;  %v1471_v56 = vpop.f32.mrf.mxu0  ;;  %v1337_v29 = vadd.f32 %v2136_v58, %v3242_v53  ;;  %v3244_v32 = vunpack.c.l.bf16 %v3243_v37  ;;  %v2200_v35 = vadd.f32 %v2199_v16, %v2198_v52 }
 0x166   :  { %v1472_v57 = vadd.f32 %v1471_v56, %v3241_v46  ;;  %v1503_v60 = vpop.f32.mrf.mxu1  ;;  %v1431_v1 = vadd.f32 %v2197_v61, %v1334_v11  ;;  %v3252_v52 = vunpack.c.h.bf16 %v3246_v13  ;;  %v1426_v13 = vadd.f32 %v2194_v25, %v1329_v48 }
 0x167   :  { %v1504_v49 = vadd.f32 %v1503_v60, %v1407_v9  ;;  %v2236_v12 = vpop.f32.mrf.mxu0  ;;  %v1568_v34 = vadd.f32 %v3244_v32, %v1480_v50  ;;  %v1576_v24 = vadd.f32 %v3247_v2, %v1512_v59  ;;  %v3248_v9 = vld [vmem:[#allocation18_spill] sm:$0xff]  ;;  %v1434_v39 = vadd.f32 %v2200_v35, %v1337_v29 }
 0x168   :  { %v1483_v22 = vadd.f32 %v2236_v12, %v1386_v55  ;;  %v2244_v15 = vpop.f32.mrf.mxu1  ;;  %v3249_v17 = vunpack.c.l.bf16 %v3248_v9  ;;  %v3251_v55 = vunpack.c.l.bf16 %v3032_v31  ;;  %v3253_v43 = vunpack.c.h.bf16 %v3248_v9 }
 0x169   :  { %v1515_v58 = vadd.f32 %v2244_v15, %v1418_v14  ;;  %v1474_v20 = vpop.f32.mrf.mxu0  ;;  %v1584_v41 = vmax.f32 %v1568_v34, 0.0  ;;  %v1592_v45 = vmax.f32 %v1576_v24, 0.0  ;;  %v3256_v24 = vunpack.c.l.bf16 %v3063_v5 }
 0x16a   :  { %v1566_v28 = vadd.f32 %v3249_v17, %v1472_v57  ;;  %v1569_v38 = vadd.f32 %v3250_v62, %v1483_v22  ;;  %v1475_v33 = vadd.f32 %v1474_v20, %v3089_v23  ;;  %v1506_v40 = vpop.f32.mrf.mxu1  ;;  %v1574_v50 = vadd.f32 %v3251_v55, %v1504_v49 }
 0x16b   :  { %v1577_v16 = vadd.f32 %v3252_v52, %v1515_v58  ;;  %v1507_v0 = vadd.f32 %v1506_v40, %v1410_v47  ;;  %v2239_v42 = vpop.f32.mrf.mxu0  ;;  %v1394_v22 = vadd.f32 %v3111_v6, %v3107_v4  ;;  %v3257_v25 = vunpack.c.h.bf16 %v3047_v10 }
 0x16c   :  { %v1585_v19 = vmax.f32 %v1569_v38, 0.0  ;;  %v1567_v51 = vadd.f32 %v3253_v43, %v1475_v33  ;;  %v1496_v59 = vadd.f32 %v2239_v42, %v1399_v21  ;;  %v2247_v56 = vpop.f32.mrf.mxu1  ;;  %v1582_v60 = vmax.f32 %v1566_v28, 0.0 }
 0x16d   :  { %v1593_v23 = vmax.f32 %v1577_v16, 0.0  ;;  %v1575_v11 = vadd.f32 %v1878_v26, %v1507_v0  ;;  %v1528_v46 = vadd.f32 %v2247_v56, %v1431_v1  ;;  %v1487_v57 = vpop.f32.mrf.mxu0  ;;  %v1590_v12 = vmax.f32 %v1574_v50, 0.0 }
 0x16e   :  { %v1899_v53 = vpack.c.bf16 %v1585_v19, %v1584_v41  ;;  %v1583_v49 = vmax.f32 %v1567_v51, 0.0  ;;  %v1488_v47 = vadd.f32 %v1487_v57, %v3104_v8  ;;  %v1519_v29 = vpop.f32.mrf.mxu1  ;;  %v1572_v31 = vadd.f32 %v1873_v36, %v1496_v59 }
 0x16f   :  { %v1919_v14 = vpack.c.bf16 %v1593_v23, %v1592_v45  ;;  %v1591_v61 = vmax.f32 %v1575_v11, 0.0  ;;  %v1520_v37 = vadd.f32 %v1519_v29, %v1423_v3  ;;  %v2240_v32 = vpop.f32.mrf.mxu0  ;;  %v3254_v3 = vunpack.c.l.bf16 %v3047_v10 }
 0x170   :  { %1938 = vst [vmem:[%s3200_s4 + $0x8] sm:$0xff] %v1899_v53   ;;  %v1894_v21 = vpack.c.bf16 %v1583_v49, %v1582_v60  ;;  %v1499_v26 = vadd.f32 %v2240_v32, %v1402_v63  ;;  %v2248_v34 = vpop.f32.mrf.mxu1  ;;  %v3255_v36 = vunpack.c.l.bf16 %v3058_v30  ;;  %v1588_v9 = vmax.f32 %v1572_v31, 0.0 }
 0x171   :  { %1942 = vst [vmem:[%s3200_s4 + $0x28] sm:$0xff] %v1919_v14   ;;  %v1914_v8 = vpack.c.bf16 %v1591_v61, %v1590_v12  ;;  %v1580_v15 = vadd.f32 %v3254_v3, %v1528_v46  ;;  %v1531_v44 = vadd.f32 %v2248_v34, %v1434_v39  ;;  %v1490_v35 = vpop.f32.mrf.mxu0  ;;  %v1578_v58 = vadd.f32 %v3256_v24, %v1520_v37 }
 0x172   :  { %1895 = vst [vmem:[%s3200_s4] sm:$0xff] %v1894_v21   ;;  %v1570_v63 = vadd.f32 %v3255_v36, %v1488_v47  ;;  %v1573_v4 = vadd.f32 %v1874_v18, %v1499_v26  ;;  %v1491_v6 = vadd.f32 %v1490_v35, %v1394_v22  ;;  %v1522_v2 = vpop.f32.mrf.mxu1 }
 0x173   :  { %1941 = vst [vmem:[%s3200_s4 + $0x20] sm:$0xff] %v1914_v8   ;;  %v1581_v48 = vadd.f32 %v3257_v25, %v1531_v44  ;;  %v1523_v20 = vadd.f32 %v1522_v2, %v1426_v13  ;;  %v1596_v7 = vmax.f32 %v1580_v15, 0.0  ;;  %v1594_v1 = vmax.f32 %v1578_v58, 0.0 }
 0x174   :  { %v1589_v17 = vmax.f32 %v1573_v4, 0.0  ;;  %v1571_v28 = vadd.f32 %v1870_v27, %v1491_v6  ;;  %v1586_v38 = vmax.f32 %v1570_v63, 0.0 }
 0x175   :  { %v1597_v18 = vmax.f32 %v1581_v48, 0.0  ;;  %v1579_v62 = vadd.f32 %v1886_v54, %v1523_v20 }
 0x176   :  { %v1909_v33 = vpack.c.bf16 %v1589_v17, %v1588_v9  ;;  %v1587_v40 = vmax.f32 %v1571_v28, 0.0 }
 0x177   :  { %v1929_v55 = vpack.c.bf16 %v1597_v18, %v1596_v7  ;;  %v1595_v50 = vmax.f32 %v1579_v62, 0.0 }
 0x178   :  { %1940 = vst [vmem:[%s3200_s4 + $0x18] sm:$0xff] %v1909_v33   ;;  %v1904_v10 = vpack.c.bf16 %v1587_v40, %v1586_v38 }
 0x179   :  { %1944 = vst [vmem:[%s3200_s4 + $0x38] sm:$0xff] %v1929_v55   ;;  %v1924_v30 = vpack.c.bf16 %v1595_v50, %v1594_v1 }
 0x17a   :  { %1939 = vst [vmem:[%s3200_s4 + $0x10] sm:$0xff] %v1904_v10  }
 0x17b   :  { %1943 = vst [vmem:[%s3200_s4 + $0x30] sm:$0xff] %v1924_v30  }

// kernel: resnet_feature_extractor_forward.29
= control target key start
LH: loop header
LB: loop body
LE: loop exit
PB: predicated region body
PF: predicated region fallthrough
CT: control target
= control target key end

     0   :  { %s1632_s1 = inlined_call_operand.vmem [shape: bf16[1152,128], index: 1, kind: input, shape index: {}]   ;;  %s1633_s0 = inlined_call_operand.vmem [shape: bf16[32,1152], index: 0, kind: input, shape index: {}]   ;;  %s1634_s2 = inlined_call_operand.vmem [shape: f32[1,128], index: 2, kind: input, shape index: {}]   ;;  %s1635_s3 = inlined_call_operand.vmem [shape: bf16[32,128], index: 3, kind: output, shape index: {}]  }
   0x1   :  { %v1235_v0 = vld [vmem:[%s1632_s1 + $0x78] sm:$0xff]   ;;  %v1239_v4 = vld [vmem:[%s1632_s1 + $0x70] sm:$0xff]   ;;  %v1243_v8 = vld [vmem:[%s1632_s1 + $0x68] sm:$0xff]  }
   0x2   :  { %v1236_v1 = vld [vmem:[%s1632_s1 + $0x38] sm:$0xff]   ;;  %1093 = vmatprep.subr.bf16.mxu0 %v1235_v0  ;;  %v1240_v5 = vld [vmem:[%s1632_s1 + $0x30] sm:$0xff]   ;;  %v1244_v9 = vld [vmem:[%s1632_s1 + $0x28] sm:$0xff]  }
   0x3   :  { %v1237_v2 = vld [vmem:[%s1632_s1 + $0xf8] sm:$0xff]   ;;  %1094 = vmatpush3.bf16.msra.mxu0 %v1236_v1  ;;  %v1241_v6 = vld [vmem:[%s1632_s1 + $0xf0] sm:$0xff]   ;;  %v1245_v10 = vld [vmem:[%s1632_s1 + $0xe8] sm:$0xff]  }
   0x4   :  { %v1238_v3 = vld [vmem:[%s1632_s1 + $0xb8] sm:$0xff]   ;;  %1121 = vmatprep.subr.bf16.mxu1 %v1237_v2  ;;  %1095 = vmatprep.subr.bf16.mxu0 %v1239_v4  ;;  %v1242_v7 = vld [vmem:[%s1632_s1 + $0xb0] sm:$0xff]   ;;  %v1246_v11 = vld [vmem:[%s1632_s1 + $0xa8] sm:$0xff]  }
   0x5   :  { %1122 = vmatpush3.bf16.msra.mxu1 %v1238_v3  ;;  %v1247_v12 = vld [vmem:[%s1632_s1 + $0x60] sm:$0xff]   ;;  %v1251_v16 = vld [vmem:[%s1632_s1 + $0x58] sm:$0xff]   ;;  %v1255_v20 = vld [vmem:[%s1632_s1 + $0x50] sm:$0xff]  }
   0x6   :  { %1123 = vmatprep.subr.bf16.mxu1 %v1241_v6  ;;  %v1248_v13 = vld [vmem:[%s1632_s1 + $0x20] sm:$0xff]   ;;  %v1252_v17 = vld [vmem:[%s1632_s1 + $0x18] sm:$0xff]   ;;  %v1256_v21 = vld [vmem:[%s1632_s1 + $0x10] sm:$0xff]  }
   0x7   :  { %1096 = vmatpush3.bf16.msra.mxu0 %v1240_v5  ;;  %v1249_v14 = vld [vmem:[%s1632_s1 + $0xe0] sm:$0xff]   ;;  %v1253_v18 = vld [vmem:[%s1632_s1 + $0xd8] sm:$0xff]   ;;  %v1257_v22 = vld [vmem:[%s1632_s1 + $0xd0] sm:$0xff]  }
   0x8   :  { %1097 = vmatprep.subr.bf16.mxu0 %v1243_v8  ;;  %v1250_v15 = vld [vmem:[%s1632_s1 + $0xa0] sm:$0xff]   ;;  %v1254_v19 = vld [vmem:[%s1632_s1 + $0x98] sm:$0xff]   ;;  %v1258_v23 = vld [vmem:[%s1632_s1 + $0x90] sm:$0xff]  }
   0x9   :  { %1124 = vmatpush3.bf16.msra.mxu1 %v1242_v7  ;;  %v1259_v24 = vld [vmem:[%s1632_s1 + $0x48] sm:$0xff]   ;;  %v1263_v28 = vld [vmem:[%s1632_s1 + $0x40] sm:$0xff]   ;;  %v1270_v34 = vld [vmem:[%s1632_s1 + $0x178] sm:$0xff]  }
   0xa   :  { %1125 = vmatprep.subr.bf16.mxu1 %v1245_v10  ;;  %v1260_v25 = vld [vmem:[%s1632_s1 + $0x8] sm:$0xff]   ;;  %v1264_v29 = vld [vmem:[%s1632_s1] sm:$0xff]   ;;  %v1274_v37 = vld [vmem:[%s1632_s1 + $0x138] sm:$0xff]  }
   0xb   :  { %1098 = vmatpush3.bf16.msra.mxu0 %v1244_v9  ;;  %v1261_v26 = vld [vmem:[%s1632_s1 + $0xc8] sm:$0xff]   ;;  %v1265_v30 = vld [vmem:[%s1632_s1 + $0xc0] sm:$0xff]   ;;  %v1275_v38 = vld [vmem:[%s1632_s1 + $0x1f8] sm:$0xff]  }
   0xc   :  { %1099 = vmatprep.subr.bf16.mxu0 %v1247_v12  ;;  %v1262_v27 = vld [vmem:[%s1632_s1 + $0x88] sm:$0xff]   ;;  %v1266_v31 = vld [vmem:[%s1633_s0] ss:$36 sps:$4 sm:$0xff]   ;;  %v1276_v39 = vld [vmem:[%s1632_s1 + $0x1b8] sm:$0xff]  }
   0xd   :  { %1126 = vmatpush3.bf16.msra.mxu1 %v1246_v11  ;;  %v1268_v32 = vld [vmem:[%s1633_s0 + $0x4] ss:$36 sps:$4 sm:$0xff]   ;;  %v1273_v36 = vld [vmem:[%s1633_s0 + $0xc] ss:$36 sps:$4 sm:$0xff]   ;;  %v1289_v52 = vld [vmem:[%s1632_s1 + $0x158] sm:$0xff]  }
   0xe   :  { %1127 = vmatprep.subr.bf16.mxu1 %v1249_v14  ;;  %v1269_v33 = vld [vmem:[%s1632_s1 + $0x80] sm:$0xff]   ;;  %742 = vmatprep.mubr.bf16.mxu0 %v1268_v32  ;;  %v1271_v35 = vld [vmem:[%s1633_s0 + $0x8] ss:$36 sps:$4 sm:$0xff]   ;;  %v1277_v40 = vld [vmem:[%s1632_s1 + $0x170] sm:$0xff]  }
   0xf   :  { %1100 = vmatpush3.bf16.msra.mxu0 %v1248_v13  ;;  %791 = vmatprep.mubr.bf16.mxu1 %v1273_v36  ;;  %v1278_v41 = vld [vmem:[%s1632_s1 + $0x130] sm:$0xff]   ;;  %v1281_v44 = vld [vmem:[%s1632_s1 + $0x168] sm:$0xff]   ;;  %v1285_v48 = vld [vmem:[%s1632_s1 + $0x160] sm:$0xff]  }
  0x10   :  { %1101 = vmatprep.subr.bf16.mxu0 %v1251_v16  ;;  %v1279_v42 = vld [vmem:[%s1632_s1 + $0x1f0] sm:$0xff]   ;;  %v1282_v45 = vld [vmem:[%s1632_s1 + $0x128] sm:$0xff]   ;;  %v1286_v49 = vld [vmem:[%s1632_s1 + $0x120] sm:$0xff]  }
  0x11   :  { %1128 = vmatpush3.bf16.msra.mxu1 %v1250_v15  ;;  %v1280_v43 = vld [vmem:[%s1632_s1 + $0x1b0] sm:$0xff]   ;;  %v1283_v46 = vld [vmem:[%s1632_s1 + $0x1e8] sm:$0xff]   ;;  %v1287_v50 = vld [vmem:[%s1632_s1 + $0x1e0] sm:$0xff]  }
  0x12   :  { %1129 = vmatprep.subr.bf16.mxu1 %v1253_v18  ;;  %v1284_v47 = vld [vmem:[%s1632_s1 + $0x1a8] sm:$0xff]   ;;  %v1288_v51 = vld [vmem:[%s1632_s1 + $0x1a0] sm:$0xff]   ;;  %v1290_v53 = vld [vmem:[%s1632_s1 + $0x118] sm:$0xff]  }
  0x13   :  { %1102 = vmatpush3.bf16.msra.mxu0 %v1252_v17  ;;  %v1291_v54 = vld [vmem:[%s1633_s0 + $0x4c] ss:$36 sps:$4 sm:$0xff]   ;;  %v1293_v55 = vld [vmem:[%s1632_s1 + $0x1d8] sm:$0xff]   ;;  %v1307_v4 = vld [vmem:[%s1632_s1 + $0x140] sm:$0xff]  }
  0x14   :  { %1103 = vmatprep.subr.bf16.mxu0 %v1255_v20  ;;  %v1294_v56 = vld [vmem:[%s1633_s0 + $0x48] ss:$36 sps:$4 sm:$0xff]   ;;  %v1295_v57 = vld [vmem:[%s1632_s1 + $0x198] sm:$0xff]   ;;  %v1298_v59 = vld [vmem:[%s1632_s1 + $0x150] sm:$0xff]  }
  0x15   :  { %1130 = vmatpush3.bf16.msra.mxu1 %v1254_v19  ;;  %v1296_v58 = vld [vmem:[%s1633_s0 + $0x54] ss:$36 sps:$4 sm:$0xff]   ;;  %v1303_v0 = vld [vmem:[%s1632_s1 + $0x148] sm:$0xff]   ;;  %v1308_v5 = vld [vmem:[%s1632_s1 + $0x100] sm:$0xff]  }
  0x16   :  { %1131 = vmatprep.subr.bf16.mxu1 %v1257_v22  ;;  %v1299_v60 = vld [vmem:[%s1633_s0 + $0x50] ss:$36 sps:$4 sm:$0xff]   ;;  %v1304_v1 = vld [vmem:[%s1632_s1 + $0x108] sm:$0xff]   ;;  %v1309_v6 = vld [vmem:[%s1632_s1 + $0x1c0] sm:$0xff]  }
  0x17   :  { %1104 = vmatpush3.bf16.msra.mxu0 %v1256_v21  ;;  %v1300_v61 = vld [vmem:[%s1632_s1 + $0x110] sm:$0xff]   ;;  %v1305_v2 = vld [vmem:[%s1632_s1 + $0x1c8] sm:$0xff]   ;;  %v1313_v9 = vld [vmem:[%s1632_s1 + $0x180] sm:$0xff]  }
  0x18   :  { %1105 = vmatprep.subr.bf16.mxu0 %v1259_v24  ;;  %v1301_v62 = vld [vmem:[%s1632_s1 + $0x1d0] sm:$0xff]   ;;  %v1306_v3 = vld [vmem:[%s1632_s1 + $0x188] sm:$0xff]   ;;  %v1314_v10 = vld [vmem:[%s1632_s1 + $0x238] sm:$0xff]  }
  0x19   :  { %1132 = vmatpush3.bf16.msra.mxu1 %v1258_v23  ;;  %v1302_v63 = vld [vmem:[%s1632_s1 + $0x190] sm:$0xff]   ;;  %v1315_v11 = vld [vmem:[%s1633_s0 + $0x18] ss:$36 sps:$4 sm:$0xff]   ;;  %v1322_v16 = vld [vmem:[%s1632_s1 + $0x228] sm:$0xff]  }
  0x1a   :  { %1133 = vmatprep.subr.bf16.mxu1 %v1261_v26  ;;  %v1310_v7 = vld [vmem:[%s1633_s0 + $0x10] ss:$36 sps:$4 sm:$0xff]   ;;  %v1317_v12 = vld [vmem:[%s1633_s0 + $0x1c] ss:$36 sps:$4 sm:$0xff]   ;;  %v1323_v17 = vld [vmem:[%s1633_s0 + $0x64] ss:$36 sps:$4 sm:$0xff]  }
  0x1b   :  { %1106 = vmatpush3.bf16.msra.mxu0 %v1260_v25  ;;  %v1312_v8 = vld [vmem:[%s1633_s0 + $0x14] ss:$36 sps:$4 sm:$0xff]   ;;  %v1319_v14 = vld [vmem:[%s1633_s0 + $0x5c] ss:$36 sps:$4 sm:$0xff]   ;;  %v1329_v23 = vld [vmem:[%s1632_s1 + $0x208] sm:$0xff]  }
  0x1c   :  { %1107 = vmatprep.subr.bf16.mxu0 %v1263_v28  ;;  %v1318_v13 = vld [vmem:[%s1632_s1 + $0x230] sm:$0xff]   ;;  %v1321_v15 = vld [vmem:[%s1633_s0 + $0x58] ss:$36 sps:$4 sm:$0xff]   ;;  %v1325_v18 = vld [vmem:[%s1633_s0 + $0x60] ss:$36 sps:$4 sm:$0xff]  }
  0x1d   :  { %1134 = vmatpush3.bf16.msra.mxu1 %v1262_v27  ;;  %v1326_v19 = vld [vmem:[%s1632_s1 + $0x220] sm:$0xff]   ;;  %v1327_v20 = vld [vmem:[%s1632_s1 + $0x218] sm:$0xff]   ;;  %v1328_v22 = vld [vmem:[%s1632_s1 + $0x210] sm:$0xff]  }
  0x1e   :  { %1135 = vmatprep.subr.bf16.mxu1 %v1265_v30  ;;  %v1331_v21 = vld [vmem:[%s1633_s0 + $0x20] ss:$36 sps:$4 sm:$0xff]   ;;  %v1332_v25 = vld [vmem:[%s1633_s0 + $0x68] ss:$36 sps:$4 sm:$0xff]  }
  0x1f   :  { %1108 = vmatpush3.bf16.msra.mxu0 %v1264_v29  ;;  %v1330_v24 = vld [vmem:[%s1632_s1 + $0x200] sm:$0xff]  }
  0x20   :  { %1149 = vmatprep.subr.bf16.mxu0 %v1270_v34 }
  0x21   :  { %1136 = vmatpush3.bf16.msra.mxu1 %v1269_v33 }
  0x22   :  { %743 = vmatmul.mubr.bf16.vlgmr.msra.gmra.mxu0 %v1266_v31  ;;  %1177 = vmatprep.subr.bf16.mxu1 %v1275_v38 }
  0x23   :  { %1150 = vmatpush3.bf16.msra.mxu0 %v1274_v37  ;;  %750 = vmatprep.mubr.bf16.mxu0 %v1291_v54 }
  0x24   :  { %792 = vmatmul.mubr.bf16.vlgmr.msra.gmra.mxu1 %v1271_v35  ;;  %1151 = vmatprep.subr.bf16.mxu0 %v1277_v40 }
  0x25   :  { %1178 = vmatpush3.bf16.msra.mxu1 %v1276_v39  ;;  %799 = vmatprep.mubr.bf16.mxu1 %v1296_v58 }
  0x26   :  { %1179 = vmatprep.subr.bf16.mxu1 %v1279_v42 }
  0x27   :  { %1152 = vmatpush3.bf16.msra.mxu0 %v1278_v41 }
  0x28   :  { %1153 = vmatprep.subr.bf16.mxu0 %v1281_v44 }
  0x29   :  { %1180 = vmatpush3.bf16.msra.mxu1 %v1280_v43 }
  0x2a   :  { %1181 = vmatprep.subr.bf16.mxu1 %v1283_v46  ;;  %751 = vmatmul.mubr.bf16.gmra.mxu0 %v1294_v56 }
  0x2b   :  { %1154 = vmatpush3.bf16.msra.mxu0 %v1282_v45  ;;  %840 = vmatprep.mubr.bf16.mxu0 %v1312_v8 }
  0x2c   :  { %1155 = vmatprep.subr.bf16.mxu0 %v1285_v48  ;;  %800 = vmatmul.mubr.bf16.gmra.mxu1 %v1299_v60 }
  0x2d   :  { %1182 = vmatpush3.bf16.msra.mxu1 %v1284_v47  ;;  %889 = vmatprep.mubr.bf16.mxu1 %v1317_v12 }
  0x2e   :  { %1183 = vmatprep.subr.bf16.mxu1 %v1287_v50 }
  0x2f   :  { %1156 = vmatpush3.bf16.msra.mxu0 %v1286_v49 }
  0x30   :  { %1157 = vmatprep.subr.bf16.mxu0 %v1289_v52 }
  0x31   :  { %1184 = vmatpush3.bf16.msra.mxu1 %v1288_v51 }
  0x32   :  { %1185 = vmatprep.subr.bf16.mxu1 %v1293_v55 }
  0x33   :  { %1158 = vmatpush3.bf16.msra.mxu0 %v1290_v53 }
  0x34   :  { %1159 = vmatprep.subr.bf16.mxu0 %v1298_v59 }
  0x35   :  { %1186 = vmatpush3.bf16.msra.mxu1 %v1295_v57  ;;  %v983_v57 = vld [vmem:[%s1634_s2] ss:$0 sm:$0xff] }
  0x36   :  { %1187 = vmatprep.subr.bf16.mxu1 %v1301_v62 }
  0x37   :  { %1160 = vmatpush3.bf16.msra.mxu0 %v1300_v61 }
  0x38   :  { %1161 = vmatprep.subr.bf16.mxu0 %v1303_v0 }
  0x39   :  { %1188 = vmatpush3.bf16.msra.mxu1 %v1302_v63 }
  0x3a   :  { %1189 = vmatprep.subr.bf16.mxu1 %v1305_v2 }
  0x3b   :  { %1162 = vmatpush3.bf16.msra.mxu0 %v1304_v1 }
  0x3c   :  { %1163 = vmatprep.subr.bf16.mxu0 %v1307_v4 }
  0x3d   :  { %1190 = vmatpush3.bf16.msra.mxu1 %v1306_v3 }
  0x3e   :  { %1191 = vmatprep.subr.bf16.mxu1 %v1309_v6 }
  0x3f   :  { %1164 = vmatpush3.bf16.msra.mxu0 %v1308_v5 }
  0x40   :  { %1215 = vmatprep.subr.bf16.mxu0 %v1314_v10 }
  0x41   :  { %1192 = vmatpush3.bf16.msra.mxu1 %v1313_v9 }
  0x42   :  { %841 = vmatmul.mubr.bf16.vlgmr.msra.gmra.mxu0 %v1310_v7 }
  0x43   :  { %1216 = vmatpush3.bf16.msra.mxu0 %v1314_v10  ;;  %848 = vmatprep.mubr.bf16.mxu0 %v1319_v14 }
  0x44   :  { %890 = vmatmul.mubr.bf16.vlgmr.msra.gmra.mxu1 %v1315_v11  ;;  %1217 = vmatprep.subr.bf16.mxu0 %v1318_v13 }
  0x45   :  { %897 = vmatprep.mubr.bf16.mxu1 %v1323_v17 }
  0x47   :  { %1218 = vmatpush3.bf16.msra.mxu0 %v1318_v13 }
  0x48   :  { %1219 = vmatprep.subr.bf16.mxu0 %v1322_v16 }
  0x4a   :  { %849 = vmatmul.mubr.bf16.gmra.mxu0 %v1321_v15 }
  0x4b   :  { %1220 = vmatpush3.bf16.msra.mxu0 %v1322_v16  ;;  %1231 = vmatprep.mubr.bf16.mxu0 %v1331_v21 }
  0x4c   :  { %898 = vmatmul.mubr.bf16.gmra.mxu1 %v1325_v18  ;;  %1221 = vmatprep.subr.bf16.mxu0 %v1326_v19 }
  0x4f   :  { %1222 = vmatpush3.bf16.msra.mxu0 %v1326_v19 }
  0x50   :  { %1223 = vmatprep.subr.bf16.mxu0 %v1327_v20 }
  0x53   :  { %1224 = vmatpush3.bf16.msra.mxu0 %v1327_v20 }
  0x54   :  { %1225 = vmatprep.subr.bf16.mxu0 %v1328_v22 }
  0x57   :  { %1226 = vmatpush3.bf16.msra.mxu0 %v1328_v22 }
  0x58   :  { %1227 = vmatprep.subr.bf16.mxu0 %v1329_v23 }
  0x5b   :  { %1228 = vmatpush3.bf16.msra.mxu0 %v1329_v23 }
  0x5c   :  { %1229 = vmatprep.subr.bf16.mxu0 %v1330_v24 }
  0x5f   :  { %1230 = vmatpush3.bf16.msra.mxu0 %v1330_v24 }
  0x62   :  { %1232 = vmatmul.mubr.bf16.vlgmr.msra.gmra.mxu0 %v1332_v25 }
  0xe2   :  { %v1109_v26 = vpop.f32.mrf.mxu0 }
  0xe4   :  { %v1137_v27 = vpop.f32.mrf.mxu1  ;;  %v1110_v28 = vpop.f32.mrf.mxu0 }
  0xe5   :  { %v1111_v54 = vadd.f32 %v1110_v28, %v1109_v26 }
  0xe6   :  { %v1138_v29 = vpop.f32.mrf.mxu1  ;;  %v1112_v30 = vpop.f32.mrf.mxu0 }
  0xe7   :  { %v745_v62 = vadd.f32 %v1111_v54, %v983_v57  ;;  %v1139_v63 = vadd.f32 %v1138_v29, %v1137_v27 }
  0xe8   :  { %v1140_v31 = vpop.f32.mrf.mxu1  ;;  %v1113_v32 = vpop.f32.mrf.mxu0 }
  0xe9   :  { %v1114_v59 = vadd.f32 %v1113_v32, %v1112_v30  ;;  %v794_v10 = vadd.f32 %v1139_v63, %v745_v62 }
  0xea   :  { %v1115_v33 = vpop.f32.mrf.mxu0  ;;  %v1141_v34 = vpop.f32.mrf.mxu1 }
  0xeb   :  { %v748_v5 = vadd.f32 %v1114_v59, %v983_v57  ;;  %v1142_v6 = vadd.f32 %v1141_v34, %v1140_v31 }
  0xec   :  { %v1143_v35 = vpop.f32.mrf.mxu1  ;;  %v1116_v36 = vpop.f32.mrf.mxu0 }
  0xed   :  { %v1117_v53 = vadd.f32 %v1116_v36, %v1115_v33  ;;  %v797_v16 = vadd.f32 %v1142_v6, %v748_v5 }
  0xee   :  { %v1144_v37 = vpop.f32.mrf.mxu1  ;;  %v1118_v38 = vpop.f32.mrf.mxu0 }
  0xef   :  { %v753_v60 = vadd.f32 %v1117_v53, %v983_v57  ;;  %v1145_v61 = vadd.f32 %v1144_v37, %v1143_v35 }
  0xf0   :  { %v1146_v39 = vpop.f32.mrf.mxu1  ;;  %v1119_v40 = vpop.f32.mrf.mxu0 }
  0xf1   :  { %v1120_v58 = vadd.f32 %v1119_v40, %v1118_v38  ;;  %v802_v7 = vadd.f32 %v1145_v61, %v753_v60 }
  0xf2   :  { %v1147_v42 = vpop.f32.mrf.mxu1 }
  0xf3   :  { %v756_v2 = vadd.f32 %v1120_v58, %v983_v57  ;;  %v1148_v3 = vadd.f32 %v1147_v42, %v1146_v39 }
  0xf5   :  { %v805_v12 = vadd.f32 %v1148_v3, %v756_v2 }
 0x102   :  { %v1165_v41 = vpop.f32.mrf.mxu0 }
 0x104   :  { %v1166_v43 = vpop.f32.mrf.mxu0  ;;  %v1193_v44 = vpop.f32.mrf.mxu1 }
 0x105   :  { %v1167_v8 = vadd.f32 %v1166_v43, %v1165_v41 }
 0x106   :  { %v1168_v45 = vpop.f32.mrf.mxu0  ;;  %v1194_v46 = vpop.f32.mrf.mxu1 }
 0x107   :  { %v843_v17 = vadd.f32 %v1167_v8, %v794_v10  ;;  %v1195_v18 = vadd.f32 %v1194_v46, %v1193_v44 }
 0x108   :  { %v1169_v47 = vpop.f32.mrf.mxu0  ;;  %v1196_v48 = vpop.f32.mrf.mxu1 }
 0x109   :  { %v1170_v13 = vadd.f32 %v1169_v47, %v1168_v45  ;;  %v892_v27 = vadd.f32 %v1195_v18, %v843_v17 }
 0x10a   :  { %v1171_v49 = vpop.f32.mrf.mxu0  ;;  %v1197_v50 = vpop.f32.mrf.mxu1 }
 0x10b   :  { %v846_v22 = vadd.f32 %v1170_v13, %v797_v16  ;;  %v1198_v23 = vadd.f32 %v1197_v50, %v1196_v48 }
 0x10c   :  { %v1172_v51 = vpop.f32.mrf.mxu0  ;;  %v1199_v52 = vpop.f32.mrf.mxu1 }
 0x10d   :  { %v1173_v4 = vadd.f32 %v1172_v51, %v1171_v49  ;;  %v895_v32 = vadd.f32 %v1198_v23, %v846_v22 }
 0x10e   :  { %v1174_v55 = vpop.f32.mrf.mxu0  ;;  %v1200_v56 = vpop.f32.mrf.mxu1 }
 0x10f   :  { %v851_v14 = vadd.f32 %v1173_v4, %v802_v7  ;;  %v1201_v15 = vadd.f32 %v1200_v56, %v1199_v52 }
 0x110   :  { %v1175_v0 = vpop.f32.mrf.mxu0  ;;  %v1202_v1 = vpop.f32.mrf.mxu1 }
 0x111   :  { %v1176_v9 = vadd.f32 %v1175_v0, %v1174_v55  ;;  %v900_v24 = vadd.f32 %v1201_v15, %v851_v14 }
 0x112   :  { %v1203_v11 = vpop.f32.mrf.mxu1 }
 0x113   :  { %v854_v19 = vadd.f32 %v1176_v9, %v805_v12  ;;  %v1204_v20 = vadd.f32 %v1203_v11, %v1202_v1 }
 0x115   :  { %v903_v28 = vadd.f32 %v1204_v20, %v854_v19 }
 0x122   :  { %v1233_v21 = vpop.f32.mrf.mxu0 }
 0x123   :  { %v949_v26 = vadd.f32 %v1233_v21, %v900_v24 }
 0x124   :  { %v940_v25 = vpop.f32.mrf.mxu0 }
 0x125   :  { %v941_v30 = vadd.f32 %v940_v25, %v892_v27  ;;  %v957_v34 = vmax.f32 %v949_v26, 0.0 }
 0x126   :  { %v1234_v29 = vpop.f32.mrf.mxu0 }
 0x127   :  { %v952_v31 = vadd.f32 %v1234_v29, %v903_v28  ;;  %v955_v37 = vmax.f32 %v941_v30, 0.0 }
 0x128   :  { %v943_v33 = vpop.f32.mrf.mxu0 }
 0x129   :  { %v958_v35 = vmax.f32 %v952_v31, 0.0  ;;  %v944_v36 = vadd.f32 %v943_v33, %v895_v32 }
 0x12b   :  { %v1090_v38 = vpack.c.bf16 %v958_v35, %v957_v34  ;;  %v956_v39 = vmax.f32 %v944_v36, 0.0 }
 0x12d   :  { %1092 = vst [vmem:[%s1635_s3 + $0x8] sm:$0xff] %v1090_v38   ;;  %v1085_v40 = vpack.c.bf16 %v956_v39, %v955_v37 }
 0x12f   :  { %1086 = vst [vmem:[%s1635_s3] sm:$0xff] %v1085_v40  }

// kernel: resnet_feature_extractor_forward.30
= control target key start
LH: loop header
LB: loop body
LE: loop exit
PB: predicated region body
PF: predicated region fallthrough
CT: control target
= control target key end

     0   :  { %s304_s1 = inlined_call_operand.vmem [shape: bf16[128,128], index: 1, kind: input, shape index: {}]   ;;  %s305_s0 = inlined_call_operand.vmem [shape: bf16[32,128], index: 0, kind: input, shape index: {}]   ;;  %s306_s2 = inlined_call_operand.vmem [shape: f32[1,128], index: 2, kind: input, shape index: {}]   ;;  %s307_s3 = inlined_call_operand.vmem [shape: bf16[32,128], index: 3, kind: output, shape index: {}]  }
   0x1   :  { %v235_v0 = vld [vmem:[%s304_s1 + $0x38] sm:$0xff]   ;;  %v236_v1 = vld [vmem:[%s304_s1 + $0x30] sm:$0xff]   ;;  %v237_v2 = vld [vmem:[%s304_s1 + $0x28] sm:$0xff]  }
   0x2   :  { %215 = vmatprep.subr.bf16.mxu0 %v235_v0  ;;  %v238_v3 = vld [vmem:[%s304_s1 + $0x20] sm:$0xff]   ;;  %v239_v5 = vld [vmem:[%s304_s1 + $0x18] sm:$0xff]   ;;  %v240_v6 = vld [vmem:[%s304_s1 + $0x10] sm:$0xff]  }
   0x3   :  { %216 = vmatpush3.bf16.msra.mxu0 %v235_v0  ;;  %v243_v4 = vld [vmem:[%s305_s0] sm:$0xff]   ;;  %v241_v7 = vld [vmem:[%s304_s1 + $0x8] sm:$0xff]  }
   0x4   :  { %217 = vmatprep.subr.bf16.mxu0 %v236_v1  ;;  %231 = vmatprep.mubr.bf16.mxu0 %v243_v4  ;;  %v242_v8 = vld [vmem:[%s304_s1] sm:$0xff]   ;;  %v244_v9 = vld [vmem:[%s305_s0 + $0x8] sm:$0xff]  }
   0x5   :  { %v175_v11 = vld [vmem:[%s306_s2] ss:$0 sm:$0xff] }
   0x7   :  { %218 = vmatpush3.bf16.msra.mxu0 %v236_v1 }
   0x8   :  { %219 = vmatprep.subr.bf16.mxu0 %v237_v2 }
   0xb   :  { %220 = vmatpush3.bf16.msra.mxu0 %v237_v2 }
   0xc   :  { %221 = vmatprep.subr.bf16.mxu0 %v238_v3 }
   0xf   :  { %222 = vmatpush3.bf16.msra.mxu0 %v238_v3 }
  0x10   :  { %223 = vmatprep.subr.bf16.mxu0 %v239_v5 }
  0x13   :  { %224 = vmatpush3.bf16.msra.mxu0 %v239_v5 }
  0x14   :  { %225 = vmatprep.subr.bf16.mxu0 %v240_v6 }
  0x17   :  { %226 = vmatpush3.bf16.msra.mxu0 %v240_v6 }
  0x18   :  { %227 = vmatprep.subr.bf16.mxu0 %v241_v7 }
  0x1b   :  { %228 = vmatpush3.bf16.msra.mxu0 %v241_v7 }
  0x1c   :  { %229 = vmatprep.subr.bf16.mxu0 %v242_v8 }
  0x1f   :  { %230 = vmatpush3.bf16.msra.mxu0 %v242_v8 }
  0x22   :  { %232 = vmatmul.mubr.bf16.vlgmr.msra.gmra.mxu0 %v244_v9 }
  0xe2   :  { %v233_v10 = vpop.f32.mrf.mxu0 }
  0xe3   :  { %v145_v14 = vadd.f32 %v233_v10, %v175_v11 }
  0xe4   :  { %v136_v12 = vpop.f32.mrf.mxu0 }
  0xe5   :  { %v137_v17 = vadd.f32 %v175_v11, %v136_v12 }
  0xe6   :  { %v234_v13 = vpop.f32.mrf.mxu0 }
  0xe7   :  { %v148_v15 = vadd.f32 %v234_v13, %v175_v11 }
  0xe8   :  { %v139_v16 = vpop.f32.mrf.mxu0 }
  0xe9   :  { %v202_v18 = vpack.c.bf16 %v148_v15, %v145_v14  ;;  %v140_v19 = vadd.f32 %v175_v11, %v139_v16 }
  0xeb   :  { %204 = vst [vmem:[%s307_s3 + $0x8] sm:$0xff] %v202_v18   ;;  %v197_v20 = vpack.c.bf16 %v140_v19, %v137_v17 }
  0xed   :  { %198 = vst [vmem:[%s307_s3] sm:$0xff] %v197_v20  }

// kernel: resnet_feature_extractor_forward.31
= control target key start
LH: loop header
LB: loop body
LE: loop exit
PB: predicated region body
PF: predicated region fallthrough
CT: control target
= control target key end

     0   :  { %s1667_s1 = inlined_call_operand.vmem [shape: bf16[1152,128], index: 1, kind: input, shape index: {}]   ;;  %s1668_s0 = inlined_call_operand.vmem [shape: bf16[32,1152], index: 0, kind: input, shape index: {}]   ;;  %s1669_s2 = inlined_call_operand.vmem [shape: f32[1,128], index: 2, kind: input, shape index: {}]   ;;  %s1670_s3 = inlined_call_operand.vmem [shape: bf16[32,128], index: 3, kind: input, shape index: {}]   ;;  %s1671_s4 = inlined_call_operand.vmem [shape: bf16[32,128], index: 4, kind: output, shape index: {}]  }
   0x1   :  { %v1259_v0 = vld [vmem:[%s1667_s1 + $0x78] sm:$0xff]   ;;  %v1263_v4 = vld [vmem:[%s1667_s1 + $0x70] sm:$0xff]   ;;  %v1267_v8 = vld [vmem:[%s1667_s1 + $0x68] sm:$0xff]  }
   0x2   :  { %v1260_v1 = vld [vmem:[%s1667_s1 + $0x38] sm:$0xff]   ;;  %1117 = vmatprep.subr.bf16.mxu0 %v1259_v0  ;;  %v1264_v5 = vld [vmem:[%s1667_s1 + $0x30] sm:$0xff]   ;;  %v1268_v9 = vld [vmem:[%s1667_s1 + $0x28] sm:$0xff]  }
   0x3   :  { %v1261_v2 = vld [vmem:[%s1667_s1 + $0xf8] sm:$0xff]   ;;  %1118 = vmatpush3.bf16.msra.mxu0 %v1260_v1  ;;  %v1265_v6 = vld [vmem:[%s1667_s1 + $0xf0] sm:$0xff]   ;;  %v1269_v10 = vld [vmem:[%s1667_s1 + $0xe8] sm:$0xff]  }
   0x4   :  { %v1262_v3 = vld [vmem:[%s1667_s1 + $0xb8] sm:$0xff]   ;;  %1145 = vmatprep.subr.bf16.mxu1 %v1261_v2  ;;  %1119 = vmatprep.subr.bf16.mxu0 %v1263_v4  ;;  %v1266_v7 = vld [vmem:[%s1667_s1 + $0xb0] sm:$0xff]   ;;  %v1270_v11 = vld [vmem:[%s1667_s1 + $0xa8] sm:$0xff]  }
   0x5   :  { %1146 = vmatpush3.bf16.msra.mxu1 %v1262_v3  ;;  %v1271_v12 = vld [vmem:[%s1667_s1 + $0x60] sm:$0xff]   ;;  %v1275_v16 = vld [vmem:[%s1667_s1 + $0x58] sm:$0xff]   ;;  %v1279_v20 = vld [vmem:[%s1667_s1 + $0x50] sm:$0xff]  }
   0x6   :  { %1147 = vmatprep.subr.bf16.mxu1 %v1265_v6  ;;  %v1272_v13 = vld [vmem:[%s1667_s1 + $0x20] sm:$0xff]   ;;  %v1276_v17 = vld [vmem:[%s1667_s1 + $0x18] sm:$0xff]   ;;  %v1280_v21 = vld [vmem:[%s1667_s1 + $0x10] sm:$0xff]  }
   0x7   :  { %1120 = vmatpush3.bf16.msra.mxu0 %v1264_v5  ;;  %v1273_v14 = vld [vmem:[%s1667_s1 + $0xe0] sm:$0xff]   ;;  %v1277_v18 = vld [vmem:[%s1667_s1 + $0xd8] sm:$0xff]   ;;  %v1281_v22 = vld [vmem:[%s1667_s1 + $0xd0] sm:$0xff]  }
   0x8   :  { %1121 = vmatprep.subr.bf16.mxu0 %v1267_v8  ;;  %v1274_v15 = vld [vmem:[%s1667_s1 + $0xa0] sm:$0xff]   ;;  %v1278_v19 = vld [vmem:[%s1667_s1 + $0x98] sm:$0xff]   ;;  %v1282_v23 = vld [vmem:[%s1667_s1 + $0x90] sm:$0xff]  }
   0x9   :  { %1148 = vmatpush3.bf16.msra.mxu1 %v1266_v7  ;;  %v1283_v24 = vld [vmem:[%s1667_s1 + $0x48] sm:$0xff]   ;;  %v1287_v28 = vld [vmem:[%s1667_s1 + $0x40] sm:$0xff]   ;;  %v1294_v34 = vld [vmem:[%s1667_s1 + $0x178] sm:$0xff]  }
   0xa   :  { %1149 = vmatprep.subr.bf16.mxu1 %v1269_v10  ;;  %v1284_v25 = vld [vmem:[%s1667_s1 + $0x8] sm:$0xff]   ;;  %v1288_v29 = vld [vmem:[%s1667_s1] sm:$0xff]   ;;  %v1298_v37 = vld [vmem:[%s1667_s1 + $0x138] sm:$0xff]  }
   0xb   :  { %1122 = vmatpush3.bf16.msra.mxu0 %v1268_v9  ;;  %v1285_v26 = vld [vmem:[%s1667_s1 + $0xc8] sm:$0xff]   ;;  %v1289_v30 = vld [vmem:[%s1667_s1 + $0xc0] sm:$0xff]   ;;  %v1299_v38 = vld [vmem:[%s1667_s1 + $0x1f8] sm:$0xff]  }
   0xc   :  { %1123 = vmatprep.subr.bf16.mxu0 %v1271_v12  ;;  %v1286_v27 = vld [vmem:[%s1667_s1 + $0x88] sm:$0xff]   ;;  %v1290_v31 = vld [vmem:[%s1668_s0] ss:$36 sps:$4 sm:$0xff]   ;;  %v1300_v39 = vld [vmem:[%s1667_s1 + $0x1b8] sm:$0xff]  }
   0xd   :  { %1150 = vmatpush3.bf16.msra.mxu1 %v1270_v11  ;;  %v1292_v32 = vld [vmem:[%s1668_s0 + $0x4] ss:$36 sps:$4 sm:$0xff]   ;;  %v1297_v36 = vld [vmem:[%s1668_s0 + $0xc] ss:$36 sps:$4 sm:$0xff]   ;;  %v1313_v52 = vld [vmem:[%s1667_s1 + $0x158] sm:$0xff]  }
   0xe   :  { %1151 = vmatprep.subr.bf16.mxu1 %v1273_v14  ;;  %v1293_v33 = vld [vmem:[%s1667_s1 + $0x80] sm:$0xff]   ;;  %745 = vmatprep.mubr.bf16.mxu0 %v1292_v32  ;;  %v1295_v35 = vld [vmem:[%s1668_s0 + $0x8] ss:$36 sps:$4 sm:$0xff]   ;;  %v1301_v40 = vld [vmem:[%s1667_s1 + $0x170] sm:$0xff]  }
   0xf   :  { %1124 = vmatpush3.bf16.msra.mxu0 %v1272_v13  ;;  %794 = vmatprep.mubr.bf16.mxu1 %v1297_v36  ;;  %v1302_v41 = vld [vmem:[%s1667_s1 + $0x130] sm:$0xff]   ;;  %v1305_v44 = vld [vmem:[%s1667_s1 + $0x168] sm:$0xff]   ;;  %v1309_v48 = vld [vmem:[%s1667_s1 + $0x160] sm:$0xff]  }
  0x10   :  { %1125 = vmatprep.subr.bf16.mxu0 %v1275_v16  ;;  %v1303_v42 = vld [vmem:[%s1667_s1 + $0x1f0] sm:$0xff]   ;;  %v1306_v45 = vld [vmem:[%s1667_s1 + $0x128] sm:$0xff]   ;;  %v1310_v49 = vld [vmem:[%s1667_s1 + $0x120] sm:$0xff]  }
  0x11   :  { %1152 = vmatpush3.bf16.msra.mxu1 %v1274_v15  ;;  %v1304_v43 = vld [vmem:[%s1667_s1 + $0x1b0] sm:$0xff]   ;;  %v1307_v46 = vld [vmem:[%s1667_s1 + $0x1e8] sm:$0xff]   ;;  %v1311_v50 = vld [vmem:[%s1667_s1 + $0x1e0] sm:$0xff]  }
  0x12   :  { %1153 = vmatprep.subr.bf16.mxu1 %v1277_v18  ;;  %v1308_v47 = vld [vmem:[%s1667_s1 + $0x1a8] sm:$0xff]   ;;  %v1312_v51 = vld [vmem:[%s1667_s1 + $0x1a0] sm:$0xff]   ;;  %v1314_v53 = vld [vmem:[%s1667_s1 + $0x118] sm:$0xff]  }
  0x13   :  { %1126 = vmatpush3.bf16.msra.mxu0 %v1276_v17  ;;  %v1315_v54 = vld [vmem:[%s1668_s0 + $0x4c] ss:$36 sps:$4 sm:$0xff]   ;;  %v1317_v55 = vld [vmem:[%s1667_s1 + $0x1d8] sm:$0xff]   ;;  %v1331_v4 = vld [vmem:[%s1667_s1 + $0x140] sm:$0xff]  }
  0x14   :  { %1127 = vmatprep.subr.bf16.mxu0 %v1279_v20  ;;  %v1318_v56 = vld [vmem:[%s1668_s0 + $0x48] ss:$36 sps:$4 sm:$0xff]   ;;  %v1319_v57 = vld [vmem:[%s1667_s1 + $0x198] sm:$0xff]   ;;  %v1322_v59 = vld [vmem:[%s1667_s1 + $0x150] sm:$0xff]  }
  0x15   :  { %1154 = vmatpush3.bf16.msra.mxu1 %v1278_v19  ;;  %v1320_v58 = vld [vmem:[%s1668_s0 + $0x54] ss:$36 sps:$4 sm:$0xff]   ;;  %v1327_v0 = vld [vmem:[%s1667_s1 + $0x148] sm:$0xff]   ;;  %v1332_v5 = vld [vmem:[%s1667_s1 + $0x100] sm:$0xff]  }
  0x16   :  { %1155 = vmatprep.subr.bf16.mxu1 %v1281_v22  ;;  %v1323_v60 = vld [vmem:[%s1668_s0 + $0x50] ss:$36 sps:$4 sm:$0xff]   ;;  %v1328_v1 = vld [vmem:[%s1667_s1 + $0x108] sm:$0xff]   ;;  %v1333_v6 = vld [vmem:[%s1667_s1 + $0x1c0] sm:$0xff]  }
  0x17   :  { %1128 = vmatpush3.bf16.msra.mxu0 %v1280_v21  ;;  %v1324_v61 = vld [vmem:[%s1667_s1 + $0x110] sm:$0xff]   ;;  %v1329_v2 = vld [vmem:[%s1667_s1 + $0x1c8] sm:$0xff]   ;;  %v1337_v9 = vld [vmem:[%s1667_s1 + $0x180] sm:$0xff]  }
  0x18   :  { %1129 = vmatprep.subr.bf16.mxu0 %v1283_v24  ;;  %v1325_v62 = vld [vmem:[%s1667_s1 + $0x1d0] sm:$0xff]   ;;  %v1330_v3 = vld [vmem:[%s1667_s1 + $0x188] sm:$0xff]   ;;  %v1338_v10 = vld [vmem:[%s1667_s1 + $0x238] sm:$0xff]  }
  0x19   :  { %1156 = vmatpush3.bf16.msra.mxu1 %v1282_v23  ;;  %v1326_v63 = vld [vmem:[%s1667_s1 + $0x190] sm:$0xff]   ;;  %v1339_v11 = vld [vmem:[%s1668_s0 + $0x18] ss:$36 sps:$4 sm:$0xff]   ;;  %v1346_v16 = vld [vmem:[%s1667_s1 + $0x228] sm:$0xff]  }
  0x1a   :  { %1157 = vmatprep.subr.bf16.mxu1 %v1285_v26  ;;  %v1334_v7 = vld [vmem:[%s1668_s0 + $0x10] ss:$36 sps:$4 sm:$0xff]   ;;  %v1341_v12 = vld [vmem:[%s1668_s0 + $0x1c] ss:$36 sps:$4 sm:$0xff]   ;;  %v1347_v17 = vld [vmem:[%s1668_s0 + $0x64] ss:$36 sps:$4 sm:$0xff]  }
  0x1b   :  { %1130 = vmatpush3.bf16.msra.mxu0 %v1284_v25  ;;  %v1336_v8 = vld [vmem:[%s1668_s0 + $0x14] ss:$36 sps:$4 sm:$0xff]   ;;  %v1343_v14 = vld [vmem:[%s1668_s0 + $0x5c] ss:$36 sps:$4 sm:$0xff]   ;;  %v1353_v23 = vld [vmem:[%s1667_s1 + $0x208] sm:$0xff]  }
  0x1c   :  { %1131 = vmatprep.subr.bf16.mxu0 %v1287_v28  ;;  %v1342_v13 = vld [vmem:[%s1667_s1 + $0x230] sm:$0xff]   ;;  %v1345_v15 = vld [vmem:[%s1668_s0 + $0x58] ss:$36 sps:$4 sm:$0xff]   ;;  %v1349_v18 = vld [vmem:[%s1668_s0 + $0x60] ss:$36 sps:$4 sm:$0xff]  }
  0x1d   :  { %1158 = vmatpush3.bf16.msra.mxu1 %v1286_v27  ;;  %v1350_v19 = vld [vmem:[%s1667_s1 + $0x220] sm:$0xff]   ;;  %v1351_v20 = vld [vmem:[%s1667_s1 + $0x218] sm:$0xff]   ;;  %v1352_v22 = vld [vmem:[%s1667_s1 + $0x210] sm:$0xff]  }
  0x1e   :  { %1159 = vmatprep.subr.bf16.mxu1 %v1289_v30  ;;  %v1355_v21 = vld [vmem:[%s1668_s0 + $0x20] ss:$36 sps:$4 sm:$0xff]   ;;  %v1356_v25 = vld [vmem:[%s1668_s0 + $0x68] ss:$36 sps:$4 sm:$0xff]  }
  0x1f   :  { %1132 = vmatpush3.bf16.msra.mxu0 %v1288_v29  ;;  %v1354_v24 = vld [vmem:[%s1667_s1 + $0x200] sm:$0xff]  }
  0x20   :  { %1173 = vmatprep.subr.bf16.mxu0 %v1294_v34 }
  0x21   :  { %1160 = vmatpush3.bf16.msra.mxu1 %v1293_v33 }
  0x22   :  { %746 = vmatmul.mubr.bf16.vlgmr.msra.gmra.mxu0 %v1290_v31  ;;  %1201 = vmatprep.subr.bf16.mxu1 %v1299_v38 }
  0x23   :  { %1174 = vmatpush3.bf16.msra.mxu0 %v1298_v37  ;;  %753 = vmatprep.mubr.bf16.mxu0 %v1315_v54 }
  0x24   :  { %795 = vmatmul.mubr.bf16.vlgmr.msra.gmra.mxu1 %v1295_v35  ;;  %1175 = vmatprep.subr.bf16.mxu0 %v1301_v40 }
  0x25   :  { %1202 = vmatpush3.bf16.msra.mxu1 %v1300_v39  ;;  %802 = vmatprep.mubr.bf16.mxu1 %v1320_v58 }
  0x26   :  { %1203 = vmatprep.subr.bf16.mxu1 %v1303_v42 }
  0x27   :  { %1176 = vmatpush3.bf16.msra.mxu0 %v1302_v41 }
  0x28   :  { %1177 = vmatprep.subr.bf16.mxu0 %v1305_v44 }
  0x29   :  { %1204 = vmatpush3.bf16.msra.mxu1 %v1304_v43 }
  0x2a   :  { %1205 = vmatprep.subr.bf16.mxu1 %v1307_v46  ;;  %754 = vmatmul.mubr.bf16.gmra.mxu0 %v1318_v56 }
  0x2b   :  { %1178 = vmatpush3.bf16.msra.mxu0 %v1306_v45  ;;  %843 = vmatprep.mubr.bf16.mxu0 %v1336_v8 }
  0x2c   :  { %1179 = vmatprep.subr.bf16.mxu0 %v1309_v48  ;;  %803 = vmatmul.mubr.bf16.gmra.mxu1 %v1323_v60 }
  0x2d   :  { %1206 = vmatpush3.bf16.msra.mxu1 %v1308_v47  ;;  %892 = vmatprep.mubr.bf16.mxu1 %v1341_v12 }
  0x2e   :  { %1207 = vmatprep.subr.bf16.mxu1 %v1311_v50 }
  0x2f   :  { %1180 = vmatpush3.bf16.msra.mxu0 %v1310_v49 }
  0x30   :  { %1181 = vmatprep.subr.bf16.mxu0 %v1313_v52 }
  0x31   :  { %1208 = vmatpush3.bf16.msra.mxu1 %v1312_v51 }
  0x32   :  { %1209 = vmatprep.subr.bf16.mxu1 %v1317_v55  ;;  %v998_v55 = vld [vmem:[%s1669_s2] ss:$0 sm:$0xff] }
  0x33   :  { %1182 = vmatpush3.bf16.msra.mxu0 %v1314_v53 }
  0x34   :  { %1183 = vmatprep.subr.bf16.mxu0 %v1322_v59 }
  0x35   :  { %1210 = vmatpush3.bf16.msra.mxu1 %v1319_v57 }
  0x36   :  { %1211 = vmatprep.subr.bf16.mxu1 %v1325_v62 }
  0x37   :  { %1184 = vmatpush3.bf16.msra.mxu0 %v1324_v61 }
  0x38   :  { %1185 = vmatprep.subr.bf16.mxu0 %v1327_v0 }
  0x39   :  { %1212 = vmatpush3.bf16.msra.mxu1 %v1326_v63 }
  0x3a   :  { %1213 = vmatprep.subr.bf16.mxu1 %v1329_v2 }
  0x3b   :  { %1186 = vmatpush3.bf16.msra.mxu0 %v1328_v1 }
  0x3c   :  { %1187 = vmatprep.subr.bf16.mxu0 %v1331_v4 }
  0x3d   :  { %1214 = vmatpush3.bf16.msra.mxu1 %v1330_v3 }
  0x3e   :  { %1215 = vmatprep.subr.bf16.mxu1 %v1333_v6 }
  0x3f   :  { %1188 = vmatpush3.bf16.msra.mxu0 %v1332_v5 }
  0x40   :  { %1239 = vmatprep.subr.bf16.mxu0 %v1338_v10 }
  0x41   :  { %1216 = vmatpush3.bf16.msra.mxu1 %v1337_v9 }
  0x42   :  { %844 = vmatmul.mubr.bf16.vlgmr.msra.gmra.mxu0 %v1334_v7 }
  0x43   :  { %1240 = vmatpush3.bf16.msra.mxu0 %v1338_v10  ;;  %851 = vmatprep.mubr.bf16.mxu0 %v1343_v14 }
  0x44   :  { %893 = vmatmul.mubr.bf16.vlgmr.msra.gmra.mxu1 %v1339_v11  ;;  %1241 = vmatprep.subr.bf16.mxu0 %v1342_v13 }
  0x45   :  { %900 = vmatprep.mubr.bf16.mxu1 %v1347_v17 }
  0x47   :  { %1242 = vmatpush3.bf16.msra.mxu0 %v1342_v13 }
  0x48   :  { %1243 = vmatprep.subr.bf16.mxu0 %v1346_v16 }
  0x4a   :  { %852 = vmatmul.mubr.bf16.gmra.mxu0 %v1345_v15 }
  0x4b   :  { %1244 = vmatpush3.bf16.msra.mxu0 %v1346_v16  ;;  %1255 = vmatprep.mubr.bf16.mxu0 %v1355_v21 }
  0x4c   :  { %901 = vmatmul.mubr.bf16.gmra.mxu1 %v1349_v18  ;;  %1245 = vmatprep.subr.bf16.mxu0 %v1350_v19  ;;  %v1115_v18 = vld [vmem:[%s1670_s3 + $0x8] sm:$0xff]  }
  0x4f   :  { %1246 = vmatpush3.bf16.msra.mxu0 %v1350_v19 }
  0x50   :  { %1247 = vmatprep.subr.bf16.mxu0 %v1351_v20 }
  0x53   :  { %1248 = vmatpush3.bf16.msra.mxu0 %v1351_v20 }
  0x54   :  { %1249 = vmatprep.subr.bf16.mxu0 %v1352_v22 }
  0x57   :  { %1250 = vmatpush3.bf16.msra.mxu0 %v1352_v22 }
  0x58   :  { %1251 = vmatprep.subr.bf16.mxu0 %v1353_v23 }
  0x5b   :  { %1252 = vmatpush3.bf16.msra.mxu0 %v1353_v23 }
  0x5c   :  { %1253 = vmatprep.subr.bf16.mxu0 %v1354_v24 }
  0x5f   :  { %1254 = vmatpush3.bf16.msra.mxu0 %v1354_v24  ;;  %v1103_v24 = vunpack.c.l.bf16 %v1115_v18 }
  0x62   :  { %1256 = vmatmul.mubr.bf16.vlgmr.msra.gmra.mxu0 %v1356_v25  ;;  %v1098_v25 = vld [vmem:[%s1670_s3] sm:$0xff]  }
  0xe2   :  { %v1133_v26 = vpop.f32.mrf.mxu0 }
  0xe4   :  { %v1161_v27 = vpop.f32.mrf.mxu1  ;;  %v1134_v28 = vpop.f32.mrf.mxu0 }
  0xe5   :  { %v1135_v54 = vadd.f32 %v1134_v28, %v1133_v26 }
  0xe6   :  { %v1162_v29 = vpop.f32.mrf.mxu1  ;;  %v1136_v30 = vpop.f32.mrf.mxu0 }
  0xe7   :  { %v748_v61 = vadd.f32 %v1135_v54, %v998_v55  ;;  %v1163_v62 = vadd.f32 %v1162_v29, %v1161_v27 }
  0xe8   :  { %v1164_v31 = vpop.f32.mrf.mxu1  ;;  %v1137_v32 = vpop.f32.mrf.mxu0 }
  0xe9   :  { %v1138_v63 = vadd.f32 %v1137_v32, %v1136_v30  ;;  %v797_v7 = vadd.f32 %v1163_v62, %v748_v61  ;;  %v1099_v32 = vunpack.c.l.bf16 %v1098_v25 }
  0xea   :  { %v1139_v33 = vpop.f32.mrf.mxu0  ;;  %v1165_v34 = vpop.f32.mrf.mxu1 }
  0xeb   :  { %v751_v8 = vadd.f32 %v1138_v63, %v998_v55  ;;  %v1166_v9 = vadd.f32 %v1165_v34, %v1164_v31  ;;  %v1104_v34 = vunpack.c.h.bf16 %v1115_v18 }
  0xec   :  { %v1167_v35 = vpop.f32.mrf.mxu1  ;;  %v1140_v36 = vpop.f32.mrf.mxu0 }
  0xed   :  { %v1141_v53 = vadd.f32 %v1140_v36, %v1139_v33  ;;  %v800_v19 = vadd.f32 %v1166_v9, %v751_v8 }
  0xee   :  { %v1168_v37 = vpop.f32.mrf.mxu1  ;;  %v1142_v38 = vpop.f32.mrf.mxu0 }
  0xef   :  { %v756_v58 = vadd.f32 %v1141_v53, %v998_v55  ;;  %v1169_v59 = vadd.f32 %v1168_v37, %v1167_v35 }
  0xf0   :  { %v1170_v39 = vpop.f32.mrf.mxu1  ;;  %v1143_v40 = vpop.f32.mrf.mxu0 }
  0xf1   :  { %v1144_v60 = vadd.f32 %v1143_v40, %v1142_v38  ;;  %v805_v3 = vadd.f32 %v1169_v59, %v756_v58 }
  0xf2   :  { %v1171_v42 = vpop.f32.mrf.mxu1 }
  0xf3   :  { %v759_v4 = vadd.f32 %v1144_v60, %v998_v55  ;;  %v1172_v5 = vadd.f32 %v1171_v42, %v1170_v39  ;;  %v1100_v39 = vunpack.c.h.bf16 %v1098_v25 }
  0xf5   :  { %v808_v14 = vadd.f32 %v1172_v5, %v759_v4 }
 0x102   :  { %v1189_v41 = vpop.f32.mrf.mxu0 }
 0x104   :  { %v1190_v43 = vpop.f32.mrf.mxu0  ;;  %v1217_v44 = vpop.f32.mrf.mxu1 }
 0x105   :  { %v1191_v6 = vadd.f32 %v1190_v43, %v1189_v41 }
 0x106   :  { %v1192_v45 = vpop.f32.mrf.mxu0  ;;  %v1218_v46 = vpop.f32.mrf.mxu1 }
 0x107   :  { %v846_v15 = vadd.f32 %v1191_v6, %v797_v7  ;;  %v1219_v16 = vadd.f32 %v1218_v46, %v1217_v44 }
 0x108   :  { %v1193_v47 = vpop.f32.mrf.mxu0  ;;  %v1220_v48 = vpop.f32.mrf.mxu1 }
 0x109   :  { %v1194_v17 = vadd.f32 %v1193_v47, %v1192_v45  ;;  %v895_v29 = vadd.f32 %v1219_v16, %v846_v15 }
 0x10a   :  { %v1195_v49 = vpop.f32.mrf.mxu0  ;;  %v1221_v50 = vpop.f32.mrf.mxu1 }
 0x10b   :  { %v849_v26 = vadd.f32 %v1194_v17, %v800_v19  ;;  %v1222_v27 = vadd.f32 %v1221_v50, %v1220_v48 }
 0x10c   :  { %v1196_v51 = vpop.f32.mrf.mxu0  ;;  %v1223_v52 = vpop.f32.mrf.mxu1 }
 0x10d   :  { %v1197_v0 = vadd.f32 %v1196_v51, %v1195_v49  ;;  %v898_v38 = vadd.f32 %v1222_v27, %v849_v26 }
 0x10e   :  { %v1198_v56 = vpop.f32.mrf.mxu0  ;;  %v1224_v57 = vpop.f32.mrf.mxu1 }
 0x10f   :  { %v854_v10 = vadd.f32 %v1197_v0, %v805_v3  ;;  %v1225_v11 = vadd.f32 %v1224_v57, %v1223_v52 }
 0x110   :  { %v1199_v1 = vpop.f32.mrf.mxu0  ;;  %v1226_v2 = vpop.f32.mrf.mxu1 }
 0x111   :  { %v1200_v12 = vadd.f32 %v1199_v1, %v1198_v56  ;;  %v903_v22 = vadd.f32 %v1225_v11, %v854_v10 }
 0x112   :  { %v1227_v13 = vpop.f32.mrf.mxu1 }
 0x113   :  { %v857_v20 = vadd.f32 %v1200_v12, %v808_v14  ;;  %v1228_v21 = vadd.f32 %v1227_v13, %v1226_v2 }
 0x115   :  { %v906_v33 = vadd.f32 %v1228_v21, %v857_v20 }
 0x122   :  { %v1257_v23 = vpop.f32.mrf.mxu0 }
 0x123   :  { %v952_v28 = vadd.f32 %v1257_v23, %v903_v22 }
 0x124   :  { %v943_v30 = vpop.f32.mrf.mxu0 }
 0x125   :  { %v944_v31 = vadd.f32 %v943_v30, %v895_v29  ;;  %v968_v36 = vadd.f32 %v1103_v24, %v952_v28 }
 0x126   :  { %v1258_v35 = vpop.f32.mrf.mxu0 }
 0x127   :  { %v955_v37 = vadd.f32 %v1258_v35, %v906_v33  ;;  %v966_v41 = vadd.f32 %v1099_v32, %v944_v31  ;;  %v972_v44 = vmax.f32 %v968_v36, 0.0 }
 0x128   :  { %v946_v40 = vpop.f32.mrf.mxu0 }
 0x129   :  { %v969_v42 = vadd.f32 %v1104_v34, %v955_v37  ;;  %v947_v43 = vadd.f32 %v946_v40, %v898_v38  ;;  %v970_v47 = vmax.f32 %v966_v41, 0.0 }
 0x12b   :  { %v973_v45 = vmax.f32 %v969_v42, 0.0  ;;  %v967_v46 = vadd.f32 %v1100_v39, %v947_v43 }
 0x12d   :  { %v1113_v48 = vpack.c.bf16 %v973_v45, %v972_v44  ;;  %v971_v49 = vmax.f32 %v967_v46, 0.0 }
 0x12f   :  { %1116 = vst [vmem:[%s1671_s4 + $0x8] sm:$0xff] %v1113_v48   ;;  %v1108_v50 = vpack.c.bf16 %v971_v49, %v970_v47 }
 0x131   :  { %1109 = vst [vmem:[%s1671_s4] sm:$0xff] %v1108_v50  }

// kernel: resnet_feature_extractor_forward.34
= control target key start
LH: loop header
LB: loop body
LE: loop exit
PB: predicated region body
PF: predicated region fallthrough
CT: control target
= control target key end

     0   :  { %vm1125_vm0 = vmmov 0   ;;  %s1383_s1 = inlined_call_operand.vmem [shape: bf16[1152,128], index: 1, kind: input, shape index: {}]   ;;  %s1384_s0 = inlined_call_operand.vmem [shape: bf16[8,1152], index: 0, kind: input, shape index: {}]   ;;  %s1385_s2 = inlined_call_operand.vmem [shape: f32[1,128], index: 2, kind: input, shape index: {}]   ;;  %s1386_s3 = inlined_call_operand.vmem [shape: bf16[8,128], index: 3, kind: output, shape index: {}]  }
   0x1   :  { %v1043_v0 = vld [vmem:[%s1383_s1 + $0x78] sm:$0xff]   ;;  %v1047_v4 = vld [vmem:[%s1383_s1 + $0x70] sm:$0xff]   ;;  %v1051_v8 = vld [vmem:[%s1383_s1 + $0x68] sm:$0xff]  }
   0x2   :  { %v1044_v1 = vld [vmem:[%s1383_s1 + $0x38] sm:$0xff]   ;;  %924 = vmatprep.subr.bf16.mxu0 %v1043_v0  ;;  %v1048_v5 = vld [vmem:[%s1383_s1 + $0x30] sm:$0xff]   ;;  %v1052_v9 = vld [vmem:[%s1383_s1 + $0x28] sm:$0xff]  }
   0x3   :  { %v1045_v2 = vld [vmem:[%s1383_s1 + $0xf8] sm:$0xff]   ;;  %925 = vmatpush3.bf16.msra.mxu0 %v1044_v1  ;;  %v1049_v6 = vld [vmem:[%s1383_s1 + $0xf0] sm:$0xff]   ;;  %v1053_v10 = vld [vmem:[%s1383_s1 + $0xe8] sm:$0xff]  }
   0x4   :  { %v1046_v3 = vld [vmem:[%s1383_s1 + $0xb8] sm:$0xff]   ;;  %946 = vmatprep.subr.bf16.mxu1 %v1045_v2  ;;  %926 = vmatprep.subr.bf16.mxu0 %v1047_v4  ;;  %v1050_v7 = vld [vmem:[%s1383_s1 + $0xb0] sm:$0xff]   ;;  %v1054_v11 = vld [vmem:[%s1383_s1 + $0xa8] sm:$0xff]  }
   0x5   :  { %947 = vmatpush3.bf16.msra.mxu1 %v1046_v3  ;;  %v1055_v12 = vld [vmem:[%s1383_s1 + $0x60] sm:$0xff]   ;;  %v1059_v16 = vld [vmem:[%s1383_s1 + $0x58] sm:$0xff]   ;;  %v1063_v20 = vld [vmem:[%s1383_s1 + $0x50] sm:$0xff]  }
   0x6   :  { %948 = vmatprep.subr.bf16.mxu1 %v1049_v6  ;;  %v1056_v13 = vld [vmem:[%s1383_s1 + $0x20] sm:$0xff]   ;;  %v1060_v17 = vld [vmem:[%s1383_s1 + $0x18] sm:$0xff]   ;;  %v1064_v21 = vld [vmem:[%s1383_s1 + $0x10] sm:$0xff]  }
   0x7   :  { %927 = vmatpush3.bf16.msra.mxu0 %v1048_v5  ;;  %v1057_v14 = vld [vmem:[%s1383_s1 + $0xe0] sm:$0xff]   ;;  %v1061_v18 = vld [vmem:[%s1383_s1 + $0xd8] sm:$0xff]   ;;  %v1065_v22 = vld [vmem:[%s1383_s1 + $0xd0] sm:$0xff]  }
   0x8   :  { %928 = vmatprep.subr.bf16.mxu0 %v1051_v8  ;;  %v1058_v15 = vld [vmem:[%s1383_s1 + $0xa0] sm:$0xff]   ;;  %v1062_v19 = vld [vmem:[%s1383_s1 + $0x98] sm:$0xff]   ;;  %v1066_v23 = vld [vmem:[%s1383_s1 + $0x90] sm:$0xff]  }
   0x9   :  { %949 = vmatpush3.bf16.msra.mxu1 %v1050_v7  ;;  %v1067_v24 = vld [vmem:[%s1383_s1 + $0x48] sm:$0xff]   ;;  %v1071_v28 = vld [vmem:[%s1383_s1 + $0x40] sm:$0xff]   ;;  %v1077_v35 = vld [vmem:[%s1383_s1 + $0x178] sm:$0xff]  }
   0xa   :  { %950 = vmatprep.subr.bf16.mxu1 %v1053_v10  ;;  %v1068_v25 = vld [vmem:[%s1383_s1 + $0x8] sm:$0xff]   ;;  %v1072_v29 = vld [vmem:[%s1383_s1] sm:$0xff]   ;;  %v1080_v39 = vld [vmem:[%s1383_s1 + $0x138] sm:$0xff]  }
   0xb   :  { %929 = vmatpush3.bf16.msra.mxu0 %v1052_v9  ;;  %v1069_v26 = vld [vmem:[%s1383_s1 + $0xc8] sm:$0xff]   ;;  %v1073_v30 = vld [vmem:[%s1383_s1 + $0xc0] sm:$0xff]   ;;  %v1081_v40 = vld [vmem:[%s1383_s1 + $0x1f8] sm:$0xff]   ;;  %v1124_v9 = vmov 0.0  }
   0xc   :  { %930 = vmatprep.subr.bf16.mxu0 %v1055_v12  ;;  %v1070_v27 = vld [vmem:[%s1383_s1 + $0x88] sm:$0xff]   ;;  %v15_v31 = vld [vmem:[%s1384_s0] sm:$0xff]  ;;  %v1082_v41 = vld [vmem:[%s1383_s1 + $0x1b8] sm:$0xff]  }
   0xd   :  { %951 = vmatpush3.bf16.msra.mxu1 %v1054_v11  ;;  %v843_v32 = vcombine.low %v15_v31, %v15_v31  ;;  %v844_v33 = vcombine.high %v15_v31, %v15_v31  ;;  %v1076_v34 = vld [vmem:[%s1383_s1 + $0x80] sm:$0xff]   ;;  %v16_v36 = vld [vmem:[%s1384_s0 + $0x8] sm:$0xff]  ;;  %v1083_v42 = vld [vmem:[%s1383_s1 + $0x170] sm:$0xff]  }
   0xe   :  { %952 = vmatprep.subr.bf16.mxu1 %v1057_v14  ;;  %v845_v37 = vcombine.low %v16_v36, %v16_v36  ;;  %v846_v38 = vcombine.high %v16_v36, %v16_v36  ;;  %v1084_v43 = vld [vmem:[%s1383_s1 + $0x130] sm:$0xff]   ;;  %v1087_v46 = vld [vmem:[%s1383_s1 + $0x168] sm:$0xff]   ;;  %v1091_v50 = vld [vmem:[%s1383_s1 + $0x160] sm:$0xff]  }
   0xf   :  { %931 = vmatpush3.bf16.msra.mxu0 %v1056_v13  ;;  %667 = vmatprep.mubr.bf16.mxu0 %v844_v33  ;;  %v1085_v44 = vld [vmem:[%s1383_s1 + $0x1f0] sm:$0xff]   ;;  %v1088_v47 = vld [vmem:[%s1383_s1 + $0x128] sm:$0xff]   ;;  %v1092_v51 = vld [vmem:[%s1383_s1 + $0x120] sm:$0xff]  }
  0x10   :  { %932 = vmatprep.subr.bf16.mxu0 %v1059_v16  ;;  %707 = vmatprep.mubr.bf16.mxu1 %v846_v38  ;;  %v1086_v45 = vld [vmem:[%s1383_s1 + $0x1b0] sm:$0xff]   ;;  %v1089_v48 = vld [vmem:[%s1383_s1 + $0x1e8] sm:$0xff]   ;;  %v1093_v52 = vld [vmem:[%s1383_s1 + $0x1e0] sm:$0xff]  }
  0x11   :  { %953 = vmatpush3.bf16.msra.mxu1 %v1058_v15  ;;  %v1090_v49 = vld [vmem:[%s1383_s1 + $0x1a8] sm:$0xff]   ;;  %v1094_v53 = vld [vmem:[%s1383_s1 + $0x1a0] sm:$0xff]   ;;  %v1095_v54 = vld [vmem:[%s1383_s1 + $0x158] sm:$0xff]  }
  0x12   :  { %954 = vmatprep.subr.bf16.mxu1 %v1061_v18  ;;  %v1096_v55 = vld [vmem:[%s1383_s1 + $0x118] sm:$0xff]   ;;  %v1099_v58 = vld [vmem:[%s1383_s1 + $0x150] sm:$0xff]   ;;  %v1103_v62 = vld [vmem:[%s1383_s1 + $0x148] sm:$0xff]  }
  0x13   :  { %933 = vmatpush3.bf16.msra.mxu0 %v1060_v17  ;;  %v1097_v56 = vld [vmem:[%s1383_s1 + $0x1d8] sm:$0xff]   ;;  %v1100_v59 = vld [vmem:[%s1383_s1 + $0x110] sm:$0xff]   ;;  %v1104_v63 = vld [vmem:[%s1383_s1 + $0x108] sm:$0xff]  }
  0x14   :  { %934 = vmatprep.subr.bf16.mxu0 %v1063_v20  ;;  %v1098_v57 = vld [vmem:[%s1383_s1 + $0x198] sm:$0xff]   ;;  %v1101_v60 = vld [vmem:[%s1383_s1 + $0x1d0] sm:$0xff]   ;;  %v1105_v0 = vld [vmem:[%s1383_s1 + $0x1c8] sm:$0xff]  }
  0x15   :  { %955 = vmatpush3.bf16.msra.mxu1 %v1062_v19  ;;  %v1102_v61 = vld [vmem:[%s1383_s1 + $0x190] sm:$0xff]   ;;  %v1106_v1 = vld [vmem:[%s1383_s1 + $0x188] sm:$0xff]   ;;  %v1107_v2 = vld [vmem:[%s1383_s1 + $0x140] sm:$0xff]  }
  0x16   :  { %956 = vmatprep.subr.bf16.mxu1 %v1065_v22  ;;  %v1108_v3 = vld [vmem:[%s1383_s1 + $0x100] sm:$0xff]   ;;  %v17_v5 = vld [vmem:[%s1384_s0 + $0x10] sm:$0xff]  ;;  %v18_v10 = vld [vmem:[%s1384_s0 + $0x18] sm:$0xff] }
  0x17   :  { %935 = vmatpush3.bf16.msra.mxu0 %v1064_v21  ;;  %v1109_v4 = vld [vmem:[%s1383_s1 + $0x1c0] sm:$0xff]   ;;  %v847_v6 = vcombine.low %v17_v5, %v17_v5  ;;  %v848_v7 = vcombine.high %v17_v5, %v17_v5  ;;  %v849_v11 = vcombine.low %v18_v10, %v18_v10  ;;  %v850_v12 = vcombine.high %v18_v10, %v18_v10  ;;  %v1115_v13 = vld [vmem:[%s1383_s1 + $0x238] sm:$0xff]   ;;  %v1116_v14 = vld [vmem:[%s1383_s1 + $0x230] sm:$0xff]  }
  0x18   :  { %936 = vmatprep.subr.bf16.mxu0 %v1067_v24  ;;  %v1112_v8 = vld [vmem:[%s1383_s1 + $0x180] sm:$0xff]   ;;  %v1117_v15 = vld [vmem:[%s1383_s1 + $0x228] sm:$0xff]   ;;  %v1119_v17 = vld [vmem:[%s1383_s1 + $0x218] sm:$0xff]  }
  0x19   :  { %957 = vmatpush3.bf16.msra.mxu1 %v1066_v23  ;;  %v1118_v16 = vld [vmem:[%s1383_s1 + $0x220] sm:$0xff]   ;;  %v1120_v18 = vld [vmem:[%s1383_s1 + $0x210] sm:$0xff]   ;;  %v1121_v19 = vld [vmem:[%s1383_s1 + $0x208] sm:$0xff]  }
  0x1a   :  { %958 = vmatprep.subr.bf16.mxu1 %v1069_v26  ;;  %v1122_v20 = vld [vmem:[%s1383_s1 + $0x200] sm:$0xff]  }
  0x1b   :  { %937 = vmatpush3.bf16.msra.mxu0 %v1068_v25  ;;  %v1123_v21 = vld [vmem:[%s1384_s0 + $0x20] ss:$0 sps:$4 sm:$0xff]  }
  0x1c   :  { %938 = vmatprep.subr.bf16.mxu0 %v1071_v28 }
  0x1d   :  { %959 = vmatpush3.bf16.msra.mxu1 %v1070_v27 }
  0x1e   :  { %960 = vmatprep.subr.bf16.mxu1 %v1073_v30 }
  0x1f   :  { %939 = vmatpush3.bf16.msra.mxu0 %v1072_v29 }
  0x20   :  { %968 = vmatprep.subr.bf16.mxu0 %v1077_v35 }
  0x21   :  { %961 = vmatpush3.bf16.msra.mxu1 %v1076_v34 }
  0x22   :  { %668 = vmatmul.mubr.bf16.vlgmr.msra.gmra.mxu0 %v843_v32  ;;  %990 = vmatprep.subr.bf16.mxu1 %v1081_v40 }
  0x23   :  { %969 = vmatpush3.bf16.msra.mxu0 %v1080_v39  ;;  %747 = vmatprep.mubr.bf16.mxu0 %v848_v7  ;;  %v842_v39 = vld [vmem:[%s1385_s2] ss:$0 sm:$0xff] }
  0x24   :  { %708 = vmatmul.mubr.bf16.vlgmr.msra.gmra.mxu1 %v845_v37  ;;  %970 = vmatprep.subr.bf16.mxu0 %v1083_v42 }
  0x25   :  { %991 = vmatpush3.bf16.msra.mxu1 %v1082_v41  ;;  %787 = vmatprep.mubr.bf16.mxu1 %v850_v12 }
  0x26   :  { %992 = vmatprep.subr.bf16.mxu1 %v1085_v44 }
  0x27   :  { %971 = vmatpush3.bf16.msra.mxu0 %v1084_v43 }
  0x28   :  { %972 = vmatprep.subr.bf16.mxu0 %v1087_v46 }
  0x29   :  { %993 = vmatpush3.bf16.msra.mxu1 %v1086_v45 }
  0x2a   :  { %994 = vmatprep.subr.bf16.mxu1 %v1089_v48 }
  0x2b   :  { %973 = vmatpush3.bf16.msra.mxu0 %v1088_v47 }
  0x2c   :  { %974 = vmatprep.subr.bf16.mxu0 %v1091_v50 }
  0x2d   :  { %995 = vmatpush3.bf16.msra.mxu1 %v1090_v49 }
  0x2e   :  { %996 = vmatprep.subr.bf16.mxu1 %v1093_v52 }
  0x2f   :  { %975 = vmatpush3.bf16.msra.mxu0 %v1092_v51 }
  0x30   :  { %976 = vmatprep.subr.bf16.mxu0 %v1095_v54 }
  0x31   :  { %997 = vmatpush3.bf16.msra.mxu1 %v1094_v53 }
  0x32   :  { %998 = vmatprep.subr.bf16.mxu1 %v1097_v56 }
  0x33   :  { %977 = vmatpush3.bf16.msra.mxu0 %v1096_v55 }
  0x34   :  { %978 = vmatprep.subr.bf16.mxu0 %v1099_v58 }
  0x35   :  { %999 = vmatpush3.bf16.msra.mxu1 %v1098_v57 }
  0x36   :  { %1000 = vmatprep.subr.bf16.mxu1 %v1101_v60 }
  0x37   :  { %979 = vmatpush3.bf16.msra.mxu0 %v1100_v59 }
  0x38   :  { %980 = vmatprep.subr.bf16.mxu0 %v1103_v62 }
  0x39   :  { %1001 = vmatpush3.bf16.msra.mxu1 %v1102_v61 }
  0x3a   :  { %1002 = vmatprep.subr.bf16.mxu1 %v1105_v0 }
  0x3b   :  { %981 = vmatpush3.bf16.msra.mxu0 %v1104_v63 }
  0x3c   :  { %982 = vmatprep.subr.bf16.mxu0 %v1107_v2 }
  0x3d   :  { %1003 = vmatpush3.bf16.msra.mxu1 %v1106_v1 }
  0x3e   :  { %1004 = vmatprep.subr.bf16.mxu1 %v1109_v4 }
  0x3f   :  { %983 = vmatpush3.bf16.msra.mxu0 %v1108_v3 }
  0x40   :  { %1021 = vmatprep.subr.bf16.mxu0 %v1124_v9 }
  0x41   :  { %1005 = vmatpush3.bf16.msra.mxu1 %v1112_v8 }
  0x42   :  { %748 = vmatmul.mubr.bf16.vlgmr.msra.gmra.mxu0 %v847_v6 }
  0x43   :  { %1022 = vmatpush3.bf16.msra.mxu0 %v1115_v13  ;;  %1037 = vmatprep.mubr.msk.bf16.mxu0 %vm1125_vm0, %v1124_v9 }
  0x44   :  { %788 = vmatmul.mubr.bf16.vlgmr.msra.gmra.mxu1 %v849_v11  ;;  %1023 = vmatprep.subr.bf16.mxu0 %v1124_v9 }
  0x47   :  { %1024 = vmatpush3.bf16.msra.mxu0 %v1116_v14 }
  0x48   :  { %1025 = vmatprep.subr.bf16.mxu0 %v1124_v9 }
  0x4b   :  { %1026 = vmatpush3.bf16.msra.mxu0 %v1117_v15 }
  0x4c   :  { %1027 = vmatprep.subr.bf16.mxu0 %v1124_v9 }
  0x4f   :  { %1028 = vmatpush3.bf16.msra.mxu0 %v1118_v16 }
  0x50   :  { %1029 = vmatprep.subr.bf16.mxu0 %v1124_v9 }
  0x53   :  { %1030 = vmatpush3.bf16.msra.mxu0 %v1119_v17 }
  0x54   :  { %1031 = vmatprep.subr.bf16.mxu0 %v1124_v9 }
  0x57   :  { %1032 = vmatpush3.bf16.msra.mxu0 %v1120_v18 }
  0x58   :  { %1033 = vmatprep.subr.bf16.mxu0 %v1124_v9 }
  0x5b   :  { %1034 = vmatpush3.bf16.msra.mxu0 %v1121_v19 }
  0x5c   :  { %1035 = vmatprep.subr.bf16.mxu0 %v1124_v9 }
  0x5f   :  { %1036 = vmatpush3.bf16.msra.mxu0 %v1122_v20 }
  0x62   :  { %1038 = vmatmul.mubr.bf16.vlgmr.msra.gmra.mxu0 %v1123_v21 }
  0xe2   :  { %v940_v22 = vpop.f32.mrf.mxu0 }
  0xe4   :  { %v941_v23 = vpop.f32.mrf.mxu0  ;;  %v962_v24 = vpop.f32.mrf.mxu1 }
  0xe5   :  { %v942_v38 = vadd.f32 %v941_v23, %v940_v22 }
  0xe6   :  { %v943_v25 = vpop.f32.mrf.mxu0  ;;  %v963_v26 = vpop.f32.mrf.mxu1 }
  0xe7   :  { %v670_v40 = vadd.f32 %v942_v38, %v842_v39  ;;  %v964_v41 = vadd.f32 %v963_v26, %v962_v24 }
  0xe8   :  { %v944_v27 = vpop.f32.mrf.mxu0  ;;  %v965_v28 = vpop.f32.mrf.mxu1 }
  0xe9   :  { %v710_v43 = vadd.f32 %v964_v41, %v670_v40 }
  0xea   :  { %v966_v29 = vpop.f32.mrf.mxu1 }
 0x102   :  { %v984_v30 = vpop.f32.mrf.mxu0 }
 0x104   :  { %v985_v31 = vpop.f32.mrf.mxu0  ;;  %v1006_v32 = vpop.f32.mrf.mxu1 }
 0x105   :  { %v986_v42 = vadd.f32 %v985_v31, %v984_v30 }
 0x106   :  { %v987_v33 = vpop.f32.mrf.mxu0  ;;  %v1007_v34 = vpop.f32.mrf.mxu1 }
 0x107   :  { %v750_v44 = vadd.f32 %v986_v42, %v710_v43  ;;  %v1008_v45 = vadd.f32 %v1007_v34, %v1006_v32 }
 0x108   :  { %v988_v35 = vpop.f32.mrf.mxu0  ;;  %v1009_v36 = vpop.f32.mrf.mxu1 }
 0x109   :  { %v790_v46 = vadd.f32 %v1008_v45, %v750_v44 }
 0x10a   :  { %v1010_v37 = vpop.f32.mrf.mxu1 }
 0x122   :  { %v829_v47 = vpop.f32.mrf.mxu0 }
 0x123   :  { %v830_v48 = vadd.f32 %v829_v47, %v790_v46 }
 0x124   :  { %v1039_v49 = vpop.f32.mrf.mxu0 }
 0x125   :  { %v835_v50 = vmax.f32 %v830_v48, 0.0 }
 0x126   :  { %v832_v51 = vpop.f32.mrf.mxu0 }
 0x127   :  { %v836_v52 = vpack.c.bf16 %v835_v50, %v835_v50 }
 0x128   :  { %v1040_v53 = vpop.f32.mrf.mxu0 }
 0x129   :  { %837 = vst [vmem:[%s1386_s3] sm:$0xf] %v836_v52 }

// kernel: resnet_feature_extractor_forward.35
= control target key start
LH: loop header
LB: loop body
LE: loop exit
PB: predicated region body
PF: predicated region fallthrough
CT: control target
= control target key end

     0   :  { %v181_v0 = vmov 0.0   ;;  %vm182_vm0 = vmmov 0   ;;  %s236_s1 = inlined_call_operand.vmem [shape: bf16[128,128], index: 1, kind: input, shape index: {}]   ;;  %s237_s0 = inlined_call_operand.vmem [shape: bf16[8,128], index: 0, kind: input, shape index: {}]   ;;  %s238_s2 = inlined_call_operand.vmem [shape: f32[1,128], index: 2, kind: input, shape index: {}]   ;;  %s239_s3 = inlined_call_operand.vmem [shape: bf16[8,128], index: 3, kind: output, shape index: {}]  }
   0x1   :  { %151 = vmatprep.subr.bf16.mxu0 %v181_v0  ;;  %v173_v1 = vld [vmem:[%s236_s1 + $0x38] sm:$0xff]   ;;  %167 = vmatprep.mubr.msk.bf16.mxu0 %vm182_vm0, %v181_v0  ;;  %v174_v2 = vld [vmem:[%s236_s1 + $0x30] sm:$0xff]   ;;  %v175_v3 = vld [vmem:[%s236_s1 + $0x28] sm:$0xff]  }
   0x2   :  { %152 = vmatpush3.bf16.msra.mxu0 %v173_v1  ;;  %v176_v4 = vld [vmem:[%s236_s1 + $0x20] sm:$0xff]   ;;  %v177_v5 = vld [vmem:[%s236_s1 + $0x18] sm:$0xff]   ;;  %v178_v6 = vld [vmem:[%s236_s1 + $0x10] sm:$0xff]  }
   0x3   :  { %153 = vmatprep.subr.bf16.mxu0 %v181_v0  ;;  %v179_v7 = vld [vmem:[%s236_s1 + $0x8] sm:$0xff]   ;;  %v180_v8 = vld [vmem:[%s236_s1] sm:$0xff]  }
   0x4   :  { %v15_v9 = vld [vmem:[%s237_s0] sm:$0xf] }
   0x5   :  { %v133_v10 = vld [vmem:[%s238_s2] ss:$0 sm:$0xff] }
   0x6   :  { %154 = vmatpush3.bf16.msra.mxu0 %v174_v2 }
   0x7   :  { %155 = vmatprep.subr.bf16.mxu0 %v181_v0 }
   0xa   :  { %156 = vmatpush3.bf16.msra.mxu0 %v175_v3 }
   0xb   :  { %157 = vmatprep.subr.bf16.mxu0 %v181_v0 }
   0xe   :  { %158 = vmatpush3.bf16.msra.mxu0 %v176_v4 }
   0xf   :  { %159 = vmatprep.subr.bf16.mxu0 %v181_v0 }
  0x12   :  { %160 = vmatpush3.bf16.msra.mxu0 %v177_v5 }
  0x13   :  { %161 = vmatprep.subr.bf16.mxu0 %v181_v0 }
  0x16   :  { %162 = vmatpush3.bf16.msra.mxu0 %v178_v6 }
  0x17   :  { %163 = vmatprep.subr.bf16.mxu0 %v181_v0 }
  0x1a   :  { %164 = vmatpush3.bf16.msra.mxu0 %v179_v7 }
  0x1b   :  { %165 = vmatprep.subr.bf16.mxu0 %v181_v0 }
  0x1e   :  { %166 = vmatpush3.bf16.msra.mxu0 %v180_v8 }
  0x21   :  { %168 = vmatmul.mubr.bf16.vlgmr.msra.gmra.mxu0 %v15_v9 }
  0xe1   :  { %v121_v11 = vpop.f32.mrf.mxu0 }
  0xe2   :  { %v122_v12 = vadd.f32 %v133_v10, %v121_v11 }
  0xe3   :  { %v169_v13 = vpop.f32.mrf.mxu0 }
  0xe4   :  { %v127_v14 = vpack.c.bf16 %v122_v12, %v122_v12 }
  0xe5   :  { %v124_v15 = vpop.f32.mrf.mxu0 }
  0xe6   :  { %128 = vst [vmem:[%s239_s3] sm:$0xf] %v127_v14 }
  0xe7   :  { %v170_v16 = vpop.f32.mrf.mxu0 }

// kernel: resnet_feature_extractor_forward.36
= control target key start
LH: loop header
LB: loop body
LE: loop exit
PB: predicated region body
PF: predicated region fallthrough
CT: control target
= control target key end

     0   :  { %vm1131_vm0 = vmmov 0   ;;  %s1397_s1 = inlined_call_operand.vmem [shape: bf16[1152,128], index: 1, kind: input, shape index: {}]   ;;  %s1398_s0 = inlined_call_operand.vmem [shape: bf16[8,1152], index: 0, kind: input, shape index: {}]   ;;  %s1399_s2 = inlined_call_operand.vmem [shape: f32[1,128], index: 2, kind: input, shape index: {}]   ;;  %s1400_s3 = inlined_call_operand.vmem [shape: bf16[8,128], index: 3, kind: input, shape index: {}]   ;;  %s1401_s4 = inlined_call_operand.vmem [shape: bf16[8,128], index: 4, kind: output, shape index: {}]  }
   0x1   :  { %v1049_v0 = vld [vmem:[%s1397_s1 + $0x78] sm:$0xff]   ;;  %v1053_v4 = vld [vmem:[%s1397_s1 + $0x70] sm:$0xff]   ;;  %v1057_v8 = vld [vmem:[%s1397_s1 + $0x68] sm:$0xff]  }
   0x2   :  { %v1050_v1 = vld [vmem:[%s1397_s1 + $0x38] sm:$0xff]   ;;  %930 = vmatprep.subr.bf16.mxu0 %v1049_v0  ;;  %v1054_v5 = vld [vmem:[%s1397_s1 + $0x30] sm:$0xff]   ;;  %v1058_v9 = vld [vmem:[%s1397_s1 + $0x28] sm:$0xff]  }
   0x3   :  { %v1051_v2 = vld [vmem:[%s1397_s1 + $0xf8] sm:$0xff]   ;;  %931 = vmatpush3.bf16.msra.mxu0 %v1050_v1  ;;  %v1055_v6 = vld [vmem:[%s1397_s1 + $0xf0] sm:$0xff]   ;;  %v1059_v10 = vld [vmem:[%s1397_s1 + $0xe8] sm:$0xff]  }
   0x4   :  { %v1052_v3 = vld [vmem:[%s1397_s1 + $0xb8] sm:$0xff]   ;;  %952 = vmatprep.subr.bf16.mxu1 %v1051_v2  ;;  %932 = vmatprep.subr.bf16.mxu0 %v1053_v4  ;;  %v1056_v7 = vld [vmem:[%s1397_s1 + $0xb0] sm:$0xff]   ;;  %v1060_v11 = vld [vmem:[%s1397_s1 + $0xa8] sm:$0xff]  }
   0x5   :  { %953 = vmatpush3.bf16.msra.mxu1 %v1052_v3  ;;  %v1061_v12 = vld [vmem:[%s1397_s1 + $0x60] sm:$0xff]   ;;  %v1065_v16 = vld [vmem:[%s1397_s1 + $0x58] sm:$0xff]   ;;  %v1069_v20 = vld [vmem:[%s1397_s1 + $0x50] sm:$0xff]  }
   0x6   :  { %954 = vmatprep.subr.bf16.mxu1 %v1055_v6  ;;  %v1062_v13 = vld [vmem:[%s1397_s1 + $0x20] sm:$0xff]   ;;  %v1066_v17 = vld [vmem:[%s1397_s1 + $0x18] sm:$0xff]   ;;  %v1070_v21 = vld [vmem:[%s1397_s1 + $0x10] sm:$0xff]  }
   0x7   :  { %933 = vmatpush3.bf16.msra.mxu0 %v1054_v5  ;;  %v1063_v14 = vld [vmem:[%s1397_s1 + $0xe0] sm:$0xff]   ;;  %v1067_v18 = vld [vmem:[%s1397_s1 + $0xd8] sm:$0xff]   ;;  %v1071_v22 = vld [vmem:[%s1397_s1 + $0xd0] sm:$0xff]  }
   0x8   :  { %934 = vmatprep.subr.bf16.mxu0 %v1057_v8  ;;  %v1064_v15 = vld [vmem:[%s1397_s1 + $0xa0] sm:$0xff]   ;;  %v1068_v19 = vld [vmem:[%s1397_s1 + $0x98] sm:$0xff]   ;;  %v1072_v23 = vld [vmem:[%s1397_s1 + $0x90] sm:$0xff]  }
   0x9   :  { %955 = vmatpush3.bf16.msra.mxu1 %v1056_v7  ;;  %v1073_v24 = vld [vmem:[%s1397_s1 + $0x48] sm:$0xff]   ;;  %v1077_v28 = vld [vmem:[%s1397_s1 + $0x40] sm:$0xff]   ;;  %v1083_v35 = vld [vmem:[%s1397_s1 + $0x178] sm:$0xff]  }
   0xa   :  { %956 = vmatprep.subr.bf16.mxu1 %v1059_v10  ;;  %v1074_v25 = vld [vmem:[%s1397_s1 + $0x8] sm:$0xff]   ;;  %v1078_v29 = vld [vmem:[%s1397_s1] sm:$0xff]   ;;  %v1086_v39 = vld [vmem:[%s1397_s1 + $0x138] sm:$0xff]  }
   0xb   :  { %935 = vmatpush3.bf16.msra.mxu0 %v1058_v9  ;;  %v1075_v26 = vld [vmem:[%s1397_s1 + $0xc8] sm:$0xff]   ;;  %v1079_v30 = vld [vmem:[%s1397_s1 + $0xc0] sm:$0xff]   ;;  %v1087_v40 = vld [vmem:[%s1397_s1 + $0x1f8] sm:$0xff]   ;;  %v1130_v9 = vmov 0.0  }
   0xc   :  { %936 = vmatprep.subr.bf16.mxu0 %v1061_v12  ;;  %v1076_v27 = vld [vmem:[%s1397_s1 + $0x88] sm:$0xff]   ;;  %v18_v31 = vld [vmem:[%s1398_s0] sm:$0xff]  ;;  %v1088_v41 = vld [vmem:[%s1397_s1 + $0x1b8] sm:$0xff]  }
   0xd   :  { %957 = vmatpush3.bf16.msra.mxu1 %v1060_v11  ;;  %v849_v32 = vcombine.low %v18_v31, %v18_v31  ;;  %v850_v33 = vcombine.high %v18_v31, %v18_v31  ;;  %v1082_v34 = vld [vmem:[%s1397_s1 + $0x80] sm:$0xff]   ;;  %v19_v36 = vld [vmem:[%s1398_s0 + $0x8] sm:$0xff]  ;;  %v1089_v42 = vld [vmem:[%s1397_s1 + $0x170] sm:$0xff]  }
   0xe   :  { %958 = vmatprep.subr.bf16.mxu1 %v1063_v14  ;;  %v851_v37 = vcombine.low %v19_v36, %v19_v36  ;;  %v852_v38 = vcombine.high %v19_v36, %v19_v36  ;;  %v1090_v43 = vld [vmem:[%s1397_s1 + $0x130] sm:$0xff]   ;;  %v1093_v46 = vld [vmem:[%s1397_s1 + $0x168] sm:$0xff]   ;;  %v1097_v50 = vld [vmem:[%s1397_s1 + $0x160] sm:$0xff]  }
   0xf   :  { %937 = vmatpush3.bf16.msra.mxu0 %v1062_v13  ;;  %670 = vmatprep.mubr.bf16.mxu0 %v850_v33  ;;  %v1091_v44 = vld [vmem:[%s1397_s1 + $0x1f0] sm:$0xff]   ;;  %v1094_v47 = vld [vmem:[%s1397_s1 + $0x128] sm:$0xff]   ;;  %v1098_v51 = vld [vmem:[%s1397_s1 + $0x120] sm:$0xff]  }
  0x10   :  { %938 = vmatprep.subr.bf16.mxu0 %v1065_v16  ;;  %710 = vmatprep.mubr.bf16.mxu1 %v852_v38  ;;  %v1092_v45 = vld [vmem:[%s1397_s1 + $0x1b0] sm:$0xff]   ;;  %v1095_v48 = vld [vmem:[%s1397_s1 + $0x1e8] sm:$0xff]   ;;  %v1099_v52 = vld [vmem:[%s1397_s1 + $0x1e0] sm:$0xff]  }
  0x11   :  { %959 = vmatpush3.bf16.msra.mxu1 %v1064_v15  ;;  %v1096_v49 = vld [vmem:[%s1397_s1 + $0x1a8] sm:$0xff]   ;;  %v1100_v53 = vld [vmem:[%s1397_s1 + $0x1a0] sm:$0xff]   ;;  %v1101_v54 = vld [vmem:[%s1397_s1 + $0x158] sm:$0xff]  }
  0x12   :  { %960 = vmatprep.subr.bf16.mxu1 %v1067_v18  ;;  %v1102_v55 = vld [vmem:[%s1397_s1 + $0x118] sm:$0xff]   ;;  %v1105_v58 = vld [vmem:[%s1397_s1 + $0x150] sm:$0xff]   ;;  %v1109_v62 = vld [vmem:[%s1397_s1 + $0x148] sm:$0xff]  }
  0x13   :  { %939 = vmatpush3.bf16.msra.mxu0 %v1066_v17  ;;  %v1103_v56 = vld [vmem:[%s1397_s1 + $0x1d8] sm:$0xff]   ;;  %v1106_v59 = vld [vmem:[%s1397_s1 + $0x110] sm:$0xff]   ;;  %v1110_v63 = vld [vmem:[%s1397_s1 + $0x108] sm:$0xff]  }
  0x14   :  { %940 = vmatprep.subr.bf16.mxu0 %v1069_v20  ;;  %v1104_v57 = vld [vmem:[%s1397_s1 + $0x198] sm:$0xff]   ;;  %v1107_v60 = vld [vmem:[%s1397_s1 + $0x1d0] sm:$0xff]   ;;  %v1111_v0 = vld [vmem:[%s1397_s1 + $0x1c8] sm:$0xff]  }
  0x15   :  { %961 = vmatpush3.bf16.msra.mxu1 %v1068_v19  ;;  %v1108_v61 = vld [vmem:[%s1397_s1 + $0x190] sm:$0xff]   ;;  %v1112_v1 = vld [vmem:[%s1397_s1 + $0x188] sm:$0xff]   ;;  %v1113_v2 = vld [vmem:[%s1397_s1 + $0x140] sm:$0xff]  }
  0x16   :  { %962 = vmatprep.subr.bf16.mxu1 %v1071_v22  ;;  %v1114_v3 = vld [vmem:[%s1397_s1 + $0x100] sm:$0xff]   ;;  %v20_v5 = vld [vmem:[%s1398_s0 + $0x10] sm:$0xff]  ;;  %v21_v10 = vld [vmem:[%s1398_s0 + $0x18] sm:$0xff] }
  0x17   :  { %941 = vmatpush3.bf16.msra.mxu0 %v1070_v21  ;;  %v1115_v4 = vld [vmem:[%s1397_s1 + $0x1c0] sm:$0xff]   ;;  %v853_v6 = vcombine.low %v20_v5, %v20_v5  ;;  %v854_v7 = vcombine.high %v20_v5, %v20_v5  ;;  %v855_v11 = vcombine.low %v21_v10, %v21_v10  ;;  %v856_v12 = vcombine.high %v21_v10, %v21_v10  ;;  %v1121_v13 = vld [vmem:[%s1397_s1 + $0x238] sm:$0xff]   ;;  %v1122_v14 = vld [vmem:[%s1397_s1 + $0x230] sm:$0xff]  }
  0x18   :  { %942 = vmatprep.subr.bf16.mxu0 %v1073_v24  ;;  %v1118_v8 = vld [vmem:[%s1397_s1 + $0x180] sm:$0xff]   ;;  %v1123_v15 = vld [vmem:[%s1397_s1 + $0x228] sm:$0xff]   ;;  %v1125_v17 = vld [vmem:[%s1397_s1 + $0x218] sm:$0xff]  }
  0x19   :  { %963 = vmatpush3.bf16.msra.mxu1 %v1072_v23  ;;  %v1124_v16 = vld [vmem:[%s1397_s1 + $0x220] sm:$0xff]   ;;  %v1126_v18 = vld [vmem:[%s1397_s1 + $0x210] sm:$0xff]   ;;  %v1127_v19 = vld [vmem:[%s1397_s1 + $0x208] sm:$0xff]  }
  0x1a   :  { %964 = vmatprep.subr.bf16.mxu1 %v1075_v26  ;;  %v1128_v20 = vld [vmem:[%s1397_s1 + $0x200] sm:$0xff]  }
  0x1b   :  { %943 = vmatpush3.bf16.msra.mxu0 %v1074_v25  ;;  %v1129_v21 = vld [vmem:[%s1398_s0 + $0x20] ss:$0 sps:$4 sm:$0xff]  }
  0x1c   :  { %944 = vmatprep.subr.bf16.mxu0 %v1077_v28 }
  0x1d   :  { %965 = vmatpush3.bf16.msra.mxu1 %v1076_v27 }
  0x1e   :  { %966 = vmatprep.subr.bf16.mxu1 %v1079_v30 }
  0x1f   :  { %945 = vmatpush3.bf16.msra.mxu0 %v1078_v29 }
  0x20   :  { %974 = vmatprep.subr.bf16.mxu0 %v1083_v35 }
  0x21   :  { %967 = vmatpush3.bf16.msra.mxu1 %v1082_v34 }
  0x22   :  { %671 = vmatmul.mubr.bf16.vlgmr.msra.gmra.mxu0 %v849_v32  ;;  %996 = vmatprep.subr.bf16.mxu1 %v1087_v40 }
  0x23   :  { %975 = vmatpush3.bf16.msra.mxu0 %v1086_v39  ;;  %750 = vmatprep.mubr.bf16.mxu0 %v854_v7  ;;  %v848_v39 = vld [vmem:[%s1399_s2] ss:$0 sm:$0xff] }
  0x24   :  { %711 = vmatmul.mubr.bf16.vlgmr.msra.gmra.mxu1 %v851_v37  ;;  %976 = vmatprep.subr.bf16.mxu0 %v1089_v42 }
  0x25   :  { %997 = vmatpush3.bf16.msra.mxu1 %v1088_v41  ;;  %790 = vmatprep.mubr.bf16.mxu1 %v856_v12 }
  0x26   :  { %998 = vmatprep.subr.bf16.mxu1 %v1091_v44 }
  0x27   :  { %977 = vmatpush3.bf16.msra.mxu0 %v1090_v43 }
  0x28   :  { %978 = vmatprep.subr.bf16.mxu0 %v1093_v46  ;;  %v838_v46 = vld [vmem:[%s1400_s3] sm:$0xf] }
  0x29   :  { %999 = vmatpush3.bf16.msra.mxu1 %v1092_v45 }
  0x2a   :  { %1000 = vmatprep.subr.bf16.mxu1 %v1095_v48  ;;  %v839_v48 = vunpack.c.l.bf16 %v838_v46 }
  0x2b   :  { %979 = vmatpush3.bf16.msra.mxu0 %v1094_v47 }
  0x2c   :  { %980 = vmatprep.subr.bf16.mxu0 %v1097_v50 }
  0x2d   :  { %1001 = vmatpush3.bf16.msra.mxu1 %v1096_v49 }
  0x2e   :  { %1002 = vmatprep.subr.bf16.mxu1 %v1099_v52 }
  0x2f   :  { %981 = vmatpush3.bf16.msra.mxu0 %v1098_v51 }
  0x30   :  { %982 = vmatprep.subr.bf16.mxu0 %v1101_v54 }
  0x31   :  { %1003 = vmatpush3.bf16.msra.mxu1 %v1100_v53 }
  0x32   :  { %1004 = vmatprep.subr.bf16.mxu1 %v1103_v56 }
  0x33   :  { %983 = vmatpush3.bf16.msra.mxu0 %v1102_v55 }
  0x34   :  { %984 = vmatprep.subr.bf16.mxu0 %v1105_v58 }
  0x35   :  { %1005 = vmatpush3.bf16.msra.mxu1 %v1104_v57 }
  0x36   :  { %1006 = vmatprep.subr.bf16.mxu1 %v1107_v60 }
  0x37   :  { %985 = vmatpush3.bf16.msra.mxu0 %v1106_v59 }
  0x38   :  { %986 = vmatprep.subr.bf16.mxu0 %v1109_v62 }
  0x39   :  { %1007 = vmatpush3.bf16.msra.mxu1 %v1108_v61 }
  0x3a   :  { %1008 = vmatprep.subr.bf16.mxu1 %v1111_v0 }
  0x3b   :  { %987 = vmatpush3.bf16.msra.mxu0 %v1110_v63 }
  0x3c   :  { %988 = vmatprep.subr.bf16.mxu0 %v1113_v2 }
  0x3d   :  { %1009 = vmatpush3.bf16.msra.mxu1 %v1112_v1 }
  0x3e   :  { %1010 = vmatprep.subr.bf16.mxu1 %v1115_v4 }
  0x3f   :  { %989 = vmatpush3.bf16.msra.mxu0 %v1114_v3 }
  0x40   :  { %1027 = vmatprep.subr.bf16.mxu0 %v1130_v9 }
  0x41   :  { %1011 = vmatpush3.bf16.msra.mxu1 %v1118_v8 }
  0x42   :  { %751 = vmatmul.mubr.bf16.vlgmr.msra.gmra.mxu0 %v853_v6 }
  0x43   :  { %1028 = vmatpush3.bf16.msra.mxu0 %v1121_v13  ;;  %1043 = vmatprep.mubr.msk.bf16.mxu0 %vm1131_vm0, %v1130_v9 }
  0x44   :  { %791 = vmatmul.mubr.bf16.vlgmr.msra.gmra.mxu1 %v855_v11  ;;  %1029 = vmatprep.subr.bf16.mxu0 %v1130_v9 }
  0x47   :  { %1030 = vmatpush3.bf16.msra.mxu0 %v1122_v14 }
  0x48   :  { %1031 = vmatprep.subr.bf16.mxu0 %v1130_v9 }
  0x4b   :  { %1032 = vmatpush3.bf16.msra.mxu0 %v1123_v15 }
  0x4c   :  { %1033 = vmatprep.subr.bf16.mxu0 %v1130_v9 }
  0x4f   :  { %1034 = vmatpush3.bf16.msra.mxu0 %v1124_v16 }
  0x50   :  { %1035 = vmatprep.subr.bf16.mxu0 %v1130_v9 }
  0x53   :  { %1036 = vmatpush3.bf16.msra.mxu0 %v1125_v17 }
  0x54   :  { %1037 = vmatprep.subr.bf16.mxu0 %v1130_v9 }
  0x57   :  { %1038 = vmatpush3.bf16.msra.mxu0 %v1126_v18 }
  0x58   :  { %1039 = vmatprep.subr.bf16.mxu0 %v1130_v9 }
  0x5b   :  { %1040 = vmatpush3.bf16.msra.mxu0 %v1127_v19 }
  0x5c   :  { %1041 = vmatprep.subr.bf16.mxu0 %v1130_v9 }
  0x5f   :  { %1042 = vmatpush3.bf16.msra.mxu0 %v1128_v20 }
  0x62   :  { %1044 = vmatmul.mubr.bf16.vlgmr.msra.gmra.mxu0 %v1129_v21 }
  0xe2   :  { %v946_v22 = vpop.f32.mrf.mxu0 }
  0xe4   :  { %v947_v23 = vpop.f32.mrf.mxu0  ;;  %v968_v24 = vpop.f32.mrf.mxu1 }
  0xe5   :  { %v948_v38 = vadd.f32 %v947_v23, %v946_v22 }
  0xe6   :  { %v949_v25 = vpop.f32.mrf.mxu0  ;;  %v969_v26 = vpop.f32.mrf.mxu1 }
  0xe7   :  { %v673_v40 = vadd.f32 %v948_v38, %v848_v39  ;;  %v970_v41 = vadd.f32 %v969_v26, %v968_v24 }
  0xe8   :  { %v950_v27 = vpop.f32.mrf.mxu0  ;;  %v971_v28 = vpop.f32.mrf.mxu1 }
  0xe9   :  { %v713_v43 = vadd.f32 %v970_v41, %v673_v40 }
  0xea   :  { %v972_v29 = vpop.f32.mrf.mxu1 }
 0x102   :  { %v990_v30 = vpop.f32.mrf.mxu0 }
 0x104   :  { %v991_v31 = vpop.f32.mrf.mxu0  ;;  %v1012_v32 = vpop.f32.mrf.mxu1 }
 0x105   :  { %v992_v42 = vadd.f32 %v991_v31, %v990_v30 }
 0x106   :  { %v993_v33 = vpop.f32.mrf.mxu0  ;;  %v1013_v34 = vpop.f32.mrf.mxu1 }
 0x107   :  { %v753_v44 = vadd.f32 %v992_v42, %v713_v43  ;;  %v1014_v45 = vadd.f32 %v1013_v34, %v1012_v32 }
 0x108   :  { %v994_v35 = vpop.f32.mrf.mxu0  ;;  %v1015_v36 = vpop.f32.mrf.mxu1 }
 0x109   :  { %v793_v47 = vadd.f32 %v1014_v45, %v753_v44 }
 0x10a   :  { %v1016_v37 = vpop.f32.mrf.mxu1 }
 0x122   :  { %v832_v49 = vpop.f32.mrf.mxu0 }
 0x123   :  { %v833_v50 = vadd.f32 %v832_v49, %v793_v47 }
 0x124   :  { %v1045_v51 = vpop.f32.mrf.mxu0 }
 0x125   :  { %v840_v52 = vadd.f32 %v839_v48, %v833_v50 }
 0x126   :  { %v835_v53 = vpop.f32.mrf.mxu0 }
 0x127   :  { %v841_v54 = vmax.f32 %v840_v52, 0.0 }
 0x128   :  { %v1046_v55 = vpop.f32.mrf.mxu0 }
 0x129   :  { %v842_v56 = vpack.c.bf16 %v841_v54, %v841_v54 }
 0x12b   :  { %843 = vst [vmem:[%s1401_s4] sm:$0xf] %v842_v56 }

// kernel: resnet_feature_extractor_forward.44
= control target key start
LH: loop header
LB: loop body
LE: loop exit
PB: predicated region body
PF: predicated region fallthrough
CT: control target
= control target key end

     0   :  { %v16_v0 = vlaneseq  ;;  %vm24_vm0 = vcmask 1041409   ;;  %s51_s0 = inlined_call_operand.vmem [shape: bf16[2,1,128], index: 0, kind: input, shape index: {}]   ;;  %s52_s1 = inlined_call_operand.vmem [shape: f32[2,128], index: 1, kind: output, shape index: {}]  }
   0x1   :  { %v8_v1 = vld [vmem:[%s51_s0] sm:$0x1]  ;;  %v9_v2 = vld [vmem:[%s51_s0 + $0x1] sm:$0x1] }
   0x2   :  { %v10_v3 = vunpack.c.l.bf16 %v8_v1  ;;  %v11_v4 = vunpack.c.l.bf16 %v9_v2  ;;  %v17_v5 = vshrl.u32 %v16_v0, 7 }
   0x4   :  { %v18_v6 = vsub.s32 0, %v17_v5 }
   0x6   :  { %v19_v7 = vrot.slane %v10_v3, %v18_v6  ;;  %v23_v8 = vrot.slane %v11_v4, %v18_v6 }
   0x8   :  { %v25_v9 = vsel %vm24_vm0, %v23_v8, %v19_v7 }
   0x9   :  { %27 = vst [vmem:[%s52_s1] sm:$0x3] %v25_v9 }

// kernel: resnet_feature_extractor_forward.45
= control target key start
LH: loop header
LB: loop body
LE: loop exit
PB: predicated region body
PF: predicated region fallthrough
CT: control target
= control target key end

     0   :  { %v180_v0 = vmov 0.0   ;;  %vm181_vm0 = vmmov 0   ;;  %s235_s1 = inlined_call_operand.vmem [shape: bf16[128,128], index: 1, kind: input, shape index: {}]   ;;  %s236_s0 = inlined_call_operand.vmem [shape: bf16[8,128], index: 0, kind: input, shape index: {}]   ;;  %s237_s2 = inlined_call_operand.vmem [shape: f32[1,128], index: 2, kind: input, shape index: {}]   ;;  %s238_s3 = inlined_call_operand.vmem [shape: f32[8,128], index: 3, kind: output, shape index: {}]  }
   0x1   :  { %150 = vmatprep.subr.bf16.mxu0 %v180_v0  ;;  %v172_v1 = vld [vmem:[%s235_s1 + $0x38] sm:$0xff]   ;;  %166 = vmatprep.mubr.msk.bf16.mxu0 %vm181_vm0, %v180_v0  ;;  %v173_v2 = vld [vmem:[%s235_s1 + $0x30] sm:$0xff]   ;;  %v174_v3 = vld [vmem:[%s235_s1 + $0x28] sm:$0xff]  }
   0x2   :  { %151 = vmatpush3.bf16.msra.mxu0 %v172_v1  ;;  %v175_v4 = vld [vmem:[%s235_s1 + $0x20] sm:$0xff]   ;;  %v176_v5 = vld [vmem:[%s235_s1 + $0x18] sm:$0xff]   ;;  %v177_v6 = vld [vmem:[%s235_s1 + $0x10] sm:$0xff]  }
   0x3   :  { %152 = vmatprep.subr.bf16.mxu0 %v180_v0  ;;  %v178_v7 = vld [vmem:[%s235_s1 + $0x8] sm:$0xff]   ;;  %v179_v8 = vld [vmem:[%s235_s1] sm:$0xff]  }
   0x4   :  { %v15_v9 = vld [vmem:[%s236_s0] sm:$0xf] }
   0x5   :  { %v132_v10 = vld [vmem:[%s237_s2] ss:$0 sm:$0xff] }
   0x6   :  { %153 = vmatpush3.bf16.msra.mxu0 %v173_v2 }
   0x7   :  { %154 = vmatprep.subr.bf16.mxu0 %v180_v0 }
   0xa   :  { %155 = vmatpush3.bf16.msra.mxu0 %v174_v3 }
   0xb   :  { %156 = vmatprep.subr.bf16.mxu0 %v180_v0 }
   0xe   :  { %157 = vmatpush3.bf16.msra.mxu0 %v175_v4 }
   0xf   :  { %158 = vmatprep.subr.bf16.mxu0 %v180_v0 }
  0x12   :  { %159 = vmatpush3.bf16.msra.mxu0 %v176_v5 }
  0x13   :  { %160 = vmatprep.subr.bf16.mxu0 %v180_v0 }
  0x16   :  { %161 = vmatpush3.bf16.msra.mxu0 %v177_v6 }
  0x17   :  { %162 = vmatprep.subr.bf16.mxu0 %v180_v0 }
  0x1a   :  { %163 = vmatpush3.bf16.msra.mxu0 %v178_v7 }
  0x1b   :  { %164 = vmatprep.subr.bf16.mxu0 %v180_v0 }
  0x1e   :  { %165 = vmatpush3.bf16.msra.mxu0 %v179_v8 }
  0x21   :  { %167 = vmatmul.mubr.bf16.vlgmr.msra.gmra.mxu0 %v15_v9 }
  0xe1   :  { %v121_v11 = vpop.f32.mrf.mxu0 }
  0xe2   :  { %v122_v12 = vadd.f32 %v132_v10, %v121_v11 }
  0xe3   :  { %v168_v13 = vpop.f32.mrf.mxu0 }
  0xe4   :  { %127 = vst [vmem:[%s238_s3] sm:$0xff] %v122_v12 }
  0xe5   :  { %v124_v14 = vpop.f32.mrf.mxu0 }
  0xe7   :  { %v169_v15 = vpop.f32.mrf.mxu0 }

</bundles_post_ra>
